<compile_context>
chip_gen: v6e
topology: v6e:2x2x1
jax: 0.10.0
libtpu: 0.0.40
codegen_flags: <defaults>
</compile_context>

<pallas_src>
import functools

import jax
import jax.numpy as jnp
from jax import lax
from jax.experimental import pallas as pl
from jax.experimental.pallas import tpu as pltpu


# ----------------------------------------------------------------------------
# config (mirrors `opt` of the torch module)
# ----------------------------------------------------------------------------
class Opt:
    scale_factor = 2
    num_features = 8      # RDN G0
    growth_rate = 8       # RDN G  (== num_features so RDB residual adds are valid)
    num_blocks = 2        # RDN D
    num_layers = 2        # RDN C
    idx_stages = 0        # 0 -> pixel-space residual branch (VGG19 branch not taken)
    arch = "resnet18"
    input_channel = 3


def _round_up(x, m):
    return ((x + m - 1) // m) * m


def _tn_max():
    # v5e MXU is 4x128x128 -> 128-wide N tiles already saturate it; v6e/v7x prefer 256.
    try:
        kind = jax.devices()[0].device_kind.lower()
    except Exception:
        return 256
    return 128 if "v5" in kind else 256


_TN_MAX = _tn_max()
_VMEM_LIMIT = 32 * 1024 * 1024   # fits v7x 64 MiB physical with headroom; raises v5e default


# ----------------------------------------------------------------------------
# tile-size selection (K/N padding is independent of M so it can be done at init)
# ----------------------------------------------------------------------------
def _pad_m(M):
    MP = _round_up(max(M, 16), 16)      # >=16 keeps bf16 sublane packing happy
    TM = min(256, MP)
    MP = _round_up(MP, TM)
    return MP, TM


def _pad_n(N):
    NP = _round_up(max(N, 128), 128)
    TN = _TN_MAX if NP % _TN_MAX == 0 else 128
    return NP, TN


def _pad_k(K):
    KP = _round_up(max(K, 128), 128)
    for TK in (512, 384, 256, 128):
        if TK <= KP and KP % TK == 0:
            return KP, TK
    return _round_up(KP, 512), 512


# ----------------------------------------------------------------------------
# ConvP: prepared conv parameters (padded bf16 weight matrix + f32 bias + static meta)
# ----------------------------------------------------------------------------
class ConvP:
    def __init__(self, w, b, meta):
        self.w = w        # [KP, NP] bf16
        self.b = b        # [1, NP]  f32
        self.meta = meta  # (KH, KW, Cin, Cout, stride, pad, K, KP, TK, NP, TN) - static


jax.tree_util.register_pytree_node(
    ConvP,
    lambda c: ((c.w, c.b), c.meta),
    lambda meta, children: ConvP(children[0], children[1], meta),
)


def _prep_conv(w_oihw, bias, stride, pad):
    """Hoisted weight prep: OIHW -> [K, Cout], zero-pad to [KP, NP], cast to bf16."""
    Cout, Cin, KH, KW = w_oihw.shape
    K = KH * KW * Cin
    KP, TK = _pad_k(K)
    NP, TN = _pad_n(Cout)
    wm = jnp.transpose(w_oihw, (2, 3, 1, 0)).reshape(K, Cout).astype(jnp.bfloat16)
    wm = jnp.pad(wm, ((0, KP - K), (0, NP - Cout)))
    b = jnp.pad(bias.astype(jnp.float32), (0, NP - Cout)).reshape(1, NP)
    meta = (KH, KW, Cin, Cout, stride, pad, K, KP, TK, NP, TN)
    return ConvP(wm, b, meta)


# ----------------------------------------------------------------------------
# Pallas kernel: (M,N,K)-tiled matmul, bf16 operands, f32 accumulation directly into
# the resident output block, fused bias / ReLU / residual / |.-x/255| epilogue.
# ----------------------------------------------------------------------------
def _mm_kernel(a_ref, b_ref, bias_ref, o_ref, *, epilogue):
    k = pl.program_id(2)

    @pl.when(k == 0)
    def _():
        o_ref[...] = jnp.zeros_like(o_ref)

    o_ref[...] += jnp.dot(a_ref[...], b_ref[...], preferred_element_type=jnp.float32)

    @pl.when(k == pl.num_programs(2) - 1)
    def _():
        r = o_ref[...] + bias_ref[...]
        if epilogue == "relu":
            r = jnp.maximum(r, 0.0)
        o_ref[...] = r


def _mm_res_kernel(a_ref, b_ref, bias_ref, r_ref, o_ref, *, epilogue):
    k = pl.program_id(2)

    @pl.when(k == 0)
    def _():
        o_ref[...] = jnp.zeros_like(o_ref)

    o_ref[...] += jnp.dot(a_ref[...], b_ref[...], preferred_element_type=jnp.float32)

    @pl.when(k == pl.num_programs(2) - 1)
    def _():
        r = o_ref[...] + bias_ref[...]
        res = r_ref[...]
        if epilogue == "add":               # residual add (RDN local/global residual)
            r = r + res
        elif epilogue == "add_relu":        # ResNet basic-block tail
            r = jnp.maximum(r + res, 0.0)
        elif epilogue == "absdiff":         # |conv_out - x/255|  (pixel residual)
            r = jnp.abs(r - res * (1.0 / 255.0))
        o_ref[...] = r


_RES_EPILOGUES = ("add", "add_relu", "absdiff")


@functools.lru_cache(maxsize=None)
def _build_matmul(MP, TM, KP, TK, NP, TN, epilogue):
    gm, gn, gk = MP // TM, NP // TN, KP // TK
    has_res = epilogue in _RES_EPILOGUES
    kern = functools.partial(_mm_res_kernel if has_res else _mm_kernel, epilogue=epilogue)
    in_specs = [
        pl.BlockSpec((TM, TK), lambda m, n, k: (m, k)),
        pl.BlockSpec((TK, TN), lambda m, n, k: (k, n)),
        pl.BlockSpec((1, TN), lambda m, n, k: (0, n)),
    ]
    if has_res:
        in_specs.append(pl.BlockSpec((TM, TN), lambda m, n, k: (m, n)))
    return pl.pallas_call(
        kern,
        out_shape=jax.ShapeDtypeStruct((MP, NP), jnp.float32),
        grid_spec=pltpu.PrefetchScalarGridSpec(
            num_scalar_prefetch=0,
            grid=(gm, gn, gk),
            in_specs=in_specs,
            out_specs=pl.BlockSpec((TM, TN), lambda m, n, k: (m, n)),
        ),
        compiler_params=pltpu.CompilerParams(
            dimension_semantics=("parallel", "parallel", "arbitrary"),
            vmem_limit_bytes=_VMEM_LIMIT,
        ),
    )


def _mm(A, cp, epilogue="none", res=None):
    """A: [M, K] -> [M, Cout] using the prepared (padded, bf16) weights in `cp`."""
    _, _, _, Cout, _, _, K, KP, TK, NP, TN = cp.meta
    M = A.shape[0]
    MP, TM = _pad_m(M)
    Ap = jnp.pad(A.astype(jnp.bfloat16), ((0, MP - M), (0, KP - K)))
    args = [Ap, cp.w, cp.b]
    if epilogue in _RES_EPILOGUES:
        Rp = jnp.pad(res.astype(jnp.float32), ((0, MP - M), (0, NP - Cout)))
        args.append(Rp)
    out = _build_matmul(MP, TM, KP, TK, NP, TN, epilogue)(*args)
    return out[:M, :Cout]


# ----------------------------------------------------------------------------
# conv / dense glue (im2col in plain JAX under the whole-model jit)
# ----------------------------------------------------------------------------
def im2col(x, kh, kw, stride, pad):
    # x: [N, H, W, C] -> ([N, oh, ow, kh*kw*C], oh, ow); features ordered (kh, kw, C)
    if pad > 0:
        x = jnp.pad(x, ((0, 0), (pad, pad), (pad, pad), (0, 0)))
    N, H, W, C = x.shape
    oh = (H - kh) // stride + 1
    ow = (W - kw) // stride + 1
    cols = []
    for i in range(kh):
        for j in range(kw):
            sl = lax.slice(
                x, (0, i, j, 0),
                (N, i + (oh - 1) * stride + 1, j + (ow - 1) * stride + 1, C),
                (1, stride, stride, 1))
            cols.append(sl)
    return jnp.concatenate(cols, axis=-1), oh, ow


def conv2d(x_nhwc, cp, *, epilogue="none", res=None):
    KH, KW, _, Cout, stride, pad, K, _, _, _, _ = cp.meta
    patches, oh, ow = im2col(x_nhwc, KH, KW, stride, pad)
    Nb = x_nhwc.shape[0]
    M = Nb * oh * ow
    A = patches.reshape(M, K)
    r2 = None if res is None else res.reshape(M, Cout)
    out = _mm(A, cp, epilogue, r2)
    return out.reshape(Nb, oh, ow, Cout)


def dense(x2d, cp):
    return _mm(x2d, cp, "none")


def pixel_shuffle(x_nhwc, r):
    N, H, W, C = x_nhwc.shape
    co = C // (r * r)
    x = x_nhwc.reshape(N, H, W, co, r, r)
    x = jnp.transpose(x, (0, 1, 4, 2, 5, 3))
    return x.reshape(N, H * r, W * r, co)


# ----------------------------------------------------------------------------
# Pallas kernel: gridded, lane-dense reduction over the leading axis
#   op == "max"       : 3x3 max-pool tap reduction
#   op == "sum_scale" : scale_input_func sub-pixel averaging
# ----------------------------------------------------------------------------
def _reduce_lead_kernel(x_ref, o_ref, *, op, scale):
    x = x_ref[...]
    if op == "max":
        o_ref[...] = jnp.max(x, axis=0)
    else:
        o_ref[...] = jnp.sum(x, axis=0) * scale


@functools.lru_cache(maxsize=None)
def _build_reduce_lead(KK, R, TR, op, scale):
    return pl.pallas_call(
        functools.partial(_reduce_lead_kernel, op=op, scale=scale),
        out_shape=jax.ShapeDtypeStruct((R, 128), jnp.float32),
        grid_spec=pltpu.PrefetchScalarGridSpec(
            num_scalar_prefetch=0,
            grid=(R // TR,),
            in_specs=[pl.BlockSpec((KK, TR, 128), lambda r: (0, r, 0))],
            out_specs=pl.BlockSpec((TR, 128), lambda r: (r, 0)),
        ),
        compiler_params=pltpu.CompilerParams(
            dimension_semantics=("parallel",),
            vmem_limit_bytes=_VMEM_LIMIT,
        ),
    )


def _lead_reduce(x2d, op, scale=1.0):
    # x2d: [KK, L] -> [L], reducing the leading axis; lane-dense (R, 128) output tiles.
    KK, L = x2d.shape
    rows = -(-L // 128)
    TR = min(256, _round_up(rows, 8))
    LP = _round_up(L, TR * 128)
    R = LP // 128
    xp = jnp.pad(x2d.astype(jnp.float32), ((0, 0), (0, LP - L))).reshape(KK, R, 128)
    out = _build_reduce_lead(KK, R, TR, op, float(scale))(xp)
    return out.reshape(-1)[:L]


def maxpool2d(x_nhwc, k=3, stride=2, pad=1):
    # NOTE: zero padding stands in for -inf padding; valid because input is post-ReLU.
    N, H, W, C = x_nhwc.shape
    xp = jnp.pad(x_nhwc, ((0, 0), (pad, pad), (pad, pad), (0, 0)))
    oh = (H + 2 * pad - k) // stride + 1
    ow = (W + 2 * pad - k) // stride + 1
    taps = []
    for i in range(k):
        for j in range(k):
            taps.append(lax.slice(
                xp, (0, i, j, 0),
                (N, i + (oh - 1) * stride + 1, j + (ow - 1) * stride + 1, C),
                (1, stride, stride, 1)))
    stack = jnp.stack(taps, axis=0).reshape(k * k, N * oh * ow * C)
    out = _lead_reduce(stack, "max")
    return out.reshape(N, oh, ow, C)


def scale_input_func(x_nchw, s):
    # lr = sum_{ii,jj} x[:, :, ii::s, jj::s] / (s*s); lr = lr / 255  (produced in NHWC)
    N, C, H, W = x_nchw.shape
    Hl, Wl = H // s, W // s
    xr = x_nchw.reshape(N, C, Hl, s, Wl, s)
    xr = jnp.transpose(xr, (3, 5, 0, 2, 4, 1)).reshape(s * s, N * Hl * Wl * C)
    out = _lead_reduce(xr, "sum_scale", 1.0 / (s * s * 255.0))
    return out.reshape(N, Hl, Wl, C)


# ----------------------------------------------------------------------------
# RDN (SR model) - parameters + forward
# ----------------------------------------------------------------------------
def init_rdn_params(key, opt):
    G0, G, D, C = opt.num_features, opt.growth_rate, opt.num_blocks, opt.num_layers
    assert G0 == G, "RDB residual add requires num_features == growth_rate"
    keys = iter(jax.random.split(key, 256))

    def conv(cout, cin, k):
        w = 0.05 * jax.random.normal(next(keys), (cout, cin, k, k), jnp.float32)
        b = 0.01 * jax.random.normal(next(keys), (cout,), jnp.float32)
        return _prep_conv(w, b, stride=1, pad=(k - 1) // 2)

    p = {"sfe1": conv(G0, 3, 3), "sfe2": conv(G0, G0, 3)}
    rdbs = []
    for d in range(D):
        in_ch = G0 if d == 0 else G
        dense_layers = [conv(G, in_ch + G * i, 3) for i in range(C)]
        lff = conv(G, in_ch + G * C, 1)
        rdbs.append({"dense": dense_layers, "lff": lff})
    p["rdbs"] = rdbs
    p["gff1"] = conv(G0, G * D, 1)
    p["gff2"] = conv(G0, G0, 3)
    assert opt.scale_factor == 2
    p["up_conv"] = conv(G0 * 4, G0, 3)
    p["out_conv"] = conv(3, G0, 3)
    return p


def rdn_forward(p, lr_nhwc, x_nhwc_255):
    sfe1 = conv2d(lr_nhwc, p["sfe1"])
    sfe2 = conv2d(sfe1, p["sfe2"])
    h = sfe2
    local_feats = []
    for blk in p["rdbs"]:
        inp = h
        for cp in blk["dense"]:
            y = conv2d(h, cp, epilogue="relu")
            h = jnp.concatenate([h, y], axis=-1)
        h = conv2d(h, blk["lff"], epilogue="add", res=inp)      # local residual (fused)
        local_feats.append(h)
    cat = jnp.concatenate(local_feats, axis=-1)
    g = conv2d(cat, p["gff1"])
    h = conv2d(g, p["gff2"], epilogue="add", res=sfe1)          # global residual (fused)
    h = conv2d(h, p["up_conv"])
    h = pixel_shuffle(h, 2)
    # final conv + |preds - x/255| of the idx_stages == 0 branch, fused into one epilogue
    return conv2d(h, p["out_conv"], epilogue="absdiff", res=x_nhwc_255)


# ----------------------------------------------------------------------------
# ResNet-18 classifier - parameters (eval-mode BN folded into convs) + forward
# ----------------------------------------------------------------------------
def init_resnet18_params(key, input_channel=3, num_classes=2):
    keys = iter(jax.random.split(key, 512))

    def convw(cout, cin, k):
        return 0.05 * jax.random.normal(next(keys), (cout, cin, k, k), jnp.float32)

    def bn(c):
        g = 1.0 + 0.1 * jax.random.normal(next(keys), (c,), jnp.float32)
        b = 0.05 * jax.random.normal(next(keys), (c,), jnp.float32)
        m = 0.05 * jax.random.normal(next(keys), (c,), jnp.float32)
        v = 0.9 + 0.2 * jax.random.uniform(next(keys), (c,), jnp.float32)
        return g, b, m, v

    def fold(w, bnp, eps=1e-5):
        g, b, m, v = bnp
        s = g / jnp.sqrt(v + eps)
        return w * s[:, None, None, None], b - m * s

    def conv_bn(cout, cin, k, stride, pad):
        w, b = fold(convw(cout, cin, k), bn(cout))
        return _prep_conv(w, b, stride=stride, pad=pad)

    p = {"conv1": conv_bn(64, input_channel, 7, 2, 3)}
    stages, inplanes = [], 64
    for planes, stride in ((64, 1), (128, 2), (256, 2), (512, 2)):
        blocks = []
        for bidx in range(2):
            s = stride if bidx == 0 else 1
            c1 = conv_bn(planes, inplanes, 3, s, 1)
            c2 = conv_bn(planes, planes, 3, 1, 1)
            down = conv_bn(planes, inplanes, 1, s, 0) if (s != 1 or inplanes != planes) else None
            blocks.append({"c1": c1, "c2": c2, "down": down})
            inplanes = planes
        stages.append(blocks)
    p["stages"] = stages
    fc_w = 0.05 * jax.random.normal(next(keys), (num_classes, 512), jnp.float32)
    fc_b = 0.01 * jax.random.normal(next(keys), (num_classes,), jnp.float32)
    p["fc"] = _prep_conv(fc_w[:, :, None, None], fc_b, stride=1, pad=0)   # Linear = 1x1 conv
    return p


def resnet_forward(p, x_nhwc):
    h = conv2d(x_nhwc, p["conv1"], epilogue="relu")
    h = maxpool2d(h, 3, 2, 1)
    for stage in p["stages"]:
        for blk in stage:
            identity = h
            y = conv2d(h, blk["c1"], epilogue="relu")
            if blk["down"] is not None:
                identity = conv2d(h, blk["down"])
            h = conv2d(y, blk["c2"], epilogue="add_relu", res=identity)   # fused residual
    feat = jnp.mean(h, axis=(1, 2))            # adaptive avg pool (1,1) - tiny JAX glue
    return dense(feat, p["fc"])                # Linear: x @ W.T + b (Pallas matmul)


# ----------------------------------------------------------------------------
# BeyondtheSpectrumModelParallel.forward
# ----------------------------------------------------------------------------
def beyond_the_spectrum_forward(params, x_nchw, opt):
    lr = scale_input_func(x_nchw, opt.scale_factor)              # Pallas gridded reduce
    x_nhwc = jnp.transpose(x_nchw, (0, 2, 3, 1)).astype(jnp.float32)
    if opt.idx_stages > 0:
        # TODO(synk): VGG19 perception-feature branch (idx_stages > 0) not implemented;
        # this script exercises the idx_stages == 0 pixel-residual branch.
        raise NotImplementedError("idx_stages > 0 requires the VGG19 perception model")
    rec = rdn_forward(params["sr"], lr, x_nhwc)                  # RDN + fused |sr - x/255|
    return resnet_forward(params["cls"], rec)                    # [N, 2] logits


if __name__ == "__main__":
    opt = Opt()
    key = jax.random.PRNGKey(0)
    kx, ksr, kcls = jax.random.split(key, 3)
    # small, shape-consistent input: batch=2, 3 channels, 16x16, values in [0, 255]
    x = jax.random.uniform(kx, (2, 3, 16, 16), jnp.float32, 0.0, 255.0)
    params = {
        "sr": init_rdn_params(ksr, opt),
        "cls": init_resnet18_params(kcls, opt.input_channel, 2),
    }
    # one whole-model jit: all im2col / pad / concat glue fuses, every pallas_call is
    # compiled into a single executable with no per-op eager dispatch.
    fwd = jax.jit(functools.partial(beyond_the_spectrum_forward, opt=opt))
    logits = jax.block_until_ready(fwd(params, x))
    assert logits.shape == (2, 2)
    assert bool(jnp.all(jnp.isfinite(logits)))
    print("KERNEL_OK")
</pallas_src>

<mosaic_0001>
module attributes {stable_mosaic.version = 11 : i64} {
  func.func @_reduce_lead_kernel(%arg0: i32, %arg1: memref<4x8x128xf32, #tpu.memory_space<vmem>>, %arg2: memref<8x128xf32, #tpu.memory_space<vmem>>) attributes {dimension_semantics = [#tpu.dimension_semantics<parallel>], iteration_bounds = array<i64: 1>, scalar_prefetch = 0 : i64, scratch_operands = 0 : i64, tpu.core_type = #tpu.core_type<tc>, window_params = [{transform_indices = @transform_0, window_bounds = array<i64: 4, 8, 128>}, {transform_indices = @transform_1, window_bounds = array<i64: 8, 128>}]} {
    %c0 = arith.constant 0 : index
    %c0_0 = arith.constant 0 : index
    %c0_1 = arith.constant 0 : index
    %0 = vector.load %arg1[%c0, %c0_0, %c0_1] : memref<4x8x128xf32, #tpu.memory_space<vmem>>, vector<4x8x128xf32>
    %cst = arith.constant dense<0.000000e+00> : vector<8x128xf32>
    %1 = vector.multi_reduction <add>, %0, %cst [0] : vector<4x8x128xf32> to vector<8x128xf32>
    %cst_2 = arith.constant 9.80392214E-4 : f32
    %2 = vector.broadcast %cst_2 : f32 to vector<8x128xf32>
    %3 = arith.mulf %1, %2 : vector<8x128xf32>
    %c0_3 = arith.constant 0 : index
    %c0_4 = arith.constant 0 : index
    %4 = vector.load %arg2[%c0_3, %c0_4] : memref<8x128xf32, #tpu.memory_space<vmem>>, vector<8x128xf32>
    tpu.vector_store %arg2[%c0_3, %c0_4], %3 {strides = array<i32>} : memref<8x128xf32, #tpu.memory_space<vmem>>, vector<8x128xf32>,
    return
  }
  func.func @transform_0(%arg0: i32) -> (i32, i32, i32) {
    %c0_i32 = arith.constant 0 : i32
    %c0_i32_0 = arith.constant 0 : i32
    %c0_i32_1 = arith.constant 0 : i32
    return %c0_i32, %arg0, %c0_i32_0 : i32, i32, i32
  }
  func.func @transform_1(%arg0: i32) -> (i32, i32) {
    %c0_i32 = arith.constant 0 : i32
    %c0_i32_0 = arith.constant 0 : i32
    return %arg0, %c0_i32 : i32, i32
  }
}

module attributes {stable_mosaic.version = 11 : i64} {
  func.func @_mm_kernel(%arg0: i32, %arg1: i32, %arg2: i32, %arg3: memref<128x128xbf16, #tpu.memory_space<vmem>>, %arg4: memref<128x128xbf16, #tpu.memory_space<vmem>>, %arg5: memref<1x128xf32, #tpu.memory_space<vmem>>, %arg6: memref<128x128xf32, #tpu.memory_space<vmem>>) attributes {dimension_semantics = [#tpu.dimension_semantics<parallel>, #tpu.dimension_semantics<parallel>, #tpu.dimension_semantics<arbitrary>], iteration_bounds = array<i64: 1, 1, 1>, scalar_prefetch = 0 : i64, scratch_operands = 0 : i64, tpu.core_type = #tpu.core_type<tc>, window_params = [{transform_indices = @transform_0, window_bounds = array<i64: 128, 128>}, {transform_indices = @transform_1, window_bounds = array<i64: 128, 128>}, {transform_indices = @transform_2, window_bounds = array<i64: 1, 128>}, {transform_indices = @transform_3, window_bounds = array<i64: 128, 128>}]} {
    %c0_i32 = arith.constant 0 : i32
    %0 = arith.cmpi eq, %arg2, %c0_i32 : i32
    %1 = arith.extui %0 : i1 to i32
    %c0_i32_0 = arith.constant 0 : i32
    %2 = arith.cmpi ne, %1, %c0_i32_0 : i32
    scf.if %2 {
      %cst_10 = arith.constant 0.000000e+00 : f32
      %12 = vector.broadcast %cst_10 : f32 to vector<128x128xf32>
      %c0_11 = arith.constant 0 : index
      %c0_12 = arith.constant 0 : index
      %13 = vector.load %arg6[%c0_11, %c0_12] : memref<128x128xf32, #tpu.memory_space<vmem>>, vector<128x128xf32>
      tpu.vector_store %arg6[%c0_11, %c0_12], %12 {strides = array<i32>} : memref<128x128xf32, #tpu.memory_space<vmem>>, vector<128x128xf32>,
    } else {
    }
    %c0 = arith.constant 0 : index
    %c0_1 = arith.constant 0 : index
    %3 = vector.load %arg6[%c0, %c0_1] : memref<128x128xf32, #tpu.memory_space<vmem>>, vector<128x128xf32>
    %c0_2 = arith.constant 0 : index
    %c0_3 = arith.constant 0 : index
    %4 = vector.load %arg3[%c0_2, %c0_3] : memref<128x128xbf16, #tpu.memory_space<vmem>>, vector<128x128xbf16>
    %c0_4 = arith.constant 0 : index
    %c0_5 = arith.constant 0 : index
    %5 = vector.load %arg4[%c0_4, %c0_5] : memref<128x128xbf16, #tpu.memory_space<vmem>>, vector<128x128xbf16>
    %cst = arith.constant dense<0.000000e+00> : vector<128x128xf32>
    %6 = tpu.matmul %4, %5, %cst {dimension_numbers = #tpu.dot_dimension_numbers<[1], [0], [0], [1], [0, 0, 1, 1], [], []>} : vector<128x128xbf16>, vector<128x128xbf16>, vector<128x128xf32> -> vector<128x128xf32>
    %7 = arith.addf %3, %6 : vector<128x128xf32>
    %c0_6 = arith.constant 0 : index
    %c0_7 = arith.constant 0 : index
    %8 = vector.load %arg6[%c0_6, %c0_7] : memref<128x128xf32, #tpu.memory_space<vmem>>, vector<128x128xf32>
    tpu.vector_store %arg6[%c0_6, %c0_7], %7 {strides = array<i32>} : memref<128x128xf32, #tpu.memory_space<vmem>>, vector<128x128xf32>,
    %c0_i32_8 = arith.constant 0 : i32
    %9 = arith.cmpi eq, %arg2, %c0_i32_8 : i32
    %10 = arith.extui %9 : i1 to i32
    %c0_i32_9 = arith.constant 0 : i32
    %11 = arith.cmpi ne, %10, %c0_i32_9 : i32
    scf.if %11 {
      %c0_10 = arith.constant 0 : index
      %c0_11 = arith.constant 0 : index
      %12 = vector.load %arg6[%c0_10, %c0_11] : memref<128x128xf32, #tpu.memory_space<vmem>>, vector<128x128xf32>
      %c0_12 = arith.constant 0 : index
      %c0_13 = arith.constant 0 : index
      %13 = vector.load %arg5[%c0_12, %c0_13] : memref<1x128xf32, #tpu.memory_space<vmem>>, vector<1x128xf32>
      %14 = vector.broadcast %13 : vector<1x128xf32> to vector<128x128xf32>
      %15 = arith.addf %12, %14 : vector<128x128xf32>
      %c0_14 = arith.constant 0 : index
      %c0_15 = arith.constant 0 : index
      %16 = vector.load %arg6[%c0_14, %c0_15] : memref<128x128xf32, #tpu.memory_space<vmem>>, vector<128x128xf32>
      tpu.vector_store %arg6[%c0_14, %c0_15], %15 {strides = array<i32>} : memref<128x128xf32, #tpu.memory_space<vmem>>, vector<128x128xf32>,
    } else {
    }
    return
  }
  func.func @transform_0(%arg0: i32, %arg1: i32, %arg2: i32) -> (i32, i32) {
    %c0_i32 = arith.constant 0 : i32
    return %arg0, %arg2 : i32, i32
  }
  func.func @transform_1(%arg0: i32, %arg1: i32, %arg2: i32) -> (i32, i32) {
    %c0_i32 = arith.constant 0 : i32
    return %arg2, %arg1 : i32, i32
  }
  func.func @transform_2(%arg0: i32, %arg1: i32, %arg2: i32) -> (i32, i32) {
    %c0_i32 = arith.constant 0 : i32
    %c0_i32_0 = arith.constant 0 : i32
    return %c0_i32, %arg1 : i32, i32
  }
  func.func @transform_3(%arg0: i32, %arg1: i32, %arg2: i32) -> (i32, i32) {
    %c0_i32 = arith.constant 0 : i32
    return %arg0, %arg1 : i32, i32
  }
}

module attributes {stable_mosaic.version = 11 : i64} {
  func.func @_mm_kernel(%arg0: i32, %arg1: i32, %arg2: i32, %arg3: memref<128x128xbf16, #tpu.memory_space<vmem>>, %arg4: memref<128x128xbf16, #tpu.memory_space<vmem>>, %arg5: memref<1x128xf32, #tpu.memory_space<vmem>>, %arg6: memref<128x128xf32, #tpu.memory_space<vmem>>) attributes {dimension_semantics = [#tpu.dimension_semantics<parallel>, #tpu.dimension_semantics<parallel>, #tpu.dimension_semantics<arbitrary>], iteration_bounds = array<i64: 1, 1, 1>, scalar_prefetch = 0 : i64, scratch_operands = 0 : i64, tpu.core_type = #tpu.core_type<tc>, window_params = [{transform_indices = @transform_0, window_bounds = array<i64: 128, 128>}, {transform_indices = @transform_1, window_bounds = array<i64: 128, 128>}, {transform_indices = @transform_2, window_bounds = array<i64: 1, 128>}, {transform_indices = @transform_3, window_bounds = array<i64: 128, 128>}]} {
    %c0_i32 = arith.constant 0 : i32
    %0 = arith.cmpi eq, %arg2, %c0_i32 : i32
    %1 = arith.extui %0 : i1 to i32
    %c0_i32_0 = arith.constant 0 : i32
    %2 = arith.cmpi ne, %1, %c0_i32_0 : i32
    scf.if %2 {
      %cst_10 = arith.constant 0.000000e+00 : f32
      %12 = vector.broadcast %cst_10 : f32 to vector<128x128xf32>
      %c0_11 = arith.constant 0 : index
      %c0_12 = arith.constant 0 : index
      %13 = vector.load %arg6[%c0_11, %c0_12] : memref<128x128xf32, #tpu.memory_space<vmem>>, vector<128x128xf32>
      tpu.vector_store %arg6[%c0_11, %c0_12], %12 {strides = array<i32>} : memref<128x128xf32, #tpu.memory_space<vmem>>, vector<128x128xf32>,
    } else {
    }
    %c0 = arith.constant 0 : index
    %c0_1 = arith.constant 0 : index
    %3 = vector.load %arg6[%c0, %c0_1] : memref<128x128xf32, #tpu.memory_space<vmem>>, vector<128x128xf32>
    %c0_2 = arith.constant 0 : index
    %c0_3 = arith.constant 0 : index
    %4 = vector.load %arg3[%c0_2, %c0_3] : memref<128x128xbf16, #tpu.memory_space<vmem>>, vector<128x128xbf16>
    %c0_4 = arith.constant 0 : index
    %c0_5 = arith.constant 0 : index
    %5 = vector.load %arg4[%c0_4, %c0_5] : memref<128x128xbf16, #tpu.memory_space<vmem>>, vector<128x128xbf16>
    %cst = arith.constant dense<0.000000e+00> : vector<128x128xf32>
    %6 = tpu.matmul %4, %5, %cst {dimension_numbers = #tpu.dot_dimension_numbers<[1], [0], [0], [1], [0, 0, 1, 1], [], []>} : vector<128x128xbf16>, vector<128x128xbf16>, vector<128x128xf32> -> vector<128x128xf32>
    %7 = arith.addf %3, %6 : vector<128x128xf32>
    %c0_6 = arith.constant 0 : index
    %c0_7 = arith.constant 0 : index
    %8 = vector.load %arg6[%c0_6, %c0_7] : memref<128x128xf32, #tpu.memory_space<vmem>>, vector<128x128xf32>
    tpu.vector_store %arg6[%c0_6, %c0_7], %7 {strides = array<i32>} : memref<128x128xf32, #tpu.memory_space<vmem>>, vector<128x128xf32>,
    %c0_i32_8 = arith.constant 0 : i32
    %9 = arith.cmpi eq, %arg2, %c0_i32_8 : i32
    %10 = arith.extui %9 : i1 to i32
    %c0_i32_9 = arith.constant 0 : i32
    %11 = arith.cmpi ne, %10, %c0_i32_9 : i32
    scf.if %11 {
      %c0_10 = arith.constant 0 : index
      %c0_11 = arith.constant 0 : index
      %12 = vector.load %arg6[%c0_10, %c0_11] : memref<128x128xf32, #tpu.memory_space<vmem>>, vector<128x128xf32>
      %c0_12 = arith.constant 0 : index
      %c0_13 = arith.constant 0 : index
      %13 = vector.load %arg5[%c0_12, %c0_13] : memref<1x128xf32, #tpu.memory_space<vmem>>, vector<1x128xf32>
      %14 = vector.broadcast %13 : vector<1x128xf32> to vector<128x128xf32>
      %15 = arith.addf %12, %14 : vector<128x128xf32>
      %cst_14 = arith.constant 0.000000e+00 : f32
      %16 = vector.broadcast %cst_14 : f32 to vector<128x128xf32>
      %17 = arith.maximumf %15, %16 : vector<128x128xf32>
      %c0_15 = arith.constant 0 : index
      %c0_16 = arith.constant 0 : index
      %18 = vector.load %arg6[%c0_15, %c0_16] : memref<128x128xf32, #tpu.memory_space<vmem>>, vector<128x128xf32>
      tpu.vector_store %arg6[%c0_15, %c0_16], %17 {strides = array<i32>} : memref<128x128xf32, #tpu.memory_space<vmem>>, vector<128x128xf32>,
    } else {
    }
    return
  }
  func.func @transform_0(%arg0: i32, %arg1: i32, %arg2: i32) -> (i32, i32) {
    %c0_i32 = arith.constant 0 : i32
    return %arg0, %arg2 : i32, i32
  }
  func.func @transform_1(%arg0: i32, %arg1: i32, %arg2: i32) -> (i32, i32) {
    %c0_i32 = arith.constant 0 : i32
    return %arg2, %arg1 : i32, i32
  }
  func.func @transform_2(%arg0: i32, %arg1: i32, %arg2: i32) -> (i32, i32) {
    %c0_i32 = arith.constant 0 : i32
    %c0_i32_0 = arith.constant 0 : i32
    return %c0_i32, %arg1 : i32, i32
  }
  func.func @transform_3(%arg0: i32, %arg1: i32, %arg2: i32) -> (i32, i32) {
    %c0_i32 = arith.constant 0 : i32
    return %arg0, %arg1 : i32, i32
  }
}

module attributes {stable_mosaic.version = 11 : i64} {
  func.func @_mm_kernel(%arg0: i32, %arg1: i32, %arg2: i32, %arg3: memref<128x256xbf16, #tpu.memory_space<vmem>>, %arg4: memref<256x128xbf16, #tpu.memory_space<vmem>>, %arg5: memref<1x128xf32, #tpu.memory_space<vmem>>, %arg6: memref<128x128xf32, #tpu.memory_space<vmem>>) attributes {dimension_semantics = [#tpu.dimension_semantics<parallel>, #tpu.dimension_semantics<parallel>, #tpu.dimension_semantics<arbitrary>], iteration_bounds = array<i64: 1, 1, 1>, scalar_prefetch = 0 : i64, scratch_operands = 0 : i64, tpu.core_type = #tpu.core_type<tc>, window_params = [{transform_indices = @transform_0, window_bounds = array<i64: 128, 256>}, {transform_indices = @transform_1, window_bounds = array<i64: 256, 128>}, {transform_indices = @transform_2, window_bounds = array<i64: 1, 128>}, {transform_indices = @transform_3, window_bounds = array<i64: 128, 128>}]} {
    %c0_i32 = arith.constant 0 : i32
    %0 = arith.cmpi eq, %arg2, %c0_i32 : i32
    %1 = arith.extui %0 : i1 to i32
    %c0_i32_0 = arith.constant 0 : i32
    %2 = arith.cmpi ne, %1, %c0_i32_0 : i32
    scf.if %2 {
      %cst_10 = arith.constant 0.000000e+00 : f32
      %12 = vector.broadcast %cst_10 : f32 to vector<128x128xf32>
      %c0_11 = arith.constant 0 : index
      %c0_12 = arith.constant 0 : index
      %13 = vector.load %arg6[%c0_11, %c0_12] : memref<128x128xf32, #tpu.memory_space<vmem>>, vector<128x128xf32>
      tpu.vector_store %arg6[%c0_11, %c0_12], %12 {strides = array<i32>} : memref<128x128xf32, #tpu.memory_space<vmem>>, vector<128x128xf32>,
    } else {
    }
    %c0 = arith.constant 0 : index
    %c0_1 = arith.constant 0 : index
    %3 = vector.load %arg6[%c0, %c0_1] : memref<128x128xf32, #tpu.memory_space<vmem>>, vector<128x128xf32>
    %c0_2 = arith.constant 0 : index
    %c0_3 = arith.constant 0 : index
    %4 = vector.load %arg3[%c0_2, %c0_3] : memref<128x256xbf16, #tpu.memory_space<vmem>>, vector<128x256xbf16>
    %c0_4 = arith.constant 0 : index
    %c0_5 = arith.constant 0 : index
    %5 = vector.load %arg4[%c0_4, %c0_5] : memref<256x128xbf16, #tpu.memory_space<vmem>>, vector<256x128xbf16>
    %cst = arith.constant dense<0.000000e+00> : vector<128x128xf32>
    %6 = tpu.matmul %4, %5, %cst {dimension_numbers = #tpu.dot_dimension_numbers<[1], [0], [0], [1], [0, 0, 1, 1], [], []>} : vector<128x256xbf16>, vector<256x128xbf16>, vector<128x128xf32> -> vector<128x128xf32>
    %7 = arith.addf %3, %6 : vector<128x128xf32>
    %c0_6 = arith.constant 0 : index
    %c0_7 = arith.constant 0 : index
    %8 = vector.load %arg6[%c0_6, %c0_7] : memref<128x128xf32, #tpu.memory_space<vmem>>, vector<128x128xf32>
    tpu.vector_store %arg6[%c0_6, %c0_7], %7 {strides = array<i32>} : memref<128x128xf32, #tpu.memory_space<vmem>>, vector<128x128xf32>,
    %c0_i32_8 = arith.constant 0 : i32
    %9 = arith.cmpi eq, %arg2, %c0_i32_8 : i32
    %10 = arith.extui %9 : i1 to i32
    %c0_i32_9 = arith.constant 0 : i32
    %11 = arith.cmpi ne, %10, %c0_i32_9 : i32
    scf.if %11 {
      %c0_10 = arith.constant 0 : index
      %c0_11 = arith.constant 0 : index
      %12 = vector.load %arg6[%c0_10, %c0_11] : memref<128x128xf32, #tpu.memory_space<vmem>>, vector<128x128xf32>
      %c0_12 = arith.constant 0 : index
      %c0_13 = arith.constant 0 : index
      %13 = vector.load %arg5[%c0_12, %c0_13] : memref<1x128xf32, #tpu.memory_space<vmem>>, vector<1x128xf32>
      %14 = vector.broadcast %13 : vector<1x128xf32> to vector<128x128xf32>
      %15 = arith.addf %12, %14 : vector<128x128xf32>
      %cst_14 = arith.constant 0.000000e+00 : f32
      %16 = vector.broadcast %cst_14 : f32 to vector<128x128xf32>
      %17 = arith.maximumf %15, %16 : vector<128x128xf32>
      %c0_15 = arith.constant 0 : index
      %c0_16 = arith.constant 0 : index
      %18 = vector.load %arg6[%c0_15, %c0_16] : memref<128x128xf32, #tpu.memory_space<vmem>>, vector<128x128xf32>
      tpu.vector_store %arg6[%c0_15, %c0_16], %17 {strides = array<i32>} : memref<128x128xf32, #tpu.memory_space<vmem>>, vector<128x128xf32>,
    } else {
    }
    return
  }
  func.func @transform_0(%arg0: i32, %arg1: i32, %arg2: i32) -> (i32, i32) {
    %c0_i32 = arith.constant 0 : i32
    return %arg0, %arg2 : i32, i32
  }
  func.func @transform_1(%arg0: i32, %arg1: i32, %arg2: i32) -> (i32, i32) {
    %c0_i32 = arith.constant 0 : i32
    return %arg2, %arg1 : i32, i32
  }
  func.func @transform_2(%arg0: i32, %arg1: i32, %arg2: i32) -> (i32, i32) {
    %c0_i32 = arith.constant 0 : i32
    %c0_i32_0 = arith.constant 0 : i32
    return %c0_i32, %arg1 : i32, i32
  }
  func.func @transform_3(%arg0: i32, %arg1: i32, %arg2: i32) -> (i32, i32) {
    %c0_i32 = arith.constant 0 : i32
    return %arg0, %arg1 : i32, i32
  }
}

module attributes {stable_mosaic.version = 11 : i64} {
  func.func @_mm_res_kernel(%arg0: i32, %arg1: i32, %arg2: i32, %arg3: memref<128x128xbf16, #tpu.memory_space<vmem>>, %arg4: memref<128x128xbf16, #tpu.memory_space<vmem>>, %arg5: memref<1x128xf32, #tpu.memory_space<vmem>>, %arg6: memref<128x128xf32, #tpu.memory_space<vmem>>, %arg7: memref<128x128xf32, #tpu.memory_space<vmem>>) attributes {dimension_semantics = [#tpu.dimension_semantics<parallel>, #tpu.dimension_semantics<parallel>, #tpu.dimension_semantics<arbitrary>], iteration_bounds = array<i64: 1, 1, 1>, scalar_prefetch = 0 : i64, scratch_operands = 0 : i64, tpu.core_type = #tpu.core_type<tc>, window_params = [{transform_indices = @transform_0, window_bounds = array<i64: 128, 128>}, {transform_indices = @transform_1, window_bounds = array<i64: 128, 128>}, {transform_indices = @transform_2, window_bounds = array<i64: 1, 128>}, {transform_indices = @transform_3, window_bounds = array<i64: 128, 128>}, {transform_indices = @transform_4, window_bounds = array<i64: 128, 128>}]} {
    %c0_i32 = arith.constant 0 : i32
    %0 = arith.cmpi eq, %arg2, %c0_i32 : i32
    %1 = arith.extui %0 : i1 to i32
    %c0_i32_0 = arith.constant 0 : i32
    %2 = arith.cmpi ne, %1, %c0_i32_0 : i32
    scf.if %2 {
      %cst_10 = arith.constant 0.000000e+00 : f32
      %12 = vector.broadcast %cst_10 : f32 to vector<128x128xf32>
      %c0_11 = arith.constant 0 : index
      %c0_12 = arith.constant 0 : index
      %13 = vector.load %arg7[%c0_11, %c0_12] : memref<128x128xf32, #tpu.memory_space<vmem>>, vector<128x128xf32>
      tpu.vector_store %arg7[%c0_11, %c0_12], %12 {strides = array<i32>} : memref<128x128xf32, #tpu.memory_space<vmem>>, vector<128x128xf32>,
    } else {
    }
    %c0 = arith.constant 0 : index
    %c0_1 = arith.constant 0 : index
    %3 = vector.load %arg7[%c0, %c0_1] : memref<128x128xf32, #tpu.memory_space<vmem>>, vector<128x128xf32>
    %c0_2 = arith.constant 0 : index
    %c0_3 = arith.constant 0 : index
    %4 = vector.load %arg3[%c0_2, %c0_3] : memref<128x128xbf16, #tpu.memory_space<vmem>>, vector<128x128xbf16>
    %c0_4 = arith.constant 0 : index
    %c0_5 = arith.constant 0 : index
    %5 = vector.load %arg4[%c0_4, %c0_5] : memref<128x128xbf16, #tpu.memory_space<vmem>>, vector<128x128xbf16>
    %cst = arith.constant dense<0.000000e+00> : vector<128x128xf32>
    %6 = tpu.matmul %4, %5, %cst {dimension_numbers = #tpu.dot_dimension_numbers<[1], [0], [0], [1], [0, 0, 1, 1], [], []>} : vector<128x128xbf16>, vector<128x128xbf16>, vector<128x128xf32> -> vector<128x128xf32>
    %7 = arith.addf %3, %6 : vector<128x128xf32>
    %c0_6 = arith.constant 0 : index
    %c0_7 = arith.constant 0 : index
    %8 = vector.load %arg7[%c0_6, %c0_7] : memref<128x128xf32, #tpu.memory_space<vmem>>, vector<128x128xf32>
    tpu.vector_store %arg7[%c0_6, %c0_7], %7 {strides = array<i32>} : memref<128x128xf32, #tpu.memory_space<vmem>>, vector<128x128xf32>,
    %c0_i32_8 = arith.constant 0 : i32
    %9 = arith.cmpi eq, %arg2, %c0_i32_8 : i32
    %10 = arith.extui %9 : i1 to i32
    %c0_i32_9 = arith.constant 0 : i32
    %11 = arith.cmpi ne, %10, %c0_i32_9 : i32
    scf.if %11 {
      %c0_10 = arith.constant 0 : index
      %c0_11 = arith.constant 0 : index
      %12 = vector.load %arg7[%c0_10, %c0_11] : memref<128x128xf32, #tpu.memory_space<vmem>>, vector<128x128xf32>
      %c0_12 = arith.constant 0 : index
      %c0_13 = arith.constant 0 : index
      %13 = vector.load %arg5[%c0_12, %c0_13] : memref<1x128xf32, #tpu.memory_space<vmem>>, vector<1x128xf32>
      %14 = vector.broadcast %13 : vector<1x128xf32> to vector<128x128xf32>
      %15 = arith.addf %12, %14 : vector<128x128xf32>
      %c0_14 = arith.constant 0 : index
      %c0_15 = arith.constant 0 : index
      %16 = vector.load %arg6[%c0_14, %c0_15] : memref<128x128xf32, #tpu.memory_space<vmem>>, vector<128x128xf32>
      %17 = arith.addf %15, %16 : vector<128x128xf32>
      %c0_16 = arith.constant 0 : index
      %c0_17 = arith.constant 0 : index
      %18 = vector.load %arg7[%c0_16, %c0_17] : memref<128x128xf32, #tpu.memory_space<vmem>>, vector<128x128xf32>
      tpu.vector_store %arg7[%c0_16, %c0_17], %17 {strides = array<i32>} : memref<128x128xf32, #tpu.memory_space<vmem>>, vector<128x128xf32>,
    } else {
    }
    return
  }
  func.func @transform_0(%arg0: i32, %arg1: i32, %arg2: i32) -> (i32, i32) {
    %c0_i32 = arith.constant 0 : i32
    return %arg0, %arg2 : i32, i32
  }
  func.func @transform_1(%arg0: i32, %arg1: i32, %arg2: i32) -> (i32, i32) {
    %c0_i32 = arith.constant 0 : i32
    return %arg2, %arg1 : i32, i32
  }
  func.func @transform_2(%arg0: i32, %arg1: i32, %arg2: i32) -> (i32, i32) {
    %c0_i32 = arith.constant 0 : i32
    %c0_i32_0 = arith.constant 0 : i32
    return %c0_i32, %arg1 : i32, i32
  }
  func.func @transform_3(%arg0: i32, %arg1: i32, %arg2: i32) -> (i32, i32) {
    %c0_i32 = arith.constant 0 : i32
    return %arg0, %arg1 : i32, i32
  }
  func.func @transform_4(%arg0: i32, %arg1: i32, %arg2: i32) -> (i32, i32) {
    %c0_i32 = arith.constant 0 : i32
    return %arg0, %arg1 : i32, i32
  }
}

module attributes {stable_mosaic.version = 11 : i64} {
  func.func @_mm_res_kernel(%arg0: i32, %arg1: i32, %arg2: i32, %arg3: memref<256x128xbf16, #tpu.memory_space<vmem>>, %arg4: memref<128x128xbf16, #tpu.memory_space<vmem>>, %arg5: memref<1x128xf32, #tpu.memory_space<vmem>>, %arg6: memref<256x128xf32, #tpu.memory_space<vmem>>, %arg7: memref<256x128xf32, #tpu.memory_space<vmem>>) attributes {dimension_semantics = [#tpu.dimension_semantics<parallel>, #tpu.dimension_semantics<parallel>, #tpu.dimension_semantics<arbitrary>], iteration_bounds = array<i64: 2, 1, 1>, scalar_prefetch = 0 : i64, scratch_operands = 0 : i64, tpu.core_type = #tpu.core_type<tc>, window_params = [{transform_indices = @transform_0, window_bounds = array<i64: 256, 128>}, {transform_indices = @transform_1, window_bounds = array<i64: 128, 128>}, {transform_indices = @transform_2, window_bounds = array<i64: 1, 128>}, {transform_indices = @transform_3, window_bounds = array<i64: 256, 128>}, {transform_indices = @transform_4, window_bounds = array<i64: 256, 128>}]} {
    %c0_i32 = arith.constant 0 : i32
    %0 = arith.cmpi eq, %arg2, %c0_i32 : i32
    %1 = arith.extui %0 : i1 to i32
    %c0_i32_0 = arith.constant 0 : i32
    %2 = arith.cmpi ne, %1, %c0_i32_0 : i32
    scf.if %2 {
      %cst_10 = arith.constant 0.000000e+00 : f32
      %12 = vector.broadcast %cst_10 : f32 to vector<256x128xf32>
      %c0_11 = arith.constant 0 : index
      %c0_12 = arith.constant 0 : index
      %13 = vector.load %arg7[%c0_11, %c0_12] : memref<256x128xf32, #tpu.memory_space<vmem>>, vector<256x128xf32>
      tpu.vector_store %arg7[%c0_11, %c0_12], %12 {strides = array<i32>} : memref<256x128xf32, #tpu.memory_space<vmem>>, vector<256x128xf32>,
    } else {
    }
    %c0 = arith.constant 0 : index
    %c0_1 = arith.constant 0 : index
    %3 = vector.load %arg7[%c0, %c0_1] : memref<256x128xf32, #tpu.memory_space<vmem>>, vector<256x128xf32>
    %c0_2 = arith.constant 0 : index
    %c0_3 = arith.constant 0 : index
    %4 = vector.load %arg3[%c0_2, %c0_3] : memref<256x128xbf16, #tpu.memory_space<vmem>>, vector<256x128xbf16>
    %c0_4 = arith.constant 0 : index
    %c0_5 = arith.constant 0 : index
    %5 = vector.load %arg4[%c0_4, %c0_5] : memref<128x128xbf16, #tpu.memory_space<vmem>>, vector<128x128xbf16>
    %cst = arith.constant dense<0.000000e+00> : vector<256x128xf32>
    %6 = tpu.matmul %4, %5, %cst {dimension_numbers = #tpu.dot_dimension_numbers<[1], [0], [0], [1], [0, 0, 1, 1], [], []>} : vector<256x128xbf16>, vector<128x128xbf16>, vector<256x128xf32> -> vector<256x128xf32>
    %7 = arith.addf %3, %6 : vector<256x128xf32>
    %c0_6 = arith.constant 0 : index
    %c0_7 = arith.constant 0 : index
    %8 = vector.load %arg7[%c0_6, %c0_7] : memref<256x128xf32, #tpu.memory_space<vmem>>, vector<256x128xf32>
    tpu.vector_store %arg7[%c0_6, %c0_7], %7 {strides = array<i32>} : memref<256x128xf32, #tpu.memory_space<vmem>>, vector<256x128xf32>,
    %c0_i32_8 = arith.constant 0 : i32
    %9 = arith.cmpi eq, %arg2, %c0_i32_8 : i32
    %10 = arith.extui %9 : i1 to i32
    %c0_i32_9 = arith.constant 0 : i32
    %11 = arith.cmpi ne, %10, %c0_i32_9 : i32
    scf.if %11 {
      %c0_10 = arith.constant 0 : index
      %c0_11 = arith.constant 0 : index
      %12 = vector.load %arg7[%c0_10, %c0_11] : memref<256x128xf32, #tpu.memory_space<vmem>>, vector<256x128xf32>
      %c0_12 = arith.constant 0 : index
      %c0_13 = arith.constant 0 : index
      %13 = vector.load %arg5[%c0_12, %c0_13] : memref<1x128xf32, #tpu.memory_space<vmem>>, vector<1x128xf32>
      %14 = vector.broadcast %13 : vector<1x128xf32> to vector<256x128xf32>
      %15 = arith.addf %12, %14 : vector<256x128xf32>
      %c0_14 = arith.constant 0 : index
      %c0_15 = arith.constant 0 : index
      %16 = vector.load %arg6[%c0_14, %c0_15] : memref<256x128xf32, #tpu.memory_space<vmem>>, vector<256x128xf32>
      %cst_16 = arith.constant 0.00392156886 : f32
      %17 = vector.broadcast %cst_16 : f32 to vector<256x128xf32>
      %18 = arith.mulf %16, %17 : vector<256x128xf32>
      %19 = arith.subf %15, %18 : vector<256x128xf32>
      %20 = math.absf %19 : vector<256x128xf32>
      %c0_17 = arith.constant 0 : index
      %c0_18 = arith.constant 0 : index
      %21 = vector.load %arg7[%c0_17, %c0_18] : memref<256x128xf32, #tpu.memory_space<vmem>>, vector<256x128xf32>
      tpu.vector_store %arg7[%c0_17, %c0_18], %20 {strides = array<i32>} : memref<256x128xf32, #tpu.memory_space<vmem>>, vector<256x128xf32>,
    } else {
    }
    return
  }
  func.func @transform_0(%arg0: i32, %arg1: i32, %arg2: i32) -> (i32, i32) {
    %c0_i32 = arith.constant 0 : i32
    return %arg0, %arg2 : i32, i32
  }
  func.func @transform_1(%arg0: i32, %arg1: i32, %arg2: i32) -> (i32, i32) {
    %c0_i32 = arith.constant 0 : i32
    return %arg2, %arg1 : i32, i32
  }
  func.func @transform_2(%arg0: i32, %arg1: i32, %arg2: i32) -> (i32, i32) {
    %c0_i32 = arith.constant 0 : i32
    %c0_i32_0 = arith.constant 0 : i32
    return %c0_i32, %arg1 : i32, i32
  }
  func.func @transform_3(%arg0: i32, %arg1: i32, %arg2: i32) -> (i32, i32) {
    %c0_i32 = arith.constant 0 : i32
    return %arg0, %arg1 : i32, i32
  }
  func.func @transform_4(%arg0: i32, %arg1: i32, %arg2: i32) -> (i32, i32) {
    %c0_i32 = arith.constant 0 : i32
    return %arg0, %arg1 : i32, i32
  }
}

module attributes {stable_mosaic.version = 11 : i64} {
  func.func @_reduce_lead_kernel(%arg0: i32, %arg1: memref<9x16x128xf32, #tpu.memory_space<vmem>>, %arg2: memref<16x128xf32, #tpu.memory_space<vmem>>) attributes {dimension_semantics = [#tpu.dimension_semantics<parallel>], iteration_bounds = array<i64: 1>, scalar_prefetch = 0 : i64, scratch_operands = 0 : i64, tpu.core_type = #tpu.core_type<tc>, window_params = [{transform_indices = @transform_0, window_bounds = array<i64: 9, 16, 128>}, {transform_indices = @transform_1, window_bounds = array<i64: 16, 128>}]} {
    %c0 = arith.constant 0 : index
    %c0_0 = arith.constant 0 : index
    %c0_1 = arith.constant 0 : index
    %0 = vector.load %arg1[%c0, %c0_0, %c0_1] : memref<9x16x128xf32, #tpu.memory_space<vmem>>, vector<9x16x128xf32>
    %cst = arith.constant dense<0xFF800000> : vector<16x128xf32>
    %1 = vector.multi_reduction <maximumf>, %0, %cst [0] : vector<9x16x128xf32> to vector<16x128xf32>
    %c0_2 = arith.constant 0 : index
    %c0_3 = arith.constant 0 : index
    %2 = vector.load %arg2[%c0_2, %c0_3] : memref<16x128xf32, #tpu.memory_space<vmem>>, vector<16x128xf32>
    tpu.vector_store %arg2[%c0_2, %c0_3], %1 {strides = array<i32>} : memref<16x128xf32, #tpu.memory_space<vmem>>, vector<16x128xf32>,
    return
  }
  func.func @transform_0(%arg0: i32) -> (i32, i32, i32) {
    %c0_i32 = arith.constant 0 : i32
    %c0_i32_0 = arith.constant 0 : i32
    %c0_i32_1 = arith.constant 0 : i32
    return %c0_i32, %arg0, %c0_i32_0 : i32, i32, i32
  }
  func.func @transform_1(%arg0: i32) -> (i32, i32) {
    %c0_i32 = arith.constant 0 : i32
    %c0_i32_0 = arith.constant 0 : i32
    return %arg0, %c0_i32 : i32, i32
  }
}

module attributes {stable_mosaic.version = 11 : i64} {
  func.func @_mm_res_kernel(%arg0: i32, %arg1: i32, %arg2: i32, %arg3: memref<32x128xbf16, #tpu.memory_space<vmem>>, %arg4: memref<128x128xbf16, #tpu.memory_space<vmem>>, %arg5: memref<1x128xf32, #tpu.memory_space<vmem>>, %arg6: memref<32x128xf32, #tpu.memory_space<vmem>>, %arg7: memref<32x128xf32, #tpu.memory_space<vmem>>) attributes {dimension_semantics = [#tpu.dimension_semantics<parallel>, #tpu.dimension_semantics<parallel>, #tpu.dimension_semantics<arbitrary>], iteration_bounds = array<i64: 1, 1, 5>, scalar_prefetch = 0 : i64, scratch_operands = 0 : i64, tpu.core_type = #tpu.core_type<tc>, window_params = [{transform_indices = @transform_0, window_bounds = array<i64: 32, 128>}, {transform_indices = @transform_1, window_bounds = array<i64: 128, 128>}, {transform_indices = @transform_2, window_bounds = array<i64: 1, 128>}, {transform_indices = @transform_3, window_bounds = array<i64: 32, 128>}, {transform_indices = @transform_4, window_bounds = array<i64: 32, 128>}]} {
    %c0_i32 = arith.constant 0 : i32
    %0 = arith.cmpi eq, %arg2, %c0_i32 : i32
    %1 = arith.extui %0 : i1 to i32
    %c0_i32_0 = arith.constant 0 : i32
    %2 = arith.cmpi ne, %1, %c0_i32_0 : i32
    scf.if %2 {
      %cst_9 = arith.constant 0.000000e+00 : f32
      %12 = vector.broadcast %cst_9 : f32 to vector<32x128xf32>
      %c0_10 = arith.constant 0 : index
      %c0_11 = arith.constant 0 : index
      %13 = vector.load %arg7[%c0_10, %c0_11] : memref<32x128xf32, #tpu.memory_space<vmem>>, vector<32x128xf32>
      tpu.vector_store %arg7[%c0_10, %c0_11], %12 {strides = array<i32>} : memref<32x128xf32, #tpu.memory_space<vmem>>, vector<32x128xf32>,
    } else {
    }
    %c0 = arith.constant 0 : index
    %c0_1 = arith.constant 0 : index
    %3 = vector.load %arg7[%c0, %c0_1] : memref<32x128xf32, #tpu.memory_space<vmem>>, vector<32x128xf32>
    %c0_2 = arith.constant 0 : index
    %c0_3 = arith.constant 0 : index
    %4 = vector.load %arg3[%c0_2, %c0_3] : memref<32x128xbf16, #tpu.memory_space<vmem>>, vector<32x128xbf16>
    %c0_4 = arith.constant 0 : index
    %c0_5 = arith.constant 0 : index
    %5 = vector.load %arg4[%c0_4, %c0_5] : memref<128x128xbf16, #tpu.memory_space<vmem>>, vector<128x128xbf16>
    %cst = arith.constant dense<0.000000e+00> : vector<32x128xf32>
    %6 = tpu.matmul %4, %5, %cst {dimension_numbers = #tpu.dot_dimension_numbers<[1], [0], [0], [1], [0, 0, 1, 1], [], []>} : vector<32x128xbf16>, vector<128x128xbf16>, vector<32x128xf32> -> vector<32x128xf32>
    %7 = arith.addf %3, %6 : vector<32x128xf32>
    %c0_6 = arith.constant 0 : index
    %c0_7 = arith.constant 0 : index
    %8 = vector.load %arg7[%c0_6, %c0_7] : memref<32x128xf32, #tpu.memory_space<vmem>>, vector<32x128xf32>
    tpu.vector_store %arg7[%c0_6, %c0_7], %7 {strides = array<i32>} : memref<32x128xf32, #tpu.memory_space<vmem>>, vector<32x128xf32>,
    %c4_i32 = arith.constant 4 : i32
    %9 = arith.cmpi eq, %arg2, %c4_i32 : i32
    %10 = arith.extui %9 : i1 to i32
    %c0_i32_8 = arith.constant 0 : i32
    %11 = arith.cmpi ne, %10, %c0_i32_8 : i32
    scf.if %11 {
      %c0_9 = arith.constant 0 : index
      %c0_10 = arith.constant 0 : index
      %12 = vector.load %arg7[%c0_9, %c0_10] : memref<32x128xf32, #tpu.memory_space<vmem>>, vector<32x128xf32>
      %c0_11 = arith.constant 0 : index
      %c0_12 = arith.constant 0 : index
      %13 = vector.load %arg5[%c0_11, %c0_12] : memref<1x128xf32, #tpu.memory_space<vmem>>, vector<1x128xf32>
      %14 = vector.broadcast %13 : vector<1x128xf32> to vector<32x128xf32>
      %15 = arith.addf %12, %14 : vector<32x128xf32>
      %c0_13 = arith.constant 0 : index
      %c0_14 = arith.constant 0 : index
      %16 = vector.load %arg6[%c0_13, %c0_14] : memref<32x128xf32, #tpu.memory_space<vmem>>, vector<32x128xf32>
      %17 = arith.addf %15, %16 : vector<32x128xf32>
      %cst_15 = arith.constant 0.000000e+00 : f32
      %18 = vector.broadcast %cst_15 : f32 to vector<32x128xf32>
      %19 = arith.maximumf %17, %18 : vector<32x128xf32>
      %c0_16 = arith.constant 0 : index
      %c0_17 = arith.constant 0 : index
      %20 = vector.load %arg7[%c0_16, %c0_17] : memref<32x128xf32, #tpu.memory_space<vmem>>, vector<32x128xf32>
      tpu.vector_store %arg7[%c0_16, %c0_17], %19 {strides = array<i32>} : memref<32x128xf32, #tpu.memory_space<vmem>>, vector<32x128xf32>,
    } else {
    }
    return
  }
  func.func @transform_0(%arg0: i32, %arg1: i32, %arg2: i32) -> (i32, i32) {
    %c0_i32 = arith.constant 0 : i32
    return %arg0, %arg2 : i32, i32
  }
  func.func @transform_1(%arg0: i32, %arg1: i32, %arg2: i32) -> (i32, i32) {
    %c0_i32 = arith.constant 0 : i32
    return %arg2, %arg1 : i32, i32
  }
  func.func @transform_2(%arg0: i32, %arg1: i32, %arg2: i32) -> (i32, i32) {
    %c0_i32 = arith.constant 0 : i32
    %c0_i32_0 = arith.constant 0 : i32
    return %c0_i32, %arg1 : i32, i32
  }
  func.func @transform_3(%arg0: i32, %arg1: i32, %arg2: i32) -> (i32, i32) {
    %c0_i32 = arith.constant 0 : i32
    return %arg0, %arg1 : i32, i32
  }
  func.func @transform_4(%arg0: i32, %arg1: i32, %arg2: i32) -> (i32, i32) {
    %c0_i32 = arith.constant 0 : i32
    return %arg0, %arg1 : i32, i32
  }
}

module attributes {stable_mosaic.version = 11 : i64} {
  func.func @_mm_kernel(%arg0: i32, %arg1: i32, %arg2: i32, %arg3: memref<32x128xbf16, #tpu.memory_space<vmem>>, %arg4: memref<128x128xbf16, #tpu.memory_space<vmem>>, %arg5: memref<1x128xf32, #tpu.memory_space<vmem>>, %arg6: memref<32x128xf32, #tpu.memory_space<vmem>>) attributes {dimension_semantics = [#tpu.dimension_semantics<parallel>, #tpu.dimension_semantics<parallel>, #tpu.dimension_semantics<arbitrary>], iteration_bounds = array<i64: 1, 1, 5>, scalar_prefetch = 0 : i64, scratch_operands = 0 : i64, tpu.core_type = #tpu.core_type<tc>, window_params = [{transform_indices = @transform_0, window_bounds = array<i64: 32, 128>}, {transform_indices = @transform_1, window_bounds = array<i64: 128, 128>}, {transform_indices = @transform_2, window_bounds = array<i64: 1, 128>}, {transform_indices = @transform_3, window_bounds = array<i64: 32, 128>}]} {
    %c0_i32 = arith.constant 0 : i32
    %0 = arith.cmpi eq, %arg2, %c0_i32 : i32
    %1 = arith.extui %0 : i1 to i32
    %c0_i32_0 = arith.constant 0 : i32
    %2 = arith.cmpi ne, %1, %c0_i32_0 : i32
    scf.if %2 {
      %cst_9 = arith.constant 0.000000e+00 : f32
      %12 = vector.broadcast %cst_9 : f32 to vector<32x128xf32>
      %c0_10 = arith.constant 0 : index
      %c0_11 = arith.constant 0 : index
      %13 = vector.load %arg6[%c0_10, %c0_11] : memref<32x128xf32, #tpu.memory_space<vmem>>, vector<32x128xf32>
      tpu.vector_store %arg6[%c0_10, %c0_11], %12 {strides = array<i32>} : memref<32x128xf32, #tpu.memory_space<vmem>>, vector<32x128xf32>,
    } else {
    }
    %c0 = arith.constant 0 : index
    %c0_1 = arith.constant 0 : index
    %3 = vector.load %arg6[%c0, %c0_1] : memref<32x128xf32, #tpu.memory_space<vmem>>, vector<32x128xf32>
    %c0_2 = arith.constant 0 : index
    %c0_3 = arith.constant 0 : index
    %4 = vector.load %arg3[%c0_2, %c0_3] : memref<32x128xbf16, #tpu.memory_space<vmem>>, vector<32x128xbf16>
    %c0_4 = arith.constant 0 : index
    %c0_5 = arith.constant 0 : index
    %5 = vector.load %arg4[%c0_4, %c0_5] : memref<128x128xbf16, #tpu.memory_space<vmem>>, vector<128x128xbf16>
    %cst = arith.constant dense<0.000000e+00> : vector<32x128xf32>
    %6 = tpu.matmul %4, %5, %cst {dimension_numbers = #tpu.dot_dimension_numbers<[1], [0], [0], [1], [0, 0, 1, 1], [], []>} : vector<32x128xbf16>, vector<128x128xbf16>, vector<32x128xf32> -> vector<32x128xf32>
    %7 = arith.addf %3, %6 : vector<32x128xf32>
    %c0_6 = arith.constant 0 : index
    %c0_7 = arith.constant 0 : index
    %8 = vector.load %arg6[%c0_6, %c0_7] : memref<32x128xf32, #tpu.memory_space<vmem>>, vector<32x128xf32>
    tpu.vector_store %arg6[%c0_6, %c0_7], %7 {strides = array<i32>} : memref<32x128xf32, #tpu.memory_space<vmem>>, vector<32x128xf32>,
    %c4_i32 = arith.constant 4 : i32
    %9 = arith.cmpi eq, %arg2, %c4_i32 : i32
    %10 = arith.extui %9 : i1 to i32
    %c0_i32_8 = arith.constant 0 : i32
    %11 = arith.cmpi ne, %10, %c0_i32_8 : i32
    scf.if %11 {
      %c0_9 = arith.constant 0 : index
      %c0_10 = arith.constant 0 : index
      %12 = vector.load %arg6[%c0_9, %c0_10] : memref<32x128xf32, #tpu.memory_space<vmem>>, vector<32x128xf32>
      %c0_11 = arith.constant 0 : index
      %c0_12 = arith.constant 0 : index
      %13 = vector.load %arg5[%c0_11, %c0_12] : memref<1x128xf32, #tpu.memory_space<vmem>>, vector<1x128xf32>
      %14 = vector.broadcast %13 : vector<1x128xf32> to vector<32x128xf32>
      %15 = arith.addf %12, %14 : vector<32x128xf32>
      %cst_13 = arith.constant 0.000000e+00 : f32
      %16 = vector.broadcast %cst_13 : f32 to vector<32x128xf32>
      %17 = arith.maximumf %15, %16 : vector<32x128xf32>
      %c0_14 = arith.constant 0 : index
      %c0_15 = arith.constant 0 : index
      %18 = vector.load %arg6[%c0_14, %c0_15] : memref<32x128xf32, #tpu.memory_space<vmem>>, vector<32x128xf32>
      tpu.vector_store %arg6[%c0_14, %c0_15], %17 {strides = array<i32>} : memref<32x128xf32, #tpu.memory_space<vmem>>, vector<32x128xf32>,
    } else {
    }
    return
  }
  func.func @transform_0(%arg0: i32, %arg1: i32, %arg2: i32) -> (i32, i32) {
    %c0_i32 = arith.constant 0 : i32
    return %arg0, %arg2 : i32, i32
  }
  func.func @transform_1(%arg0: i32, %arg1: i32, %arg2: i32) -> (i32, i32) {
    %c0_i32 = arith.constant 0 : i32
    return %arg2, %arg1 : i32, i32
  }
  func.func @transform_2(%arg0: i32, %arg1: i32, %arg2: i32) -> (i32, i32) {
    %c0_i32 = arith.constant 0 : i32
    %c0_i32_0 = arith.constant 0 : i32
    return %c0_i32, %arg1 : i32, i32
  }
  func.func @transform_3(%arg0: i32, %arg1: i32, %arg2: i32) -> (i32, i32) {
    %c0_i32 = arith.constant 0 : i32
    return %arg0, %arg1 : i32, i32
  }
}

module attributes {stable_mosaic.version = 11 : i64} {
  func.func @_mm_kernel(%arg0: i32, %arg1: i32, %arg2: i32, %arg3: memref<16x128xbf16, #tpu.memory_space<vmem>>, %arg4: memref<128x128xbf16, #tpu.memory_space<vmem>>, %arg5: memref<1x128xf32, #tpu.memory_space<vmem>>, %arg6: memref<16x128xf32, #tpu.memory_space<vmem>>) attributes {dimension_semantics = [#tpu.dimension_semantics<parallel>, #tpu.dimension_semantics<parallel>, #tpu.dimension_semantics<arbitrary>], iteration_bounds = array<i64: 1, 1, 5>, scalar_prefetch = 0 : i64, scratch_operands = 0 : i64, tpu.core_type = #tpu.core_type<tc>, window_params = [{transform_indices = @transform_0, window_bounds = array<i64: 16, 128>}, {transform_indices = @transform_1, window_bounds = array<i64: 128, 128>}, {transform_indices = @transform_2, window_bounds = array<i64: 1, 128>}, {transform_indices = @transform_3, window_bounds = array<i64: 16, 128>}]} {
    %c0_i32 = arith.constant 0 : i32
    %0 = arith.cmpi eq, %arg2, %c0_i32 : i32
    %1 = arith.extui %0 : i1 to i32
    %c0_i32_0 = arith.constant 0 : i32
    %2 = arith.cmpi ne, %1, %c0_i32_0 : i32
    scf.if %2 {
      %cst_9 = arith.constant 0.000000e+00 : f32
      %12 = vector.broadcast %cst_9 : f32 to vector<16x128xf32>
      %c0_10 = arith.constant 0 : index
      %c0_11 = arith.constant 0 : index
      %13 = vector.load %arg6[%c0_10, %c0_11] : memref<16x128xf32, #tpu.memory_space<vmem>>, vector<16x128xf32>
      tpu.vector_store %arg6[%c0_10, %c0_11], %12 {strides = array<i32>} : memref<16x128xf32, #tpu.memory_space<vmem>>, vector<16x128xf32>,
    } else {
    }
    %c0 = arith.constant 0 : index
    %c0_1 = arith.constant 0 : index
    %3 = vector.load %arg6[%c0, %c0_1] : memref<16x128xf32, #tpu.memory_space<vmem>>, vector<16x128xf32>
    %c0_2 = arith.constant 0 : index
    %c0_3 = arith.constant 0 : index
    %4 = vector.load %arg3[%c0_2, %c0_3] : memref<16x128xbf16, #tpu.memory_space<vmem>>, vector<16x128xbf16>
    %c0_4 = arith.constant 0 : index
    %c0_5 = arith.constant 0 : index
    %5 = vector.load %arg4[%c0_4, %c0_5] : memref<128x128xbf16, #tpu.memory_space<vmem>>, vector<128x128xbf16>
    %cst = arith.constant dense<0.000000e+00> : vector<16x128xf32>
    %6 = tpu.matmul %4, %5, %cst {dimension_numbers = #tpu.dot_dimension_numbers<[1], [0], [0], [1], [0, 0, 1, 1], [], []>} : vector<16x128xbf16>, vector<128x128xbf16>, vector<16x128xf32> -> vector<16x128xf32>
    %7 = arith.addf %3, %6 : vector<16x128xf32>
    %c0_6 = arith.constant 0 : index
    %c0_7 = arith.constant 0 : index
    %8 = vector.load %arg6[%c0_6, %c0_7] : memref<16x128xf32, #tpu.memory_space<vmem>>, vector<16x128xf32>
    tpu.vector_store %arg6[%c0_6, %c0_7], %7 {strides = array<i32>} : memref<16x128xf32, #tpu.memory_space<vmem>>, vector<16x128xf32>,
    %c4_i32 = arith.constant 4 : i32
    %9 = arith.cmpi eq, %arg2, %c4_i32 : i32
    %10 = arith.extui %9 : i1 to i32
    %c0_i32_8 = arith.constant 0 : i32
    %11 = arith.cmpi ne, %10, %c0_i32_8 : i32
    scf.if %11 {
      %c0_9 = arith.constant 0 : index
      %c0_10 = arith.constant 0 : index
      %12 = vector.load %arg6[%c0_9, %c0_10] : memref<16x128xf32, #tpu.memory_space<vmem>>, vector<16x128xf32>
      %c0_11 = arith.constant 0 : index
      %c0_12 = arith.constant 0 : index
      %13 = vector.load %arg5[%c0_11, %c0_12] : memref<1x128xf32, #tpu.memory_space<vmem>>, vector<1x128xf32>
      %14 = vector.broadcast %13 : vector<1x128xf32> to vector<16x128xf32>
      %15 = arith.addf %12, %14 : vector<16x128xf32>
      %cst_13 = arith.constant 0.000000e+00 : f32
      %16 = vector.broadcast %cst_13 : f32 to vector<16x128xf32>
      %17 = arith.maximumf %15, %16 : vector<16x128xf32>
      %c0_14 = arith.constant 0 : index
      %c0_15 = arith.constant 0 : index
      %18 = vector.load %arg6[%c0_14, %c0_15] : memref<16x128xf32, #tpu.memory_space<vmem>>, vector<16x128xf32>
      tpu.vector_store %arg6[%c0_14, %c0_15], %17 {strides = array<i32>} : memref<16x128xf32, #tpu.memory_space<vmem>>, vector<16x128xf32>,
    } else {
    }
    return
  }
  func.func @transform_0(%arg0: i32, %arg1: i32, %arg2: i32) -> (i32, i32) {
    %c0_i32 = arith.constant 0 : i32
    return %arg0, %arg2 : i32, i32
  }
  func.func @transform_1(%arg0: i32, %arg1: i32, %arg2: i32) -> (i32, i32) {
    %c0_i32 = arith.constant 0 : i32
    return %arg2, %arg1 : i32, i32
  }
  func.func @transform_2(%arg0: i32, %arg1: i32, %arg2: i32) -> (i32, i32) {
    %c0_i32 = arith.constant 0 : i32
    %c0_i32_0 = arith.constant 0 : i32
    return %c0_i32, %arg1 : i32, i32
  }
  func.func @transform_3(%arg0: i32, %arg1: i32, %arg2: i32) -> (i32, i32) {
    %c0_i32 = arith.constant 0 : i32
    return %arg0, %arg1 : i32, i32
  }
}

module attributes {stable_mosaic.version = 11 : i64} {
  func.func @_mm_res_kernel(%arg0: i32, %arg1: i32, %arg2: i32, %arg3: memref<16x384xbf16, #tpu.memory_space<vmem>>, %arg4: memref<384x128xbf16, #tpu.memory_space<vmem>>, %arg5: memref<1x128xf32, #tpu.memory_space<vmem>>, %arg6: memref<16x128xf32, #tpu.memory_space<vmem>>, %arg7: memref<16x128xf32, #tpu.memory_space<vmem>>) attributes {dimension_semantics = [#tpu.dimension_semantics<parallel>, #tpu.dimension_semantics<parallel>, #tpu.dimension_semantics<arbitrary>], iteration_bounds = array<i64: 1, 1, 3>, scalar_prefetch = 0 : i64, scratch_operands = 0 : i64, tpu.core_type = #tpu.core_type<tc>, window_params = [{transform_indices = @transform_0, window_bounds = array<i64: 16, 384>}, {transform_indices = @transform_1, window_bounds = array<i64: 384, 128>}, {transform_indices = @transform_2, window_bounds = array<i64: 1, 128>}, {transform_indices = @transform_3, window_bounds = array<i64: 16, 128>}, {transform_indices = @transform_4, window_bounds = array<i64: 16, 128>}]} {
    %c0_i32 = arith.constant 0 : i32
    %0 = arith.cmpi eq, %arg2, %c0_i32 : i32
    %1 = arith.extui %0 : i1 to i32
    %c0_i32_0 = arith.constant 0 : i32
    %2 = arith.cmpi ne, %1, %c0_i32_0 : i32
    scf.if %2 {
      %cst_9 = arith.constant 0.000000e+00 : f32
      %12 = vector.broadcast %cst_9 : f32 to vector<16x128xf32>
      %c0_10 = arith.constant 0 : index
      %c0_11 = arith.constant 0 : index
      %13 = vector.load %arg7[%c0_10, %c0_11] : memref<16x128xf32, #tpu.memory_space<vmem>>, vector<16x128xf32>
      tpu.vector_store %arg7[%c0_10, %c0_11], %12 {strides = array<i32>} : memref<16x128xf32, #tpu.memory_space<vmem>>, vector<16x128xf32>,
    } else {
    }
    %c0 = arith.constant 0 : index
    %c0_1 = arith.constant 0 : index
    %3 = vector.load %arg7[%c0, %c0_1] : memref<16x128xf32, #tpu.memory_space<vmem>>, vector<16x128xf32>
    %c0_2 = arith.constant 0 : index
    %c0_3 = arith.constant 0 : index
    %4 = vector.load %arg3[%c0_2, %c0_3] : memref<16x384xbf16, #tpu.memory_space<vmem>>, vector<16x384xbf16>
    %c0_4 = arith.constant 0 : index
    %c0_5 = arith.constant 0 : index
    %5 = vector.load %arg4[%c0_4, %c0_5] : memref<384x128xbf16, #tpu.memory_space<vmem>>, vector<384x128xbf16>
    %cst = arith.constant dense<0.000000e+00> : vector<16x128xf32>
    %6 = tpu.matmul %4, %5, %cst {dimension_numbers = #tpu.dot_dimension_numbers<[1], [0], [0], [1], [0, 0, 1, 1], [], []>} : vector<16x384xbf16>, vector<384x128xbf16>, vector<16x128xf32> -> vector<16x128xf32>
    %7 = arith.addf %3, %6 : vector<16x128xf32>
    %c0_6 = arith.constant 0 : index
    %c0_7 = arith.constant 0 : index
    %8 = vector.load %arg7[%c0_6, %c0_7] : memref<16x128xf32, #tpu.memory_space<vmem>>, vector<16x128xf32>
    tpu.vector_store %arg7[%c0_6, %c0_7], %7 {strides = array<i32>} : memref<16x128xf32, #tpu.memory_space<vmem>>, vector<16x128xf32>,
    %c2_i32 = arith.constant 2 : i32
    %9 = arith.cmpi eq, %arg2, %c2_i32 : i32
    %10 = arith.extui %9 : i1 to i32
    %c0_i32_8 = arith.constant 0 : i32
    %11 = arith.cmpi ne, %10, %c0_i32_8 : i32
    scf.if %11 {
      %c0_9 = arith.constant 0 : index
      %c0_10 = arith.constant 0 : index
      %12 = vector.load %arg7[%c0_9, %c0_10] : memref<16x128xf32, #tpu.memory_space<vmem>>, vector<16x128xf32>
      %c0_11 = arith.constant 0 : index
      %c0_12 = arith.constant 0 : index
      %13 = vector.load %arg5[%c0_11, %c0_12] : memref<1x128xf32, #tpu.memory_space<vmem>>, vector<1x128xf32>
      %14 = vector.broadcast %13 : vector<1x128xf32> to vector<16x128xf32>
      %15 = arith.addf %12, %14 : vector<16x128xf32>
      %c0_13 = arith.constant 0 : index
      %c0_14 = arith.constant 0 : index
      %16 = vector.load %arg6[%c0_13, %c0_14] : memref<16x128xf32, #tpu.memory_space<vmem>>, vector<16x128xf32>
      %17 = arith.addf %15, %16 : vector<16x128xf32>
      %cst_15 = arith.constant 0.000000e+00 : f32
      %18 = vector.broadcast %cst_15 : f32 to vector<16x128xf32>
      %19 = arith.maximumf %17, %18 : vector<16x128xf32>
      %c0_16 = arith.constant 0 : index
      %c0_17 = arith.constant 0 : index
      %20 = vector.load %arg7[%c0_16, %c0_17] : memref<16x128xf32, #tpu.memory_space<vmem>>, vector<16x128xf32>
      tpu.vector_store %arg7[%c0_16, %c0_17], %19 {strides = array<i32>} : memref<16x128xf32, #tpu.memory_space<vmem>>, vector<16x128xf32>,
    } else {
    }
    return
  }
  func.func @transform_0(%arg0: i32, %arg1: i32, %arg2: i32) -> (i32, i32) {
    %c0_i32 = arith.constant 0 : i32
    return %arg0, %arg2 : i32, i32
  }
  func.func @transform_1(%arg0: i32, %arg1: i32, %arg2: i32) -> (i32, i32) {
    %c0_i32 = arith.constant 0 : i32
    return %arg2, %arg1 : i32, i32
  }
  func.func @transform_2(%arg0: i32, %arg1: i32, %arg2: i32) -> (i32, i32) {
    %c0_i32 = arith.constant 0 : i32
    %c0_i32_0 = arith.constant 0 : i32
    return %c0_i32, %arg1 : i32, i32
  }
  func.func @transform_3(%arg0: i32, %arg1: i32, %arg2: i32) -> (i32, i32) {
    %c0_i32 = arith.constant 0 : i32
    return %arg0, %arg1 : i32, i32
  }
  func.func @transform_4(%arg0: i32, %arg1: i32, %arg2: i32) -> (i32, i32) {
    %c0_i32 = arith.constant 0 : i32
    return %arg0, %arg1 : i32, i32
  }
}

module attributes {stable_mosaic.version = 11 : i64} {
  func.func @_mm_kernel(%arg0: i32, %arg1: i32, %arg2: i32, %arg3: memref<16x128xbf16, #tpu.memory_space<vmem>>, %arg4: memref<128x128xbf16, #tpu.memory_space<vmem>>, %arg5: memref<1x128xf32, #tpu.memory_space<vmem>>, %arg6: memref<16x128xf32, #tpu.memory_space<vmem>>) attributes {dimension_semantics = [#tpu.dimension_semantics<parallel>, #tpu.dimension_semantics<parallel>, #tpu.dimension_semantics<arbitrary>], iteration_bounds = array<i64: 1, 1, 1>, scalar_prefetch = 0 : i64, scratch_operands = 0 : i64, tpu.core_type = #tpu.core_type<tc>, window_params = [{transform_indices = @transform_0, window_bounds = array<i64: 16, 128>}, {transform_indices = @transform_1, window_bounds = array<i64: 128, 128>}, {transform_indices = @transform_2, window_bounds = array<i64: 1, 128>}, {transform_indices = @transform_3, window_bounds = array<i64: 16, 128>}]} {
    %c0_i32 = arith.constant 0 : i32
    %0 = arith.cmpi eq, %arg2, %c0_i32 : i32
    %1 = arith.extui %0 : i1 to i32
    %c0_i32_0 = arith.constant 0 : i32
    %2 = arith.cmpi ne, %1, %c0_i32_0 : i32
    scf.if %2 {
      %cst_10 = arith.constant 0.000000e+00 : f32
      %12 = vector.broadcast %cst_10 : f32 to vector<16x128xf32>
      %c0_11 = arith.constant 0 : index
      %c0_12 = arith.constant 0 : index
      %13 = vector.load %arg6[%c0_11, %c0_12] : memref<16x128xf32, #tpu.memory_space<vmem>>, vector<16x128xf32>
      tpu.vector_store %arg6[%c0_11, %c0_12], %12 {strides = array<i32>} : memref<16x128xf32, #tpu.memory_space<vmem>>, vector<16x128xf32>,
    } else {
    }
    %c0 = arith.constant 0 : index
    %c0_1 = arith.constant 0 : index
    %3 = vector.load %arg6[%c0, %c0_1] : memref<16x128xf32, #tpu.memory_space<vmem>>, vector<16x128xf32>
    %c0_2 = arith.constant 0 : index
    %c0_3 = arith.constant 0 : index
    %4 = vector.load %arg3[%c0_2, %c0_3] : memref<16x128xbf16, #tpu.memory_space<vmem>>, vector<16x128xbf16>
    %c0_4 = arith.constant 0 : index
    %c0_5 = arith.constant 0 : index
    %5 = vector.load %arg4[%c0_4, %c0_5] : memref<128x128xbf16, #tpu.memory_space<vmem>>, vector<128x128xbf16>
    %cst = arith.constant dense<0.000000e+00> : vector<16x128xf32>
    %6 = tpu.matmul %4, %5, %cst {dimension_numbers = #tpu.dot_dimension_numbers<[1], [0], [0], [1], [0, 0, 1, 1], [], []>} : vector<16x128xbf16>, vector<128x128xbf16>, vector<16x128xf32> -> vector<16x128xf32>
    %7 = arith.addf %3, %6 : vector<16x128xf32>
    %c0_6 = arith.constant 0 : index
    %c0_7 = arith.constant 0 : index
    %8 = vector.load %arg6[%c0_6, %c0_7] : memref<16x128xf32, #tpu.memory_space<vmem>>, vector<16x128xf32>
    tpu.vector_store %arg6[%c0_6, %c0_7], %7 {strides = array<i32>} : memref<16x128xf32, #tpu.memory_space<vmem>>, vector<16x128xf32>,
    %c0_i32_8 = arith.constant 0 : i32
    %9 = arith.cmpi eq, %arg2, %c0_i32_8 : i32
    %10 = arith.extui %9 : i1 to i32
    %c0_i32_9 = arith.constant 0 : i32
    %11 = arith.cmpi ne, %10, %c0_i32_9 : i32
    scf.if %11 {
      %c0_10 = arith.constant 0 : index
      %c0_11 = arith.constant 0 : index
      %12 = vector.load %arg6[%c0_10, %c0_11] : memref<16x128xf32, #tpu.memory_space<vmem>>, vector<16x128xf32>
      %c0_12 = arith.constant 0 : index
      %c0_13 = arith.constant 0 : index
      %13 = vector.load %arg5[%c0_12, %c0_13] : memref<1x128xf32, #tpu.memory_space<vmem>>, vector<1x128xf32>
      %14 = vector.broadcast %13 : vector<1x128xf32> to vector<16x128xf32>
      %15 = arith.addf %12, %14 : vector<16x128xf32>
      %c0_14 = arith.constant 0 : index
      %c0_15 = arith.constant 0 : index
      %16 = vector.load %arg6[%c0_14, %c0_15] : memref<16x128xf32, #tpu.memory_space<vmem>>, vector<16x128xf32>
      tpu.vector_store %arg6[%c0_14, %c0_15], %15 {strides = array<i32>} : memref<16x128xf32, #tpu.memory_space<vmem>>, vector<16x128xf32>,
    } else {
    }
    return
  }
  func.func @transform_0(%arg0: i32, %arg1: i32, %arg2: i32) -> (i32, i32) {
    %c0_i32 = arith.constant 0 : i32
    return %arg0, %arg2 : i32, i32
  }
  func.func @transform_1(%arg0: i32, %arg1: i32, %arg2: i32) -> (i32, i32) {
    %c0_i32 = arith.constant 0 : i32
    return %arg2, %arg1 : i32, i32
  }
  func.func @transform_2(%arg0: i32, %arg1: i32, %arg2: i32) -> (i32, i32) {
    %c0_i32 = arith.constant 0 : i32
    %c0_i32_0 = arith.constant 0 : i32
    return %c0_i32, %arg1 : i32, i32
  }
  func.func @transform_3(%arg0: i32, %arg1: i32, %arg2: i32) -> (i32, i32) {
    %c0_i32 = arith.constant 0 : i32
    return %arg0, %arg1 : i32, i32
  }
}

module attributes {stable_mosaic.version = 11 : i64} {
  func.func @_mm_kernel(%arg0: i32, %arg1: i32, %arg2: i32, %arg3: memref<16x384xbf16, #tpu.memory_space<vmem>>, %arg4: memref<384x128xbf16, #tpu.memory_space<vmem>>, %arg5: memref<1x128xf32, #tpu.memory_space<vmem>>, %arg6: memref<16x128xf32, #tpu.memory_space<vmem>>) attributes {dimension_semantics = [#tpu.dimension_semantics<parallel>, #tpu.dimension_semantics<parallel>, #tpu.dimension_semantics<arbitrary>], iteration_bounds = array<i64: 1, 1, 3>, scalar_prefetch = 0 : i64, scratch_operands = 0 : i64, tpu.core_type = #tpu.core_type<tc>, window_params = [{transform_indices = @transform_0, window_bounds = array<i64: 16, 384>}, {transform_indices = @transform_1, window_bounds = array<i64: 384, 128>}, {transform_indices = @transform_2, window_bounds = array<i64: 1, 128>}, {transform_indices = @transform_3, window_bounds = array<i64: 16, 128>}]} {
    %c0_i32 = arith.constant 0 : i32
    %0 = arith.cmpi eq, %arg2, %c0_i32 : i32
    %1 = arith.extui %0 : i1 to i32
    %c0_i32_0 = arith.constant 0 : i32
    %2 = arith.cmpi ne, %1, %c0_i32_0 : i32
    scf.if %2 {
      %cst_9 = arith.constant 0.000000e+00 : f32
      %12 = vector.broadcast %cst_9 : f32 to vector<16x128xf32>
      %c0_10 = arith.constant 0 : index
      %c0_11 = arith.constant 0 : index
      %13 = vector.load %arg6[%c0_10, %c0_11] : memref<16x128xf32, #tpu.memory_space<vmem>>, vector<16x128xf32>
      tpu.vector_store %arg6[%c0_10, %c0_11], %12 {strides = array<i32>} : memref<16x128xf32, #tpu.memory_space<vmem>>, vector<16x128xf32>,
    } else {
    }
    %c0 = arith.constant 0 : index
    %c0_1 = arith.constant 0 : index
    %3 = vector.load %arg6[%c0, %c0_1] : memref<16x128xf32, #tpu.memory_space<vmem>>, vector<16x128xf32>
    %c0_2 = arith.constant 0 : index
    %c0_3 = arith.constant 0 : index
    %4 = vector.load %arg3[%c0_2, %c0_3] : memref<16x384xbf16, #tpu.memory_space<vmem>>, vector<16x384xbf16>
    %c0_4 = arith.constant 0 : index
    %c0_5 = arith.constant 0 : index
    %5 = vector.load %arg4[%c0_4, %c0_5] : memref<384x128xbf16, #tpu.memory_space<vmem>>, vector<384x128xbf16>
    %cst = arith.constant dense<0.000000e+00> : vector<16x128xf32>
    %6 = tpu.matmul %4, %5, %cst {dimension_numbers = #tpu.dot_dimension_numbers<[1], [0], [0], [1], [0, 0, 1, 1], [], []>} : vector<16x384xbf16>, vector<384x128xbf16>, vector<16x128xf32> -> vector<16x128xf32>
    %7 = arith.addf %3, %6 : vector<16x128xf32>
    %c0_6 = arith.constant 0 : index
    %c0_7 = arith.constant 0 : index
    %8 = vector.load %arg6[%c0_6, %c0_7] : memref<16x128xf32, #tpu.memory_space<vmem>>, vector<16x128xf32>
    tpu.vector_store %arg6[%c0_6, %c0_7], %7 {strides = array<i32>} : memref<16x128xf32, #tpu.memory_space<vmem>>, vector<16x128xf32>,
    %c2_i32 = arith.constant 2 : i32
    %9 = arith.cmpi eq, %arg2, %c2_i32 : i32
    %10 = arith.extui %9 : i1 to i32
    %c0_i32_8 = arith.constant 0 : i32
    %11 = arith.cmpi ne, %10, %c0_i32_8 : i32
    scf.if %11 {
      %c0_9 = arith.constant 0 : index
      %c0_10 = arith.constant 0 : index
      %12 = vector.load %arg6[%c0_9, %c0_10] : memref<16x128xf32, #tpu.memory_space<vmem>>, vector<16x128xf32>
      %c0_11 = arith.constant 0 : index
      %c0_12 = arith.constant 0 : index
      %13 = vector.load %arg5[%c0_11, %c0_12] : memref<1x128xf32, #tpu.memory_space<vmem>>, vector<1x128xf32>
      %14 = vector.broadcast %13 : vector<1x128xf32> to vector<16x128xf32>
      %15 = arith.addf %12, %14 : vector<16x128xf32>
      %cst_13 = arith.constant 0.000000e+00 : f32
      %16 = vector.broadcast %cst_13 : f32 to vector<16x128xf32>
      %17 = arith.maximumf %15, %16 : vector<16x128xf32>
      %c0_14 = arith.constant 0 : index
      %c0_15 = arith.constant 0 : index
      %18 = vector.load %arg6[%c0_14, %c0_15] : memref<16x128xf32, #tpu.memory_space<vmem>>, vector<16x128xf32>
      tpu.vector_store %arg6[%c0_14, %c0_15], %17 {strides = array<i32>} : memref<16x128xf32, #tpu.memory_space<vmem>>, vector<16x128xf32>,
    } else {
    }
    return
  }
  func.func @transform_0(%arg0: i32, %arg1: i32, %arg2: i32) -> (i32, i32) {
    %c0_i32 = arith.constant 0 : i32
    return %arg0, %arg2 : i32, i32
  }
  func.func @transform_1(%arg0: i32, %arg1: i32, %arg2: i32) -> (i32, i32) {
    %c0_i32 = arith.constant 0 : i32
    return %arg2, %arg1 : i32, i32
  }
  func.func @transform_2(%arg0: i32, %arg1: i32, %arg2: i32) -> (i32, i32) {
    %c0_i32 = arith.constant 0 : i32
    %c0_i32_0 = arith.constant 0 : i32
    return %c0_i32, %arg1 : i32, i32
  }
  func.func @transform_3(%arg0: i32, %arg1: i32, %arg2: i32) -> (i32, i32) {
    %c0_i32 = arith.constant 0 : i32
    return %arg0, %arg1 : i32, i32
  }
}

module attributes {stable_mosaic.version = 11 : i64} {
  func.func @_mm_kernel(%arg0: i32, %arg1: i32, %arg2: i32, %arg3: memref<16x384xbf16, #tpu.memory_space<vmem>>, %arg4: memref<384x256xbf16, #tpu.memory_space<vmem>>, %arg5: memref<1x256xf32, #tpu.memory_space<vmem>>, %arg6: memref<16x256xf32, #tpu.memory_space<vmem>>) attributes {dimension_semantics = [#tpu.dimension_semantics<parallel>, #tpu.dimension_semantics<parallel>, #tpu.dimension_semantics<arbitrary>], iteration_bounds = array<i64: 1, 1, 3>, scalar_prefetch = 0 : i64, scratch_operands = 0 : i64, tpu.core_type = #tpu.core_type<tc>, window_params = [{transform_indices = @transform_0, window_bounds = array<i64: 16, 384>}, {transform_indices = @transform_1, window_bounds = array<i64: 384, 256>}, {transform_indices = @transform_2, window_bounds = array<i64: 1, 256>}, {transform_indices = @transform_3, window_bounds = array<i64: 16, 256>}]} {
    %c0_i32 = arith.constant 0 : i32
    %0 = arith.cmpi eq, %arg2, %c0_i32 : i32
    %1 = arith.extui %0 : i1 to i32
    %c0_i32_0 = arith.constant 0 : i32
    %2 = arith.cmpi ne, %1, %c0_i32_0 : i32
    scf.if %2 {
      %cst_9 = arith.constant 0.000000e+00 : f32
      %12 = vector.broadcast %cst_9 : f32 to vector<16x256xf32>
      %c0_10 = arith.constant 0 : index
      %c0_11 = arith.constant 0 : index
      %13 = vector.load %arg6[%c0_10, %c0_11] : memref<16x256xf32, #tpu.memory_space<vmem>>, vector<16x256xf32>
      tpu.vector_store %arg6[%c0_10, %c0_11], %12 {strides = array<i32>} : memref<16x256xf32, #tpu.memory_space<vmem>>, vector<16x256xf32>,
    } else {
    }
    %c0 = arith.constant 0 : index
    %c0_1 = arith.constant 0 : index
    %3 = vector.load %arg6[%c0, %c0_1] : memref<16x256xf32, #tpu.memory_space<vmem>>, vector<16x256xf32>
    %c0_2 = arith.constant 0 : index
    %c0_3 = arith.constant 0 : index
    %4 = vector.load %arg3[%c0_2, %c0_3] : memref<16x384xbf16, #tpu.memory_space<vmem>>, vector<16x384xbf16>
    %c0_4 = arith.constant 0 : index
    %c0_5 = arith.constant 0 : index
    %5 = vector.load %arg4[%c0_4, %c0_5] : memref<384x256xbf16, #tpu.memory_space<vmem>>, vector<384x256xbf16>
    %cst = arith.constant dense<0.000000e+00> : vector<16x256xf32>
    %6 = tpu.matmul %4, %5, %cst {dimension_numbers = #tpu.dot_dimension_numbers<[1], [0], [0], [1], [0, 0, 1, 1], [], []>} : vector<16x384xbf16>, vector<384x256xbf16>, vector<16x256xf32> -> vector<16x256xf32>
    %7 = arith.addf %3, %6 : vector<16x256xf32>
    %c0_6 = arith.constant 0 : index
    %c0_7 = arith.constant 0 : index
    %8 = vector.load %arg6[%c0_6, %c0_7] : memref<16x256xf32, #tpu.memory_space<vmem>>, vector<16x256xf32>
    tpu.vector_store %arg6[%c0_6, %c0_7], %7 {strides = array<i32>} : memref<16x256xf32, #tpu.memory_space<vmem>>, vector<16x256xf32>,
    %c2_i32 = arith.constant 2 : i32
    %9 = arith.cmpi eq, %arg2, %c2_i32 : i32
    %10 = arith.extui %9 : i1 to i32
    %c0_i32_8 = arith.constant 0 : i32
    %11 = arith.cmpi ne, %10, %c0_i32_8 : i32
    scf.if %11 {
      %c0_9 = arith.constant 0 : index
      %c0_10 = arith.constant 0 : index
      %12 = vector.load %arg6[%c0_9, %c0_10] : memref<16x256xf32, #tpu.memory_space<vmem>>, vector<16x256xf32>
      %c0_11 = arith.constant 0 : index
      %c0_12 = arith.constant 0 : index
      %13 = vector.load %arg5[%c0_11, %c0_12] : memref<1x256xf32, #tpu.memory_space<vmem>>, vector<1x256xf32>
      %14 = vector.broadcast %13 : vector<1x256xf32> to vector<16x256xf32>
      %15 = arith.addf %12, %14 : vector<16x256xf32>
      %cst_13 = arith.constant 0.000000e+00 : f32
      %16 = vector.broadcast %cst_13 : f32 to vector<16x256xf32>
      %17 = arith.maximumf %15, %16 : vector<16x256xf32>
      %c0_14 = arith.constant 0 : index
      %c0_15 = arith.constant 0 : index
      %18 = vector.load %arg6[%c0_14, %c0_15] : memref<16x256xf32, #tpu.memory_space<vmem>>, vector<16x256xf32>
      tpu.vector_store %arg6[%c0_14, %c0_15], %17 {strides = array<i32>} : memref<16x256xf32, #tpu.memory_space<vmem>>, vector<16x256xf32>,
    } else {
    }
    return
  }
  func.func @transform_0(%arg0: i32, %arg1: i32, %arg2: i32) -> (i32, i32) {
    %c0_i32 = arith.constant 0 : i32
    return %arg0, %arg2 : i32, i32
  }
  func.func @transform_1(%arg0: i32, %arg1: i32, %arg2: i32) -> (i32, i32) {
    %c0_i32 = arith.constant 0 : i32
    return %arg2, %arg1 : i32, i32
  }
  func.func @transform_2(%arg0: i32, %arg1: i32, %arg2: i32) -> (i32, i32) {
    %c0_i32 = arith.constant 0 : i32
    %c0_i32_0 = arith.constant 0 : i32
    return %c0_i32, %arg1 : i32, i32
  }
  func.func @transform_3(%arg0: i32, %arg1: i32, %arg2: i32) -> (i32, i32) {
    %c0_i32 = arith.constant 0 : i32
    return %arg0, %arg1 : i32, i32
  }
}

module attributes {stable_mosaic.version = 11 : i64} {
  func.func @_mm_res_kernel(%arg0: i32, %arg1: i32, %arg2: i32, %arg3: memref<16x384xbf16, #tpu.memory_space<vmem>>, %arg4: memref<384x256xbf16, #tpu.memory_space<vmem>>, %arg5: memref<1x256xf32, #tpu.memory_space<vmem>>, %arg6: memref<16x256xf32, #tpu.memory_space<vmem>>, %arg7: memref<16x256xf32, #tpu.memory_space<vmem>>) attributes {dimension_semantics = [#tpu.dimension_semantics<parallel>, #tpu.dimension_semantics<parallel>, #tpu.dimension_semantics<arbitrary>], iteration_bounds = array<i64: 1, 1, 6>, scalar_prefetch = 0 : i64, scratch_operands = 0 : i64, tpu.core_type = #tpu.core_type<tc>, window_params = [{transform_indices = @transform_0, window_bounds = array<i64: 16, 384>}, {transform_indices = @transform_1, window_bounds = array<i64: 384, 256>}, {transform_indices = @transform_2, window_bounds = array<i64: 1, 256>}, {transform_indices = @transform_3, window_bounds = array<i64: 16, 256>}, {transform_indices = @transform_4, window_bounds = array<i64: 16, 256>}]} {
    %c0_i32 = arith.constant 0 : i32
    %0 = arith.cmpi eq, %arg2, %c0_i32 : i32
    %1 = arith.extui %0 : i1 to i32
    %c0_i32_0 = arith.constant 0 : i32
    %2 = arith.cmpi ne, %1, %c0_i32_0 : i32
    scf.if %2 {
      %cst_9 = arith.constant 0.000000e+00 : f32
      %12 = vector.broadcast %cst_9 : f32 to vector<16x256xf32>
      %c0_10 = arith.constant 0 : index
      %c0_11 = arith.constant 0 : index
      %13 = vector.load %arg7[%c0_10, %c0_11] : memref<16x256xf32, #tpu.memory_space<vmem>>, vector<16x256xf32>
      tpu.vector_store %arg7[%c0_10, %c0_11], %12 {strides = array<i32>} : memref<16x256xf32, #tpu.memory_space<vmem>>, vector<16x256xf32>,
    } else {
    }
    %c0 = arith.constant 0 : index
    %c0_1 = arith.constant 0 : index
    %3 = vector.load %arg7[%c0, %c0_1] : memref<16x256xf32, #tpu.memory_space<vmem>>, vector<16x256xf32>
    %c0_2 = arith.constant 0 : index
    %c0_3 = arith.constant 0 : index
    %4 = vector.load %arg3[%c0_2, %c0_3] : memref<16x384xbf16, #tpu.memory_space<vmem>>, vector<16x384xbf16>
    %c0_4 = arith.constant 0 : index
    %c0_5 = arith.constant 0 : index
    %5 = vector.load %arg4[%c0_4, %c0_5] : memref<384x256xbf16, #tpu.memory_space<vmem>>, vector<384x256xbf16>
    %cst = arith.constant dense<0.000000e+00> : vector<16x256xf32>
    %6 = tpu.matmul %4, %5, %cst {dimension_numbers = #tpu.dot_dimension_numbers<[1], [0], [0], [1], [0, 0, 1, 1], [], []>} : vector<16x384xbf16>, vector<384x256xbf16>, vector<16x256xf32> -> vector<16x256xf32>
    %7 = arith.addf %3, %6 : vector<16x256xf32>
    %c0_6 = arith.constant 0 : index
    %c0_7 = arith.constant 0 : index
    %8 = vector.load %arg7[%c0_6, %c0_7] : memref<16x256xf32, #tpu.memory_space<vmem>>, vector<16x256xf32>
    tpu.vector_store %arg7[%c0_6, %c0_7], %7 {strides = array<i32>} : memref<16x256xf32, #tpu.memory_space<vmem>>, vector<16x256xf32>,
    %c5_i32 = arith.constant 5 : i32
    %9 = arith.cmpi eq, %arg2, %c5_i32 : i32
    %10 = arith.extui %9 : i1 to i32
    %c0_i32_8 = arith.constant 0 : i32
    %11 = arith.cmpi ne, %10, %c0_i32_8 : i32
    scf.if %11 {
      %c0_9 = arith.constant 0 : index
      %c0_10 = arith.constant 0 : index
      %12 = vector.load %arg7[%c0_9, %c0_10] : memref<16x256xf32, #tpu.memory_space<vmem>>, vector<16x256xf32>
      %c0_11 = arith.constant 0 : index
      %c0_12 = arith.constant 0 : index
      %13 = vector.load %arg5[%c0_11, %c0_12] : memref<1x256xf32, #tpu.memory_space<vmem>>, vector<1x256xf32>
      %14 = vector.broadcast %13 : vector<1x256xf32> to vector<16x256xf32>
      %15 = arith.addf %12, %14 : vector<16x256xf32>
      %c0_13 = arith.constant 0 : index
      %c0_14 = arith.constant 0 : index
      %16 = vector.load %arg6[%c0_13, %c0_14] : memref<16x256xf32, #tpu.memory_space<vmem>>, vector<16x256xf32>
      %17 = arith.addf %15, %16 : vector<16x256xf32>
      %cst_15 = arith.constant 0.000000e+00 : f32
      %18 = vector.broadcast %cst_15 : f32 to vector<16x256xf32>
      %19 = arith.maximumf %17, %18 : vector<16x256xf32>
      %c0_16 = arith.constant 0 : index
      %c0_17 = arith.constant 0 : index
      %20 = vector.load %arg7[%c0_16, %c0_17] : memref<16x256xf32, #tpu.memory_space<vmem>>, vector<16x256xf32>
      tpu.vector_store %arg7[%c0_16, %c0_17], %19 {strides = array<i32>} : memref<16x256xf32, #tpu.memory_space<vmem>>, vector<16x256xf32>,
    } else {
    }
    return
  }
  func.func @transform_0(%arg0: i32, %arg1: i32, %arg2: i32) -> (i32, i32) {
    %c0_i32 = arith.constant 0 : i32
    return %arg0, %arg2 : i32, i32
  }
  func.func @transform_1(%arg0: i32, %arg1: i32, %arg2: i32) -> (i32, i32) {
    %c0_i32 = arith.constant 0 : i32
    return %arg2, %arg1 : i32, i32
  }
  func.func @transform_2(%arg0: i32, %arg1: i32, %arg2: i32) -> (i32, i32) {
    %c0_i32 = arith.constant 0 : i32
    %c0_i32_0 = arith.constant 0 : i32
    return %c0_i32, %arg1 : i32, i32
  }
  func.func @transform_3(%arg0: i32, %arg1: i32, %arg2: i32) -> (i32, i32) {
    %c0_i32 = arith.constant 0 : i32
    return %arg0, %arg1 : i32, i32
  }
  func.func @transform_4(%arg0: i32, %arg1: i32, %arg2: i32) -> (i32, i32) {
    %c0_i32 = arith.constant 0 : i32
    return %arg0, %arg1 : i32, i32
  }
}

module attributes {stable_mosaic.version = 11 : i64} {
  func.func @_mm_kernel(%arg0: i32, %arg1: i32, %arg2: i32, %arg3: memref<16x128xbf16, #tpu.memory_space<vmem>>, %arg4: memref<128x256xbf16, #tpu.memory_space<vmem>>, %arg5: memref<1x256xf32, #tpu.memory_space<vmem>>, %arg6: memref<16x256xf32, #tpu.memory_space<vmem>>) attributes {dimension_semantics = [#tpu.dimension_semantics<parallel>, #tpu.dimension_semantics<parallel>, #tpu.dimension_semantics<arbitrary>], iteration_bounds = array<i64: 1, 1, 1>, scalar_prefetch = 0 : i64, scratch_operands = 0 : i64, tpu.core_type = #tpu.core_type<tc>, window_params = [{transform_indices = @transform_0, window_bounds = array<i64: 16, 128>}, {transform_indices = @transform_1, window_bounds = array<i64: 128, 256>}, {transform_indices = @transform_2, window_bounds = array<i64: 1, 256>}, {transform_indices = @transform_3, window_bounds = array<i64: 16, 256>}]} {
    %c0_i32 = arith.constant 0 : i32
    %0 = arith.cmpi eq, %arg2, %c0_i32 : i32
    %1 = arith.extui %0 : i1 to i32
    %c0_i32_0 = arith.constant 0 : i32
    %2 = arith.cmpi ne, %1, %c0_i32_0 : i32
    scf.if %2 {
      %cst_10 = arith.constant 0.000000e+00 : f32
      %12 = vector.broadcast %cst_10 : f32 to vector<16x256xf32>
      %c0_11 = arith.constant 0 : index
      %c0_12 = arith.constant 0 : index
      %13 = vector.load %arg6[%c0_11, %c0_12] : memref<16x256xf32, #tpu.memory_space<vmem>>, vector<16x256xf32>
      tpu.vector_store %arg6[%c0_11, %c0_12], %12 {strides = array<i32>} : memref<16x256xf32, #tpu.memory_space<vmem>>, vector<16x256xf32>,
    } else {
    }
    %c0 = arith.constant 0 : index
    %c0_1 = arith.constant 0 : index
    %3 = vector.load %arg6[%c0, %c0_1] : memref<16x256xf32, #tpu.memory_space<vmem>>, vector<16x256xf32>
    %c0_2 = arith.constant 0 : index
    %c0_3 = arith.constant 0 : index
    %4 = vector.load %arg3[%c0_2, %c0_3] : memref<16x128xbf16, #tpu.memory_space<vmem>>, vector<16x128xbf16>
    %c0_4 = arith.constant 0 : index
    %c0_5 = arith.constant 0 : index
    %5 = vector.load %arg4[%c0_4, %c0_5] : memref<128x256xbf16, #tpu.memory_space<vmem>>, vector<128x256xbf16>
    %cst = arith.constant dense<0.000000e+00> : vector<16x256xf32>
    %6 = tpu.matmul %4, %5, %cst {dimension_numbers = #tpu.dot_dimension_numbers<[1], [0], [0], [1], [0, 0, 1, 1], [], []>} : vector<16x128xbf16>, vector<128x256xbf16>, vector<16x256xf32> -> vector<16x256xf32>
    %7 = arith.addf %3, %6 : vector<16x256xf32>
    %c0_6 = arith.constant 0 : index
    %c0_7 = arith.constant 0 : index
    %8 = vector.load %arg6[%c0_6, %c0_7] : memref<16x256xf32, #tpu.memory_space<vmem>>, vector<16x256xf32>
    tpu.vector_store %arg6[%c0_6, %c0_7], %7 {strides = array<i32>} : memref<16x256xf32, #tpu.memory_space<vmem>>, vector<16x256xf32>,
    %c0_i32_8 = arith.constant 0 : i32
    %9 = arith.cmpi eq, %arg2, %c0_i32_8 : i32
    %10 = arith.extui %9 : i1 to i32
    %c0_i32_9 = arith.constant 0 : i32
    %11 = arith.cmpi ne, %10, %c0_i32_9 : i32
    scf.if %11 {
      %c0_10 = arith.constant 0 : index
      %c0_11 = arith.constant 0 : index
      %12 = vector.load %arg6[%c0_10, %c0_11] : memref<16x256xf32, #tpu.memory_space<vmem>>, vector<16x256xf32>
      %c0_12 = arith.constant 0 : index
      %c0_13 = arith.constant 0 : index
      %13 = vector.load %arg5[%c0_12, %c0_13] : memref<1x256xf32, #tpu.memory_space<vmem>>, vector<1x256xf32>
      %14 = vector.broadcast %13 : vector<1x256xf32> to vector<16x256xf32>
      %15 = arith.addf %12, %14 : vector<16x256xf32>
      %c0_14 = arith.constant 0 : index
      %c0_15 = arith.constant 0 : index
      %16 = vector.load %arg6[%c0_14, %c0_15] : memref<16x256xf32, #tpu.memory_space<vmem>>, vector<16x256xf32>
      tpu.vector_store %arg6[%c0_14, %c0_15], %15 {strides = array<i32>} : memref<16x256xf32, #tpu.memory_space<vmem>>, vector<16x256xf32>,
    } else {
    }
    return
  }
  func.func @transform_0(%arg0: i32, %arg1: i32, %arg2: i32) -> (i32, i32) {
    %c0_i32 = arith.constant 0 : i32
    return %arg0, %arg2 : i32, i32
  }
  func.func @transform_1(%arg0: i32, %arg1: i32, %arg2: i32) -> (i32, i32) {
    %c0_i32 = arith.constant 0 : i32
    return %arg2, %arg1 : i32, i32
  }
  func.func @transform_2(%arg0: i32, %arg1: i32, %arg2: i32) -> (i32, i32) {
    %c0_i32 = arith.constant 0 : i32
    %c0_i32_0 = arith.constant 0 : i32
    return %c0_i32, %arg1 : i32, i32
  }
  func.func @transform_3(%arg0: i32, %arg1: i32, %arg2: i32) -> (i32, i32) {
    %c0_i32 = arith.constant 0 : i32
    return %arg0, %arg1 : i32, i32
  }
}

module attributes {stable_mosaic.version = 11 : i64} {
  func.func @_mm_kernel(%arg0: i32, %arg1: i32, %arg2: i32, %arg3: memref<16x384xbf16, #tpu.memory_space<vmem>>, %arg4: memref<384x256xbf16, #tpu.memory_space<vmem>>, %arg5: memref<1x256xf32, #tpu.memory_space<vmem>>, %arg6: memref<16x256xf32, #tpu.memory_space<vmem>>) attributes {dimension_semantics = [#tpu.dimension_semantics<parallel>, #tpu.dimension_semantics<parallel>, #tpu.dimension_semantics<arbitrary>], iteration_bounds = array<i64: 1, 1, 6>, scalar_prefetch = 0 : i64, scratch_operands = 0 : i64, tpu.core_type = #tpu.core_type<tc>, window_params = [{transform_indices = @transform_0, window_bounds = array<i64: 16, 384>}, {transform_indices = @transform_1, window_bounds = array<i64: 384, 256>}, {transform_indices = @transform_2, window_bounds = array<i64: 1, 256>}, {transform_indices = @transform_3, window_bounds = array<i64: 16, 256>}]} {
    %c0_i32 = arith.constant 0 : i32
    %0 = arith.cmpi eq, %arg2, %c0_i32 : i32
    %1 = arith.extui %0 : i1 to i32
    %c0_i32_0 = arith.constant 0 : i32
    %2 = arith.cmpi ne, %1, %c0_i32_0 : i32
    scf.if %2 {
      %cst_9 = arith.constant 0.000000e+00 : f32
      %12 = vector.broadcast %cst_9 : f32 to vector<16x256xf32>
      %c0_10 = arith.constant 0 : index
      %c0_11 = arith.constant 0 : index
      %13 = vector.load %arg6[%c0_10, %c0_11] : memref<16x256xf32, #tpu.memory_space<vmem>>, vector<16x256xf32>
      tpu.vector_store %arg6[%c0_10, %c0_11], %12 {strides = array<i32>} : memref<16x256xf32, #tpu.memory_space<vmem>>, vector<16x256xf32>,
    } else {
    }
    %c0 = arith.constant 0 : index
    %c0_1 = arith.constant 0 : index
    %3 = vector.load %arg6[%c0, %c0_1] : memref<16x256xf32, #tpu.memory_space<vmem>>, vector<16x256xf32>
    %c0_2 = arith.constant 0 : index
    %c0_3 = arith.constant 0 : index
    %4 = vector.load %arg3[%c0_2, %c0_3] : memref<16x384xbf16, #tpu.memory_space<vmem>>, vector<16x384xbf16>
    %c0_4 = arith.constant 0 : index
    %c0_5 = arith.constant 0 : index
    %5 = vector.load %arg4[%c0_4, %c0_5] : memref<384x256xbf16, #tpu.memory_space<vmem>>, vector<384x256xbf16>
    %cst = arith.constant dense<0.000000e+00> : vector<16x256xf32>
    %6 = tpu.matmul %4, %5, %cst {dimension_numbers = #tpu.dot_dimension_numbers<[1], [0], [0], [1], [0, 0, 1, 1], [], []>} : vector<16x384xbf16>, vector<384x256xbf16>, vector<16x256xf32> -> vector<16x256xf32>
    %7 = arith.addf %3, %6 : vector<16x256xf32>
    %c0_6 = arith.constant 0 : index
    %c0_7 = arith.constant 0 : index
    %8 = vector.load %arg6[%c0_6, %c0_7] : memref<16x256xf32, #tpu.memory_space<vmem>>, vector<16x256xf32>
    tpu.vector_store %arg6[%c0_6, %c0_7], %7 {strides = array<i32>} : memref<16x256xf32, #tpu.memory_space<vmem>>, vector<16x256xf32>,
    %c5_i32 = arith.constant 5 : i32
    %9 = arith.cmpi eq, %arg2, %c5_i32 : i32
    %10 = arith.extui %9 : i1 to i32
    %c0_i32_8 = arith.constant 0 : i32
    %11 = arith.cmpi ne, %10, %c0_i32_8 : i32
    scf.if %11 {
      %c0_9 = arith.constant 0 : index
      %c0_10 = arith.constant 0 : index
      %12 = vector.load %arg6[%c0_9, %c0_10] : memref<16x256xf32, #tpu.memory_space<vmem>>, vector<16x256xf32>
      %c0_11 = arith.constant 0 : index
      %c0_12 = arith.constant 0 : index
      %13 = vector.load %arg5[%c0_11, %c0_12] : memref<1x256xf32, #tpu.memory_space<vmem>>, vector<1x256xf32>
      %14 = vector.broadcast %13 : vector<1x256xf32> to vector<16x256xf32>
      %15 = arith.addf %12, %14 : vector<16x256xf32>
      %cst_13 = arith.constant 0.000000e+00 : f32
      %16 = vector.broadcast %cst_13 : f32 to vector<16x256xf32>
      %17 = arith.maximumf %15, %16 : vector<16x256xf32>
      %c0_14 = arith.constant 0 : index
      %c0_15 = arith.constant 0 : index
      %18 = vector.load %arg6[%c0_14, %c0_15] : memref<16x256xf32, #tpu.memory_space<vmem>>, vector<16x256xf32>
      tpu.vector_store %arg6[%c0_14, %c0_15], %17 {strides = array<i32>} : memref<16x256xf32, #tpu.memory_space<vmem>>, vector<16x256xf32>,
    } else {
    }
    return
  }
  func.func @transform_0(%arg0: i32, %arg1: i32, %arg2: i32) -> (i32, i32) {
    %c0_i32 = arith.constant 0 : i32
    return %arg0, %arg2 : i32, i32
  }
  func.func @transform_1(%arg0: i32, %arg1: i32, %arg2: i32) -> (i32, i32) {
    %c0_i32 = arith.constant 0 : i32
    return %arg2, %arg1 : i32, i32
  }
  func.func @transform_2(%arg0: i32, %arg1: i32, %arg2: i32) -> (i32, i32) {
    %c0_i32 = arith.constant 0 : i32
    %c0_i32_0 = arith.constant 0 : i32
    return %c0_i32, %arg1 : i32, i32
  }
  func.func @transform_3(%arg0: i32, %arg1: i32, %arg2: i32) -> (i32, i32) {
    %c0_i32 = arith.constant 0 : i32
    return %arg0, %arg1 : i32, i32
  }
}

module attributes {stable_mosaic.version = 11 : i64} {
  func.func @_mm_kernel(%arg0: i32, %arg1: i32, %arg2: i32, %arg3: memref<16x384xbf16, #tpu.memory_space<vmem>>, %arg4: memref<384x256xbf16, #tpu.memory_space<vmem>>, %arg5: memref<1x256xf32, #tpu.memory_space<vmem>>, %arg6: memref<16x256xf32, #tpu.memory_space<vmem>>) attributes {dimension_semantics = [#tpu.dimension_semantics<parallel>, #tpu.dimension_semantics<parallel>, #tpu.dimension_semantics<arbitrary>], iteration_bounds = array<i64: 1, 2, 6>, scalar_prefetch = 0 : i64, scratch_operands = 0 : i64, tpu.core_type = #tpu.core_type<tc>, window_params = [{transform_indices = @transform_0, window_bounds = array<i64: 16, 384>}, {transform_indices = @transform_1, window_bounds = array<i64: 384, 256>}, {transform_indices = @transform_2, window_bounds = array<i64: 1, 256>}, {transform_indices = @transform_3, window_bounds = array<i64: 16, 256>}]} {
    %c0_i32 = arith.constant 0 : i32
    %0 = arith.cmpi eq, %arg2, %c0_i32 : i32
    %1 = arith.extui %0 : i1 to i32
    %c0_i32_0 = arith.constant 0 : i32
    %2 = arith.cmpi ne, %1, %c0_i32_0 : i32
    scf.if %2 {
      %cst_9 = arith.constant 0.000000e+00 : f32
      %12 = vector.broadcast %cst_9 : f32 to vector<16x256xf32>
      %c0_10 = arith.constant 0 : index
      %c0_11 = arith.constant 0 : index
      %13 = vector.load %arg6[%c0_10, %c0_11] : memref<16x256xf32, #tpu.memory_space<vmem>>, vector<16x256xf32>
      tpu.vector_store %arg6[%c0_10, %c0_11], %12 {strides = array<i32>} : memref<16x256xf32, #tpu.memory_space<vmem>>, vector<16x256xf32>,
    } else {
    }
    %c0 = arith.constant 0 : index
    %c0_1 = arith.constant 0 : index
    %3 = vector.load %arg6[%c0, %c0_1] : memref<16x256xf32, #tpu.memory_space<vmem>>, vector<16x256xf32>
    %c0_2 = arith.constant 0 : index
    %c0_3 = arith.constant 0 : index
    %4 = vector.load %arg3[%c0_2, %c0_3] : memref<16x384xbf16, #tpu.memory_space<vmem>>, vector<16x384xbf16>
    %c0_4 = arith.constant 0 : index
    %c0_5 = arith.constant 0 : index
    %5 = vector.load %arg4[%c0_4, %c0_5] : memref<384x256xbf16, #tpu.memory_space<vmem>>, vector<384x256xbf16>
    %cst = arith.constant dense<0.000000e+00> : vector<16x256xf32>
    %6 = tpu.matmul %4, %5, %cst {dimension_numbers = #tpu.dot_dimension_numbers<[1], [0], [0], [1], [0, 0, 1, 1], [], []>} : vector<16x384xbf16>, vector<384x256xbf16>, vector<16x256xf32> -> vector<16x256xf32>
    %7 = arith.addf %3, %6 : vector<16x256xf32>
    %c0_6 = arith.constant 0 : index
    %c0_7 = arith.constant 0 : index
    %8 = vector.load %arg6[%c0_6, %c0_7] : memref<16x256xf32, #tpu.memory_space<vmem>>, vector<16x256xf32>
    tpu.vector_store %arg6[%c0_6, %c0_7], %7 {strides = array<i32>} : memref<16x256xf32, #tpu.memory_space<vmem>>, vector<16x256xf32>,
    %c5_i32 = arith.constant 5 : i32
    %9 = arith.cmpi eq, %arg2, %c5_i32 : i32
    %10 = arith.extui %9 : i1 to i32
    %c0_i32_8 = arith.constant 0 : i32
    %11 = arith.cmpi ne, %10, %c0_i32_8 : i32
    scf.if %11 {
      %c0_9 = arith.constant 0 : index
      %c0_10 = arith.constant 0 : index
      %12 = vector.load %arg6[%c0_9, %c0_10] : memref<16x256xf32, #tpu.memory_space<vmem>>, vector<16x256xf32>
      %c0_11 = arith.constant 0 : index
      %c0_12 = arith.constant 0 : index
      %13 = vector.load %arg5[%c0_11, %c0_12] : memref<1x256xf32, #tpu.memory_space<vmem>>, vector<1x256xf32>
      %14 = vector.broadcast %13 : vector<1x256xf32> to vector<16x256xf32>
      %15 = arith.addf %12, %14 : vector<16x256xf32>
      %cst_13 = arith.constant 0.000000e+00 : f32
      %16 = vector.broadcast %cst_13 : f32 to vector<16x256xf32>
      %17 = arith.maximumf %15, %16 : vector<16x256xf32>
      %c0_14 = arith.constant 0 : index
      %c0_15 = arith.constant 0 : index
      %18 = vector.load %arg6[%c0_14, %c0_15] : memref<16x256xf32, #tpu.memory_space<vmem>>, vector<16x256xf32>
      tpu.vector_store %arg6[%c0_14, %c0_15], %17 {strides = array<i32>} : memref<16x256xf32, #tpu.memory_space<vmem>>, vector<16x256xf32>,
    } else {
    }
    return
  }
  func.func @transform_0(%arg0: i32, %arg1: i32, %arg2: i32) -> (i32, i32) {
    %c0_i32 = arith.constant 0 : i32
    return %arg0, %arg2 : i32, i32
  }
  func.func @transform_1(%arg0: i32, %arg1: i32, %arg2: i32) -> (i32, i32) {
    %c0_i32 = arith.constant 0 : i32
    return %arg2, %arg1 : i32, i32
  }
  func.func @transform_2(%arg0: i32, %arg1: i32, %arg2: i32) -> (i32, i32) {
    %c0_i32 = arith.constant 0 : i32
    %c0_i32_0 = arith.constant 0 : i32
    return %c0_i32, %arg1 : i32, i32
  }
  func.func @transform_3(%arg0: i32, %arg1: i32, %arg2: i32) -> (i32, i32) {
    %c0_i32 = arith.constant 0 : i32
    return %arg0, %arg1 : i32, i32
  }
}

module attributes {stable_mosaic.version = 11 : i64} {
  func.func @_mm_kernel(%arg0: i32, %arg1: i32, %arg2: i32, %arg3: memref<16x256xbf16, #tpu.memory_space<vmem>>, %arg4: memref<256x256xbf16, #tpu.memory_space<vmem>>, %arg5: memref<1x256xf32, #tpu.memory_space<vmem>>, %arg6: memref<16x256xf32, #tpu.memory_space<vmem>>) attributes {dimension_semantics = [#tpu.dimension_semantics<parallel>, #tpu.dimension_semantics<parallel>, #tpu.dimension_semantics<arbitrary>], iteration_bounds = array<i64: 1, 2, 1>, scalar_prefetch = 0 : i64, scratch_operands = 0 : i64, tpu.core_type = #tpu.core_type<tc>, window_params = [{transform_indices = @transform_0, window_bounds = array<i64: 16, 256>}, {transform_indices = @transform_1, window_bounds = array<i64: 256, 256>}, {transform_indices = @transform_2, window_bounds = array<i64: 1, 256>}, {transform_indices = @transform_3, window_bounds = array<i64: 16, 256>}]} {
    %c0_i32 = arith.constant 0 : i32
    %0 = arith.cmpi eq, %arg2, %c0_i32 : i32
    %1 = arith.extui %0 : i1 to i32
    %c0_i32_0 = arith.constant 0 : i32
    %2 = arith.cmpi ne, %1, %c0_i32_0 : i32
    scf.if %2 {
      %cst_10 = arith.constant 0.000000e+00 : f32
      %12 = vector.broadcast %cst_10 : f32 to vector<16x256xf32>
      %c0_11 = arith.constant 0 : index
      %c0_12 = arith.constant 0 : index
      %13 = vector.load %arg6[%c0_11, %c0_12] : memref<16x256xf32, #tpu.memory_space<vmem>>, vector<16x256xf32>
      tpu.vector_store %arg6[%c0_11, %c0_12], %12 {strides = array<i32>} : memref<16x256xf32, #tpu.memory_space<vmem>>, vector<16x256xf32>,
    } else {
    }
    %c0 = arith.constant 0 : index
    %c0_1 = arith.constant 0 : index
    %3 = vector.load %arg6[%c0, %c0_1] : memref<16x256xf32, #tpu.memory_space<vmem>>, vector<16x256xf32>
    %c0_2 = arith.constant 0 : index
    %c0_3 = arith.constant 0 : index
    %4 = vector.load %arg3[%c0_2, %c0_3] : memref<16x256xbf16, #tpu.memory_space<vmem>>, vector<16x256xbf16>
    %c0_4 = arith.constant 0 : index
    %c0_5 = arith.constant 0 : index
    %5 = vector.load %arg4[%c0_4, %c0_5] : memref<256x256xbf16, #tpu.memory_space<vmem>>, vector<256x256xbf16>
    %cst = arith.constant dense<0.000000e+00> : vector<16x256xf32>
    %6 = tpu.matmul %4, %5, %cst {dimension_numbers = #tpu.dot_dimension_numbers<[1], [0], [0], [1], [0, 0, 1, 1], [], []>} : vector<16x256xbf16>, vector<256x256xbf16>, vector<16x256xf32> -> vector<16x256xf32>
    %7 = arith.addf %3, %6 : vector<16x256xf32>
    %c0_6 = arith.constant 0 : index
    %c0_7 = arith.constant 0 : index
    %8 = vector.load %arg6[%c0_6, %c0_7] : memref<16x256xf32, #tpu.memory_space<vmem>>, vector<16x256xf32>
    tpu.vector_store %arg6[%c0_6, %c0_7], %7 {strides = array<i32>} : memref<16x256xf32, #tpu.memory_space<vmem>>, vector<16x256xf32>,
    %c0_i32_8 = arith.constant 0 : i32
    %9 = arith.cmpi eq, %arg2, %c0_i32_8 : i32
    %10 = arith.extui %9 : i1 to i32
    %c0_i32_9 = arith.constant 0 : i32
    %11 = arith.cmpi ne, %10, %c0_i32_9 : i32
    scf.if %11 {
      %c0_10 = arith.constant 0 : index
      %c0_11 = arith.constant 0 : index
      %12 = vector.load %arg6[%c0_10, %c0_11] : memref<16x256xf32, #tpu.memory_space<vmem>>, vector<16x256xf32>
      %c0_12 = arith.constant 0 : index
      %c0_13 = arith.constant 0 : index
      %13 = vector.load %arg5[%c0_12, %c0_13] : memref<1x256xf32, #tpu.memory_space<vmem>>, vector<1x256xf32>
      %14 = vector.broadcast %13 : vector<1x256xf32> to vector<16x256xf32>
      %15 = arith.addf %12, %14 : vector<16x256xf32>
      %c0_14 = arith.constant 0 : index
      %c0_15 = arith.constant 0 : index
      %16 = vector.load %arg6[%c0_14, %c0_15] : memref<16x256xf32, #tpu.memory_space<vmem>>, vector<16x256xf32>
      tpu.vector_store %arg6[%c0_14, %c0_15], %15 {strides = array<i32>} : memref<16x256xf32, #tpu.memory_space<vmem>>, vector<16x256xf32>,
    } else {
    }
    return
  }
  func.func @transform_0(%arg0: i32, %arg1: i32, %arg2: i32) -> (i32, i32) {
    %c0_i32 = arith.constant 0 : i32
    return %arg0, %arg2 : i32, i32
  }
  func.func @transform_1(%arg0: i32, %arg1: i32, %arg2: i32) -> (i32, i32) {
    %c0_i32 = arith.constant 0 : i32
    return %arg2, %arg1 : i32, i32
  }
  func.func @transform_2(%arg0: i32, %arg1: i32, %arg2: i32) -> (i32, i32) {
    %c0_i32 = arith.constant 0 : i32
    %c0_i32_0 = arith.constant 0 : i32
    return %c0_i32, %arg1 : i32, i32
  }
  func.func @transform_3(%arg0: i32, %arg1: i32, %arg2: i32) -> (i32, i32) {
    %c0_i32 = arith.constant 0 : i32
    return %arg0, %arg1 : i32, i32
  }
}

module attributes {stable_mosaic.version = 11 : i64} {
  func.func @_mm_res_kernel(%arg0: i32, %arg1: i32, %arg2: i32, %arg3: memref<16x512xbf16, #tpu.memory_space<vmem>>, %arg4: memref<512x256xbf16, #tpu.memory_space<vmem>>, %arg5: memref<1x256xf32, #tpu.memory_space<vmem>>, %arg6: memref<16x256xf32, #tpu.memory_space<vmem>>, %arg7: memref<16x256xf32, #tpu.memory_space<vmem>>) attributes {dimension_semantics = [#tpu.dimension_semantics<parallel>, #tpu.dimension_semantics<parallel>, #tpu.dimension_semantics<arbitrary>], iteration_bounds = array<i64: 1, 2, 9>, scalar_prefetch = 0 : i64, scratch_operands = 0 : i64, tpu.core_type = #tpu.core_type<tc>, window_params = [{transform_indices = @transform_0, window_bounds = array<i64: 16, 512>}, {transform_indices = @transform_1, window_bounds = array<i64: 512, 256>}, {transform_indices = @transform_2, window_bounds = array<i64: 1, 256>}, {transform_indices = @transform_3, window_bounds = array<i64: 16, 256>}, {transform_indices = @transform_4, window_bounds = array<i64: 16, 256>}]} {
    %c0_i32 = arith.constant 0 : i32
    %0 = arith.cmpi eq, %arg2, %c0_i32 : i32
    %1 = arith.extui %0 : i1 to i32
    %c0_i32_0 = arith.constant 0 : i32
    %2 = arith.cmpi ne, %1, %c0_i32_0 : i32
    scf.if %2 {
      %cst_9 = arith.constant 0.000000e+00 : f32
      %12 = vector.broadcast %cst_9 : f32 to vector<16x256xf32>
      %c0_10 = arith.constant 0 : index
      %c0_11 = arith.constant 0 : index
      %13 = vector.load %arg7[%c0_10, %c0_11] : memref<16x256xf32, #tpu.memory_space<vmem>>, vector<16x256xf32>
      tpu.vector_store %arg7[%c0_10, %c0_11], %12 {strides = array<i32>} : memref<16x256xf32, #tpu.memory_space<vmem>>, vector<16x256xf32>,
    } else {
    }
    %c0 = arith.constant 0 : index
    %c0_1 = arith.constant 0 : index
    %3 = vector.load %arg7[%c0, %c0_1] : memref<16x256xf32, #tpu.memory_space<vmem>>, vector<16x256xf32>
    %c0_2 = arith.constant 0 : index
    %c0_3 = arith.constant 0 : index
    %4 = vector.load %arg3[%c0_2, %c0_3] : memref<16x512xbf16, #tpu.memory_space<vmem>>, vector<16x512xbf16>
    %c0_4 = arith.constant 0 : index
    %c0_5 = arith.constant 0 : index
    %5 = vector.load %arg4[%c0_4, %c0_5] : memref<512x256xbf16, #tpu.memory_space<vmem>>, vector<512x256xbf16>
    %cst = arith.constant dense<0.000000e+00> : vector<16x256xf32>
    %6 = tpu.matmul %4, %5, %cst {dimension_numbers = #tpu.dot_dimension_numbers<[1], [0], [0], [1], [0, 0, 1, 1], [], []>} : vector<16x512xbf16>, vector<512x256xbf16>, vector<16x256xf32> -> vector<16x256xf32>
    %7 = arith.addf %3, %6 : vector<16x256xf32>
    %c0_6 = arith.constant 0 : index
    %c0_7 = arith.constant 0 : index
    %8 = vector.load %arg7[%c0_6, %c0_7] : memref<16x256xf32, #tpu.memory_space<vmem>>, vector<16x256xf32>
    tpu.vector_store %arg7[%c0_6, %c0_7], %7 {strides = array<i32>} : memref<16x256xf32, #tpu.memory_space<vmem>>, vector<16x256xf32>,
    %c8_i32 = arith.constant 8 : i32
    %9 = arith.cmpi eq, %arg2, %c8_i32 : i32
    %10 = arith.extui %9 : i1 to i32
    %c0_i32_8 = arith.constant 0 : i32
    %11 = arith.cmpi ne, %10, %c0_i32_8 : i32
    scf.if %11 {
      %c0_9 = arith.constant 0 : index
      %c0_10 = arith.constant 0 : index
      %12 = vector.load %arg7[%c0_9, %c0_10] : memref<16x256xf32, #tpu.memory_space<vmem>>, vector<16x256xf32>
      %c0_11 = arith.constant 0 : index
      %c0_12 = arith.constant 0 : index
      %13 = vector.load %arg5[%c0_11, %c0_12] : memref<1x256xf32, #tpu.memory_space<vmem>>, vector<1x256xf32>
      %14 = vector.broadcast %13 : vector<1x256xf32> to vector<16x256xf32>
      %15 = arith.addf %12, %14 : vector<16x256xf32>
      %c0_13 = arith.constant 0 : index
      %c0_14 = arith.constant 0 : index
      %16 = vector.load %arg6[%c0_13, %c0_14] : memref<16x256xf32, #tpu.memory_space<vmem>>, vector<16x256xf32>
      %17 = arith.addf %15, %16 : vector<16x256xf32>
      %cst_15 = arith.constant 0.000000e+00 : f32
      %18 = vector.broadcast %cst_15 : f32 to vector<16x256xf32>
      %19 = arith.maximumf %17, %18 : vector<16x256xf32>
      %c0_16 = arith.constant 0 : index
      %c0_17 = arith.constant 0 : index
      %20 = vector.load %arg7[%c0_16, %c0_17] : memref<16x256xf32, #tpu.memory_space<vmem>>, vector<16x256xf32>
      tpu.vector_store %arg7[%c0_16, %c0_17], %19 {strides = array<i32>} : memref<16x256xf32, #tpu.memory_space<vmem>>, vector<16x256xf32>,
    } else {
    }
    return
  }
  func.func @transform_0(%arg0: i32, %arg1: i32, %arg2: i32) -> (i32, i32) {
    %c0_i32 = arith.constant 0 : i32
    return %arg0, %arg2 : i32, i32
  }
  func.func @transform_1(%arg0: i32, %arg1: i32, %arg2: i32) -> (i32, i32) {
    %c0_i32 = arith.constant 0 : i32
    return %arg2, %arg1 : i32, i32
  }
  func.func @transform_2(%arg0: i32, %arg1: i32, %arg2: i32) -> (i32, i32) {
    %c0_i32 = arith.constant 0 : i32
    %c0_i32_0 = arith.constant 0 : i32
    return %c0_i32, %arg1 : i32, i32
  }
  func.func @transform_3(%arg0: i32, %arg1: i32, %arg2: i32) -> (i32, i32) {
    %c0_i32 = arith.constant 0 : i32
    return %arg0, %arg1 : i32, i32
  }
  func.func @transform_4(%arg0: i32, %arg1: i32, %arg2: i32) -> (i32, i32) {
    %c0_i32 = arith.constant 0 : i32
    return %arg0, %arg1 : i32, i32
  }
}

module attributes {stable_mosaic.version = 11 : i64} {
  func.func @_mm_kernel(%arg0: i32, %arg1: i32, %arg2: i32, %arg3: memref<16x512xbf16, #tpu.memory_space<vmem>>, %arg4: memref<512x256xbf16, #tpu.memory_space<vmem>>, %arg5: memref<1x256xf32, #tpu.memory_space<vmem>>, %arg6: memref<16x256xf32, #tpu.memory_space<vmem>>) attributes {dimension_semantics = [#tpu.dimension_semantics<parallel>, #tpu.dimension_semantics<parallel>, #tpu.dimension_semantics<arbitrary>], iteration_bounds = array<i64: 1, 2, 9>, scalar_prefetch = 0 : i64, scratch_operands = 0 : i64, tpu.core_type = #tpu.core_type<tc>, window_params = [{transform_indices = @transform_0, window_bounds = array<i64: 16, 512>}, {transform_indices = @transform_1, window_bounds = array<i64: 512, 256>}, {transform_indices = @transform_2, window_bounds = array<i64: 1, 256>}, {transform_indices = @transform_3, window_bounds = array<i64: 16, 256>}]} {
    %c0_i32 = arith.constant 0 : i32
    %0 = arith.cmpi eq, %arg2, %c0_i32 : i32
    %1 = arith.extui %0 : i1 to i32
    %c0_i32_0 = arith.constant 0 : i32
    %2 = arith.cmpi ne, %1, %c0_i32_0 : i32
    scf.if %2 {
      %cst_9 = arith.constant 0.000000e+00 : f32
      %12 = vector.broadcast %cst_9 : f32 to vector<16x256xf32>
      %c0_10 = arith.constant 0 : index
      %c0_11 = arith.constant 0 : index
      %13 = vector.load %arg6[%c0_10, %c0_11] : memref<16x256xf32, #tpu.memory_space<vmem>>, vector<16x256xf32>
      tpu.vector_store %arg6[%c0_10, %c0_11], %12 {strides = array<i32>} : memref<16x256xf32, #tpu.memory_space<vmem>>, vector<16x256xf32>,
    } else {
    }
    %c0 = arith.constant 0 : index
    %c0_1 = arith.constant 0 : index
    %3 = vector.load %arg6[%c0, %c0_1] : memref<16x256xf32, #tpu.memory_space<vmem>>, vector<16x256xf32>
    %c0_2 = arith.constant 0 : index
    %c0_3 = arith.constant 0 : index
    %4 = vector.load %arg3[%c0_2, %c0_3] : memref<16x512xbf16, #tpu.memory_space<vmem>>, vector<16x512xbf16>
    %c0_4 = arith.constant 0 : index
    %c0_5 = arith.constant 0 : index
    %5 = vector.load %arg4[%c0_4, %c0_5] : memref<512x256xbf16, #tpu.memory_space<vmem>>, vector<512x256xbf16>
    %cst = arith.constant dense<0.000000e+00> : vector<16x256xf32>
    %6 = tpu.matmul %4, %5, %cst {dimension_numbers = #tpu.dot_dimension_numbers<[1], [0], [0], [1], [0, 0, 1, 1], [], []>} : vector<16x512xbf16>, vector<512x256xbf16>, vector<16x256xf32> -> vector<16x256xf32>
    %7 = arith.addf %3, %6 : vector<16x256xf32>
    %c0_6 = arith.constant 0 : index
    %c0_7 = arith.constant 0 : index
    %8 = vector.load %arg6[%c0_6, %c0_7] : memref<16x256xf32, #tpu.memory_space<vmem>>, vector<16x256xf32>
    tpu.vector_store %arg6[%c0_6, %c0_7], %7 {strides = array<i32>} : memref<16x256xf32, #tpu.memory_space<vmem>>, vector<16x256xf32>,
    %c8_i32 = arith.constant 8 : i32
    %9 = arith.cmpi eq, %arg2, %c8_i32 : i32
    %10 = arith.extui %9 : i1 to i32
    %c0_i32_8 = arith.constant 0 : i32
    %11 = arith.cmpi ne, %10, %c0_i32_8 : i32
    scf.if %11 {
      %c0_9 = arith.constant 0 : index
      %c0_10 = arith.constant 0 : index
      %12 = vector.load %arg6[%c0_9, %c0_10] : memref<16x256xf32, #tpu.memory_space<vmem>>, vector<16x256xf32>
      %c0_11 = arith.constant 0 : index
      %c0_12 = arith.constant 0 : index
      %13 = vector.load %arg5[%c0_11, %c0_12] : memref<1x256xf32, #tpu.memory_space<vmem>>, vector<1x256xf32>
      %14 = vector.broadcast %13 : vector<1x256xf32> to vector<16x256xf32>
      %15 = arith.addf %12, %14 : vector<16x256xf32>
      %cst_13 = arith.constant 0.000000e+00 : f32
      %16 = vector.broadcast %cst_13 : f32 to vector<16x256xf32>
      %17 = arith.maximumf %15, %16 : vector<16x256xf32>
      %c0_14 = arith.constant 0 : index
      %c0_15 = arith.constant 0 : index
      %18 = vector.load %arg6[%c0_14, %c0_15] : memref<16x256xf32, #tpu.memory_space<vmem>>, vector<16x256xf32>
      tpu.vector_store %arg6[%c0_14, %c0_15], %17 {strides = array<i32>} : memref<16x256xf32, #tpu.memory_space<vmem>>, vector<16x256xf32>,
    } else {
    }
    return
  }
  func.func @transform_0(%arg0: i32, %arg1: i32, %arg2: i32) -> (i32, i32) {
    %c0_i32 = arith.constant 0 : i32
    return %arg0, %arg2 : i32, i32
  }
  func.func @transform_1(%arg0: i32, %arg1: i32, %arg2: i32) -> (i32, i32) {
    %c0_i32 = arith.constant 0 : i32
    return %arg2, %arg1 : i32, i32
  }
  func.func @transform_2(%arg0: i32, %arg1: i32, %arg2: i32) -> (i32, i32) {
    %c0_i32 = arith.constant 0 : i32
    %c0_i32_0 = arith.constant 0 : i32
    return %c0_i32, %arg1 : i32, i32
  }
  func.func @transform_3(%arg0: i32, %arg1: i32, %arg2: i32) -> (i32, i32) {
    %c0_i32 = arith.constant 0 : i32
    return %arg0, %arg1 : i32, i32
  }
}

module attributes {stable_mosaic.version = 11 : i64} {
  func.func @_mm_kernel(%arg0: i32, %arg1: i32, %arg2: i32, %arg3: memref<16x512xbf16, #tpu.memory_space<vmem>>, %arg4: memref<512x128xbf16, #tpu.memory_space<vmem>>, %arg5: memref<1x128xf32, #tpu.memory_space<vmem>>, %arg6: memref<16x128xf32, #tpu.memory_space<vmem>>) attributes {dimension_semantics = [#tpu.dimension_semantics<parallel>, #tpu.dimension_semantics<parallel>, #tpu.dimension_semantics<arbitrary>], iteration_bounds = array<i64: 1, 1, 1>, scalar_prefetch = 0 : i64, scratch_operands = 0 : i64, tpu.core_type = #tpu.core_type<tc>, window_params = [{transform_indices = @transform_0, window_bounds = array<i64: 16, 512>}, {transform_indices = @transform_1, window_bounds = array<i64: 512, 128>}, {transform_indices = @transform_2, window_bounds = array<i64: 1, 128>}, {transform_indices = @transform_3, window_bounds = array<i64: 16, 128>}]} {
    %c0_i32 = arith.constant 0 : i32
    %0 = arith.cmpi eq, %arg2, %c0_i32 : i32
    %1 = arith.extui %0 : i1 to i32
    %c0_i32_0 = arith.constant 0 : i32
    %2 = arith.cmpi ne, %1, %c0_i32_0 : i32
    scf.if %2 {
      %cst_10 = arith.constant 0.000000e+00 : f32
      %12 = vector.broadcast %cst_10 : f32 to vector<16x128xf32>
      %c0_11 = arith.constant 0 : index
      %c0_12 = arith.constant 0 : index
      %13 = vector.load %arg6[%c0_11, %c0_12] : memref<16x128xf32, #tpu.memory_space<vmem>>, vector<16x128xf32>
      tpu.vector_store %arg6[%c0_11, %c0_12], %12 {strides = array<i32>} : memref<16x128xf32, #tpu.memory_space<vmem>>, vector<16x128xf32>,
    } else {
    }
    %c0 = arith.constant 0 : index
    %c0_1 = arith.constant 0 : index
    %3 = vector.load %arg6[%c0, %c0_1] : memref<16x128xf32, #tpu.memory_space<vmem>>, vector<16x128xf32>
    %c0_2 = arith.constant 0 : index
    %c0_3 = arith.constant 0 : index
    %4 = vector.load %arg3[%c0_2, %c0_3] : memref<16x512xbf16, #tpu.memory_space<vmem>>, vector<16x512xbf16>
    %c0_4 = arith.constant 0 : index
    %c0_5 = arith.constant 0 : index
    %5 = vector.load %arg4[%c0_4, %c0_5] : memref<512x128xbf16, #tpu.memory_space<vmem>>, vector<512x128xbf16>
    %cst = arith.constant dense<0.000000e+00> : vector<16x128xf32>
    %6 = tpu.matmul %4, %5, %cst {dimension_numbers = #tpu.dot_dimension_numbers<[1], [0], [0], [1], [0, 0, 1, 1], [], []>} : vector<16x512xbf16>, vector<512x128xbf16>, vector<16x128xf32> -> vector<16x128xf32>
    %7 = arith.addf %3, %6 : vector<16x128xf32>
    %c0_6 = arith.constant 0 : index
    %c0_7 = arith.constant 0 : index
    %8 = vector.load %arg6[%c0_6, %c0_7] : memref<16x128xf32, #tpu.memory_space<vmem>>, vector<16x128xf32>
    tpu.vector_store %arg6[%c0_6, %c0_7], %7 {strides = array<i32>} : memref<16x128xf32, #tpu.memory_space<vmem>>, vector<16x128xf32>,
    %c0_i32_8 = arith.constant 0 : i32
    %9 = arith.cmpi eq, %arg2, %c0_i32_8 : i32
    %10 = arith.extui %9 : i1 to i32
    %c0_i32_9 = arith.constant 0 : i32
    %11 = arith.cmpi ne, %10, %c0_i32_9 : i32
    scf.if %11 {
      %c0_10 = arith.constant 0 : index
      %c0_11 = arith.constant 0 : index
      %12 = vector.load %arg6[%c0_10, %c0_11] : memref<16x128xf32, #tpu.memory_space<vmem>>, vector<16x128xf32>
      %c0_12 = arith.constant 0 : index
      %c0_13 = arith.constant 0 : index
      %13 = vector.load %arg5[%c0_12, %c0_13] : memref<1x128xf32, #tpu.memory_space<vmem>>, vector<1x128xf32>
      %14 = vector.broadcast %13 : vector<1x128xf32> to vector<16x128xf32>
      %15 = arith.addf %12, %14 : vector<16x128xf32>
      %c0_14 = arith.constant 0 : index
      %c0_15 = arith.constant 0 : index
      %16 = vector.load %arg6[%c0_14, %c0_15] : memref<16x128xf32, #tpu.memory_space<vmem>>, vector<16x128xf32>
      tpu.vector_store %arg6[%c0_14, %c0_15], %15 {strides = array<i32>} : memref<16x128xf32, #tpu.memory_space<vmem>>, vector<16x128xf32>,
    } else {
    }
    return
  }
  func.func @transform_0(%arg0: i32, %arg1: i32, %arg2: i32) -> (i32, i32) {
    %c0_i32 = arith.constant 0 : i32
    return %arg0, %arg2 : i32, i32
  }
  func.func @transform_1(%arg0: i32, %arg1: i32, %arg2: i32) -> (i32, i32) {
    %c0_i32 = arith.constant 0 : i32
    return %arg2, %arg1 : i32, i32
  }
  func.func @transform_2(%arg0: i32, %arg1: i32, %arg2: i32) -> (i32, i32) {
    %c0_i32 = arith.constant 0 : i32
    %c0_i32_0 = arith.constant 0 : i32
    return %c0_i32, %arg1 : i32, i32
  }
  func.func @transform_3(%arg0: i32, %arg1: i32, %arg2: i32) -> (i32, i32) {
    %c0_i32 = arith.constant 0 : i32
    return %arg0, %arg1 : i32, i32
  }
}

</mosaic_0001>

<bundles_post_ra>
// kernel: beyond_the_spectrum_forward.35
= control target key start
LH: loop header
LB: loop body
LE: loop exit
PB: predicated region body
PF: predicated region fallthrough
CT: control target
= control target key end

     0   :  { %s46_s0 = inlined_call_operand.vmem [shape: f32[4,8,128], index: 0, kind: input, shape index: {}]   ;;  %s47_s1 = inlined_call_operand.vmem [shape: f32[8,128], index: 1, kind: output, shape index: {}]  }
   0x1   :  { %v8_v0 = vld [vmem:[%s46_s0] sm:$0xff]  ;;  %v9_v1 = vld [vmem:[%s46_s0 + $0x8] sm:$0xff]  ;;  %v10_v2 = vld [vmem:[%s46_s0 + $0x10] sm:$0xff] }
   0x2   :  { %v12_v3 = vadd.f32 %v9_v1, %v8_v0  ;;  %v11_v4 = vld [vmem:[%s46_s0 + $0x18] sm:$0xff] }
   0x4   :  { %v13_v5 = vadd.f32 %v12_v3, %v10_v2 }
   0x6   :  { %v14_v6 = vadd.f32 %v13_v5, %v11_v4 }
   0x8   :  { %v15_v7 = vmul.f32 0.0009803922, %v14_v6 }
   0xa   :  { %16 = vst [vmem:[%s47_s1] sm:$0xff] %v15_v7 }

// kernel: beyond_the_spectrum_forward.36
= control target key start
LH: loop header
LB: loop body
LE: loop exit
PB: predicated region body
PF: predicated region fallthrough
CT: control target
= control target key end

     0   :  { %s587_s1 = inlined_call_operand.vmem [shape: bf16[128,128], index: 1, kind: input, shape index: {}]   ;;  %s588_s0 = inlined_call_operand.vmem [shape: bf16[128,128], index: 0, kind: input, shape index: {}]   ;;  %s589_s2 = inlined_call_operand.vmem [shape: f32[1,128], index: 2, kind: input, shape index: {}]   ;;  %s590_s3 = inlined_call_operand.vmem [shape: f32[128,128], index: 3, kind: output, shape index: {}]  }
   0x1   :  { %v452_v0 = vld [vmem:[%s587_s1 + $0x38] sm:$0xff]   ;;  %v453_v1 = vld [vmem:[%s587_s1 + $0x30] sm:$0xff]   ;;  %v454_v2 = vld [vmem:[%s587_s1 + $0x28] sm:$0xff]  }
   0x2   :  { %403 = vmatprep.subr.bf16.mxu0 %v452_v0  ;;  %435 = vmatprep.subr.bf16.mxu1 %v452_v0  ;;  %v455_v3 = vld [vmem:[%s587_s1 + $0x20] sm:$0xff]   ;;  %v456_v6 = vld [vmem:[%s587_s1 + $0x18] sm:$0xff]   ;;  %v457_v7 = vld [vmem:[%s587_s1 + $0x10] sm:$0xff]  }
   0x3   :  { %404 = vmatpush3.bf16.msra.mxu0 %v452_v0  ;;  %443 = vmatpush3.bf16.msra.mxu1 %v452_v0  ;;  %v460_v4 = vld [vmem:[%s588_s0] sm:$0xff]   ;;  %v458_v8 = vld [vmem:[%s587_s1 + $0x8] sm:$0xff]   ;;  %v464_v12 = vld [vmem:[%s588_s0 + $0x10] sm:$0xff]  }
   0x4   :  { %405 = vmatprep.subr.bf16.mxu0 %v453_v1  ;;  %436 = vmatprep.subr.bf16.mxu1 %v453_v1  ;;  %v461_v5 = vld [vmem:[%s588_s0 + $0x20] sm:$0xff]   ;;  %v462_v10 = vld [vmem:[%s588_s0 + $0x8] sm:$0xff]   ;;  %v465_v13 = vld [vmem:[%s588_s0 + $0x30] sm:$0xff]  }
   0x5   :  { %419 = vmatprep.mubr.bf16.mxu0 %v460_v4  ;;  %427 = vmatprep.mubr.bf16.mxu1 %v461_v5  ;;  %v459_v9 = vld [vmem:[%s587_s1] sm:$0xff]   ;;  %v463_v11 = vld [vmem:[%s588_s0 + $0x28] sm:$0xff]   ;;  %v466_v14 = vld [vmem:[%s588_s0 + $0x18] sm:$0xff]  }
   0x6   :  { %v467_v15 = vld [vmem:[%s588_s0 + $0x38] sm:$0xff]   ;;  %v386_v17 = vld [vmem:[%s589_s2] ss:$0 sm:$0xff] }
   0x7   :  { %406 = vmatpush3.bf16.msra.mxu0 %v453_v1  ;;  %444 = vmatpush3.bf16.msra.mxu1 %v453_v1 }
   0x8   :  { %407 = vmatprep.subr.bf16.mxu0 %v454_v2  ;;  %437 = vmatprep.subr.bf16.mxu1 %v454_v2 }
   0xb   :  { %408 = vmatpush3.bf16.msra.mxu0 %v454_v2  ;;  %445 = vmatpush3.bf16.msra.mxu1 %v454_v2 }
   0xc   :  { %409 = vmatprep.subr.bf16.mxu0 %v455_v3  ;;  %438 = vmatprep.subr.bf16.mxu1 %v455_v3 }
   0xf   :  { %410 = vmatpush3.bf16.msra.mxu0 %v455_v3  ;;  %446 = vmatpush3.bf16.msra.mxu1 %v455_v3 }
  0x10   :  { %411 = vmatprep.subr.bf16.mxu0 %v456_v6  ;;  %439 = vmatprep.subr.bf16.mxu1 %v456_v6 }
  0x13   :  { %412 = vmatpush3.bf16.msra.mxu0 %v456_v6  ;;  %447 = vmatpush3.bf16.msra.mxu1 %v456_v6 }
  0x14   :  { %413 = vmatprep.subr.bf16.mxu0 %v457_v7  ;;  %440 = vmatprep.subr.bf16.mxu1 %v457_v7 }
  0x17   :  { %414 = vmatpush3.bf16.msra.mxu0 %v457_v7  ;;  %448 = vmatpush3.bf16.msra.mxu1 %v457_v7 }
  0x18   :  { %415 = vmatprep.subr.bf16.mxu0 %v458_v8  ;;  %441 = vmatprep.subr.bf16.mxu1 %v458_v8 }
  0x1b   :  { %416 = vmatpush3.bf16.msra.mxu0 %v458_v8  ;;  %449 = vmatpush3.bf16.msra.mxu1 %v458_v8 }
  0x1c   :  { %417 = vmatprep.subr.bf16.mxu0 %v459_v9  ;;  %442 = vmatprep.subr.bf16.mxu1 %v459_v9 }
  0x1f   :  { %418 = vmatpush3.bf16.msra.mxu0 %v459_v9  ;;  %450 = vmatpush3.bf16.msra.mxu1 %v459_v9 }
  0x22   :  { %420 = vmatmul.mubr.bf16.vlgmr.msra.gmra.mxu0 %v462_v10  ;;  %428 = vmatmul.mubr.bf16.vlgmr.msra.gmra.mxu1 %v463_v11 }
  0x23   :  { %423 = vmatprep.mubr.bf16.mxu0 %v464_v12  ;;  %431 = vmatprep.mubr.bf16.mxu1 %v465_v13 }
  0x2a   :  { %424 = vmatmul.mubr.bf16.gmra.mxu0 %v466_v14  ;;  %432 = vmatmul.mubr.bf16.gmra.mxu1 %v467_v15 }
  0xe2   :  { %v421_v16 = vpop.f32.mrf.mxu0  ;;  %v429_v18 = vpop.f32.mrf.mxu1 }
  0xe3   :  { %v336_v21 = vadd.f32 %v421_v16, %v386_v17  ;;  %v344_v22 = vadd.f32 %v429_v18, %v386_v17 }
  0xe4   :  { %v213_v19 = vpop.f32.mrf.mxu0  ;;  %v245_v20 = vpop.f32.mrf.mxu1 }
  0xe5   :  { %352 = vst [vmem:[%s590_s3 + $0x10] sm:$0xff] %v336_v21  ;;  %360 = vst [vmem:[%s590_s3 + $0x50] sm:$0xff] %v344_v22  ;;  %v334_v25 = vadd.f32 %v386_v17, %v213_v19  ;;  %v342_v26 = vadd.f32 %v386_v17, %v245_v20 }
  0xe6   :  { %v422_v23 = vpop.f32.mrf.mxu0  ;;  %v430_v24 = vpop.f32.mrf.mxu1 }
  0xe7   :  { %350 = vst [vmem:[%s590_s3] sm:$0xff] %v334_v25  ;;  %358 = vst [vmem:[%s590_s3 + $0x40] sm:$0xff] %v342_v26  ;;  %v337_v29 = vadd.f32 %v422_v23, %v386_v17  ;;  %v345_v30 = vadd.f32 %v430_v24, %v386_v17 }
  0xe8   :  { %v216_v27 = vpop.f32.mrf.mxu0  ;;  %v248_v28 = vpop.f32.mrf.mxu1 }
  0xe9   :  { %353 = vst [vmem:[%s590_s3 + $0x18] sm:$0xff] %v337_v29  ;;  %361 = vst [vmem:[%s590_s3 + $0x58] sm:$0xff] %v345_v30  ;;  %v335_v33 = vadd.f32 %v386_v17, %v216_v27  ;;  %v343_v34 = vadd.f32 %v386_v17, %v248_v28 }
  0xea   :  { %v425_v31 = vpop.f32.mrf.mxu0  ;;  %v433_v32 = vpop.f32.mrf.mxu1 }
  0xeb   :  { %351 = vst [vmem:[%s590_s3 + $0x8] sm:$0xff] %v335_v33  ;;  %359 = vst [vmem:[%s590_s3 + $0x48] sm:$0xff] %v343_v34  ;;  %v340_v37 = vadd.f32 %v425_v31, %v386_v17  ;;  %v348_v38 = vadd.f32 %v433_v32, %v386_v17 }
  0xec   :  { %v229_v35 = vpop.f32.mrf.mxu0  ;;  %v261_v36 = vpop.f32.mrf.mxu1 }
  0xed   :  { %356 = vst [vmem:[%s590_s3 + $0x30] sm:$0xff] %v340_v37  ;;  %364 = vst [vmem:[%s590_s3 + $0x70] sm:$0xff] %v348_v38  ;;  %v338_v41 = vadd.f32 %v386_v17, %v229_v35  ;;  %v346_v42 = vadd.f32 %v386_v17, %v261_v36 }
  0xee   :  { %v426_v39 = vpop.f32.mrf.mxu0  ;;  %v434_v40 = vpop.f32.mrf.mxu1 }
  0xef   :  { %354 = vst [vmem:[%s590_s3 + $0x20] sm:$0xff] %v338_v41  ;;  %362 = vst [vmem:[%s590_s3 + $0x60] sm:$0xff] %v346_v42  ;;  %v341_v45 = vadd.f32 %v426_v39, %v386_v17  ;;  %v349_v46 = vadd.f32 %v434_v40, %v386_v17 }
  0xf0   :  { %v232_v43 = vpop.f32.mrf.mxu0  ;;  %v264_v44 = vpop.f32.mrf.mxu1 }
  0xf1   :  { %357 = vst [vmem:[%s590_s3 + $0x38] sm:$0xff] %v341_v45  ;;  %365 = vst [vmem:[%s590_s3 + $0x78] sm:$0xff] %v349_v46  ;;  %v339_v47 = vadd.f32 %v386_v17, %v232_v43  ;;  %v347_v48 = vadd.f32 %v386_v17, %v264_v44 }
  0xf3   :  { %355 = vst [vmem:[%s590_s3 + $0x28] sm:$0xff] %v339_v47  ;;  %363 = vst [vmem:[%s590_s3 + $0x68] sm:$0xff] %v347_v48 }

// kernel: beyond_the_spectrum_forward.38
= control target key start
LH: loop header
LB: loop body
LE: loop exit
PB: predicated region body
PF: predicated region fallthrough
CT: control target
= control target key end

     0   :  { %s603_s1 = inlined_call_operand.vmem [shape: bf16[128,128], index: 1, kind: input, shape index: {}]   ;;  %s604_s0 = inlined_call_operand.vmem [shape: bf16[128,128], index: 0, kind: input, shape index: {}]   ;;  %s605_s2 = inlined_call_operand.vmem [shape: f32[1,128], index: 2, kind: input, shape index: {}]   ;;  %s606_s3 = inlined_call_operand.vmem [shape: f32[128,128], index: 3, kind: output, shape index: {}]  }
   0x1   :  { %v468_v0 = vld [vmem:[%s603_s1 + $0x38] sm:$0xff]   ;;  %v469_v1 = vld [vmem:[%s603_s1 + $0x30] sm:$0xff]   ;;  %v470_v2 = vld [vmem:[%s603_s1 + $0x28] sm:$0xff]  }
   0x2   :  { %419 = vmatprep.subr.bf16.mxu0 %v468_v0  ;;  %451 = vmatprep.subr.bf16.mxu1 %v468_v0  ;;  %v471_v3 = vld [vmem:[%s603_s1 + $0x20] sm:$0xff]   ;;  %v472_v6 = vld [vmem:[%s603_s1 + $0x18] sm:$0xff]   ;;  %v473_v7 = vld [vmem:[%s603_s1 + $0x10] sm:$0xff]  }
   0x3   :  { %420 = vmatpush3.bf16.msra.mxu0 %v468_v0  ;;  %459 = vmatpush3.bf16.msra.mxu1 %v468_v0  ;;  %v476_v4 = vld [vmem:[%s604_s0] sm:$0xff]   ;;  %v474_v8 = vld [vmem:[%s603_s1 + $0x8] sm:$0xff]   ;;  %v480_v12 = vld [vmem:[%s604_s0 + $0x10] sm:$0xff]  }
   0x4   :  { %421 = vmatprep.subr.bf16.mxu0 %v469_v1  ;;  %452 = vmatprep.subr.bf16.mxu1 %v469_v1  ;;  %v477_v5 = vld [vmem:[%s604_s0 + $0x20] sm:$0xff]   ;;  %v478_v10 = vld [vmem:[%s604_s0 + $0x8] sm:$0xff]   ;;  %v481_v13 = vld [vmem:[%s604_s0 + $0x30] sm:$0xff]  }
   0x5   :  { %435 = vmatprep.mubr.bf16.mxu0 %v476_v4  ;;  %443 = vmatprep.mubr.bf16.mxu1 %v477_v5  ;;  %v475_v9 = vld [vmem:[%s603_s1] sm:$0xff]   ;;  %v479_v11 = vld [vmem:[%s604_s0 + $0x28] sm:$0xff]   ;;  %v482_v14 = vld [vmem:[%s604_s0 + $0x18] sm:$0xff]  }
   0x6   :  { %v483_v15 = vld [vmem:[%s604_s0 + $0x38] sm:$0xff]   ;;  %v402_v17 = vld [vmem:[%s605_s2] ss:$0 sm:$0xff] }
   0x7   :  { %422 = vmatpush3.bf16.msra.mxu0 %v469_v1  ;;  %460 = vmatpush3.bf16.msra.mxu1 %v469_v1 }
   0x8   :  { %423 = vmatprep.subr.bf16.mxu0 %v470_v2  ;;  %453 = vmatprep.subr.bf16.mxu1 %v470_v2 }
   0xb   :  { %424 = vmatpush3.bf16.msra.mxu0 %v470_v2  ;;  %461 = vmatpush3.bf16.msra.mxu1 %v470_v2 }
   0xc   :  { %425 = vmatprep.subr.bf16.mxu0 %v471_v3  ;;  %454 = vmatprep.subr.bf16.mxu1 %v471_v3 }
   0xf   :  { %426 = vmatpush3.bf16.msra.mxu0 %v471_v3  ;;  %462 = vmatpush3.bf16.msra.mxu1 %v471_v3 }
  0x10   :  { %427 = vmatprep.subr.bf16.mxu0 %v472_v6  ;;  %455 = vmatprep.subr.bf16.mxu1 %v472_v6 }
  0x13   :  { %428 = vmatpush3.bf16.msra.mxu0 %v472_v6  ;;  %463 = vmatpush3.bf16.msra.mxu1 %v472_v6 }
  0x14   :  { %429 = vmatprep.subr.bf16.mxu0 %v473_v7  ;;  %456 = vmatprep.subr.bf16.mxu1 %v473_v7 }
  0x17   :  { %430 = vmatpush3.bf16.msra.mxu0 %v473_v7  ;;  %464 = vmatpush3.bf16.msra.mxu1 %v473_v7 }
  0x18   :  { %431 = vmatprep.subr.bf16.mxu0 %v474_v8  ;;  %457 = vmatprep.subr.bf16.mxu1 %v474_v8 }
  0x1b   :  { %432 = vmatpush3.bf16.msra.mxu0 %v474_v8  ;;  %465 = vmatpush3.bf16.msra.mxu1 %v474_v8 }
  0x1c   :  { %433 = vmatprep.subr.bf16.mxu0 %v475_v9  ;;  %458 = vmatprep.subr.bf16.mxu1 %v475_v9 }
  0x1f   :  { %434 = vmatpush3.bf16.msra.mxu0 %v475_v9  ;;  %466 = vmatpush3.bf16.msra.mxu1 %v475_v9 }
  0x22   :  { %436 = vmatmul.mubr.bf16.vlgmr.msra.gmra.mxu0 %v478_v10  ;;  %444 = vmatmul.mubr.bf16.vlgmr.msra.gmra.mxu1 %v479_v11 }
  0x23   :  { %439 = vmatprep.mubr.bf16.mxu0 %v480_v12  ;;  %447 = vmatprep.mubr.bf16.mxu1 %v481_v13 }
  0x2a   :  { %440 = vmatmul.mubr.bf16.gmra.mxu0 %v482_v14  ;;  %448 = vmatmul.mubr.bf16.gmra.mxu1 %v483_v15 }
  0xe2   :  { %v437_v16 = vpop.f32.mrf.mxu0  ;;  %v445_v18 = vpop.f32.mrf.mxu1 }
  0xe3   :  { %v336_v21 = vadd.f32 %v437_v16, %v402_v17  ;;  %v344_v22 = vadd.f32 %v445_v18, %v402_v17 }
  0xe4   :  { %v213_v19 = vpop.f32.mrf.mxu0  ;;  %v245_v20 = vpop.f32.mrf.mxu1 }
  0xe5   :  { %v352_v25 = vmax.f32 %v336_v21, 0.0  ;;  %v360_v26 = vmax.f32 %v344_v22, 0.0  ;;  %v334_v27 = vadd.f32 %v402_v17, %v213_v19  ;;  %v342_v28 = vadd.f32 %v402_v17, %v245_v20 }
  0xe6   :  { %v438_v23 = vpop.f32.mrf.mxu0  ;;  %v446_v24 = vpop.f32.mrf.mxu1 }
  0xe7   :  { %368 = vst [vmem:[%s606_s3 + $0x10] sm:$0xff] %v352_v25  ;;  %376 = vst [vmem:[%s606_s3 + $0x50] sm:$0xff] %v360_v26  ;;  %v350_v31 = vmax.f32 %v334_v27, 0.0  ;;  %v358_v32 = vmax.f32 %v342_v28, 0.0  ;;  %v337_v33 = vadd.f32 %v438_v23, %v402_v17  ;;  %v345_v34 = vadd.f32 %v446_v24, %v402_v17 }
  0xe8   :  { %v216_v29 = vpop.f32.mrf.mxu0  ;;  %v248_v30 = vpop.f32.mrf.mxu1 }
  0xe9   :  { %366 = vst [vmem:[%s606_s3] sm:$0xff] %v350_v31  ;;  %374 = vst [vmem:[%s606_s3 + $0x40] sm:$0xff] %v358_v32  ;;  %v335_v37 = vadd.f32 %v402_v17, %v216_v29  ;;  %v343_v38 = vadd.f32 %v402_v17, %v248_v30  ;;  %v353_v39 = vmax.f32 %v337_v33, 0.0  ;;  %v361_v40 = vmax.f32 %v345_v34, 0.0 }
  0xea   :  { %v441_v35 = vpop.f32.mrf.mxu0  ;;  %v449_v36 = vpop.f32.mrf.mxu1 }
  0xeb   :  { %v351_v43 = vmax.f32 %v335_v37, 0.0  ;;  %v359_v44 = vmax.f32 %v343_v38, 0.0  ;;  %v340_v45 = vadd.f32 %v441_v35, %v402_v17  ;;  %v348_v46 = vadd.f32 %v449_v36, %v402_v17  ;;  %369 = vst [vmem:[%s606_s3 + $0x18] sm:$0xff] %v353_v39  ;;  %377 = vst [vmem:[%s606_s3 + $0x58] sm:$0xff] %v361_v40 }
  0xec   :  { %v229_v41 = vpop.f32.mrf.mxu0  ;;  %v261_v42 = vpop.f32.mrf.mxu1 }
  0xed   :  { %367 = vst [vmem:[%s606_s3 + $0x8] sm:$0xff] %v351_v43  ;;  %375 = vst [vmem:[%s606_s3 + $0x48] sm:$0xff] %v359_v44  ;;  %v356_v49 = vmax.f32 %v340_v45, 0.0  ;;  %v364_v50 = vmax.f32 %v348_v46, 0.0  ;;  %v338_v51 = vadd.f32 %v402_v17, %v229_v41  ;;  %v346_v52 = vadd.f32 %v402_v17, %v261_v42 }
  0xee   :  { %v442_v47 = vpop.f32.mrf.mxu0  ;;  %v450_v48 = vpop.f32.mrf.mxu1 }
  0xef   :  { %372 = vst [vmem:[%s606_s3 + $0x30] sm:$0xff] %v356_v49  ;;  %380 = vst [vmem:[%s606_s3 + $0x70] sm:$0xff] %v364_v50  ;;  %v341_v55 = vadd.f32 %v442_v47, %v402_v17  ;;  %v349_v56 = vadd.f32 %v450_v48, %v402_v17  ;;  %v354_v57 = vmax.f32 %v338_v51, 0.0  ;;  %v362_v58 = vmax.f32 %v346_v52, 0.0 }
  0xf0   :  { %v232_v53 = vpop.f32.mrf.mxu0  ;;  %v264_v54 = vpop.f32.mrf.mxu1 }
  0xf1   :  { %v357_v59 = vmax.f32 %v341_v55, 0.0  ;;  %v365_v60 = vmax.f32 %v349_v56, 0.0  ;;  %v339_v61 = vadd.f32 %v402_v17, %v232_v53  ;;  %v347_v62 = vadd.f32 %v402_v17, %v264_v54  ;;  %370 = vst [vmem:[%s606_s3 + $0x20] sm:$0xff] %v354_v57  ;;  %378 = vst [vmem:[%s606_s3 + $0x60] sm:$0xff] %v362_v58 }
  0xf3   :  { %373 = vst [vmem:[%s606_s3 + $0x38] sm:$0xff] %v357_v59  ;;  %381 = vst [vmem:[%s606_s3 + $0x78] sm:$0xff] %v365_v60  ;;  %v355_v63 = vmax.f32 %v339_v61, 0.0  ;;  %v363_v0 = vmax.f32 %v347_v62, 0.0 }
  0xf5   :  { %371 = vst [vmem:[%s606_s3 + $0x28] sm:$0xff] %v355_v63  ;;  %379 = vst [vmem:[%s606_s3 + $0x68] sm:$0xff] %v363_v0 }

// kernel: beyond_the_spectrum_forward.39
= control target key start
LH: loop header
LB: loop body
LE: loop exit
PB: predicated region body
PF: predicated region fallthrough
CT: control target
= control target key end

     0   :  { %s821_s1 = inlined_call_operand.vmem [shape: bf16[256,128], index: 1, kind: input, shape index: {}]   ;;  %s822_s0 = inlined_call_operand.vmem [shape: bf16[128,256], index: 0, kind: input, shape index: {}]   ;;  %s823_s2 = inlined_call_operand.vmem [shape: f32[1,128], index: 2, kind: input, shape index: {}]   ;;  %s824_s3 = inlined_call_operand.vmem [shape: f32[128,128], index: 3, kind: output, shape index: {}]  }
   0x1   :  { %v596_v0 = vld [vmem:[%s821_s1 + $0x78] sm:$0xff]   ;;  %v598_v2 = vld [vmem:[%s821_s1 + $0x70] sm:$0xff]   ;;  %v600_v4 = vld [vmem:[%s821_s1 + $0x68] sm:$0xff]  }
   0x2   :  { %v597_v1 = vld [vmem:[%s821_s1 + $0x38] sm:$0xff]   ;;  %515 = vmatprep.subr.bf16.mxu0 %v596_v0  ;;  %579 = vmatprep.subr.bf16.mxu1 %v596_v0  ;;  %v599_v3 = vld [vmem:[%s821_s1 + $0x30] sm:$0xff]   ;;  %v601_v5 = vld [vmem:[%s821_s1 + $0x28] sm:$0xff]  }
   0x3   :  { %516 = vmatpush3.bf16.msra.mxu0 %v597_v1  ;;  %587 = vmatpush3.bf16.msra.mxu1 %v597_v1  ;;  %v602_v6 = vld [vmem:[%s821_s1 + $0x60] sm:$0xff]   ;;  %v604_v8 = vld [vmem:[%s821_s1 + $0x58] sm:$0xff]   ;;  %v606_v10 = vld [vmem:[%s821_s1 + $0x50] sm:$0xff]  }
   0x4   :  { %517 = vmatprep.subr.bf16.mxu0 %v598_v2  ;;  %580 = vmatprep.subr.bf16.mxu1 %v598_v2  ;;  %v603_v7 = vld [vmem:[%s821_s1 + $0x20] sm:$0xff]   ;;  %v605_v9 = vld [vmem:[%s821_s1 + $0x18] sm:$0xff]   ;;  %v607_v13 = vld [vmem:[%s821_s1 + $0x10] sm:$0xff]  }
   0x5   :  { %v614_v11 = vld [vmem:[%s822_s0 + $0x4] ss:$8 sps:$4 sm:$0xff]   ;;  %v612_v18 = vld [vmem:[%s822_s0] ss:$8 sps:$4 sm:$0xff]   ;;  %v618_v20 = vld [vmem:[%s822_s0 + $0x14] ss:$8 sps:$4 sm:$0xff]  }
   0x6   :  { %v617_v12 = vld [vmem:[%s822_s0 + $0x44] ss:$8 sps:$4 sm:$0xff]   ;;  %307 = vmatprep.mubr.bf16.mxu0 %v614_v11  ;;  %v615_v19 = vld [vmem:[%s822_s0 + $0x40] ss:$8 sps:$4 sm:$0xff]   ;;  %v620_v21 = vld [vmem:[%s822_s0 + $0x54] ss:$8 sps:$4 sm:$0xff]  }
   0x7   :  { %518 = vmatpush3.bf16.msra.mxu0 %v599_v3  ;;  %588 = vmatpush3.bf16.msra.mxu1 %v599_v3  ;;  %v608_v14 = vld [vmem:[%s821_s1 + $0x48] sm:$0xff]   ;;  %v610_v16 = vld [vmem:[%s821_s1 + $0x40] sm:$0xff]   ;;  %v622_v22 = vld [vmem:[%s822_s0 + $0x10] ss:$8 sps:$4 sm:$0xff]  }
   0x8   :  { %519 = vmatprep.subr.bf16.mxu0 %v600_v4  ;;  %581 = vmatprep.subr.bf16.mxu1 %v600_v4  ;;  %v609_v15 = vld [vmem:[%s821_s1 + $0x8] sm:$0xff]   ;;  %v611_v17 = vld [vmem:[%s821_s1] sm:$0xff]   ;;  %v623_v23 = vld [vmem:[%s822_s0 + $0x50] ss:$8 sps:$4 sm:$0xff]  }
   0x9   :  { %339 = vmatprep.mubr.bf16.mxu1 %v617_v12  ;;  %v624_v24 = vld [vmem:[%s822_s0 + $0x24] ss:$8 sps:$4 sm:$0xff]   ;;  %v628_v26 = vld [vmem:[%s822_s0 + $0x20] ss:$8 sps:$4 sm:$0xff]   ;;  %v630_v28 = vld [vmem:[%s822_s0 + $0x34] ss:$8 sps:$4 sm:$0xff]  }
   0xa   :  { %v626_v25 = vld [vmem:[%s822_s0 + $0x64] ss:$8 sps:$4 sm:$0xff]   ;;  %v629_v27 = vld [vmem:[%s822_s0 + $0x60] ss:$8 sps:$4 sm:$0xff]   ;;  %v632_v29 = vld [vmem:[%s822_s0 + $0x74] ss:$8 sps:$4 sm:$0xff]  }
   0xb   :  { %520 = vmatpush3.bf16.msra.mxu0 %v601_v5  ;;  %589 = vmatpush3.bf16.msra.mxu1 %v601_v5  ;;  %v634_v30 = vld [vmem:[%s822_s0 + $0x30] ss:$8 sps:$4 sm:$0xff]   ;;  %v755_v38 = vld [vmem:[%s823_s2] ss:$0 sm:$0xff] }
   0xc   :  { %521 = vmatprep.subr.bf16.mxu0 %v602_v6  ;;  %582 = vmatprep.subr.bf16.mxu1 %v602_v6  ;;  %v635_v31 = vld [vmem:[%s822_s0 + $0x70] ss:$8 sps:$4 sm:$0xff]  }
   0xf   :  { %522 = vmatpush3.bf16.msra.mxu0 %v603_v7  ;;  %590 = vmatpush3.bf16.msra.mxu1 %v603_v7 }
  0x10   :  { %523 = vmatprep.subr.bf16.mxu0 %v604_v8  ;;  %583 = vmatprep.subr.bf16.mxu1 %v604_v8 }
  0x13   :  { %524 = vmatpush3.bf16.msra.mxu0 %v605_v9  ;;  %591 = vmatpush3.bf16.msra.mxu1 %v605_v9 }
  0x14   :  { %525 = vmatprep.subr.bf16.mxu0 %v606_v10  ;;  %584 = vmatprep.subr.bf16.mxu1 %v606_v10 }
  0x17   :  { %526 = vmatpush3.bf16.msra.mxu0 %v607_v13  ;;  %592 = vmatpush3.bf16.msra.mxu1 %v607_v13 }
  0x18   :  { %527 = vmatprep.subr.bf16.mxu0 %v608_v14  ;;  %585 = vmatprep.subr.bf16.mxu1 %v608_v14 }
  0x1b   :  { %528 = vmatpush3.bf16.msra.mxu0 %v609_v15  ;;  %593 = vmatpush3.bf16.msra.mxu1 %v609_v15 }
  0x1c   :  { %529 = vmatprep.subr.bf16.mxu0 %v610_v16  ;;  %586 = vmatprep.subr.bf16.mxu1 %v610_v16 }
  0x1f   :  { %530 = vmatpush3.bf16.msra.mxu0 %v611_v17  ;;  %594 = vmatpush3.bf16.msra.mxu1 %v611_v17 }
  0x22   :  { %308 = vmatmul.mubr.bf16.vlgmr.msra.gmra.mxu0 %v612_v18  ;;  %340 = vmatmul.mubr.bf16.vlgmr.msra.gmra.mxu1 %v615_v19 }
  0x23   :  { %315 = vmatprep.mubr.bf16.mxu0 %v618_v20  ;;  %347 = vmatprep.mubr.bf16.mxu1 %v620_v21 }
  0x2a   :  { %316 = vmatmul.mubr.bf16.gmra.mxu0 %v622_v22  ;;  %348 = vmatmul.mubr.bf16.gmra.mxu1 %v623_v23 }
  0x2b   :  { %323 = vmatprep.mubr.bf16.mxu0 %v624_v24  ;;  %355 = vmatprep.mubr.bf16.mxu1 %v626_v25 }
  0x32   :  { %324 = vmatmul.mubr.bf16.gmra.mxu0 %v628_v26  ;;  %356 = vmatmul.mubr.bf16.gmra.mxu1 %v629_v27 }
  0x33   :  { %331 = vmatprep.mubr.bf16.mxu0 %v630_v28  ;;  %363 = vmatprep.mubr.bf16.mxu1 %v632_v29 }
  0x3a   :  { %332 = vmatmul.mubr.bf16.gmra.mxu0 %v634_v30  ;;  %364 = vmatmul.mubr.bf16.gmra.mxu1 %v635_v31 }
  0xe2   :  { %v531_v32 = vpop.f32.mrf.mxu0  ;;  %v555_v33 = vpop.f32.mrf.mxu1 }
  0xe4   :  { %v532_v34 = vpop.f32.mrf.mxu0  ;;  %v556_v35 = vpop.f32.mrf.mxu1 }
  0xe5   :  { %v533_v36 = vadd.f32 %v532_v34, %v531_v32  ;;  %v557_v37 = vadd.f32 %v556_v35, %v555_v33 }
  0xe6   :  { %v534_v39 = vpop.f32.mrf.mxu0  ;;  %v558_v40 = vpop.f32.mrf.mxu1 }
  0xe7   :  { %v430_v43 = vadd.f32 %v533_v36, %v755_v38  ;;  %v438_v44 = vadd.f32 %v557_v37, %v755_v38 }
  0xe8   :  { %v535_v41 = vpop.f32.mrf.mxu0  ;;  %v559_v42 = vpop.f32.mrf.mxu1 }
  0xe9   :  { %v536_v45 = vadd.f32 %v535_v41, %v534_v39  ;;  %v560_v46 = vadd.f32 %v559_v42, %v558_v40  ;;  %v446_v49 = vmax.f32 %v430_v43, 0.0  ;;  %v454_v50 = vmax.f32 %v438_v44, 0.0 }
  0xea   :  { %v537_v47 = vpop.f32.mrf.mxu0  ;;  %v561_v48 = vpop.f32.mrf.mxu1 }
  0xeb   :  { %462 = vst [vmem:[%s824_s3] sm:$0xff] %v446_v49  ;;  %470 = vst [vmem:[%s824_s3 + $0x40] sm:$0xff] %v454_v50  ;;  %v431_v53 = vadd.f32 %v536_v45, %v755_v38  ;;  %v439_v54 = vadd.f32 %v560_v46, %v755_v38 }
  0xec   :  { %v538_v51 = vpop.f32.mrf.mxu0  ;;  %v562_v52 = vpop.f32.mrf.mxu1 }
  0xed   :  { %v539_v55 = vadd.f32 %v538_v51, %v537_v47  ;;  %v563_v56 = vadd.f32 %v562_v52, %v561_v48  ;;  %v447_v59 = vmax.f32 %v431_v53, 0.0  ;;  %v455_v60 = vmax.f32 %v439_v54, 0.0 }
  0xee   :  { %v540_v57 = vpop.f32.mrf.mxu0  ;;  %v564_v58 = vpop.f32.mrf.mxu1 }
  0xef   :  { %463 = vst [vmem:[%s824_s3 + $0x8] sm:$0xff] %v447_v59  ;;  %471 = vst [vmem:[%s824_s3 + $0x48] sm:$0xff] %v455_v60  ;;  %v432_v63 = vadd.f32 %v539_v55, %v755_v38  ;;  %v440_v0 = vadd.f32 %v563_v56, %v755_v38 }
  0xf0   :  { %v541_v61 = vpop.f32.mrf.mxu0  ;;  %v565_v62 = vpop.f32.mrf.mxu1 }
  0xf1   :  { %v542_v1 = vadd.f32 %v541_v61, %v540_v57  ;;  %v566_v2 = vadd.f32 %v565_v62, %v564_v58  ;;  %v448_v5 = vmax.f32 %v432_v63, 0.0  ;;  %v456_v6 = vmax.f32 %v440_v0, 0.0 }
  0xf2   :  { %v543_v3 = vpop.f32.mrf.mxu0  ;;  %v567_v4 = vpop.f32.mrf.mxu1 }
  0xf3   :  { %464 = vst [vmem:[%s824_s3 + $0x10] sm:$0xff] %v448_v5  ;;  %472 = vst [vmem:[%s824_s3 + $0x50] sm:$0xff] %v456_v6  ;;  %v433_v9 = vadd.f32 %v542_v1, %v755_v38  ;;  %v441_v10 = vadd.f32 %v566_v2, %v755_v38 }
  0xf4   :  { %v544_v7 = vpop.f32.mrf.mxu0  ;;  %v568_v8 = vpop.f32.mrf.mxu1 }
  0xf5   :  { %v545_v11 = vadd.f32 %v544_v7, %v543_v3  ;;  %v569_v12 = vadd.f32 %v568_v8, %v567_v4  ;;  %v449_v15 = vmax.f32 %v433_v9, 0.0  ;;  %v457_v16 = vmax.f32 %v441_v10, 0.0 }
  0xf6   :  { %v546_v13 = vpop.f32.mrf.mxu0  ;;  %v570_v14 = vpop.f32.mrf.mxu1 }
  0xf7   :  { %465 = vst [vmem:[%s824_s3 + $0x18] sm:$0xff] %v449_v15  ;;  %473 = vst [vmem:[%s824_s3 + $0x58] sm:$0xff] %v457_v16  ;;  %v434_v19 = vadd.f32 %v545_v11, %v755_v38  ;;  %v442_v20 = vadd.f32 %v569_v12, %v755_v38 }
  0xf8   :  { %v547_v17 = vpop.f32.mrf.mxu0  ;;  %v571_v18 = vpop.f32.mrf.mxu1 }
  0xf9   :  { %v548_v21 = vadd.f32 %v547_v17, %v546_v13  ;;  %v572_v22 = vadd.f32 %v571_v18, %v570_v14  ;;  %v450_v25 = vmax.f32 %v434_v19, 0.0  ;;  %v458_v26 = vmax.f32 %v442_v20, 0.0 }
  0xfa   :  { %v549_v23 = vpop.f32.mrf.mxu0  ;;  %v573_v24 = vpop.f32.mrf.mxu1 }
  0xfb   :  { %466 = vst [vmem:[%s824_s3 + $0x20] sm:$0xff] %v450_v25  ;;  %474 = vst [vmem:[%s824_s3 + $0x60] sm:$0xff] %v458_v26  ;;  %v435_v29 = vadd.f32 %v548_v21, %v755_v38  ;;  %v443_v30 = vadd.f32 %v572_v22, %v755_v38 }
  0xfc   :  { %v550_v27 = vpop.f32.mrf.mxu0  ;;  %v574_v28 = vpop.f32.mrf.mxu1 }
  0xfd   :  { %v551_v31 = vadd.f32 %v550_v27, %v549_v23  ;;  %v575_v32 = vadd.f32 %v574_v28, %v573_v24  ;;  %v451_v35 = vmax.f32 %v435_v29, 0.0  ;;  %v459_v36 = vmax.f32 %v443_v30, 0.0 }
  0xfe   :  { %v552_v33 = vpop.f32.mrf.mxu0  ;;  %v576_v34 = vpop.f32.mrf.mxu1 }
  0xff   :  { %467 = vst [vmem:[%s824_s3 + $0x28] sm:$0xff] %v451_v35  ;;  %475 = vst [vmem:[%s824_s3 + $0x68] sm:$0xff] %v459_v36  ;;  %v436_v40 = vadd.f32 %v551_v31, %v755_v38  ;;  %v444_v41 = vadd.f32 %v575_v32, %v755_v38 }
 0x100   :  { %v553_v37 = vpop.f32.mrf.mxu0  ;;  %v577_v39 = vpop.f32.mrf.mxu1 }
 0x101   :  { %v554_v42 = vadd.f32 %v553_v37, %v552_v33  ;;  %v578_v43 = vadd.f32 %v577_v39, %v576_v34  ;;  %v452_v44 = vmax.f32 %v436_v40, 0.0  ;;  %v460_v45 = vmax.f32 %v444_v41, 0.0 }
 0x103   :  { %468 = vst [vmem:[%s824_s3 + $0x30] sm:$0xff] %v452_v44  ;;  %476 = vst [vmem:[%s824_s3 + $0x70] sm:$0xff] %v460_v45  ;;  %v437_v46 = vadd.f32 %v554_v42, %v755_v38  ;;  %v445_v47 = vadd.f32 %v578_v43, %v755_v38 }
 0x105   :  { %v453_v48 = vmax.f32 %v437_v46, 0.0  ;;  %v461_v49 = vmax.f32 %v445_v47, 0.0 }
 0x107   :  { %469 = vst [vmem:[%s824_s3 + $0x38] sm:$0xff] %v453_v48  ;;  %477 = vst [vmem:[%s824_s3 + $0x78] sm:$0xff] %v461_v49 }

// kernel: beyond_the_spectrum_forward.40
= control target key start
LH: loop header
LB: loop body
LE: loop exit
PB: predicated region body
PF: predicated region fallthrough
CT: control target
= control target key end

     0   :  { %s693_s1 = inlined_call_operand.vmem [shape: bf16[128,128], index: 1, kind: input, shape index: {}]   ;;  %s694_s0 = inlined_call_operand.vmem [shape: bf16[128,128], index: 0, kind: input, shape index: {}]   ;;  %s695_s2 = inlined_call_operand.vmem [shape: f32[1,128], index: 2, kind: input, shape index: {}]   ;;  %s696_s3 = inlined_call_operand.vmem [shape: f32[128,128], index: 3, kind: input, shape index: {}]   ;;  %s697_s4 = inlined_call_operand.vmem [shape: f32[128,128], index: 4, kind: output, shape index: {}]  }
   0x1   :  { %v487_v0 = vld [vmem:[%s693_s1 + $0x38] sm:$0xff]   ;;  %v488_v1 = vld [vmem:[%s693_s1 + $0x30] sm:$0xff]   ;;  %v489_v2 = vld [vmem:[%s693_s1 + $0x28] sm:$0xff]  }
   0x2   :  { %438 = vmatprep.subr.bf16.mxu0 %v487_v0  ;;  %470 = vmatprep.subr.bf16.mxu1 %v487_v0  ;;  %v490_v3 = vld [vmem:[%s693_s1 + $0x20] sm:$0xff]   ;;  %v491_v6 = vld [vmem:[%s693_s1 + $0x18] sm:$0xff]   ;;  %v492_v7 = vld [vmem:[%s693_s1 + $0x10] sm:$0xff]  }
   0x3   :  { %439 = vmatpush3.bf16.msra.mxu0 %v487_v0  ;;  %478 = vmatpush3.bf16.msra.mxu1 %v487_v0  ;;  %v495_v4 = vld [vmem:[%s694_s0] sm:$0xff]   ;;  %v493_v8 = vld [vmem:[%s693_s1 + $0x8] sm:$0xff]   ;;  %v499_v12 = vld [vmem:[%s694_s0 + $0x10] sm:$0xff]  }
   0x4   :  { %440 = vmatprep.subr.bf16.mxu0 %v488_v1  ;;  %471 = vmatprep.subr.bf16.mxu1 %v488_v1  ;;  %v496_v5 = vld [vmem:[%s694_s0 + $0x20] sm:$0xff]   ;;  %v497_v10 = vld [vmem:[%s694_s0 + $0x8] sm:$0xff]   ;;  %v500_v13 = vld [vmem:[%s694_s0 + $0x30] sm:$0xff]  }
   0x5   :  { %454 = vmatprep.mubr.bf16.mxu0 %v495_v4  ;;  %462 = vmatprep.mubr.bf16.mxu1 %v496_v5  ;;  %v494_v9 = vld [vmem:[%s693_s1] sm:$0xff]   ;;  %v498_v11 = vld [vmem:[%s694_s0 + $0x28] sm:$0xff]   ;;  %v501_v14 = vld [vmem:[%s694_s0 + $0x18] sm:$0xff]  }
   0x6   :  { %v502_v15 = vld [vmem:[%s694_s0 + $0x38] sm:$0xff]   ;;  %v579_v17 = vld [vmem:[%s695_s2] ss:$0 sm:$0xff]  ;;  %v355_v19 = vld [vmem:[%s696_s3 + $0x10] sm:$0xff] }
   0x7   :  { %441 = vmatpush3.bf16.msra.mxu0 %v488_v1  ;;  %479 = vmatpush3.bf16.msra.mxu1 %v488_v1  ;;  %v363_v20 = vld [vmem:[%s696_s3 + $0x50] sm:$0xff]  ;;  %v353_v25 = vld [vmem:[%s696_s3] sm:$0xff]  ;;  %v356_v37 = vld [vmem:[%s696_s3 + $0x18] sm:$0xff] }
   0x8   :  { %442 = vmatprep.subr.bf16.mxu0 %v489_v2  ;;  %472 = vmatprep.subr.bf16.mxu1 %v489_v2  ;;  %v361_v26 = vld [vmem:[%s696_s3 + $0x40] sm:$0xff]  ;;  %v364_v38 = vld [vmem:[%s696_s3 + $0x58] sm:$0xff]  ;;  %v354_v41 = vld [vmem:[%s696_s3 + $0x8] sm:$0xff] }
   0x9   :  { %v362_v42 = vld [vmem:[%s696_s3 + $0x48] sm:$0xff]  ;;  %v359_v49 = vld [vmem:[%s696_s3 + $0x30] sm:$0xff]  ;;  %v357_v61 = vld [vmem:[%s696_s3 + $0x20] sm:$0xff] }
   0xa   :  { %v367_v50 = vld [vmem:[%s696_s3 + $0x70] sm:$0xff]  ;;  %v365_v62 = vld [vmem:[%s696_s3 + $0x60] sm:$0xff]  ;;  %v360_v1 = vld [vmem:[%s696_s3 + $0x38] sm:$0xff] }
   0xb   :  { %443 = vmatpush3.bf16.msra.mxu0 %v489_v2  ;;  %480 = vmatpush3.bf16.msra.mxu1 %v489_v2  ;;  %v368_v2 = vld [vmem:[%s696_s3 + $0x78] sm:$0xff] }
   0xc   :  { %444 = vmatprep.subr.bf16.mxu0 %v490_v3  ;;  %473 = vmatprep.subr.bf16.mxu1 %v490_v3 }
   0xf   :  { %445 = vmatpush3.bf16.msra.mxu0 %v490_v3  ;;  %481 = vmatpush3.bf16.msra.mxu1 %v490_v3 }
  0x10   :  { %446 = vmatprep.subr.bf16.mxu0 %v491_v6  ;;  %474 = vmatprep.subr.bf16.mxu1 %v491_v6 }
  0x13   :  { %447 = vmatpush3.bf16.msra.mxu0 %v491_v6  ;;  %482 = vmatpush3.bf16.msra.mxu1 %v491_v6 }
  0x14   :  { %448 = vmatprep.subr.bf16.mxu0 %v492_v7  ;;  %475 = vmatprep.subr.bf16.mxu1 %v492_v7 }
  0x17   :  { %449 = vmatpush3.bf16.msra.mxu0 %v492_v7  ;;  %483 = vmatpush3.bf16.msra.mxu1 %v492_v7 }
  0x18   :  { %450 = vmatprep.subr.bf16.mxu0 %v493_v8  ;;  %476 = vmatprep.subr.bf16.mxu1 %v493_v8 }
  0x1b   :  { %451 = vmatpush3.bf16.msra.mxu0 %v493_v8  ;;  %484 = vmatpush3.bf16.msra.mxu1 %v493_v8 }
  0x1c   :  { %452 = vmatprep.subr.bf16.mxu0 %v494_v9  ;;  %477 = vmatprep.subr.bf16.mxu1 %v494_v9 }
  0x1f   :  { %453 = vmatpush3.bf16.msra.mxu0 %v494_v9  ;;  %485 = vmatpush3.bf16.msra.mxu1 %v494_v9  ;;  %v358_v9 = vld [vmem:[%s696_s3 + $0x28] sm:$0xff] }
  0x22   :  { %455 = vmatmul.mubr.bf16.vlgmr.msra.gmra.mxu0 %v497_v10  ;;  %463 = vmatmul.mubr.bf16.vlgmr.msra.gmra.mxu1 %v498_v11  ;;  %v366_v10 = vld [vmem:[%s696_s3 + $0x68] sm:$0xff] }
  0x23   :  { %458 = vmatprep.mubr.bf16.mxu0 %v499_v12  ;;  %466 = vmatprep.mubr.bf16.mxu1 %v500_v13 }
  0x2a   :  { %459 = vmatmul.mubr.bf16.gmra.mxu0 %v501_v14  ;;  %467 = vmatmul.mubr.bf16.gmra.mxu1 %v502_v15 }
  0xe2   :  { %v456_v16 = vpop.f32.mrf.mxu0  ;;  %v464_v18 = vpop.f32.mrf.mxu1 }
  0xe3   :  { %v339_v23 = vadd.f32 %v456_v16, %v579_v17  ;;  %v347_v24 = vadd.f32 %v464_v18, %v579_v17 }
  0xe4   :  { %v216_v21 = vpop.f32.mrf.mxu0  ;;  %v248_v22 = vpop.f32.mrf.mxu1 }
  0xe5   :  { %v371_v29 = vadd.f32 %v355_v19, %v339_v23  ;;  %v379_v30 = vadd.f32 %v363_v20, %v347_v24  ;;  %v337_v31 = vadd.f32 %v579_v17, %v216_v21  ;;  %v345_v32 = vadd.f32 %v579_v17, %v248_v22 }
  0xe6   :  { %v457_v27 = vpop.f32.mrf.mxu0  ;;  %v465_v28 = vpop.f32.mrf.mxu1 }
  0xe7   :  { %387 = vst [vmem:[%s697_s4 + $0x10] sm:$0xff] %v371_v29  ;;  %395 = vst [vmem:[%s697_s4 + $0x50] sm:$0xff] %v379_v30  ;;  %v369_v35 = vadd.f32 %v353_v25, %v337_v31  ;;  %v377_v36 = vadd.f32 %v361_v26, %v345_v32  ;;  %v340_v39 = vadd.f32 %v457_v27, %v579_v17 }
  0xe8   :  { %v219_v33 = vpop.f32.mrf.mxu0  ;;  %v251_v34 = vpop.f32.mrf.mxu1  ;;  %v348_v40 = vadd.f32 %v465_v28, %v579_v17 }
  0xe9   :  { %385 = vst [vmem:[%s697_s4] sm:$0xff] %v369_v35  ;;  %393 = vst [vmem:[%s697_s4 + $0x40] sm:$0xff] %v377_v36  ;;  %v338_v45 = vadd.f32 %v579_v17, %v219_v33  ;;  %v346_v46 = vadd.f32 %v579_v17, %v251_v34  ;;  %v372_v47 = vadd.f32 %v356_v37, %v340_v39 }
  0xea   :  { %v460_v43 = vpop.f32.mrf.mxu0  ;;  %v468_v44 = vpop.f32.mrf.mxu1  ;;  %v380_v48 = vadd.f32 %v364_v38, %v348_v40 }
  0xeb   :  { %v370_v53 = vadd.f32 %v354_v41, %v338_v45  ;;  %v378_v54 = vadd.f32 %v362_v42, %v346_v46  ;;  %v343_v55 = vadd.f32 %v460_v43, %v579_v17  ;;  %v351_v56 = vadd.f32 %v468_v44, %v579_v17  ;;  %388 = vst [vmem:[%s697_s4 + $0x18] sm:$0xff] %v372_v47 }
  0xec   :  { %v232_v51 = vpop.f32.mrf.mxu0  ;;  %v264_v52 = vpop.f32.mrf.mxu1  ;;  %396 = vst [vmem:[%s697_s4 + $0x58] sm:$0xff] %v380_v48 }
  0xed   :  { %386 = vst [vmem:[%s697_s4 + $0x8] sm:$0xff] %v370_v53  ;;  %394 = vst [vmem:[%s697_s4 + $0x48] sm:$0xff] %v378_v54  ;;  %v375_v59 = vadd.f32 %v359_v49, %v343_v55  ;;  %v383_v60 = vadd.f32 %v367_v50, %v351_v56  ;;  %v341_v63 = vadd.f32 %v579_v17, %v232_v51 }
  0xee   :  { %v461_v57 = vpop.f32.mrf.mxu0  ;;  %v469_v58 = vpop.f32.mrf.mxu1  ;;  %v349_v0 = vadd.f32 %v579_v17, %v264_v52 }
  0xef   :  { %391 = vst [vmem:[%s697_s4 + $0x30] sm:$0xff] %v375_v59  ;;  %399 = vst [vmem:[%s697_s4 + $0x70] sm:$0xff] %v383_v60  ;;  %v344_v5 = vadd.f32 %v461_v57, %v579_v17  ;;  %v352_v6 = vadd.f32 %v469_v58, %v579_v17  ;;  %v373_v7 = vadd.f32 %v357_v61, %v341_v63 }
  0xf0   :  { %v235_v3 = vpop.f32.mrf.mxu0  ;;  %v267_v4 = vpop.f32.mrf.mxu1  ;;  %v381_v8 = vadd.f32 %v365_v62, %v349_v0 }
  0xf1   :  { %v376_v11 = vadd.f32 %v360_v1, %v344_v5  ;;  %v384_v12 = vadd.f32 %v368_v2, %v352_v6  ;;  %v342_v13 = vadd.f32 %v579_v17, %v235_v3  ;;  %v350_v14 = vadd.f32 %v579_v17, %v267_v4  ;;  %389 = vst [vmem:[%s697_s4 + $0x20] sm:$0xff] %v373_v7 }
  0xf2   :  { %397 = vst [vmem:[%s697_s4 + $0x60] sm:$0xff] %v381_v8 }
  0xf3   :  { %392 = vst [vmem:[%s697_s4 + $0x38] sm:$0xff] %v376_v11  ;;  %400 = vst [vmem:[%s697_s4 + $0x78] sm:$0xff] %v384_v12  ;;  %v374_v15 = vadd.f32 %v358_v9, %v342_v13  ;;  %v382_v16 = vadd.f32 %v366_v10, %v350_v14 }
  0xf5   :  { %390 = vst [vmem:[%s697_s4 + $0x28] sm:$0xff] %v374_v15  ;;  %398 = vst [vmem:[%s697_s4 + $0x68] sm:$0xff] %v382_v16 }

// kernel: beyond_the_spectrum_forward.47
= control target key start
LH: loop header
LB: loop body
LE: loop exit
PB: predicated region body
PF: predicated region fallthrough
CT: control target
= control target key end

     0   :  { %s1391_s15 = smov 0   ;;  %s1393_s16 = smov 0   ;;  %s1678_s0 = inlined_call_operand.vmem [shape: bf16[512,128], index: 0, kind: input, shape index: {}]   ;;  %s1679_s1 = inlined_call_operand.vmem [shape: bf16[128,128], index: 1, kind: input, shape index: {}]   ;;  %s1680_s2 = inlined_call_operand.vmem [shape: f32[1,128], index: 2, kind: input, shape index: {}]   ;;  %s1681_s3 = inlined_call_operand.vmem [shape: f32[512,128], index: 3, kind: input, shape index: {}]   ;;  %s1682_s4 = inlined_call_operand.vmem [shape: f32[512,128], index: 4, kind: output, shape index: {}]  }
   0x1   :  { %s1395_s17 = smov 0  }
   0x2 LB: > { %s33_s18 = sadd.s32 1, %s1360_s16  ;;  %p1171_p0 = scmp.ge.s32.totalorder %s1364_s17, 1  ;;  %s1364_s17 = sphi %s1395_s17, %s14_s17   ;;  %s1360_s16 = sphi %s1393_s16, %s1684_s16   ;;  %s1356_s15 = sphi %s1391_s15, %s1683_s15  }
   0x3   : > { %p35_p1 = scmp.ge.s32.totalorder %s33_s18, 2  ;;  %p229_p2 = scmp.lt.s32.totalorder %s1364_s17, 3 }
   0x5   : > { %s1686_s18 = smov (%p35_p1, %s33_s18), 0  ;;  %p230_p3 = pnand %p1171_p0, %p229_p2 }
   0x6   : > { %s1172_s21 = sshll.u32 (!%p230_p3), %s1356_s15, 5 }
   0x7   : > { %233 = sbr.rel (%p230_p3) target bundleno = 275 (0x113), region = 36  ;;  %p281_p4 = scmp.lt.s32.totalorder (!%p230_p3), %s1172_s21, 63 }
   0xc   : > { %v1318_v0 = vld [vmem:[%s1679_s1 + $0x38] sm:$0xff]   ;;  %v1319_v1 = vld [vmem:[%s1679_s1 + $0x30] sm:$0xff]   ;;  %s1688_s21 = smov (!%p281_p4, %s1172_s21), 63  ;;  %v1320_v2 = vld [vmem:[%s1679_s1 + $0x28] sm:$0xff]  }
   0xd   : > { %1229 = vmatprep.subr.bf16.mxu0 %v1318_v0  ;;  %1277 = vmatprep.subr.bf16.mxu1 %v1318_v0  ;;  %s1173_s26 = sshll.u32 %s1688_s21, 2  ;;  %v1321_v3 = vld [vmem:[%s1679_s1 + $0x20] sm:$0xff]   ;;  %v1322_v6 = vld [vmem:[%s1679_s1 + $0x18] sm:$0xff]   ;;  %v1323_v7 = vld [vmem:[%s1679_s1 + $0x10] sm:$0xff]   ;;  %s1175_s14 = sshll.u32 %s1688_s21, 3 }
   0xe   : > { %1230 = vmatpush3.bf16.msra.mxu0 %v1318_v0  ;;  %1285 = vmatpush3.bf16.msra.mxu1 %v1318_v0  ;;  %s1424_s29 = scalar_lea.vmem %s1678_s0, %s1173_s26  ;;  %v1324_v8 = vld [vmem:[%s1679_s1 + $0x8] sm:$0xff]   ;;  %v1325_v9 = vld [vmem:[%s1679_s1] sm:$0xff]   ;;  %s1463_s20 = scalar_lea.vmem %s1681_s3, %s1175_s14 }
   0xf   : > { %1231 = vmatprep.subr.bf16.mxu0 %v1319_v1  ;;  %1278 = vmatprep.subr.bf16.mxu1 %v1319_v1  ;;  %v1326_v4 = vld [vmem:[%s1424_s29] sm:$0xff]   ;;  %v1328_v10 = vld [vmem:[%s1424_s29 + $0x8] sm:$0xff]   ;;  %v1330_v12 = vld [vmem:[%s1424_s29 + $0x10] sm:$0xff]   ;;  %s1573_s26 = scalar_lea.vmem %s1682_s4, %s1175_s14 }
  0x10   : > { %v1327_v5 = vld [vmem:[%s1424_s29 + $0x40] sm:$0xff]   ;;  %1245 = vmatprep.mubr.bf16.mxu0 %v1326_v4  ;;  %v1329_v11 = vld [vmem:[%s1424_s29 + $0x48] sm:$0xff]   ;;  %v1331_v13 = vld [vmem:[%s1424_s29 + $0x50] sm:$0xff]  }
  0x11   : > { %1261 = vmatprep.mubr.bf16.mxu1 %v1327_v5  ;;  %v1332_v14 = vld [vmem:[%s1424_s29 + $0x18] sm:$0xff]   ;;  %v1334_v16 = vld [vmem:[%s1424_s29 + $0x20] sm:$0xff]   ;;  %v1336_v18 = vld [vmem:[%s1424_s29 + $0x28] sm:$0xff]  }
  0x12   : > { %1232 = vmatpush3.bf16.msra.mxu0 %v1319_v1  ;;  %1286 = vmatpush3.bf16.msra.mxu1 %v1319_v1  ;;  %v1333_v15 = vld [vmem:[%s1424_s29 + $0x58] sm:$0xff]   ;;  %v1335_v17 = vld [vmem:[%s1424_s29 + $0x60] sm:$0xff]   ;;  %v1337_v19 = vld [vmem:[%s1424_s29 + $0x68] sm:$0xff]  }
  0x13   : > { %1233 = vmatprep.subr.bf16.mxu0 %v1320_v2  ;;  %1279 = vmatprep.subr.bf16.mxu1 %v1320_v2  ;;  %v1338_v20 = vld [vmem:[%s1424_s29 + $0x30] sm:$0xff]   ;;  %v1340_v22 = vld [vmem:[%s1424_s29 + $0x38] sm:$0xff]   ;;  %v879_v26 = vld [vmem:[%s1463_s20] sm:$0xff] }
  0x14   : > { %v1339_v21 = vld [vmem:[%s1424_s29 + $0x70] sm:$0xff]   ;;  %v1341_v23 = vld [vmem:[%s1424_s29 + $0x78] sm:$0xff]   ;;  %v895_v27 = vld [vmem:[%s1463_s20 + $0x80] sm:$0xff]  ;;  %v1477_v34 = vmul.f32 0.003921569, %v879_v26 }
  0x15   : > { %v881_v24 = vld [vmem:[%s1463_s20 + $0x10] sm:$0xff]  ;;  %v882_v28 = vld [vmem:[%s1463_s20 + $0x18] sm:$0xff]  ;;  %v880_v32 = vld [vmem:[%s1463_s20 + $0x8] sm:$0xff]  ;;  %v1479_v35 = vmul.f32 0.003921569, %v895_v27 }
  0x16   : > { %1234 = vmatpush3.bf16.msra.mxu0 %v1320_v2  ;;  %1287 = vmatpush3.bf16.msra.mxu1 %v1320_v2  ;;  %v897_v25 = vld [vmem:[%s1463_s20 + $0x90] sm:$0xff]  ;;  %v898_v29 = vld [vmem:[%s1463_s20 + $0x98] sm:$0xff]  ;;  %v1471_v30 = vmul.f32 0.003921569, %v881_v24  ;;  %v896_v33 = vld [vmem:[%s1463_s20 + $0x88] sm:$0xff] }
  0x17   : > { %1235 = vmatprep.subr.bf16.mxu0 %v1321_v3  ;;  %1280 = vmatprep.subr.bf16.mxu1 %v1321_v3  ;;  %v1473_v31 = vmul.f32 0.003921569, %v897_v25  ;;  %v885_v36 = vld [vmem:[%s1463_s20 + $0x30] sm:$0xff]  ;;  %v1483_v38 = vmul.f32 0.003921569, %v882_v28  ;;  %v883_v40 = vld [vmem:[%s1463_s20 + $0x20] sm:$0xff] }
  0x18   : > { %v901_v37 = vld [vmem:[%s1463_s20 + $0xb0] sm:$0xff]  ;;  %v1485_v39 = vmul.f32 0.003921569, %v898_v29  ;;  %v899_v41 = vld [vmem:[%s1463_s20 + $0xa0] sm:$0xff]  ;;  %v1489_v42 = vmul.f32 0.003921569, %v880_v32 }
  0x19   : > { %v1491_v43 = vmul.f32 0.003921569, %v896_v33  ;;  %v886_v44 = vld [vmem:[%s1463_s20 + $0x38] sm:$0xff]  ;;  %v1495_v46 = vmul.f32 0.003921569, %v885_v36  ;;  %v884_v48 = vld [vmem:[%s1463_s20 + $0x28] sm:$0xff] }
  0x1a   : > { %1236 = vmatpush3.bf16.msra.mxu0 %v1321_v3  ;;  %1288 = vmatpush3.bf16.msra.mxu1 %v1321_v3  ;;  %v902_v45 = vld [vmem:[%s1463_s20 + $0xb8] sm:$0xff]  ;;  %v1497_v47 = vmul.f32 0.003921569, %v901_v37  ;;  %v900_v49 = vld [vmem:[%s1463_s20 + $0xa8] sm:$0xff]  ;;  %v1501_v50 = vmul.f32 0.003921569, %v883_v40 }
  0x1b   : > { %1237 = vmatprep.subr.bf16.mxu0 %v1322_v6  ;;  %1281 = vmatprep.subr.bf16.mxu1 %v1322_v6  ;;  %v1503_v51 = vmul.f32 0.003921569, %v899_v41  ;;  %v889_v52 = vld [vmem:[%s1463_s20 + $0x50] sm:$0xff]  ;;  %v1506_v53 = vmul.f32 0.003921569, %v886_v44  ;;  %v887_v56 = vld [vmem:[%s1463_s20 + $0x40] sm:$0xff] }
  0x1c   : > { %v1508_v54 = vmul.f32 0.003921569, %v902_v45  ;;  %v905_v55 = vld [vmem:[%s1463_s20 + $0xd0] sm:$0xff]  ;;  %v1512_v57 = vmul.f32 0.003921569, %v884_v48  ;;  %v903_v59 = vld [vmem:[%s1463_s20 + $0xc0] sm:$0xff] }
  0x1d   : > { %v1514_v58 = vmul.f32 0.003921569, %v900_v49  ;;  %v1517_v60 = vmul.f32 0.003921569, %v889_v52  ;;  %v890_v61 = vld [vmem:[%s1463_s20 + $0x58] sm:$0xff]  ;;  %v888_v63 = vld [vmem:[%s1463_s20 + $0x48] sm:$0xff] }
  0x1e   : > { %1238 = vmatpush3.bf16.msra.mxu0 %v1322_v6  ;;  %1289 = vmatpush3.bf16.msra.mxu1 %v1322_v6  ;;  %v906_v62 = vld [vmem:[%s1463_s20 + $0xd8] sm:$0xff]  ;;  %v1525_v0 = vld [vmem:[%s1680_s2] ss:$0 sm:$0xff]  ;;  %v1527_v1 = vmul.f32 0.003921569, %v905_v55  ;;  %v904_v3 = vld [vmem:[%s1463_s20 + $0xc8] sm:$0xff] }
  0x1f   : > { %1239 = vmatprep.subr.bf16.mxu0 %v1323_v7  ;;  %1282 = vmatprep.subr.bf16.mxu1 %v1323_v7  ;;  %v1529_v2 = vmul.f32 0.003921569, %v887_v56  ;;  %v1532_v4 = vmul.f32 0.003921569, %v903_v59  ;;  %v893_v5 = vld [vmem:[%s1463_s20 + $0x70] sm:$0xff]  ;;  %v892_v24 = vld [vmem:[%s1463_s20 + $0x68] sm:$0xff] }
  0x20   : > { %v909_v6 = vld [vmem:[%s1463_s20 + $0xf0] sm:$0xff]  ;;  %v908_v25 = vld [vmem:[%s1463_s20 + $0xe8] sm:$0xff]  ;;  %v1575_v45 = vmul.f32 0.003921569, %v892_v24 }
  0x21   : > { %v1577_v48 = vmul.f32 0.003921569, %v908_v25 }
  0x22   : > { %1240 = vmatpush3.bf16.msra.mxu0 %v1323_v7  ;;  %1290 = vmatpush3.bf16.msra.mxu1 %v1323_v7  ;;  %v891_v7 = vld [vmem:[%s1463_s20 + $0x60] sm:$0xff] }
  0x23   : > { %1241 = vmatprep.subr.bf16.mxu0 %v1324_v8  ;;  %1283 = vmatprep.subr.bf16.mxu1 %v1324_v8 }
  0x26   : > { %1242 = vmatpush3.bf16.msra.mxu0 %v1324_v8  ;;  %1291 = vmatpush3.bf16.msra.mxu1 %v1324_v8 }
  0x27   : > { %1243 = vmatprep.subr.bf16.mxu0 %v1325_v9  ;;  %1284 = vmatprep.subr.bf16.mxu1 %v1325_v9 }
  0x2a   : > { %1244 = vmatpush3.bf16.msra.mxu0 %v1325_v9  ;;  %1292 = vmatpush3.bf16.msra.mxu1 %v1325_v9 }
  0x2d   : > { %1246 = vmatmul.mubr.bf16.vlgmr.msra.gmra.mxu0 %v1328_v10  ;;  %1262 = vmatmul.mubr.bf16.vlgmr.msra.gmra.mxu1 %v1329_v11  ;;  %v1537_v10 = vmul.f32 0.003921569, %v890_v61  ;;  %v1539_v11 = vmul.f32 0.003921569, %v906_v62 }
  0x2e   : > { %1249 = vmatprep.mubr.bf16.mxu0 %v1330_v12  ;;  %1265 = vmatprep.mubr.bf16.mxu1 %v1331_v13  ;;  %v1541_v12 = vmul.f32 0.003921569, %v888_v63  ;;  %v1543_v13 = vmul.f32 0.003921569, %v904_v3 }
  0x35   : > { %1250 = vmatmul.mubr.bf16.gmra.mxu0 %v1332_v14  ;;  %1266 = vmatmul.mubr.bf16.gmra.mxu1 %v1333_v15  ;;  %v907_v14 = vld [vmem:[%s1463_s20 + $0xe0] sm:$0xff]  ;;  %v894_v15 = vld [vmem:[%s1463_s20 + $0x78] sm:$0xff] }
  0x36   : > { %1253 = vmatprep.mubr.bf16.mxu0 %v1334_v16  ;;  %1269 = vmatprep.mubr.bf16.mxu1 %v1335_v17  ;;  %v910_v16 = vld [vmem:[%s1463_s20 + $0xf8] sm:$0xff]  ;;  %v1558_v28 = vmul.f32 0.003921569, %v907_v14  ;;  %v1560_v29 = vmul.f32 0.003921569, %v894_v15 }
  0x37   : > { %v1562_v32 = vmul.f32 0.003921569, %v910_v16 }
  0x3d   : > { %1254 = vmatmul.mubr.bf16.gmra.mxu0 %v1336_v18  ;;  %1270 = vmatmul.mubr.bf16.gmra.mxu1 %v1337_v19  ;;  %v1548_v19 = vmul.f32 0.003921569, %v893_v5 }
  0x3e   : > { %1257 = vmatprep.mubr.bf16.mxu0 %v1338_v20  ;;  %1273 = vmatprep.mubr.bf16.mxu1 %v1339_v21  ;;  %v1550_v20 = vmul.f32 0.003921569, %v909_v6  ;;  %v1552_v21 = vmul.f32 0.003921569, %v891_v7 }
  0x45   : > { %1258 = vmatmul.mubr.bf16.gmra.mxu0 %v1340_v22  ;;  %1274 = vmatmul.mubr.bf16.gmra.mxu1 %v1341_v23 }
  0xed   : > { %v1247_v8 = vpop.f32.mrf.mxu0  ;;  %v1263_v9 = vpop.f32.mrf.mxu1 }
  0xee   : > { %v849_v22 = vadd.f32 %v1247_v8, %v1525_v0  ;;  %v865_v23 = vadd.f32 %v1263_v9, %v1525_v0 }
  0xef   : > { %v614_v17 = vpop.f32.mrf.mxu0  ;;  %v678_v18 = vpop.f32.mrf.mxu1 }
  0xf0   : > { %v945_v33 = vsub.f32 %v849_v22, %v1471_v30  ;;  %v961_v36 = vsub.f32 %v865_v23, %v1473_v31  ;;  %v847_v37 = vadd.f32 %v1525_v0, %v614_v17  ;;  %v863_v40 = vadd.f32 %v1525_v0, %v678_v18 }
  0xf1   : > { %v1248_v26 = vpop.f32.mrf.mxu0  ;;  %v1264_v27 = vpop.f32.mrf.mxu1 }
  0xf2   : > { %v977_v30 = vand.u32 2147483647, %v945_v33  ;;  %v993_v31 = vand.u32 2147483647, %v961_v36  ;;  %v943_v49 = vsub.f32 %v847_v37, %v1477_v34  ;;  %v959_v52 = vsub.f32 %v863_v40, %v1479_v35 }
  0xf3   : > { %v617_v41 = vpop.f32.mrf.mxu0  ;;  %v681_v44 = vpop.f32.mrf.mxu1  ;;  %v850_v55 = vadd.f32 %v1248_v26, %v1525_v0  ;;  %v866_v56 = vadd.f32 %v1264_v27, %v1525_v0 }
  0xf4   : > { %1009 = vst [vmem:[%s1573_s26 + $0x10] sm:$0xff] %v977_v30  ;;  %1025 = vst [vmem:[%s1573_s26 + $0x90] sm:$0xff] %v993_v31  ;;  %v975_v62 = vand.u32 2147483647, %v943_v49  ;;  %v991_v63 = vand.u32 2147483647, %v959_v52  ;;  %v848_v34 = vadd.f32 %v1525_v0, %v617_v41  ;;  %v864_v6 = vadd.f32 %v1525_v0, %v681_v44 }
  0xf5   : > { %v1251_v59 = vpop.f32.mrf.mxu0  ;;  %v1267_v61 = vpop.f32.mrf.mxu1  ;;  %v946_v3 = vsub.f32 %v850_v55, %v1483_v38  ;;  %v962_v5 = vsub.f32 %v866_v56, %v1485_v39 }
  0xf6   : > { %1007 = vst [vmem:[%s1573_s26] sm:$0xff] %v975_v62  ;;  %1023 = vst [vmem:[%s1573_s26 + $0x80] sm:$0xff] %v991_v63  ;;  %v853_v8 = vadd.f32 %v1251_v59, %v1525_v0  ;;  %v869_v9 = vadd.f32 %v1267_v61, %v1525_v0  ;;  %v944_v38 = vsub.f32 %v848_v34, %v1489_v42 }
  0xf7   : > { %v630_v35 = vpop.f32.mrf.mxu0  ;;  %v694_v7 = vpop.f32.mrf.mxu1  ;;  %v978_v14 = vand.u32 2147483647, %v946_v3  ;;  %v994_v15 = vand.u32 2147483647, %v962_v5  ;;  %v960_v39 = vsub.f32 %v864_v6, %v1491_v43 }
  0xf8   : > { %v949_v18 = vsub.f32 %v853_v8, %v1495_v46  ;;  %v965_v22 = vsub.f32 %v869_v9, %v1497_v47  ;;  %v851_v23 = vadd.f32 %v1525_v0, %v630_v35  ;;  %v867_v24 = vadd.f32 %v1525_v0, %v694_v7 }
  0xf9   : > { %v1252_v16 = vpop.f32.mrf.mxu0  ;;  %v1268_v17 = vpop.f32.mrf.mxu1  ;;  %1010 = vst [vmem:[%s1573_s26 + $0x18] sm:$0xff] %v978_v14  ;;  %1026 = vst [vmem:[%s1573_s26 + $0x98] sm:$0xff] %v994_v15  ;;  %v976_v25 = vand.u32 2147483647, %v944_v38  ;;  %v992_v42 = vand.u32 2147483647, %v960_v39 }
  0xfa   : > { %v981_v27 = vand.u32 2147483647, %v949_v18  ;;  %v997_v33 = vand.u32 2147483647, %v965_v22  ;;  %v947_v36 = vsub.f32 %v851_v23, %v1501_v50  ;;  %v963_v46 = vsub.f32 %v867_v24, %v1503_v51 }
  0xfb   : > { %v633_v26 = vpop.f32.mrf.mxu0  ;;  %v697_v43 = vpop.f32.mrf.mxu1  ;;  %1008 = vst [vmem:[%s1573_s26 + $0x8] sm:$0xff] %v976_v25  ;;  %1024 = vst [vmem:[%s1573_s26 + $0x88] sm:$0xff] %v992_v42  ;;  %v854_v47 = vadd.f32 %v1252_v16, %v1525_v0  ;;  %v870_v37 = vadd.f32 %v1268_v17, %v1525_v0 }
  0xfc   : > { %1013 = vst [vmem:[%s1573_s26 + $0x30] sm:$0xff] %v981_v27  ;;  %1029 = vst [vmem:[%s1573_s26 + $0xb0] sm:$0xff] %v997_v33  ;;  %v979_v44 = vand.u32 2147483647, %v947_v36  ;;  %v995_v30 = vand.u32 2147483647, %v963_v46  ;;  %v852_v51 = vadd.f32 %v1525_v0, %v633_v26  ;;  %v868_v49 = vadd.f32 %v1525_v0, %v697_v43 }
  0xfd   : > { %v1255_v40 = vpop.f32.mrf.mxu0  ;;  %v1271_v41 = vpop.f32.mrf.mxu1  ;;  %v950_v31 = vsub.f32 %v854_v47, %v1506_v53  ;;  %v966_v50 = vsub.f32 %v870_v37, %v1508_v54 }
  0xfe   : > { %1011 = vst [vmem:[%s1573_s26 + $0x20] sm:$0xff] %v979_v44  ;;  %1027 = vst [vmem:[%s1573_s26 + $0xa0] sm:$0xff] %v995_v30  ;;  %v857_v56 = vadd.f32 %v1255_v40, %v1525_v0  ;;  %v873_v59 = vadd.f32 %v1271_v41, %v1525_v0  ;;  %v948_v53 = vsub.f32 %v852_v51, %v1512_v57 }
  0xff   : > { %v646_v52 = vpop.f32.mrf.mxu0  ;;  %v710_v55 = vpop.f32.mrf.mxu1  ;;  %v982_v61 = vand.u32 2147483647, %v950_v31  ;;  %v998_v62 = vand.u32 2147483647, %v966_v50  ;;  %v964_v54 = vsub.f32 %v868_v49, %v1514_v58 }
 0x100   : > { %v953_v5 = vsub.f32 %v857_v56, %v1517_v60  ;;  %v969_v34 = vsub.f32 %v873_v59, %v1527_v1  ;;  %v855_v6 = vadd.f32 %v1525_v0, %v646_v52  ;;  %v871_v35 = vadd.f32 %v1525_v0, %v710_v55 }
 0x101   : > { %v1256_v63 = vpop.f32.mrf.mxu0  ;;  %v1272_v3 = vpop.f32.mrf.mxu1  ;;  %1014 = vst [vmem:[%s1573_s26 + $0x38] sm:$0xff] %v982_v61  ;;  %1030 = vst [vmem:[%s1573_s26 + $0xb8] sm:$0xff] %v998_v62  ;;  %v980_v7 = vand.u32 2147483647, %v948_v53  ;;  %v996_v57 = vand.u32 2147483647, %v964_v54 }
 0x102   : > { %v985_v9 = vand.u32 2147483647, %v953_v5  ;;  %v1001_v14 = vand.u32 2147483647, %v969_v34  ;;  %v951_v15 = vsub.f32 %v855_v6, %v1529_v2  ;;  %v967_v60 = vsub.f32 %v871_v35, %v1532_v4 }
 0x103   : > { %v649_v8 = vpop.f32.mrf.mxu0  ;;  %v713_v58 = vpop.f32.mrf.mxu1  ;;  %1012 = vst [vmem:[%s1573_s26 + $0x28] sm:$0xff] %v980_v7  ;;  %1028 = vst [vmem:[%s1573_s26 + $0xa8] sm:$0xff] %v996_v57  ;;  %v858_v1 = vadd.f32 %v1256_v63, %v1525_v0  ;;  %v874_v38 = vadd.f32 %v1272_v3, %v1525_v0 }
 0x104   : > { %1017 = vst [vmem:[%s1573_s26 + $0x50] sm:$0xff] %v985_v9  ;;  %1033 = vst [vmem:[%s1573_s26 + $0xd0] sm:$0xff] %v1001_v14  ;;  %v983_v17 = vand.u32 2147483647, %v951_v15  ;;  %v999_v18 = vand.u32 2147483647, %v967_v60  ;;  %v856_v4 = vadd.f32 %v1525_v0, %v649_v8  ;;  %v872_v23 = vadd.f32 %v1525_v0, %v713_v58 }
 0x105   : > { %v1259_v39 = vpop.f32.mrf.mxu0  ;;  %v1275_v16 = vpop.f32.mrf.mxu1  ;;  %v954_v22 = vsub.f32 %v858_v1, %v1537_v10  ;;  %v970_v2 = vsub.f32 %v874_v38, %v1539_v11 }
 0x106   : > { %1015 = vst [vmem:[%s1573_s26 + $0x40] sm:$0xff] %v983_v17  ;;  %1031 = vst [vmem:[%s1573_s26 + $0xc0] sm:$0xff] %v999_v18  ;;  %v861_v42 = vadd.f32 %v1259_v39, %v1525_v0  ;;  %v877_v26 = vadd.f32 %v1275_v16, %v1525_v0  ;;  %v952_v10 = vsub.f32 %v856_v4, %v1541_v12 }
 0x107   : > { %v662_v24 = vpop.f32.mrf.mxu0  ;;  %v726_v25 = vpop.f32.mrf.mxu1  ;;  %v986_v43 = vand.u32 2147483647, %v954_v22  ;;  %v1002_v27 = vand.u32 2147483647, %v970_v2  ;;  %v968_v11 = vsub.f32 %v872_v23, %v1543_v13 }
 0x108   : > { %v957_v46 = vsub.f32 %v861_v42, %v1548_v19  ;;  %v973_v47 = vsub.f32 %v877_v26, %v1550_v20  ;;  %v859_v37 = vadd.f32 %v1525_v0, %v662_v24  ;;  %v875_v40 = vadd.f32 %v1525_v0, %v726_v25 }
 0x109   : > { %v1260_v33 = vpop.f32.mrf.mxu0  ;;  %v1276_v36 = vpop.f32.mrf.mxu1  ;;  %1018 = vst [vmem:[%s1573_s26 + $0x58] sm:$0xff] %v986_v43  ;;  %1034 = vst [vmem:[%s1573_s26 + $0xd8] sm:$0xff] %v1002_v27  ;;  %v984_v41 = vand.u32 2147483647, %v952_v10  ;;  %v1000_v12 = vand.u32 2147483647, %v968_v11 }
 0x10a   : > { %v989_v30 = vand.u32 2147483647, %v957_v46  ;;  %v1005_v31 = vand.u32 2147483647, %v973_v47  ;;  %v955_v19 = vsub.f32 %v859_v37, %v1552_v21  ;;  %v971_v20 = vsub.f32 %v875_v40, %v1558_v28 }
 0x10b   : > { %v665_v44 = vpop.f32.mrf.mxu0  ;;  %v729_v13 = vpop.f32.mrf.mxu1  ;;  %1016 = vst [vmem:[%s1573_s26 + $0x48] sm:$0xff] %v984_v41  ;;  %1032 = vst [vmem:[%s1573_s26 + $0xc8] sm:$0xff] %v1000_v12  ;;  %v862_v50 = vadd.f32 %v1260_v33, %v1525_v0  ;;  %v878_v51 = vadd.f32 %v1276_v36, %v1525_v0 }
 0x10c   : > { %1021 = vst [vmem:[%s1573_s26 + $0x70] sm:$0xff] %v989_v30  ;;  %1037 = vst [vmem:[%s1573_s26 + $0xf0] sm:$0xff] %v1005_v31  ;;  %v987_v49 = vand.u32 2147483647, %v955_v19  ;;  %v1003_v52 = vand.u32 2147483647, %v971_v20  ;;  %v860_v28 = vadd.f32 %v1525_v0, %v665_v44  ;;  %v876_v56 = vadd.f32 %v1525_v0, %v729_v13 }
 0x10d   : > { %v958_v55 = vsub.f32 %v862_v50, %v1560_v29  ;;  %v974_v21 = vsub.f32 %v878_v51, %v1562_v32 }
 0x10e   : > { %1019 = vst [vmem:[%s1573_s26 + $0x60] sm:$0xff] %v987_v49  ;;  %1035 = vst [vmem:[%s1573_s26 + $0xe0] sm:$0xff] %v1003_v52  ;;  %v956_v62 = vsub.f32 %v860_v28, %v1575_v45  ;;  %v972_v53 = vsub.f32 %v876_v56, %v1577_v48 }
 0x10f   : > { %v990_v59 = vand.u32 2147483647, %v958_v55  ;;  %v1006_v61 = vand.u32 2147483647, %v974_v21 }
 0x110   : > { %v988_v54 = vand.u32 2147483647, %v956_v62  ;;  %v1004_v63 = vand.u32 2147483647, %v972_v53 }
 0x111   : > { %1022 = vst [vmem:[%s1573_s26 + $0x78] sm:$0xff] %v990_v59  ;;  %1038 = vst [vmem:[%s1573_s26 + $0xf8] sm:$0xff] %v1006_v61 }
 0x112   : > { %1020 = vst [vmem:[%s1573_s26 + $0x68] sm:$0xff] %v988_v54  ;;  %1036 = vst [vmem:[%s1573_s26 + $0xe8] sm:$0xff] %v1004_v63 }
 0x113 PF: > { %s14_s17 = sadd.s32 1, %s1364_s17   ;;  %s1683_s15 = smov %s1360_s16 }
 0x114   : > { %p11_p5 = scmp.ge.s32.totalorder %s14_s17, 4   ;;  %s1684_s16 = smov %s1686_s18 }
 0x116   :  { %13 = sbr.rel (!%p11_p5) target bundleno = 2 (0x2), region = 83 }

// kernel: beyond_the_spectrum_forward.49
= control target key start
LH: loop header
LB: loop body
LE: loop exit
PB: predicated region body
PF: predicated region fallthrough
CT: control target
= control target key end

     0   :  { %s118_s0 = inlined_call_operand.vmem [shape: f32[9,16,128], index: 0, kind: input, shape index: {}]   ;;  %s119_s1 = inlined_call_operand.vmem [shape: f32[16,128], index: 1, kind: output, shape index: {}]  }
   0x1   :  { %v8_v0 = vld [vmem:[%s118_s0] sm:$0xff]  ;;  %v10_v1 = vld [vmem:[%s118_s0 + $0x10] sm:$0xff]  ;;  %v9_v12 = vld [vmem:[%s118_s0 + $0x8] sm:$0xff] }
   0x2   :  { %v12_v2 = vld [vmem:[%s118_s0 + $0x20] sm:$0xff]  ;;  %v14_v3 = vld [vmem:[%s118_s0 + $0x30] sm:$0xff]  ;;  %v11_v13 = vld [vmem:[%s118_s0 + $0x18] sm:$0xff] }
   0x3   :  { %v16_v4 = vld [vmem:[%s118_s0 + $0x40] sm:$0xff]  ;;  %v18_v5 = vld [vmem:[%s118_s0 + $0x50] sm:$0xff]  ;;  %v26_v6 = vmax.f32 %v8_v0, %v12_v2  ;;  %v27_v10 = vmax.f32 %v10_v1, %v14_v3  ;;  %v13_v14 = vld [vmem:[%s118_s0 + $0x28] sm:$0xff] }
   0x4   :  { %v20_v7 = vld [vmem:[%s118_s0 + $0x60] sm:$0xff]  ;;  %v22_v8 = vld [vmem:[%s118_s0 + $0x70] sm:$0xff]  ;;  %v15_v16 = vld [vmem:[%s118_s0 + $0x38] sm:$0xff]  ;;  %v34_v19 = vmax.f32 %v9_v12, %v13_v14 }
   0x5   :  { %v24_v9 = vld [vmem:[%s118_s0 + $0x80] sm:$0xff]  ;;  %v28_v11 = vmax.f32 %v26_v6, %v16_v4  ;;  %v29_v15 = vmax.f32 %v27_v10, %v18_v5  ;;  %v17_v17 = vld [vmem:[%s118_s0 + $0x48] sm:$0xff]  ;;  %v19_v18 = vld [vmem:[%s118_s0 + $0x58] sm:$0xff]  ;;  %v35_v22 = vmax.f32 %v11_v13, %v15_v16 }
   0x6   :  { %v21_v21 = vld [vmem:[%s118_s0 + $0x68] sm:$0xff]  ;;  %v23_v24 = vld [vmem:[%s118_s0 + $0x78] sm:$0xff]  ;;  %v36_v25 = vmax.f32 %v34_v19, %v17_v17 }
   0x7   :  { %v30_v20 = vmax.f32 %v28_v11, %v20_v7  ;;  %v31_v23 = vmax.f32 %v29_v15, %v22_v8  ;;  %v25_v27 = vld [vmem:[%s118_s0 + $0x88] sm:$0xff]  ;;  %v37_v28 = vmax.f32 %v35_v22, %v19_v18 }
   0x8   :  { %v38_v29 = vmax.f32 %v36_v25, %v21_v21 }
   0x9   :  { %v32_v26 = vmax.f32 %v30_v20, %v24_v9  ;;  %v39_v31 = vmax.f32 %v37_v28, %v23_v24 }
   0xa   :  { %v40_v32 = vmax.f32 %v38_v29, %v25_v27 }
   0xb   :  { %v33_v30 = vmax.f32 %v32_v26, %v31_v23 }
   0xc   :  { %v41_v33 = vmax.f32 %v40_v32, %v39_v31 }
   0xd   :  { %42 = vst [vmem:[%s119_s1] sm:$0xff] %v33_v30 }
   0xe   :  { %43 = vst [vmem:[%s119_s1 + $0x8] sm:$0xff] %v41_v33 }

// kernel: beyond_the_spectrum_forward.51
= control target key start
LH: loop header
LB: loop body
LE: loop exit
PB: predicated region body
PF: predicated region fallthrough
CT: control target
= control target key end

     0   :  { %s855_s15 = smov 0   ;;  %s857_s16 = smov 0   ;;  %s1014_s0 = inlined_call_operand.vmem [shape: bf16[32,640], index: 0, kind: input, shape index: {}]   ;;  %s1015_s1 = inlined_call_operand.vmem [shape: bf16[640,128], index: 1, kind: input, shape index: {}]   ;;  %s1016_s2 = inlined_call_operand.vmem [shape: f32[1,128], index: 2, kind: input, shape index: {}]   ;;  %s1017_s3 = inlined_call_operand.vmem [shape: f32[32,128], index: 3, kind: input, shape index: {}]   ;;  %s1018_s4 = inlined_call_operand.vmem [shape: f32[32,128], index: 4, kind: output, shape index: {}]  }
   0x1   :  { %s859_s17 = smov 0   ;;  %s861_s18 = smov 0  }
   0x2   :  { %s863_s19 = smov 0  }
   0x3 LB: > { %s26_s20 = sadd.s32 1, %s823_s18  ;;  %p49_p1 = scmp.ne.s32.totalorder %s815_s16, %s811_s15  ;;  %s827_s19 = sphi %s863_s19, %s14_s19   ;;  %s823_s18 = sphi %s861_s18, %s1022_s18   ;;  %s819_s17 = sphi %s859_s17, %s1021_s17   ;;  %s815_s16 = sphi %s857_s16, %s1020_s16   ;;  %s811_s15 = sphi %s855_s15, %s1019_s15  }
   0x4   : > { %p27_p0 = scmp.ge.s32.totalorder %s26_s20, 5  ;;  %p50_p2 = scmp.eq.s32.totalorder %s827_s19, 0 }
   0x5   : > { %s42_s22 = sadd.s32 1, %s815_s16  ;;  %p684_p5 = scmp.ge.s32.totalorder %s827_s19, 5 }
   0x6   : > { %s1024_s20 = smov (%p27_p0, %s26_s20), 0  ;;  %p51_p3 = por %p50_p2, %p49_p1 }
   0x7   : > { %s38_s21 = ssub.s32 %s823_s18, %s1024_s20  ;;  %203 = sbr.rel (%p684_p5) target bundleno = 18 (0x12), region = 24 }
   0x8   : > { %p40_p4 = scmp.eq.s32.totalorder %s38_s21, 0 }
   0xa   : > { %s890_s23 = scalar_select %p40_p4, %s815_s16, %s42_s22  }
   0xc   : > { %206 = sbr.rel (!%p51_p3) target bundleno = 18 (0x12), region = 28  ;;  %s208_s24 = sand.u32 (%p51_p3), 1, %s815_s16  }
   0xd   : > { %s686_s25 = sshll.u32 (%p51_p3), %s823_s18, 2  ;;  %s685_s26 = sshll.u32 (%p51_p3), %s208_s24, 4 }
   0xe   : > { %s215_s29 = scalar_lea.vmem (%p51_p3), %s1014_s0, %s686_s25  ;;  %s210_s30 = scalar_lea.vmem (%p51_p3), [#allocation2], %s685_s26 }
   0xf   : > { %v232_v0 = vld [vmem:[%s215_s29] sm:$0xf] (%p51_p3)  ;;  %v234_v1 = vld [vmem:[%s215_s29 + $0x14] sm:$0xf] (%p51_p3)  ;;  %v236_v2 = vld [vmem:[%s215_s29 + $0x28] sm:$0xf] (%p51_p3) }
  0x10   : > { %233 = vst [vmem:[%s210_s30] sm:$0xf] (%p51_p3), %v232_v0  ;;  %235 = vst [vmem:[%s210_s30 + $0x4] sm:$0xf] (%p51_p3), %v234_v1  ;;  %v238_v3 = vld [vmem:[%s215_s29 + $0x3c] sm:$0xf] (%p51_p3) }
  0x11   : > { %237 = vst [vmem:[%s210_s30 + $0x8] sm:$0xf] %v236_v2  ;;  %239 = vst [vmem:[%s210_s30 + $0xc] sm:$0xf] %v238_v3 }
  0x12 PF: > { %p687_p6 = scmp.ge.s32.totalorder %s827_s19, 1  ;;  %p282_p7 = scmp.lt.s32.totalorder %s827_s19, 6 }
  0x14   : > { %p283_p8 = pnand %p687_p6, %p282_p7 }
  0x15   : > { %s289_s5 = sand.u32 (!%p283_p8), 1, %s811_s15   ;;  %s689_s6 = sshll.u32 (!%p283_p8), %s819_s17, 4 }
  0x16   : > { %286 = sbr.rel (%p283_p8) target bundleno = 284 (0x11c), region = 73  ;;  %s902_s7 = sshll.u32 (!%p283_p8), %s289_s5, 4 }
  0x17   : > { %p338_p9 = scmp.lt.s32.totalorder (!%p283_p8), %s689_s6, 79  ;;  %s291_s12 = scalar_lea.vmem (!%p283_p8), [#allocation2], %s902_s7 }
  0x18   : > { %p691_p10 = scmp.ne.s32.totalorder (!%p283_p8), %s819_s17, 0 }
  0x1b   : > { %s1026_s6 = smov (!%p338_p9, %s689_s6), 79  ;;  %371 = sbr.rel (%p691_p10) target bundleno = 35 (0x23), region = 81 }
  0x1c   : > { %s690_s8 = sshll.u32 %s1026_s6, 2 }
  0x1d   : > { %s907_s11 = scalar_lea.vmem %s1015_s1, %s690_s8 }
  0x20   : > { %v829_v4 = vmov 0.0  }
  0x21   : > { %372 = vst [vmem:[%s1018_s4] sm:$0xff] %v829_v4  ;;  %373 = vst [vmem:[%s1018_s4 + $0x8] sm:$0xff] %v829_v4 }
  0x22   : > { %374 = vst [vmem:[%s1018_s4 + $0x10] sm:$0xff] %v829_v4  ;;  %375 = vst [vmem:[%s1018_s4 + $0x18] sm:$0xff] %v829_v4 }
  0x23 PF: > { %v779_v5 = vld [vmem:[%s907_s11 + $0x38] sm:$0xff]   ;;  %v780_v6 = vld [vmem:[%s907_s11 + $0x30] sm:$0xff]   ;;  %v781_v7 = vld [vmem:[%s907_s11 + $0x28] sm:$0xff]   ;;  %p702_p11 = scmp.ne.s32.totalorder %s819_s17, 4 }
  0x24   : > { %718 = vmatprep.subr.bf16.mxu0 %v779_v5  ;;  %v782_v8 = vld [vmem:[%s907_s11 + $0x20] sm:$0xff]   ;;  %v783_v10 = vld [vmem:[%s907_s11 + $0x18] sm:$0xff]   ;;  %v784_v11 = vld [vmem:[%s907_s11 + $0x10] sm:$0xff]  }
  0x25   : > { %719 = vmatpush3.bf16.msra.mxu0 %v779_v5  ;;  %v787_v9 = vld [vmem:[%s291_s12] sm:$0xff]   ;;  %v785_v12 = vld [vmem:[%s907_s11 + $0x8] sm:$0xff]  }
  0x26   : > { %720 = vmatprep.subr.bf16.mxu0 %v780_v6  ;;  %734 = vmatprep.mubr.bf16.mxu0 %v787_v9  ;;  %v786_v13 = vld [vmem:[%s907_s11] sm:$0xff]   ;;  %v788_v14 = vld [vmem:[%s291_s12 + $0x8] sm:$0xff]  }
  0x28   : > { %v376_v17 = vld [vmem:[%s1018_s4] sm:$0xff]  ;;  %v377_v23 = vld [vmem:[%s1018_s4 + $0x8] sm:$0xff] }
  0x29   : > { %721 = vmatpush3.bf16.msra.mxu0 %v780_v6  ;;  %v378_v15 = vld [vmem:[%s1018_s4 + $0x10] sm:$0xff]  ;;  %v379_v20 = vld [vmem:[%s1018_s4 + $0x18] sm:$0xff] }
  0x2a   : > { %722 = vmatprep.subr.bf16.mxu0 %v781_v7 }
  0x2d   : > { %723 = vmatpush3.bf16.msra.mxu0 %v781_v7 }
  0x2e   : > { %724 = vmatprep.subr.bf16.mxu0 %v782_v8 }
  0x31   : > { %725 = vmatpush3.bf16.msra.mxu0 %v782_v8 }
  0x32   : > { %726 = vmatprep.subr.bf16.mxu0 %v783_v10 }
  0x35   : > { %727 = vmatpush3.bf16.msra.mxu0 %v783_v10 }
  0x36   : > { %728 = vmatprep.subr.bf16.mxu0 %v784_v11 }
  0x39   : > { %729 = vmatpush3.bf16.msra.mxu0 %v784_v11 }
  0x3a   : > { %730 = vmatprep.subr.bf16.mxu0 %v785_v12 }
  0x3d   : > { %731 = vmatpush3.bf16.msra.mxu0 %v785_v12 }
  0x3e   : > { %732 = vmatprep.subr.bf16.mxu0 %v786_v13 }
  0x41   : > { %733 = vmatpush3.bf16.msra.mxu0 %v786_v13 }
  0x44   : > { %735 = vmatmul.mubr.bf16.vlgmr.msra.gmra.mxu0 %v788_v14 }
 0x104   : > { %v736_v16 = vpop.f32.mrf.mxu0 }
 0x105   : > { %v511_v18 = vadd.f32 %v736_v16, %v378_v15 }
 0x106   : > { %v494_v19 = vpop.f32.mrf.mxu0 }
 0x107   : > { %515 = vst [vmem:[%s1018_s4 + $0x10] sm:$0xff] %v511_v18  ;;  %v509_v21 = vadd.f32 %v494_v19, %v376_v17 }
 0x108   : > { %v737_v22 = vpop.f32.mrf.mxu0 }
 0x109   : > { %513 = vst [vmem:[%s1018_s4] sm:$0xff] %v509_v21  ;;  %v512_v24 = vadd.f32 %v737_v22, %v379_v20  ;;  %520 = sbr.rel (%p702_p11) target bundleno = 284 (0x11c), region = 85 }
 0x10a   : > { %v497_v25 = vpop.f32.mrf.mxu0 }
 0x10b   : > { %516 = vst [vmem:[%s1018_s4 + $0x18] sm:$0xff] %v512_v24  ;;  %v510_v26 = vadd.f32 %v497_v25, %v377_v23 }
 0x10d   : > { %514 = vst [vmem:[%s1018_s4 + $0x8] sm:$0xff] %v510_v26 }
 0x10e   : > { %v703_v28 = vld [vmem:[%s1016_s2] ss:$0 sm:$0xff]  ;;  %v537_v32 = vld [vmem:[%s1017_s3 + $0x8] sm:$0xff]  ;;  %v523_v33 = vld [vmem:[%s1018_s4 + $0x10] sm:$0xff] }
 0x10f   : > { %v536_v29 = vld [vmem:[%s1017_s3] sm:$0xff]  ;;  %v534_v35 = vadd.f32 %v703_v28, %v523_v33  ;;  %v538_v36 = vld [vmem:[%s1017_s3 + $0x10] sm:$0xff]  ;;  %v539_v38 = vld [vmem:[%s1017_s3 + $0x18] sm:$0xff] }
 0x110   : > { %v521_v27 = vld [vmem:[%s1018_s4] sm:$0xff] }
 0x111   : > { %v532_v30 = vadd.f32 %v703_v28, %v521_v27  ;;  %v542_v42 = vadd.f32 %v538_v36, %v534_v35 }
 0x112   : > { %v524_v37 = vld [vmem:[%s1018_s4 + $0x18] sm:$0xff] }
 0x113   : > { %v540_v39 = vadd.f32 %v536_v29, %v532_v30  ;;  %v535_v40 = vadd.f32 %v703_v28, %v524_v37  ;;  %v546_v46 = vmax.f32 %v542_v42, 0.0 }
 0x114   : > { %v522_v31 = vld [vmem:[%s1018_s4 + $0x8] sm:$0xff] }
 0x115   : > { %v533_v34 = vadd.f32 %v703_v28, %v522_v31  ;;  %v544_v43 = vmax.f32 %v540_v39, 0.0  ;;  %v543_v44 = vadd.f32 %v539_v38, %v535_v40  ;;  %550 = vst [vmem:[%s1018_s4 + $0x10] sm:$0xff] %v546_v46 }
 0x117   : > { %v541_v41 = vadd.f32 %v537_v32, %v533_v34  ;;  %548 = vst [vmem:[%s1018_s4] sm:$0xff] %v544_v43  ;;  %v547_v47 = vmax.f32 %v543_v44, 0.0 }
 0x119   : > { %v545_v45 = vmax.f32 %v541_v41, 0.0  ;;  %551 = vst [vmem:[%s1018_s4 + $0x18] sm:$0xff] %v547_v47 }
 0x11b   : > { %549 = vst [vmem:[%s1018_s4 + $0x8] sm:$0xff] %v545_v45 }
 0x11c PF: > { %s14_s19 = sadd.s32 1, %s827_s19   ;;  %s1019_s15 = smov %s815_s16 }
 0x11d   : > { %p11_p12 = scmp.ge.s32.totalorder %s14_s19, 7   ;;  %s1020_s16 = smov %s890_s23 }
 0x11e   : > { %s1021_s17 = smov %s823_s18  ;;  %s1022_s18 = smov %s1024_s20 }
 0x11f   :  { %13 = sbr.rel (!%p11_p12) target bundleno = 3 (0x3), region = 129 }

// kernel: beyond_the_spectrum_forward.50
= control target key start
LH: loop header
LB: loop body
LE: loop exit
PB: predicated region body
PF: predicated region fallthrough
CT: control target
= control target key end

     0   :  { %s763_s12 = smov 0   ;;  %s765_s13 = smov 0   ;;  %s910_s0 = inlined_call_operand.vmem [shape: bf16[32,640], index: 0, kind: input, shape index: {}]   ;;  %s911_s1 = inlined_call_operand.vmem [shape: bf16[640,128], index: 1, kind: input, shape index: {}]   ;;  %s912_s2 = inlined_call_operand.vmem [shape: f32[1,128], index: 2, kind: input, shape index: {}]   ;;  %s913_s3 = inlined_call_operand.vmem [shape: f32[32,128], index: 3, kind: output, shape index: {}]  }
   0x1   :  { %s767_s14 = smov 0   ;;  %s769_s15 = smov 0  }
   0x2   :  { %s771_s16 = smov 0  }
   0x3 LB: > { %s25_s17 = sadd.s32 1, %s736_s15  ;;  %p48_p1 = scmp.ne.s32.totalorder %s728_s13, %s724_s12  ;;  %s740_s16 = sphi %s771_s16, %s13_s16   ;;  %s736_s15 = sphi %s769_s15, %s917_s15   ;;  %s732_s14 = sphi %s767_s14, %s916_s14   ;;  %s728_s13 = sphi %s765_s13, %s915_s13   ;;  %s724_s12 = sphi %s763_s12, %s914_s12  }
   0x4   : > { %p26_p0 = scmp.ge.s32.totalorder %s25_s17, 5  ;;  %p49_p2 = scmp.eq.s32.totalorder %s740_s16, 0 }
   0x5   : > { %s41_s19 = sadd.s32 1, %s728_s13  ;;  %p597_p5 = scmp.ge.s32.totalorder %s740_s16, 5 }
   0x6   : > { %s919_s17 = smov (%p26_p0, %s25_s17), 0  ;;  %p50_p3 = por %p49_p2, %p48_p1 }
   0x7   : > { %s37_s18 = ssub.s32 %s736_s15, %s919_s17  ;;  %162 = sbr.rel (%p597_p5) target bundleno = 18 (0x12), region = 20 }
   0x8   : > { %p39_p4 = scmp.eq.s32.totalorder %s37_s18, 0 }
   0xa   : > { %s798_s20 = scalar_select %p39_p4, %s728_s13, %s41_s19  }
   0xc   : > { %165 = sbr.rel (!%p50_p3) target bundleno = 18 (0x12), region = 24  ;;  %s167_s21 = sand.u32 (%p50_p3), 1, %s728_s13  }
   0xd   : > { %s599_s22 = sshll.u32 (%p50_p3), %s736_s15, 2  ;;  %s598_s23 = sshll.u32 (%p50_p3), %s167_s21, 4 }
   0xe   : > { %s174_s26 = scalar_lea.vmem (%p50_p3), %s910_s0, %s599_s22  ;;  %s169_s27 = scalar_lea.vmem (%p50_p3), [#allocation2], %s598_s23 }
   0xf   : > { %v191_v0 = vld [vmem:[%s174_s26] sm:$0xf] (%p50_p3)  ;;  %v193_v1 = vld [vmem:[%s174_s26 + $0x14] sm:$0xf] (%p50_p3)  ;;  %v195_v2 = vld [vmem:[%s174_s26 + $0x28] sm:$0xf] (%p50_p3) }
  0x10   : > { %192 = vst [vmem:[%s169_s27] sm:$0xf] (%p50_p3), %v191_v0  ;;  %194 = vst [vmem:[%s169_s27 + $0x4] sm:$0xf] (%p50_p3), %v193_v1  ;;  %v197_v3 = vld [vmem:[%s174_s26 + $0x3c] sm:$0xf] (%p50_p3) }
  0x11   : > { %196 = vst [vmem:[%s169_s27 + $0x8] sm:$0xf] %v195_v2  ;;  %198 = vst [vmem:[%s169_s27 + $0xc] sm:$0xf] %v197_v3 }
  0x12 PF: > { %p600_p6 = scmp.ge.s32.totalorder %s740_s16, 1  ;;  %p241_p7 = scmp.lt.s32.totalorder %s740_s16, 6 }
  0x14   : > { %p242_p8 = pnand %p600_p6, %p241_p7 }
  0x15   : > { %s248_s28 = sand.u32 (!%p242_p8), 1, %s724_s12   ;;  %s602_s29 = sshll.u32 (!%p242_p8), %s732_s14, 4 }
  0x16   : > { %245 = sbr.rel (%p242_p8) target bundleno = 282 (0x11a), region = 69  ;;  %s810_s30 = sshll.u32 (!%p242_p8), %s248_s28, 4 }
  0x17   : > { %p287_p9 = scmp.lt.s32.totalorder (!%p242_p8), %s602_s29, 79  ;;  %s250_s8 = scalar_lea.vmem (!%p242_p8), [#allocation2], %s810_s30 }
  0x18   : > { %p604_p10 = scmp.ne.s32.totalorder (!%p242_p8), %s732_s14, 0 }
  0x1b   : > { %s921_s29 = smov (!%p287_p9, %s602_s29), 79  ;;  %311 = sbr.rel (%p604_p10) target bundleno = 35 (0x23), region = 77 }
  0x1c   : > { %s603_s4 = sshll.u32 %s921_s29, 2 }
  0x1d   : > { %s815_s7 = scalar_lea.vmem %s911_s1, %s603_s4 }
  0x20   : > { %v742_v4 = vmov 0.0  }
  0x21   : > { %312 = vst [vmem:[%s913_s3] sm:$0xff] %v742_v4  ;;  %313 = vst [vmem:[%s913_s3 + $0x8] sm:$0xff] %v742_v4 }
  0x22   : > { %314 = vst [vmem:[%s913_s3 + $0x10] sm:$0xff] %v742_v4  ;;  %315 = vst [vmem:[%s913_s3 + $0x18] sm:$0xff] %v742_v4 }
  0x23 PF: > { %v692_v5 = vld [vmem:[%s815_s7 + $0x38] sm:$0xff]   ;;  %v693_v6 = vld [vmem:[%s815_s7 + $0x30] sm:$0xff]   ;;  %v694_v7 = vld [vmem:[%s815_s7 + $0x28] sm:$0xff]   ;;  %p615_p11 = scmp.ne.s32.totalorder %s732_s14, 4 }
  0x24   : > { %631 = vmatprep.subr.bf16.mxu0 %v692_v5  ;;  %v695_v8 = vld [vmem:[%s815_s7 + $0x20] sm:$0xff]   ;;  %v696_v10 = vld [vmem:[%s815_s7 + $0x18] sm:$0xff]   ;;  %v697_v11 = vld [vmem:[%s815_s7 + $0x10] sm:$0xff]  }
  0x25   : > { %632 = vmatpush3.bf16.msra.mxu0 %v692_v5  ;;  %v700_v9 = vld [vmem:[%s250_s8] sm:$0xff]   ;;  %v698_v12 = vld [vmem:[%s815_s7 + $0x8] sm:$0xff]  }
  0x26   : > { %633 = vmatprep.subr.bf16.mxu0 %v693_v6  ;;  %647 = vmatprep.mubr.bf16.mxu0 %v700_v9  ;;  %v699_v13 = vld [vmem:[%s815_s7] sm:$0xff]   ;;  %v701_v14 = vld [vmem:[%s250_s8 + $0x8] sm:$0xff]  }
  0x28   : > { %v316_v17 = vld [vmem:[%s913_s3] sm:$0xff]  ;;  %v317_v23 = vld [vmem:[%s913_s3 + $0x8] sm:$0xff] }
  0x29   : > { %634 = vmatpush3.bf16.msra.mxu0 %v693_v6  ;;  %v318_v15 = vld [vmem:[%s913_s3 + $0x10] sm:$0xff]  ;;  %v319_v20 = vld [vmem:[%s913_s3 + $0x18] sm:$0xff] }
  0x2a   : > { %635 = vmatprep.subr.bf16.mxu0 %v694_v7 }
  0x2d   : > { %636 = vmatpush3.bf16.msra.mxu0 %v694_v7 }
  0x2e   : > { %637 = vmatprep.subr.bf16.mxu0 %v695_v8 }
  0x31   : > { %638 = vmatpush3.bf16.msra.mxu0 %v695_v8 }
  0x32   : > { %639 = vmatprep.subr.bf16.mxu0 %v696_v10 }
  0x35   : > { %640 = vmatpush3.bf16.msra.mxu0 %v696_v10 }
  0x36   : > { %641 = vmatprep.subr.bf16.mxu0 %v697_v11 }
  0x39   : > { %642 = vmatpush3.bf16.msra.mxu0 %v697_v11 }
  0x3a   : > { %643 = vmatprep.subr.bf16.mxu0 %v698_v12 }
  0x3d   : > { %644 = vmatpush3.bf16.msra.mxu0 %v698_v12 }
  0x3e   : > { %645 = vmatprep.subr.bf16.mxu0 %v699_v13 }
  0x41   : > { %646 = vmatpush3.bf16.msra.mxu0 %v699_v13 }
  0x44   : > { %648 = vmatmul.mubr.bf16.vlgmr.msra.gmra.mxu0 %v701_v14 }
 0x104   : > { %v649_v16 = vpop.f32.mrf.mxu0 }
 0x105   : > { %v451_v18 = vadd.f32 %v649_v16, %v318_v15 }
 0x106   : > { %v434_v19 = vpop.f32.mrf.mxu0 }
 0x107   : > { %455 = vst [vmem:[%s913_s3 + $0x10] sm:$0xff] %v451_v18  ;;  %v449_v21 = vadd.f32 %v434_v19, %v316_v17 }
 0x108   : > { %v650_v22 = vpop.f32.mrf.mxu0 }
 0x109   : > { %453 = vst [vmem:[%s913_s3] sm:$0xff] %v449_v21  ;;  %v452_v24 = vadd.f32 %v650_v22, %v319_v20  ;;  %460 = sbr.rel (%p615_p11) target bundleno = 282 (0x11a), region = 81 }
 0x10a   : > { %v437_v25 = vpop.f32.mrf.mxu0 }
 0x10b   : > { %456 = vst [vmem:[%s913_s3 + $0x18] sm:$0xff] %v452_v24  ;;  %v450_v26 = vadd.f32 %v437_v25, %v317_v23 }
 0x10d   : > { %454 = vst [vmem:[%s913_s3 + $0x8] sm:$0xff] %v450_v26 }
 0x10e   : > { %v616_v28 = vld [vmem:[%s912_s2] ss:$0 sm:$0xff]  ;;  %v463_v32 = vld [vmem:[%s913_s3 + $0x10] sm:$0xff] }
 0x10f   : > { %v474_v34 = vadd.f32 %v616_v28, %v463_v32 }
 0x110   : > { %v461_v27 = vld [vmem:[%s913_s3] sm:$0xff] }
 0x111   : > { %v472_v30 = vadd.f32 %v616_v28, %v461_v27  ;;  %v478_v38 = vmax.f32 %v474_v34, 0.0 }
 0x112   : > { %v464_v33 = vld [vmem:[%s913_s3 + $0x18] sm:$0xff] }
 0x113   : > { %v475_v35 = vadd.f32 %v616_v28, %v464_v33  ;;  %v476_v36 = vmax.f32 %v472_v30, 0.0  ;;  %482 = vst [vmem:[%s913_s3 + $0x10] sm:$0xff] %v478_v38 }
 0x114   : > { %v462_v29 = vld [vmem:[%s913_s3 + $0x8] sm:$0xff] }
 0x115   : > { %v473_v31 = vadd.f32 %v616_v28, %v462_v29  ;;  %v479_v39 = vmax.f32 %v475_v35, 0.0  ;;  %480 = vst [vmem:[%s913_s3] sm:$0xff] %v476_v36 }
 0x117   : > { %v477_v37 = vmax.f32 %v473_v31, 0.0  ;;  %483 = vst [vmem:[%s913_s3 + $0x18] sm:$0xff] %v479_v39 }
 0x119   : > { %481 = vst [vmem:[%s913_s3 + $0x8] sm:$0xff] %v477_v37 }
 0x11a PF: > { %s13_s16 = sadd.s32 1, %s740_s16   ;;  %s914_s12 = smov %s728_s13 }
 0x11b   : > { %p10_p12 = scmp.ge.s32.totalorder %s13_s16, 7   ;;  %s915_s13 = smov %s798_s20 }
 0x11c   : > { %s916_s14 = smov %s736_s15  ;;  %s917_s15 = smov %s919_s17 }
 0x11d   :  { %12 = sbr.rel (!%p10_p12) target bundleno = 3 (0x3), region = 122 }

// kernel: beyond_the_spectrum_forward.54
= control target key start
LH: loop header
LB: loop body
LE: loop exit
PB: predicated region body
PF: predicated region fallthrough
CT: control target
= control target key end

     0   :  { %s724_s12 = smov 0   ;;  %s726_s13 = smov 0   ;;  %s839_s0 = inlined_call_operand.vmem [shape: bf16[16,640], index: 0, kind: input, shape index: {}]   ;;  %s840_s1 = inlined_call_operand.vmem [shape: bf16[640,128], index: 1, kind: input, shape index: {}]   ;;  %s841_s2 = inlined_call_operand.vmem [shape: f32[1,128], index: 2, kind: input, shape index: {}]   ;;  %s842_s3 = inlined_call_operand.vmem [shape: f32[16,128], index: 3, kind: output, shape index: {}]  }
   0x1   :  { %s728_s14 = smov 0   ;;  %s730_s15 = smov 0  }
   0x2   :  { %s732_s16 = smov 0  }
   0x3 LB: > { %s25_s17 = sadd.s32 1, %s695_s15  ;;  %p48_p1 = scmp.ne.s32.totalorder %s687_s13, %s683_s12  ;;  %s699_s16 = sphi %s732_s16, %s13_s16   ;;  %s695_s15 = sphi %s730_s15, %s846_s15   ;;  %s691_s14 = sphi %s728_s14, %s845_s14   ;;  %s687_s13 = sphi %s726_s13, %s844_s13   ;;  %s683_s12 = sphi %s724_s12, %s843_s12  }
   0x4   : > { %p26_p0 = scmp.ge.s32.totalorder %s25_s17, 5  ;;  %p49_p2 = scmp.eq.s32.totalorder %s699_s16, 0 }
   0x5   : > { %s41_s19 = sadd.s32 1, %s687_s13  ;;  %p557_p5 = scmp.ge.s32.totalorder %s699_s16, 5 }
   0x6   : > { %s848_s17 = smov (%p26_p0, %s25_s17), 0  ;;  %p50_p3 = por %p49_p2, %p48_p1 }
   0x7   : > { %s37_s18 = ssub.s32 %s695_s15, %s848_s17  ;;  %162 = sbr.rel (%p557_p5) target bundleno = 17 (0x11), region = 20 }
   0x8   : > { %p39_p4 = scmp.eq.s32.totalorder %s37_s18, 0 }
   0xa   : > { %s759_s20 = scalar_select %p39_p4, %s687_s13, %s41_s19  }
   0xc   : > { %165 = sbr.rel (!%p50_p3) target bundleno = 17 (0x11), region = 24  ;;  %s167_s21 = sand.u32 (%p50_p3), 1, %s687_s13  }
   0xd   : > { %s559_s22 = sshll.u32 (%p50_p3), %s695_s15, 2  ;;  %s558_s23 = sshll.u32 (%p50_p3), %s167_s21, 3 }
   0xe   : > { %s174_s26 = scalar_lea.vmem (%p50_p3), %s839_s0, %s559_s22  ;;  %s169_s27 = scalar_lea.vmem (%p50_p3), [#allocation2], %s558_s23 }
   0xf   : > { %v191_v0 = vld [vmem:[%s174_s26] sm:$0xf] (%p50_p3)  ;;  %v193_v1 = vld [vmem:[%s174_s26 + $0x14] sm:$0xf] (%p50_p3) }
  0x10   : > { %192 = vst [vmem:[%s169_s27] sm:$0xf] (%p50_p3), %v191_v0  ;;  %194 = vst [vmem:[%s169_s27 + $0x4] sm:$0xf] (%p50_p3), %v193_v1 }
  0x11 PF: > { %p560_p6 = scmp.ge.s32.totalorder %s699_s16, 1  ;;  %p233_p7 = scmp.lt.s32.totalorder %s699_s16, 6 }
  0x13   : > { %p234_p8 = pnand %p560_p6, %p233_p7 }
  0x14   : > { %s240_s28 = sand.u32 (!%p234_p8), 1, %s683_s12   ;;  %s562_s29 = sshll.u32 (!%p234_p8), %s691_s14, 4 }
  0x15   : > { %237 = sbr.rel (%p234_p8) target bundleno = 278 (0x116), region = 69  ;;  %s771_s30 = sshll.u32 (!%p234_p8), %s240_s28, 3 }
  0x16   : > { %p279_p9 = scmp.lt.s32.totalorder (!%p234_p8), %s562_s29, 79  ;;  %s242_s8 = scalar_lea.vmem (!%p234_p8), [#allocation2], %s771_s30 }
  0x17   : > { %p564_p10 = scmp.ne.s32.totalorder (!%p234_p8), %s691_s14, 0 }
  0x1a   : > { %s850_s29 = smov (!%p279_p9, %s562_s29), 79  ;;  %303 = sbr.rel (%p564_p10) target bundleno = 33 (0x21), region = 77 }
  0x1b   : > { %s563_s4 = sshll.u32 %s850_s29, 2 }
  0x1c   : > { %s776_s7 = scalar_lea.vmem %s840_s1, %s563_s4 }
  0x1f   : > { %v701_v2 = vmov 0.0  }
  0x20   : > { %304 = vst [vmem:[%s842_s3] sm:$0xff] %v701_v2  ;;  %305 = vst [vmem:[%s842_s3 + $0x8] sm:$0xff] %v701_v2 }
  0x21 PF: > { %v652_v3 = vld [vmem:[%s776_s7 + $0x38] sm:$0xff]   ;;  %v702_v4 = vmov 0.0   ;;  %v653_v5 = vld [vmem:[%s776_s7 + $0x30] sm:$0xff]   ;;  %vm703_vm0 = vmmov 0   ;;  %v654_v6 = vld [vmem:[%s776_s7 + $0x28] sm:$0xff]   ;;  %p574_p11 = scmp.ne.s32.totalorder %s691_s14, 4 }
  0x22   : > { %589 = vmatprep.subr.bf16.mxu0 %v702_v4  ;;  %605 = vmatprep.mubr.msk.bf16.mxu0 %vm703_vm0, %v702_v4  ;;  %v655_v7 = vld [vmem:[%s776_s7 + $0x20] sm:$0xff]   ;;  %v656_v8 = vld [vmem:[%s776_s7 + $0x18] sm:$0xff]   ;;  %v657_v9 = vld [vmem:[%s776_s7 + $0x10] sm:$0xff]  }
  0x23   : > { %590 = vmatpush3.bf16.msra.mxu0 %v652_v3  ;;  %v658_v10 = vld [vmem:[%s776_s7 + $0x8] sm:$0xff]   ;;  %v659_v11 = vld [vmem:[%s776_s7] sm:$0xff]  }
  0x24   : > { %591 = vmatprep.subr.bf16.mxu0 %v702_v4  ;;  %v660_v12 = vld [vmem:[%s242_s8] sm:$0xff]  }
  0x27   : > { %592 = vmatpush3.bf16.msra.mxu0 %v653_v5  ;;  %v306_v13 = vld [vmem:[%s842_s3] sm:$0xff]  ;;  %v307_v17 = vld [vmem:[%s842_s3 + $0x8] sm:$0xff] }
  0x28   : > { %593 = vmatprep.subr.bf16.mxu0 %v702_v4 }
  0x2b   : > { %594 = vmatpush3.bf16.msra.mxu0 %v654_v6 }
  0x2c   : > { %595 = vmatprep.subr.bf16.mxu0 %v702_v4 }
  0x2f   : > { %596 = vmatpush3.bf16.msra.mxu0 %v655_v7 }
  0x30   : > { %597 = vmatprep.subr.bf16.mxu0 %v702_v4 }
  0x33   : > { %598 = vmatpush3.bf16.msra.mxu0 %v656_v8 }
  0x34   : > { %599 = vmatprep.subr.bf16.mxu0 %v702_v4 }
  0x37   : > { %600 = vmatpush3.bf16.msra.mxu0 %v657_v9 }
  0x38   : > { %601 = vmatprep.subr.bf16.mxu0 %v702_v4 }
  0x3b   : > { %602 = vmatpush3.bf16.msra.mxu0 %v658_v10 }
  0x3c   : > { %603 = vmatprep.subr.bf16.mxu0 %v702_v4 }
  0x3f   : > { %604 = vmatpush3.bf16.msra.mxu0 %v659_v11 }
  0x42   : > { %606 = vmatmul.mubr.bf16.vlgmr.msra.gmra.mxu0 %v660_v12 }
 0x102   : > { %v414_v14 = vpop.f32.mrf.mxu0 }
 0x103   : > { %v421_v15 = vadd.f32 %v414_v14, %v306_v13 }
 0x104   : > { %v607_v16 = vpop.f32.mrf.mxu0 }
 0x105   : > { %423 = vst [vmem:[%s842_s3] sm:$0xff] %v421_v15  ;;  %428 = sbr.rel (%p574_p11) target bundleno = 278 (0x116), region = 81 }
 0x106   : > { %v417_v18 = vpop.f32.mrf.mxu0 }
 0x107   : > { %v422_v19 = vadd.f32 %v417_v18, %v307_v17 }
 0x108   : > { %v608_v20 = vpop.f32.mrf.mxu0 }
 0x109   : > { %424 = vst [vmem:[%s842_s3 + $0x8] sm:$0xff] %v422_v19 }
 0x10a   : > { %v575_v22 = vld [vmem:[%s841_s2] ss:$0 sm:$0xff] }
 0x10c   : > { %v429_v21 = vld [vmem:[%s842_s3] sm:$0xff] }
 0x10d   : > { %v438_v24 = vadd.f32 %v575_v22, %v429_v21 }
 0x10f   : > { %v440_v26 = vmax.f32 %v438_v24, 0.0 }
 0x110   : > { %v430_v23 = vld [vmem:[%s842_s3 + $0x8] sm:$0xff] }
 0x111   : > { %v439_v25 = vadd.f32 %v575_v22, %v430_v23  ;;  %442 = vst [vmem:[%s842_s3] sm:$0xff] %v440_v26 }
 0x113   : > { %v441_v27 = vmax.f32 %v439_v25, 0.0 }
 0x115   : > { %443 = vst [vmem:[%s842_s3 + $0x8] sm:$0xff] %v441_v27 }
 0x116 PF: > { %s13_s16 = sadd.s32 1, %s699_s16   ;;  %s843_s12 = smov %s687_s13 }
 0x117   : > { %p10_p12 = scmp.ge.s32.totalorder %s13_s16, 7   ;;  %s844_s13 = smov %s759_s20 }
 0x118   : > { %s845_s14 = smov %s695_s15  ;;  %s846_s15 = smov %s848_s17 }
 0x119   :  { %12 = sbr.rel (!%p10_p12) target bundleno = 3 (0x3), region = 122 }

// kernel: beyond_the_spectrum_forward.55
= control target key start
LH: loop header
LB: loop body
LE: loop exit
PB: predicated region body
PF: predicated region fallthrough
CT: control target
= control target key end

     0   :  { %v210_v0 = vmov 0.0   ;;  %vm211_vm0 = vmmov 0   ;;  %s268_s1 = inlined_call_operand.vmem [shape: bf16[128,128], index: 1, kind: input, shape index: {}]   ;;  %s269_s0 = inlined_call_operand.vmem [shape: bf16[16,128], index: 0, kind: input, shape index: {}]   ;;  %s270_s2 = inlined_call_operand.vmem [shape: f32[1,128], index: 2, kind: input, shape index: {}]   ;;  %s271_s3 = inlined_call_operand.vmem [shape: f32[16,128], index: 3, kind: output, shape index: {}]  }
   0x1   :  { %179 = vmatprep.subr.bf16.mxu0 %v210_v0  ;;  %v201_v1 = vld [vmem:[%s268_s1 + $0x38] sm:$0xff]   ;;  %195 = vmatprep.mubr.msk.bf16.mxu0 %vm211_vm0, %v210_v0  ;;  %v202_v2 = vld [vmem:[%s268_s1 + $0x30] sm:$0xff]   ;;  %v203_v3 = vld [vmem:[%s268_s1 + $0x28] sm:$0xff]  }
   0x2   :  { %180 = vmatpush3.bf16.msra.mxu0 %v201_v1  ;;  %v204_v4 = vld [vmem:[%s268_s1 + $0x20] sm:$0xff]   ;;  %v205_v5 = vld [vmem:[%s268_s1 + $0x18] sm:$0xff]   ;;  %v206_v6 = vld [vmem:[%s268_s1 + $0x10] sm:$0xff]  }
   0x3   :  { %181 = vmatprep.subr.bf16.mxu0 %v210_v0  ;;  %v207_v7 = vld [vmem:[%s268_s1 + $0x8] sm:$0xff]   ;;  %v208_v8 = vld [vmem:[%s268_s1] sm:$0xff]  }
   0x4   :  { %v209_v9 = vld [vmem:[%s269_s0] sm:$0xff]  }
   0x5   :  { %v169_v11 = vld [vmem:[%s270_s2] ss:$0 sm:$0xff] }
   0x6   :  { %182 = vmatpush3.bf16.msra.mxu0 %v202_v2 }
   0x7   :  { %183 = vmatprep.subr.bf16.mxu0 %v210_v0 }
   0xa   :  { %184 = vmatpush3.bf16.msra.mxu0 %v203_v3 }
   0xb   :  { %185 = vmatprep.subr.bf16.mxu0 %v210_v0 }
   0xe   :  { %186 = vmatpush3.bf16.msra.mxu0 %v204_v4 }
   0xf   :  { %187 = vmatprep.subr.bf16.mxu0 %v210_v0 }
  0x12   :  { %188 = vmatpush3.bf16.msra.mxu0 %v205_v5 }
  0x13   :  { %189 = vmatprep.subr.bf16.mxu0 %v210_v0 }
  0x16   :  { %190 = vmatpush3.bf16.msra.mxu0 %v206_v6 }
  0x17   :  { %191 = vmatprep.subr.bf16.mxu0 %v210_v0 }
  0x1a   :  { %192 = vmatpush3.bf16.msra.mxu0 %v207_v7 }
  0x1b   :  { %193 = vmatprep.subr.bf16.mxu0 %v210_v0 }
  0x1e   :  { %194 = vmatpush3.bf16.msra.mxu0 %v208_v8 }
  0x21   :  { %196 = vmatmul.mubr.bf16.vlgmr.msra.gmra.mxu0 %v209_v9 }
  0xe1   :  { %v129_v10 = vpop.f32.mrf.mxu0 }
  0xe2   :  { %v152_v13 = vadd.f32 %v169_v11, %v129_v10 }
  0xe3   :  { %v197_v12 = vpop.f32.mrf.mxu0 }
  0xe4   :  { %154 = vst [vmem:[%s271_s3] sm:$0xff] %v152_v13 }
  0xe5   :  { %v132_v14 = vpop.f32.mrf.mxu0 }
  0xe6   :  { %v153_v16 = vadd.f32 %v169_v11, %v132_v14 }
  0xe7   :  { %v198_v15 = vpop.f32.mrf.mxu0 }
  0xe8   :  { %155 = vst [vmem:[%s271_s3 + $0x8] sm:$0xff] %v153_v16 }

// kernel: beyond_the_spectrum_forward.56
= control target key start
LH: loop header
LB: loop body
LE: loop exit
PB: predicated region body
PF: predicated region fallthrough
CT: control target
= control target key end

     0   :  { %s1051_s15 = smov 0   ;;  %s1053_s16 = smov 0   ;;  %s1188_s0 = inlined_call_operand.vmem [shape: bf16[16,1152], index: 0, kind: input, shape index: {}]   ;;  %s1189_s1 = inlined_call_operand.vmem [shape: bf16[1152,128], index: 1, kind: input, shape index: {}]   ;;  %s1190_s2 = inlined_call_operand.vmem [shape: f32[1,128], index: 2, kind: input, shape index: {}]   ;;  %s1191_s3 = inlined_call_operand.vmem [shape: f32[16,128], index: 3, kind: input, shape index: {}]   ;;  %s1192_s4 = inlined_call_operand.vmem [shape: f32[16,128], index: 4, kind: output, shape index: {}]  }
   0x1   :  { %s1055_s17 = smov 0   ;;  %s1057_s18 = smov 0  }
   0x2   :  { %s1059_s19 = smov 0  }
   0x3 LB: > { %s26_s20 = sadd.s32 1, %s1017_s18  ;;  %p49_p1 = scmp.ne.s32.totalorder %s1009_s16, %s1005_s15  ;;  %s1021_s19 = sphi %s1059_s19, %s14_s19   ;;  %s1017_s18 = sphi %s1057_s18, %s1196_s18   ;;  %s1013_s17 = sphi %s1055_s17, %s1195_s17   ;;  %s1009_s16 = sphi %s1053_s16, %s1194_s16   ;;  %s1005_s15 = sphi %s1051_s15, %s1193_s15  }
   0x4   : > { %p27_p0 = scmp.ge.s32.totalorder %s26_s20, 3  ;;  %p50_p2 = scmp.eq.s32.totalorder %s1021_s19, 0 }
   0x5   : > { %s42_s22 = sadd.s32 1, %s1009_s16  ;;  %p816_p5 = scmp.ge.s32.totalorder %s1021_s19, 3 }
   0x6   : > { %s1198_s20 = smov (%p27_p0, %s26_s20), 0  ;;  %p51_p3 = por %p50_p2, %p49_p1 }
   0x7   : > { %s38_s21 = ssub.s32 %s1017_s18, %s1198_s20  ;;  %203 = sbr.rel (%p816_p5) target bundleno = 19 (0x13), region = 24 }
   0x8   : > { %p40_p4 = scmp.eq.s32.totalorder %s38_s21, 0 }
   0xa   : > { %s1086_s23 = scalar_select %p40_p4, %s1009_s16, %s42_s22  }
   0xc   : > { %206 = sbr.rel (!%p51_p3) target bundleno = 19 (0x13), region = 28  ;;  %s208_s24 = sand.u32 (%p51_p3), 1, %s1009_s16  }
   0xd   : > { %s858_s25 = smul.u32 (%p51_p3), 12, %s1017_s18 }
   0xe   : > { %s910_s26 = smul.u32 (%p51_p3), 24, %s208_s24 }
   0xf   : > { %s216_s29 = scalar_lea.vmem (%p51_p3), %s1188_s0, %s858_s25 }
  0x10   : > { %v231_v0 = vld [vmem:[%s216_s29] sm:$0xff] (%p51_p3)  ;;  %v818_v2 = vld [vmem:[%s216_s29 + $0x8] sm:$0xf] (%p51_p3)  ;;  %s210_s30 = scalar_lea.vmem (%p51_p3), [#allocation2], %s910_s26  ;;  %v820_v3 = vld [vmem:[%s216_s29 + $0x2c] sm:$0xf] (%p51_p3) }
  0x11   : > { %v233_v1 = vld [vmem:[%s216_s29 + $0x24] sm:$0xff]  ;;  %232 = vst [vmem:[%s210_s30] sm:$0xff] %v231_v0  ;;  %819 = vst [vmem:[%s210_s30 + $0x8] sm:$0xf] %v818_v2 }
  0x12   : > { %234 = vst [vmem:[%s210_s30 + $0xc] sm:$0xff] %v233_v1  ;;  %821 = vst [vmem:[%s210_s30 + $0x14] sm:$0xf] %v820_v3 }
  0x13 PF: > { %p822_p6 = scmp.ge.s32.totalorder %s1021_s19, 1  ;;  %p263_p7 = scmp.lt.s32.totalorder %s1021_s19, 4 }
  0x15   : > { %p264_p8 = pnand %p822_p6, %p263_p7 }
  0x16   : > { %s270_s5 = sand.u32 (!%p264_p8), 1, %s1005_s15   ;;  %s319_s6 = smul.u32 (!%p264_p8), 48, %s1013_s17 }
  0x17   : > { %267 = sbr.rel (%p264_p8) target bundleno = 289 (0x121), region = 58  ;;  %p824_p10 = scmp.ne.s32.totalorder (!%p264_p8), %s1013_s17, 0 }
  0x18   : > { %s911_s7 = smul.u32 (!%p264_p8), 24, %s270_s5  ;;  %p320_p9 = scmp.lt.s32.totalorder (!%p264_p8), %s319_s6, 143 }
  0x1a   : > { %s1103_s12 = scalar_lea.vmem (!%p264_p8), [#allocation2], %s911_s7 }
  0x1c   : > { %s1200_s6 = smov (!%p320_p9, %s319_s6), 143  ;;  %353 = sbr.rel (%p824_p10) target bundleno = 35 (0x23), region = 66 }
  0x1d   : > { %s823_s8 = sshll.u32 %s1200_s6, 2 }
  0x1e   : > { %s1101_s11 = scalar_lea.vmem %s1189_s1, %s823_s8 }
  0x21   : > { %v1023_v4 = vmov 0.0  }
  0x22   : > { %354 = vst [vmem:[%s1192_s4] sm:$0xff] %v1023_v4  ;;  %355 = vst [vmem:[%s1192_s4 + $0x8] sm:$0xff] %v1023_v4 }
  0x23 PF: > { %v955_v5 = vld [vmem:[%s1101_s11 + $0x78] sm:$0xff]   ;;  %v1024_v6 = vmov 0.0   ;;  %vm1025_vm0 = vmmov 0   ;;  %v958_v9 = vld [vmem:[%s1101_s11 + $0x70] sm:$0xff]   ;;  %v961_v12 = vld [vmem:[%s1101_s11 + $0x68] sm:$0xff]   ;;  %p852_p11 = scmp.ne.s32.totalorder %s1013_s17, 2 }
  0x24   : > { %890 = vmatprep.subr.bf16.mxu1 %v1024_v6  ;;  %v956_v7 = vld [vmem:[%s1101_s11 + $0xb8] sm:$0xff]   ;;  %859 = vmatprep.subr.bf16.mxu0 %v955_v5  ;;  %v959_v10 = vld [vmem:[%s1101_s11 + $0xb0] sm:$0xff]   ;;  %v962_v13 = vld [vmem:[%s1101_s11 + $0xa8] sm:$0xff]  }
  0x25   : > { %v957_v8 = vld [vmem:[%s1101_s11 + $0x38] sm:$0xff]   ;;  %906 = vmatprep.mubr.msk.bf16.mxu1 %vm1025_vm0, %v1024_v6  ;;  %891 = vmatpush3.bf16.msra.mxu1 %v956_v7  ;;  %v960_v11 = vld [vmem:[%s1101_s11 + $0x30] sm:$0xff]   ;;  %v963_v14 = vld [vmem:[%s1101_s11 + $0x28] sm:$0xff]  }
  0x26   : > { %860 = vmatpush3.bf16.msra.mxu0 %v957_v8  ;;  %892 = vmatprep.subr.bf16.mxu1 %v1024_v6  ;;  %v964_v15 = vld [vmem:[%s1101_s11 + $0x60] sm:$0xff]   ;;  %v967_v18 = vld [vmem:[%s1101_s11 + $0x58] sm:$0xff]   ;;  %v970_v21 = vld [vmem:[%s1101_s11 + $0x50] sm:$0xff]  }
  0x27   : > { %861 = vmatprep.subr.bf16.mxu0 %v958_v9  ;;  %v965_v16 = vld [vmem:[%s1101_s11 + $0xa0] sm:$0xff]   ;;  %v968_v19 = vld [vmem:[%s1101_s11 + $0x98] sm:$0xff]   ;;  %v971_v22 = vld [vmem:[%s1101_s11 + $0x90] sm:$0xff]  }
  0x28   : > { %v966_v17 = vld [vmem:[%s1101_s11 + $0x20] sm:$0xff]   ;;  %v969_v20 = vld [vmem:[%s1101_s11 + $0x18] sm:$0xff]   ;;  %v972_v23 = vld [vmem:[%s1101_s11 + $0x10] sm:$0xff]  }
  0x29   : > { %893 = vmatpush3.bf16.msra.mxu1 %v959_v10  ;;  %v973_v24 = vld [vmem:[%s1101_s11 + $0x48] sm:$0xff]   ;;  %v976_v27 = vld [vmem:[%s1101_s11 + $0x40] sm:$0xff]  }
  0x2a   : > { %862 = vmatpush3.bf16.msra.mxu0 %v960_v11  ;;  %894 = vmatprep.subr.bf16.mxu1 %v1024_v6  ;;  %v974_v25 = vld [vmem:[%s1101_s11 + $0x88] sm:$0xff]   ;;  %v977_v29 = vld [vmem:[%s1101_s11 + $0x80] sm:$0xff]  }
  0x2b   : > { %863 = vmatprep.subr.bf16.mxu0 %v961_v12  ;;  %v975_v26 = vld [vmem:[%s1101_s11 + $0x8] sm:$0xff]   ;;  %v978_v30 = vld [vmem:[%s1101_s11] sm:$0xff]  }
  0x2c   : > { %v981_v28 = vld [vmem:[%s1103_s12 + $0x4] ss:$12 sps:$4 sm:$0xff]   ;;  %v982_v31 = vld [vmem:[%s1103_s12 + $0x8] ss:$12 sps:$4 sm:$0xff]   ;;  %v979_v32 = vld [vmem:[%s1103_s12] ss:$12 sps:$4 sm:$0xff]  }
  0x2d   : > { %895 = vmatpush3.bf16.msra.mxu1 %v962_v13  ;;  %602 = vmatprep.mubr.bf16.mxu0 %v981_v28  ;;  %v356_v39 = vld [vmem:[%s1192_s4] sm:$0xff]  ;;  %v357_v46 = vld [vmem:[%s1192_s4 + $0x8] sm:$0xff] }
  0x2e   : > { %864 = vmatpush3.bf16.msra.mxu0 %v963_v14  ;;  %896 = vmatprep.subr.bf16.mxu1 %v1024_v6 }
  0x2f   : > { %865 = vmatprep.subr.bf16.mxu0 %v964_v15 }
  0x31   : > { %897 = vmatpush3.bf16.msra.mxu1 %v965_v16 }
  0x32   : > { %866 = vmatpush3.bf16.msra.mxu0 %v966_v17  ;;  %898 = vmatprep.subr.bf16.mxu1 %v1024_v6 }
  0x33   : > { %867 = vmatprep.subr.bf16.mxu0 %v967_v18 }
  0x35   : > { %899 = vmatpush3.bf16.msra.mxu1 %v968_v19 }
  0x36   : > { %868 = vmatpush3.bf16.msra.mxu0 %v969_v20  ;;  %900 = vmatprep.subr.bf16.mxu1 %v1024_v6 }
  0x37   : > { %869 = vmatprep.subr.bf16.mxu0 %v970_v21 }
  0x39   : > { %901 = vmatpush3.bf16.msra.mxu1 %v971_v22 }
  0x3a   : > { %870 = vmatpush3.bf16.msra.mxu0 %v972_v23  ;;  %902 = vmatprep.subr.bf16.mxu1 %v1024_v6 }
  0x3b   : > { %871 = vmatprep.subr.bf16.mxu0 %v973_v24 }
  0x3d   : > { %903 = vmatpush3.bf16.msra.mxu1 %v974_v25 }
  0x3e   : > { %872 = vmatpush3.bf16.msra.mxu0 %v975_v26  ;;  %904 = vmatprep.subr.bf16.mxu1 %v1024_v6 }
  0x3f   : > { %873 = vmatprep.subr.bf16.mxu0 %v976_v27 }
  0x41   : > { %905 = vmatpush3.bf16.msra.mxu1 %v977_v29 }
  0x42   : > { %874 = vmatpush3.bf16.msra.mxu0 %v978_v30 }
  0x44   : > { %907 = vmatmul.mubr.bf16.vlgmr.msra.gmra.mxu1 %v982_v31 }
  0x45   : > { %603 = vmatmul.mubr.bf16.vlgmr.msra.gmra.mxu0 %v979_v32 }
 0x104   : > { %v645_v33 = vpop.f32.mrf.mxu1 }
 0x105   : > { %v875_v34 = vpop.f32.mrf.mxu0 }
 0x106   : > { %v908_v35 = vpop.f32.mrf.mxu1 }
 0x107   : > { %v876_v36 = vpop.f32.mrf.mxu0 }
 0x108   : > { %v877_v37 = vadd.f32 %v876_v36, %v875_v34  ;;  %v648_v38 = vpop.f32.mrf.mxu1 }
 0x109   : > { %v878_v40 = vpop.f32.mrf.mxu0 }
 0x10a   : > { %v646_v41 = vadd.f32 %v877_v37, %v645_v33  ;;  %v909_v42 = vpop.f32.mrf.mxu1 }
 0x10b   : > { %v879_v43 = vpop.f32.mrf.mxu0 }
 0x10c   : > { %v652_v44 = vadd.f32 %v646_v41, %v356_v39  ;;  %v880_v45 = vadd.f32 %v879_v43, %v878_v40 }
 0x10e   : > { %654 = vst [vmem:[%s1192_s4] sm:$0xff] %v652_v44  ;;  %v649_v47 = vadd.f32 %v880_v45, %v648_v38  ;;  %659 = sbr.rel (%p852_p11) target bundleno = 289 (0x121), region = 70 }
 0x110   : > { %v653_v48 = vadd.f32 %v649_v47, %v357_v46 }
 0x112   : > { %655 = vst [vmem:[%s1192_s4 + $0x8] sm:$0xff] %v653_v48 }
 0x113   : > { %v853_v50 = vld [vmem:[%s1190_s2] ss:$0 sm:$0xff]  ;;  %v672_v54 = vld [vmem:[%s1191_s3 + $0x8] sm:$0xff] }
 0x114   : > { %v671_v51 = vld [vmem:[%s1191_s3] sm:$0xff] }
 0x115   : > { %v660_v49 = vld [vmem:[%s1192_s4] sm:$0xff] }
 0x116   : > { %v669_v52 = vadd.f32 %v853_v50, %v660_v49 }
 0x118   : > { %v673_v56 = vadd.f32 %v671_v51, %v669_v52 }
 0x119   : > { %v661_v53 = vld [vmem:[%s1192_s4 + $0x8] sm:$0xff] }
 0x11a   : > { %v670_v55 = vadd.f32 %v853_v50, %v661_v53  ;;  %v675_v58 = vmax.f32 %v673_v56, 0.0 }
 0x11c   : > { %v674_v57 = vadd.f32 %v672_v54, %v670_v55  ;;  %677 = vst [vmem:[%s1192_s4] sm:$0xff] %v675_v58 }
 0x11e   : > { %v676_v59 = vmax.f32 %v674_v57, 0.0 }
 0x120   : > { %678 = vst [vmem:[%s1192_s4 + $0x8] sm:$0xff] %v676_v59 }
 0x121 PF: > { %s14_s19 = sadd.s32 1, %s1021_s19   ;;  %s1193_s15 = smov %s1009_s16 }
 0x122   : > { %p11_p12 = scmp.ge.s32.totalorder %s14_s19, 5   ;;  %s1194_s16 = smov %s1086_s23 }
 0x123   : > { %s1195_s17 = smov %s1017_s18  ;;  %s1196_s18 = smov %s1198_s20 }
 0x124   :  { %13 = sbr.rel (!%p11_p12) target bundleno = 3 (0x3), region = 120 }

// kernel: beyond_the_spectrum_forward.57
= control target key start
LH: loop header
LB: loop body
LE: loop exit
PB: predicated region body
PF: predicated region fallthrough
CT: control target
= control target key end

     0   :  { %s963_s12 = smov 0   ;;  %s965_s13 = smov 0   ;;  %s1094_s0 = inlined_call_operand.vmem [shape: bf16[16,1152], index: 0, kind: input, shape index: {}]   ;;  %s1095_s1 = inlined_call_operand.vmem [shape: bf16[1152,128], index: 1, kind: input, shape index: {}]   ;;  %s1096_s2 = inlined_call_operand.vmem [shape: f32[1,128], index: 2, kind: input, shape index: {}]   ;;  %s1097_s3 = inlined_call_operand.vmem [shape: f32[16,128], index: 3, kind: output, shape index: {}]  }
   0x1   :  { %s967_s14 = smov 0   ;;  %s969_s15 = smov 0  }
   0x2   :  { %s971_s16 = smov 0  }
   0x3 LB: > { %s25_s17 = sadd.s32 1, %s934_s15  ;;  %p48_p1 = scmp.ne.s32.totalorder %s926_s13, %s922_s12  ;;  %s938_s16 = sphi %s971_s16, %s13_s16   ;;  %s934_s15 = sphi %s969_s15, %s1101_s15   ;;  %s930_s14 = sphi %s967_s14, %s1100_s14   ;;  %s926_s13 = sphi %s965_s13, %s1099_s13   ;;  %s922_s12 = sphi %s963_s12, %s1098_s12  }
   0x4   : > { %p26_p0 = scmp.ge.s32.totalorder %s25_s17, 3  ;;  %p49_p2 = scmp.eq.s32.totalorder %s938_s16, 0 }
   0x5   : > { %s41_s19 = sadd.s32 1, %s926_s13  ;;  %p733_p5 = scmp.ge.s32.totalorder %s938_s16, 3 }
   0x6   : > { %s1103_s17 = smov (%p26_p0, %s25_s17), 0  ;;  %p50_p3 = por %p49_p2, %p48_p1 }
   0x7   : > { %s37_s18 = ssub.s32 %s934_s15, %s1103_s17  ;;  %162 = sbr.rel (%p733_p5) target bundleno = 19 (0x13), region = 20 }
   0x8   : > { %p39_p4 = scmp.eq.s32.totalorder %s37_s18, 0 }
   0xa   : > { %s998_s20 = scalar_select %p39_p4, %s926_s13, %s41_s19  }
   0xc   : > { %165 = sbr.rel (!%p50_p3) target bundleno = 19 (0x13), region = 24  ;;  %s167_s21 = sand.u32 (%p50_p3), 1, %s926_s13  }
   0xd   : > { %s775_s22 = smul.u32 (%p50_p3), 12, %s934_s15 }
   0xe   : > { %s827_s23 = smul.u32 (%p50_p3), 24, %s167_s21 }
   0xf   : > { %s175_s26 = scalar_lea.vmem (%p50_p3), %s1094_s0, %s775_s22 }
  0x10   : > { %v190_v0 = vld [vmem:[%s175_s26] sm:$0xff] (%p50_p3)  ;;  %v735_v2 = vld [vmem:[%s175_s26 + $0x8] sm:$0xf] (%p50_p3)  ;;  %s169_s27 = scalar_lea.vmem (%p50_p3), [#allocation2], %s827_s23  ;;  %v737_v3 = vld [vmem:[%s175_s26 + $0x2c] sm:$0xf] (%p50_p3) }
  0x11   : > { %v192_v1 = vld [vmem:[%s175_s26 + $0x24] sm:$0xff]  ;;  %191 = vst [vmem:[%s169_s27] sm:$0xff] %v190_v0  ;;  %736 = vst [vmem:[%s169_s27 + $0x8] sm:$0xf] %v735_v2 }
  0x12   : > { %193 = vst [vmem:[%s169_s27 + $0xc] sm:$0xff] %v192_v1  ;;  %738 = vst [vmem:[%s169_s27 + $0x14] sm:$0xf] %v737_v3 }
  0x13 PF: > { %p739_p6 = scmp.ge.s32.totalorder %s938_s16, 1  ;;  %p222_p7 = scmp.lt.s32.totalorder %s938_s16, 4 }
  0x15   : > { %p223_p8 = pnand %p739_p6, %p222_p7 }
  0x16   : > { %s229_s28 = sand.u32 (!%p223_p8), 1, %s922_s12   ;;  %s268_s29 = smul.u32 (!%p223_p8), 48, %s930_s14 }
  0x17   : > { %226 = sbr.rel (%p223_p8) target bundleno = 287 (0x11f), region = 54  ;;  %p741_p10 = scmp.ne.s32.totalorder (!%p223_p8), %s930_s14, 0 }
  0x18   : > { %s828_s30 = smul.u32 (!%p223_p8), 24, %s229_s28  ;;  %p269_p9 = scmp.lt.s32.totalorder (!%p223_p8), %s268_s29, 143 }
  0x1a   : > { %s1015_s8 = scalar_lea.vmem (!%p223_p8), [#allocation2], %s828_s30 }
  0x1c   : > { %s1105_s29 = smov (!%p269_p9, %s268_s29), 143  ;;  %293 = sbr.rel (%p741_p10) target bundleno = 35 (0x23), region = 62 }
  0x1d   : > { %s740_s4 = sshll.u32 %s1105_s29, 2 }
  0x1e   : > { %s1013_s7 = scalar_lea.vmem %s1095_s1, %s740_s4 }
  0x21   : > { %v940_v4 = vmov 0.0  }
  0x22   : > { %294 = vst [vmem:[%s1097_s3] sm:$0xff] %v940_v4  ;;  %295 = vst [vmem:[%s1097_s3 + $0x8] sm:$0xff] %v940_v4 }
  0x23 PF: > { %v872_v5 = vld [vmem:[%s1013_s7 + $0x78] sm:$0xff]   ;;  %v941_v6 = vmov 0.0   ;;  %vm942_vm0 = vmmov 0   ;;  %v875_v9 = vld [vmem:[%s1013_s7 + $0x70] sm:$0xff]   ;;  %v878_v12 = vld [vmem:[%s1013_s7 + $0x68] sm:$0xff]   ;;  %p769_p11 = scmp.ne.s32.totalorder %s930_s14, 2 }
  0x24   : > { %807 = vmatprep.subr.bf16.mxu1 %v941_v6  ;;  %v873_v7 = vld [vmem:[%s1013_s7 + $0xb8] sm:$0xff]   ;;  %776 = vmatprep.subr.bf16.mxu0 %v872_v5  ;;  %v876_v10 = vld [vmem:[%s1013_s7 + $0xb0] sm:$0xff]   ;;  %v879_v13 = vld [vmem:[%s1013_s7 + $0xa8] sm:$0xff]  }
  0x25   : > { %v874_v8 = vld [vmem:[%s1013_s7 + $0x38] sm:$0xff]   ;;  %823 = vmatprep.mubr.msk.bf16.mxu1 %vm942_vm0, %v941_v6  ;;  %808 = vmatpush3.bf16.msra.mxu1 %v873_v7  ;;  %v877_v11 = vld [vmem:[%s1013_s7 + $0x30] sm:$0xff]   ;;  %v880_v14 = vld [vmem:[%s1013_s7 + $0x28] sm:$0xff]  }
  0x26   : > { %777 = vmatpush3.bf16.msra.mxu0 %v874_v8  ;;  %809 = vmatprep.subr.bf16.mxu1 %v941_v6  ;;  %v881_v15 = vld [vmem:[%s1013_s7 + $0x60] sm:$0xff]   ;;  %v884_v18 = vld [vmem:[%s1013_s7 + $0x58] sm:$0xff]   ;;  %v887_v21 = vld [vmem:[%s1013_s7 + $0x50] sm:$0xff]  }
  0x27   : > { %778 = vmatprep.subr.bf16.mxu0 %v875_v9  ;;  %v882_v16 = vld [vmem:[%s1013_s7 + $0xa0] sm:$0xff]   ;;  %v885_v19 = vld [vmem:[%s1013_s7 + $0x98] sm:$0xff]   ;;  %v888_v22 = vld [vmem:[%s1013_s7 + $0x90] sm:$0xff]  }
  0x28   : > { %v883_v17 = vld [vmem:[%s1013_s7 + $0x20] sm:$0xff]   ;;  %v886_v20 = vld [vmem:[%s1013_s7 + $0x18] sm:$0xff]   ;;  %v889_v23 = vld [vmem:[%s1013_s7 + $0x10] sm:$0xff]  }
  0x29   : > { %810 = vmatpush3.bf16.msra.mxu1 %v876_v10  ;;  %v890_v24 = vld [vmem:[%s1013_s7 + $0x48] sm:$0xff]   ;;  %v893_v27 = vld [vmem:[%s1013_s7 + $0x40] sm:$0xff]  }
  0x2a   : > { %779 = vmatpush3.bf16.msra.mxu0 %v877_v11  ;;  %811 = vmatprep.subr.bf16.mxu1 %v941_v6  ;;  %v891_v25 = vld [vmem:[%s1013_s7 + $0x88] sm:$0xff]   ;;  %v894_v29 = vld [vmem:[%s1013_s7 + $0x80] sm:$0xff]  }
  0x2b   : > { %780 = vmatprep.subr.bf16.mxu0 %v878_v12  ;;  %v892_v26 = vld [vmem:[%s1013_s7 + $0x8] sm:$0xff]   ;;  %v895_v30 = vld [vmem:[%s1013_s7] sm:$0xff]  }
  0x2c   : > { %v898_v28 = vld [vmem:[%s1015_s8 + $0x4] ss:$12 sps:$4 sm:$0xff]   ;;  %v899_v31 = vld [vmem:[%s1015_s8 + $0x8] ss:$12 sps:$4 sm:$0xff]   ;;  %v896_v32 = vld [vmem:[%s1015_s8] ss:$12 sps:$4 sm:$0xff]  }
  0x2d   : > { %812 = vmatpush3.bf16.msra.mxu1 %v879_v13  ;;  %542 = vmatprep.mubr.bf16.mxu0 %v898_v28  ;;  %v296_v39 = vld [vmem:[%s1097_s3] sm:$0xff]  ;;  %v297_v46 = vld [vmem:[%s1097_s3 + $0x8] sm:$0xff] }
  0x2e   : > { %781 = vmatpush3.bf16.msra.mxu0 %v880_v14  ;;  %813 = vmatprep.subr.bf16.mxu1 %v941_v6 }
  0x2f   : > { %782 = vmatprep.subr.bf16.mxu0 %v881_v15 }
  0x31   : > { %814 = vmatpush3.bf16.msra.mxu1 %v882_v16 }
  0x32   : > { %783 = vmatpush3.bf16.msra.mxu0 %v883_v17  ;;  %815 = vmatprep.subr.bf16.mxu1 %v941_v6 }
  0x33   : > { %784 = vmatprep.subr.bf16.mxu0 %v884_v18 }
  0x35   : > { %816 = vmatpush3.bf16.msra.mxu1 %v885_v19 }
  0x36   : > { %785 = vmatpush3.bf16.msra.mxu0 %v886_v20  ;;  %817 = vmatprep.subr.bf16.mxu1 %v941_v6 }
  0x37   : > { %786 = vmatprep.subr.bf16.mxu0 %v887_v21 }
  0x39   : > { %818 = vmatpush3.bf16.msra.mxu1 %v888_v22 }
  0x3a   : > { %787 = vmatpush3.bf16.msra.mxu0 %v889_v23  ;;  %819 = vmatprep.subr.bf16.mxu1 %v941_v6 }
  0x3b   : > { %788 = vmatprep.subr.bf16.mxu0 %v890_v24 }
  0x3d   : > { %820 = vmatpush3.bf16.msra.mxu1 %v891_v25 }
  0x3e   : > { %789 = vmatpush3.bf16.msra.mxu0 %v892_v26  ;;  %821 = vmatprep.subr.bf16.mxu1 %v941_v6 }
  0x3f   : > { %790 = vmatprep.subr.bf16.mxu0 %v893_v27 }
  0x41   : > { %822 = vmatpush3.bf16.msra.mxu1 %v894_v29 }
  0x42   : > { %791 = vmatpush3.bf16.msra.mxu0 %v895_v30 }
  0x44   : > { %824 = vmatmul.mubr.bf16.vlgmr.msra.gmra.mxu1 %v899_v31 }
  0x45   : > { %543 = vmatmul.mubr.bf16.vlgmr.msra.gmra.mxu0 %v896_v32 }
 0x104   : > { %v585_v33 = vpop.f32.mrf.mxu1 }
 0x105   : > { %v792_v34 = vpop.f32.mrf.mxu0 }
 0x106   : > { %v825_v35 = vpop.f32.mrf.mxu1 }
 0x107   : > { %v793_v36 = vpop.f32.mrf.mxu0 }
 0x108   : > { %v794_v37 = vadd.f32 %v793_v36, %v792_v34  ;;  %v588_v38 = vpop.f32.mrf.mxu1 }
 0x109   : > { %v795_v40 = vpop.f32.mrf.mxu0 }
 0x10a   : > { %v586_v41 = vadd.f32 %v794_v37, %v585_v33  ;;  %v826_v42 = vpop.f32.mrf.mxu1 }
 0x10b   : > { %v796_v43 = vpop.f32.mrf.mxu0 }
 0x10c   : > { %v592_v44 = vadd.f32 %v586_v41, %v296_v39  ;;  %v797_v45 = vadd.f32 %v796_v43, %v795_v40 }
 0x10e   : > { %594 = vst [vmem:[%s1097_s3] sm:$0xff] %v592_v44  ;;  %v589_v47 = vadd.f32 %v797_v45, %v588_v38  ;;  %599 = sbr.rel (%p769_p11) target bundleno = 287 (0x11f), region = 66 }
 0x110   : > { %v593_v48 = vadd.f32 %v589_v47, %v297_v46 }
 0x112   : > { %595 = vst [vmem:[%s1097_s3 + $0x8] sm:$0xff] %v593_v48 }
 0x113   : > { %v770_v50 = vld [vmem:[%s1096_s2] ss:$0 sm:$0xff] }
 0x115   : > { %v600_v49 = vld [vmem:[%s1097_s3] sm:$0xff] }
 0x116   : > { %v609_v52 = vadd.f32 %v770_v50, %v600_v49 }
 0x118   : > { %v611_v54 = vmax.f32 %v609_v52, 0.0 }
 0x119   : > { %v601_v51 = vld [vmem:[%s1097_s3 + $0x8] sm:$0xff] }
 0x11a   : > { %v610_v53 = vadd.f32 %v770_v50, %v601_v51  ;;  %613 = vst [vmem:[%s1097_s3] sm:$0xff] %v611_v54 }
 0x11c   : > { %v612_v55 = vmax.f32 %v610_v53, 0.0 }
 0x11e   : > { %614 = vst [vmem:[%s1097_s3 + $0x8] sm:$0xff] %v612_v55 }
 0x11f PF: > { %s13_s16 = sadd.s32 1, %s938_s16   ;;  %s1098_s12 = smov %s926_s13 }
 0x120   : > { %p10_p12 = scmp.ge.s32.totalorder %s13_s16, 5   ;;  %s1099_s13 = smov %s998_s20 }
 0x121   : > { %s1100_s14 = smov %s934_s15  ;;  %s1101_s15 = smov %s1103_s17 }
 0x122   :  { %12 = sbr.rel (!%p10_p12) target bundleno = 3 (0x3), region = 113 }

// kernel: beyond_the_spectrum_forward.59
= control target key start
LH: loop header
LB: loop body
LE: loop exit
PB: predicated region body
PF: predicated region fallthrough
CT: control target
= control target key end

     0   :  { %s1134_s12 = smov 0   ;;  %s1136_s13 = smov 0   ;;  %s1319_s0 = inlined_call_operand.vmem [shape: bf16[16,1152], index: 0, kind: input, shape index: {}]   ;;  %s1320_s1 = inlined_call_operand.vmem [shape: bf16[1152,256], index: 1, kind: input, shape index: {}]   ;;  %s1321_s2 = inlined_call_operand.vmem [shape: f32[1,256], index: 2, kind: input, shape index: {}]   ;;  %s1322_s3 = inlined_call_operand.vmem [shape: f32[16,256], index: 3, kind: output, shape index: {}]  }
   0x1   :  { %s1138_s14 = smov 0   ;;  %s1140_s15 = smov 0  }
   0x2   :  { %s1142_s16 = smov 0  }
   0x3 LB: > { %s25_s17 = sadd.s32 1, %s1106_s15  ;;  %p48_p1 = scmp.ne.s32.totalorder %s1098_s13, %s1094_s12  ;;  %s1110_s16 = sphi %s1142_s16, %s13_s16   ;;  %s1106_s15 = sphi %s1140_s15, %s1326_s15   ;;  %s1102_s14 = sphi %s1138_s14, %s1325_s14   ;;  %s1098_s13 = sphi %s1136_s13, %s1324_s13   ;;  %s1094_s12 = sphi %s1134_s12, %s1323_s12  }
   0x4   : > { %p26_p0 = scmp.ge.s32.totalorder %s25_s17, 3  ;;  %p49_p2 = scmp.eq.s32.totalorder %s1110_s16, 0 }
   0x5   : > { %s41_s19 = sadd.s32 1, %s1098_s13  ;;  %p884_p5 = scmp.ge.s32.totalorder %s1110_s16, 3 }
   0x6   : > { %s1328_s17 = smov (%p26_p0, %s25_s17), 0  ;;  %p50_p3 = por %p49_p2, %p48_p1 }
   0x7   : > { %s37_s18 = ssub.s32 %s1106_s15, %s1328_s17  ;;  %164 = sbr.rel (%p884_p5) target bundleno = 19 (0x13), region = 20 }
   0x8   : > { %p39_p4 = scmp.eq.s32.totalorder %s37_s18, 0 }
   0xa   : > { %s1169_s20 = scalar_select %p39_p4, %s1098_s13, %s41_s19  }
   0xc   : > { %167 = sbr.rel (!%p50_p3) target bundleno = 19 (0x13), region = 24  ;;  %s169_s21 = sand.u32 (%p50_p3), 1, %s1098_s13  }
   0xd   : > { %s950_s22 = smul.u32 (%p50_p3), 12, %s1106_s15 }
   0xe   : > { %s952_s23 = smul.u32 (%p50_p3), 24, %s169_s21 }
   0xf   : > { %s177_s26 = scalar_lea.vmem (%p50_p3), %s1319_s0, %s950_s22 }
  0x10   : > { %v192_v0 = vld [vmem:[%s177_s26] sm:$0xff] (%p50_p3)  ;;  %v886_v2 = vld [vmem:[%s177_s26 + $0x8] sm:$0xf] (%p50_p3)  ;;  %s171_s27 = scalar_lea.vmem (%p50_p3), [#allocation2], %s952_s23  ;;  %v888_v3 = vld [vmem:[%s177_s26 + $0x2c] sm:$0xf] (%p50_p3) }
  0x11   : > { %v194_v1 = vld [vmem:[%s177_s26 + $0x24] sm:$0xff]  ;;  %193 = vst [vmem:[%s171_s27] sm:$0xff] %v192_v0  ;;  %887 = vst [vmem:[%s171_s27 + $0x8] sm:$0xf] %v886_v2 }
  0x12   : > { %195 = vst [vmem:[%s171_s27 + $0xc] sm:$0xff] %v194_v1  ;;  %889 = vst [vmem:[%s171_s27 + $0x14] sm:$0xf] %v888_v3 }
  0x13 PF: > { %p890_p6 = scmp.ge.s32.totalorder %s1110_s16, 1  ;;  %p227_p7 = scmp.lt.s32.totalorder %s1110_s16, 4 }
  0x15   : > { %p228_p8 = pnand %p890_p6, %p227_p7 }
  0x16   : > { %s234_s28 = sand.u32 (!%p228_p8), 1, %s1094_s12   ;;  %s278_s29 = smul.u32 (!%p228_p8), 48, %s1102_s14 }
  0x17   : > { %231 = sbr.rel (%p228_p8) target bundleno = 319 (0x13f), region = 54  ;;  %p893_p10 = scmp.ne.s32.totalorder (!%p228_p8), %s1102_s14, 0 }
  0x18   : > { %s953_s30 = smul.u32 (!%p228_p8), 24, %s234_s28  ;;  %p280_p9 = scmp.lt.s32.totalorder (!%p228_p8), %s278_s29, 143 }
  0x1a   : > { %s1186_s8 = scalar_lea.vmem (!%p228_p8), [#allocation2], %s953_s30 }
  0x1c   : > { %s1330_s29 = smov (!%p280_p9, %s278_s29), 143  ;;  %311 = sbr.rel (%p893_p10) target bundleno = 36 (0x24), region = 62 }
  0x1d   : > { %s951_s4 = sshll.u32 %s1330_s29, 3 }
  0x1e   : > { %s1184_s7 = scalar_lea.vmem %s1320_s1, %s951_s4 }
  0x21   : > { %v1112_v4 = vmov 0.0  }
  0x22   : > { %312 = vst [vmem:[%s1322_s3] sm:$0xff] %v1112_v4  ;;  %313 = vst [vmem:[%s1322_s3 + $0x8] sm:$0xff] %v1112_v4 }
  0x23   : > { %314 = vst [vmem:[%s1322_s3 + $0x10] sm:$0xff] %v1112_v4  ;;  %315 = vst [vmem:[%s1322_s3 + $0x18] sm:$0xff] %v1112_v4 }
  0x24 PF: > { %v996_v5 = vld [vmem:[%s1184_s7 + $0x74] ss:$8 sps:$4 sm:$0xff]   ;;  %v998_v6 = vld [vmem:[%s1184_s7 + $0x70] ss:$8 sps:$4 sm:$0xff]   ;;  %v1113_v7 = vmov 0   ;;  %p945_p11 = scmp.ne.s32.totalorder %s1102_s14, 2 }
  0x25   : > { %703 = vmatprep.mubr.bf16.mxu1 %v1113_v7  ;;  %628 = vmatprep.subr.bf16.mxu0 %v996_v5  ;;  %v999_v8 = vld [vmem:[%s1184_s7 + $0x64] ss:$8 sps:$4 sm:$0xff]   ;;  %v1001_v9 = vld [vmem:[%s1184_s7 + $0x60] ss:$8 sps:$4 sm:$0xff]   ;;  %v1002_v10 = vld [vmem:[%s1184_s7 + $0x54] ss:$8 sps:$4 sm:$0xff]  }
  0x26   : > { %629 = vmatpush1.bf16.msra.mxu0 %v998_v6  ;;  %v1004_v11 = vld [vmem:[%s1184_s7 + $0x50] ss:$8 sps:$4 sm:$0xff]   ;;  %v1005_v12 = vld [vmem:[%s1184_s7 + $0x44] ss:$8 sps:$4 sm:$0xff]   ;;  %v1017_v13 = vld [vmem:[%s1184_s7 + $0x174] ss:$8 sps:$4 sm:$0xff]  }
  0x27   : > { %630 = vmatprep.subr.bf16.mxu0 %v999_v8  ;;  %v1019_v14 = vld [vmem:[%s1184_s7 + $0x170] ss:$8 sps:$4 sm:$0xff]   ;;  %v1007_v15 = vld [vmem:[%s1184_s7 + $0x40] ss:$8 sps:$4 sm:$0xff]   ;;  %v1008_v16 = vld [vmem:[%s1184_s7 + $0x34] ss:$8 sps:$4 sm:$0xff]   ;;  %671 = vmatprep.subr.bf16.mxu1 %v1017_v13 }
  0x28   : > { %v1023_v17 = vld [vmem:[%s1184_s7 + $0x164] ss:$8 sps:$4 sm:$0xff]   ;;  %672 = vmatpush1.bf16.msra.mxu1 %v1019_v14  ;;  %v1025_v18 = vld [vmem:[%s1184_s7 + $0x160] ss:$8 sps:$4 sm:$0xff]   ;;  %v1010_v19 = vld [vmem:[%s1184_s7 + $0x30] ss:$8 sps:$4 sm:$0xff]  }
  0x29   : > { %673 = vmatprep.subr.bf16.mxu1 %v1023_v17  ;;  %v1029_v20 = vld [vmem:[%s1184_s7 + $0x154] ss:$8 sps:$4 sm:$0xff]   ;;  %v1011_v21 = vld [vmem:[%s1184_s7 + $0x24] ss:$8 sps:$4 sm:$0xff]   ;;  %v1031_v22 = vld [vmem:[%s1184_s7 + $0x150] ss:$8 sps:$4 sm:$0xff]  }
  0x2a   : > { %631 = vmatpush1.bf16.msra.mxu0 %v1001_v9  ;;  %v1035_v23 = vld [vmem:[%s1184_s7 + $0x144] ss:$8 sps:$4 sm:$0xff]   ;;  %v1013_v24 = vld [vmem:[%s1184_s7 + $0x20] ss:$8 sps:$4 sm:$0xff]   ;;  %v1014_v25 = vld [vmem:[%s1184_s7 + $0x14] ss:$8 sps:$4 sm:$0xff]  }
  0x2b   : > { %632 = vmatprep.subr.bf16.mxu0 %v1002_v10  ;;  %v1037_v26 = vld [vmem:[%s1184_s7 + $0x140] ss:$8 sps:$4 sm:$0xff]   ;;  %v1041_v27 = vld [vmem:[%s1184_s7 + $0x134] ss:$8 sps:$4 sm:$0xff]   ;;  %v1016_v28 = vld [vmem:[%s1184_s7 + $0x10] ss:$8 sps:$4 sm:$0xff]  }
  0x2c   : > { %674 = vmatpush1.bf16.msra.mxu1 %v1025_v18  ;;  %v1020_v29 = vld [vmem:[%s1184_s7 + $0x4] ss:$8 sps:$4 sm:$0xff]   ;;  %v1043_v30 = vld [vmem:[%s1184_s7 + $0x130] ss:$8 sps:$4 sm:$0xff]   ;;  %v1022_v32 = vld [vmem:[%s1184_s7] ss:$8 sps:$4 sm:$0xff]  }
  0x2d   : > { %675 = vmatprep.subr.bf16.mxu1 %v1029_v20  ;;  %v1047_v31 = vld [vmem:[%s1184_s7 + $0x124] ss:$8 sps:$4 sm:$0xff]   ;;  %v1026_v33 = vld [vmem:[%s1184_s7 + $0xf4] ss:$8 sps:$4 sm:$0xff]   ;;  %v1049_v34 = vld [vmem:[%s1184_s7 + $0x120] ss:$8 sps:$4 sm:$0xff]  }
  0x2e   : > { %633 = vmatpush1.bf16.msra.mxu0 %v1004_v11  ;;  %v1053_v35 = vld [vmem:[%s1184_s7 + $0x114] ss:$8 sps:$4 sm:$0xff]   ;;  %v1028_v36 = vld [vmem:[%s1184_s7 + $0xf0] ss:$8 sps:$4 sm:$0xff]   ;;  %v1032_v37 = vld [vmem:[%s1184_s7 + $0xe4] ss:$8 sps:$4 sm:$0xff]  }
  0x2f   : > { %634 = vmatprep.subr.bf16.mxu0 %v1005_v12  ;;  %v1055_v38 = vld [vmem:[%s1184_s7 + $0x110] ss:$8 sps:$4 sm:$0xff]   ;;  %v1059_v39 = vld [vmem:[%s1184_s7 + $0x104] ss:$8 sps:$4 sm:$0xff]   ;;  %v1034_v41 = vld [vmem:[%s1184_s7 + $0xe0] ss:$8 sps:$4 sm:$0xff]  }
  0x30   : > { %676 = vmatpush1.bf16.msra.mxu1 %v1031_v22  ;;  %v1071_v40 = vld [vmem:[%s1186_s8 + $0x4] ss:$12 sps:$4 sm:$0xff]   ;;  %v1065_v46 = vld [vmem:[%s1186_s8 + $0x8] ss:$12 sps:$4 sm:$0xff]   ;;  %v1069_v56 = vld [vmem:[%s1186_s8] ss:$12 sps:$4 sm:$0xff]  }
  0x31   : > { %677 = vmatprep.subr.bf16.mxu1 %v1035_v23  ;;  %v1038_v42 = vld [vmem:[%s1184_s7 + $0xd4] ss:$8 sps:$4 sm:$0xff]   ;;  %660 = vmatprep.mubr.bf16.mxu0 %v1071_v40  ;;  %v1061_v43 = vld [vmem:[%s1184_s7 + $0x100] ss:$8 sps:$4 sm:$0xff]   ;;  %v1040_v44 = vld [vmem:[%s1184_s7 + $0xd0] ss:$8 sps:$4 sm:$0xff]  }
  0x32   : > { %635 = vmatpush1.bf16.msra.mxu0 %v1007_v15  ;;  %v1044_v45 = vld [vmem:[%s1184_s7 + $0xc4] ss:$8 sps:$4 sm:$0xff]   ;;  %v1046_v47 = vld [vmem:[%s1184_s7 + $0xc0] ss:$8 sps:$4 sm:$0xff]   ;;  %v1050_v48 = vld [vmem:[%s1184_s7 + $0xb4] ss:$8 sps:$4 sm:$0xff]  }
  0x33   : > { %636 = vmatprep.subr.bf16.mxu0 %v1008_v16  ;;  %v1052_v49 = vld [vmem:[%s1184_s7 + $0xb0] ss:$8 sps:$4 sm:$0xff]   ;;  %v1056_v50 = vld [vmem:[%s1184_s7 + $0xa4] ss:$8 sps:$4 sm:$0xff]   ;;  %v1058_v51 = vld [vmem:[%s1184_s7 + $0xa0] ss:$8 sps:$4 sm:$0xff]  }
  0x34   : > { %678 = vmatpush1.bf16.msra.mxu1 %v1037_v26  ;;  %v1062_v52 = vld [vmem:[%s1184_s7 + $0x94] ss:$8 sps:$4 sm:$0xff]   ;;  %v1064_v53 = vld [vmem:[%s1184_s7 + $0x90] ss:$8 sps:$4 sm:$0xff]   ;;  %v1066_v54 = vld [vmem:[%s1184_s7 + $0x84] ss:$8 sps:$4 sm:$0xff]  }
  0x35   : > { %679 = vmatprep.subr.bf16.mxu1 %v1041_v27  ;;  %v1068_v55 = vld [vmem:[%s1184_s7 + $0x80] ss:$8 sps:$4 sm:$0xff]   ;;  %v318_v3 = vld [vmem:[%s1322_s3 + $0x10] sm:$0xff]  ;;  %v319_v8 = vld [vmem:[%s1322_s3 + $0x18] sm:$0xff] }
  0x36   : > { %637 = vmatpush1.bf16.msra.mxu0 %v1010_v19  ;;  %v316_v59 = vld [vmem:[%s1322_s3] sm:$0xff]  ;;  %v317_v63 = vld [vmem:[%s1322_s3 + $0x8] sm:$0xff] }
  0x37   : > { %638 = vmatprep.subr.bf16.mxu0 %v1011_v21 }
  0x38   : > { %680 = vmatpush1.bf16.msra.mxu1 %v1043_v30 }
  0x39   : > { %681 = vmatprep.subr.bf16.mxu1 %v1047_v31 }
  0x3a   : > { %639 = vmatpush1.bf16.msra.mxu0 %v1013_v24 }
  0x3b   : > { %640 = vmatprep.subr.bf16.mxu0 %v1014_v25 }
  0x3c   : > { %682 = vmatpush1.bf16.msra.mxu1 %v1049_v34 }
  0x3d   : > { %683 = vmatprep.subr.bf16.mxu1 %v1053_v35 }
  0x3e   : > { %641 = vmatpush1.bf16.msra.mxu0 %v1016_v28 }
  0x3f   : > { %642 = vmatprep.subr.bf16.mxu0 %v1020_v29 }
  0x40   : > { %684 = vmatpush1.bf16.msra.mxu1 %v1055_v38 }
  0x41   : > { %685 = vmatprep.subr.bf16.mxu1 %v1059_v39 }
  0x42   : > { %643 = vmatpush1.bf16.msra.mxu0 %v1022_v32 }
  0x43   : > { %644 = vmatprep.subr.bf16.mxu0 %v1026_v33 }
  0x44   : > { %686 = vmatpush1.bf16.msra.mxu1 %v1061_v43 }
  0x46   : > { %645 = vmatpush2.bf16.msra.mxu0 %v1028_v36 }
  0x47   : > { %646 = vmatprep.subr.bf16.mxu0 %v1032_v37  ;;  %704 = vmatmul.mubr.bf16.vlgmr.msra.gmra.mxu1 %v1065_v46 }
  0x4a   : > { %647 = vmatpush2.bf16.msra.mxu0 %v1034_v41 }
  0x4b   : > { %648 = vmatprep.subr.bf16.mxu0 %v1038_v42 }
  0x4e   : > { %649 = vmatpush2.bf16.msra.mxu0 %v1040_v44 }
  0x4f   : > { %650 = vmatprep.subr.bf16.mxu0 %v1044_v45 }
  0x52   : > { %651 = vmatpush2.bf16.msra.mxu0 %v1046_v47 }
  0x53   : > { %652 = vmatprep.subr.bf16.mxu0 %v1050_v48 }
  0x56   : > { %653 = vmatpush2.bf16.msra.mxu0 %v1052_v49 }
  0x57   : > { %654 = vmatprep.subr.bf16.mxu0 %v1056_v50 }
  0x5a   : > { %655 = vmatpush2.bf16.msra.mxu0 %v1058_v51 }
  0x5b   : > { %656 = vmatprep.subr.bf16.mxu0 %v1062_v52 }
  0x5e   : > { %657 = vmatpush2.bf16.msra.mxu0 %v1064_v53 }
  0x5f   : > { %658 = vmatprep.subr.bf16.mxu0 %v1066_v54 }
  0x62   : > { %659 = vmatpush2.bf16.msra.mxu0 %v1068_v55 }
  0x65   : > { %661 = vmatmul.mubr.bf16.vlgmr.msra.gmra.mxu0 %v1069_v56 }
 0x107   : > { %v705_v57 = vpop.f32.mrf.mxu1 }
 0x109   : > { %v707_v58 = vpop.f32.mrf.mxu1 }
 0x10b   : > { %v709_v62 = vpop.f32.mrf.mxu1 }
 0x10d   : > { %v711_v7 = vpop.f32.mrf.mxu1 }
 0x125   : > { %v662_v60 = vpop.f32.mrf.mxu0 }
 0x126   : > { %v706_v61 = vadd.f32 %v705_v57, %v662_v60 }
 0x127   : > { %v664_v0 = vpop.f32.mrf.mxu0 }
 0x128   : > { %v714_v1 = vadd.f32 %v706_v61, %v316_v59  ;;  %v708_v2 = vadd.f32 %v707_v58, %v664_v0 }
 0x129   : > { %v666_v4 = vpop.f32.mrf.mxu0 }
 0x12a   : > { %718 = vst [vmem:[%s1322_s3] sm:$0xff] %v714_v1  ;;  %v715_v5 = vadd.f32 %v708_v2, %v317_v63  ;;  %v710_v6 = vadd.f32 %v709_v62, %v666_v4 }
 0x12b   : > { %v668_v9 = vpop.f32.mrf.mxu0 }
 0x12c   : > { %719 = vst [vmem:[%s1322_s3 + $0x8] sm:$0xff] %v715_v5  ;;  %v716_v10 = vadd.f32 %v710_v6, %v318_v3  ;;  %v712_v11 = vadd.f32 %v711_v7, %v668_v9  ;;  %725 = sbr.rel (%p945_p11) target bundleno = 319 (0x13f), region = 66 }
 0x12e   : > { %720 = vst [vmem:[%s1322_s3 + $0x10] sm:$0xff] %v716_v10  ;;  %v717_v12 = vadd.f32 %v712_v11, %v319_v8 }
 0x130   : > { %721 = vst [vmem:[%s1322_s3 + $0x18] sm:$0xff] %v717_v12 }
 0x131   : > { %v732_v13 = vlaneseq  ;;  %v730_v15 = vld [vmem:[%s1321_s2] sm:$0x3] }
 0x132   : > { %v726_v16 = vld [vmem:[%s1322_s3] sm:$0xff] }
 0x133   : > { %v733_v14 = vshrl.u32 %v732_v13, 7  ;;  %v727_v19 = vld [vmem:[%s1322_s3 + $0x8] sm:$0xff] }
 0x135   : > { %v734_v17 = vsub.s32 0, %v733_v14  ;;  %v738_v18 = vsub.s32 1, %v733_v14  ;;  %v728_v20 = vld [vmem:[%s1322_s3 + $0x10] sm:$0xff] }
 0x137   : > { %v729_v21 = vld [vmem:[%s1322_s3 + $0x18] sm:$0xff]  ;;  %v735_v22 = vrot.slane %v730_v15, %v734_v17  ;;  %v739_v23 = vrot.slane %v730_v15, %v738_v18 }
 0x139   : > { %v742_v24 = vadd.f32 %v735_v22, %v726_v16  ;;  %v743_v25 = vadd.f32 %v739_v23, %v727_v19  ;;  %v744_v26 = vadd.f32 %v735_v22, %v728_v20  ;;  %v745_v27 = vadd.f32 %v739_v23, %v729_v21 }
 0x13b   : > { %v746_v28 = vmax.f32 %v742_v24, 0.0  ;;  %v747_v29 = vmax.f32 %v743_v25, 0.0  ;;  %v748_v30 = vmax.f32 %v744_v26, 0.0  ;;  %v749_v31 = vmax.f32 %v745_v27, 0.0 }
 0x13d   : > { %750 = vst [vmem:[%s1322_s3] sm:$0xff] %v746_v28  ;;  %751 = vst [vmem:[%s1322_s3 + $0x8] sm:$0xff] %v747_v29 }
 0x13e   : > { %752 = vst [vmem:[%s1322_s3 + $0x10] sm:$0xff] %v748_v30  ;;  %753 = vst [vmem:[%s1322_s3 + $0x18] sm:$0xff] %v749_v31 }
 0x13f PF: > { %s13_s16 = sadd.s32 1, %s1110_s16   ;;  %s1323_s12 = smov %s1098_s13 }
 0x140   : > { %p10_p12 = scmp.ge.s32.totalorder %s13_s16, 5   ;;  %s1324_s13 = smov %s1169_s20 }
 0x141   : > { %s1325_s14 = smov %s1106_s15  ;;  %s1326_s15 = smov %s1328_s17 }
 0x142   :  { %12 = sbr.rel (!%p10_p12) target bundleno = 3 (0x3), region = 113 }

// kernel: beyond_the_spectrum_forward.60
= control target key start
LH: loop header
LB: loop body
LE: loop exit
PB: predicated region body
PF: predicated region fallthrough
CT: control target
= control target key end

     0   :  { %v257_v1 = vmov 0   ;;  %v191_v18 = vlaneseq  ;;  %s344_s1 = inlined_call_operand.vmem [shape: bf16[128,256], index: 1, kind: input, shape index: {}]   ;;  %s345_s0 = inlined_call_operand.vmem [shape: bf16[16,128], index: 0, kind: input, shape index: {}]   ;;  %s346_s2 = inlined_call_operand.vmem [shape: f32[1,256], index: 2, kind: input, shape index: {}]   ;;  %s347_s3 = inlined_call_operand.vmem [shape: f32[16,256], index: 3, kind: output, shape index: {}]  }
   0x1   :  { %v232_v0 = vld [vmem:[%s344_s1 + $0x74] ss:$8 sps:$4 sm:$0xff]   ;;  %163 = vmatprep.mubr.bf16.mxu0 %v257_v1  ;;  %v234_v2 = vld [vmem:[%s344_s1 + $0x70] ss:$8 sps:$4 sm:$0xff]   ;;  %v235_v3 = vld [vmem:[%s344_s1 + $0x64] ss:$8 sps:$4 sm:$0xff]  }
   0x2   :  { %131 = vmatprep.subr.bf16.mxu0 %v232_v0  ;;  %v237_v4 = vld [vmem:[%s344_s1 + $0x60] ss:$8 sps:$4 sm:$0xff]   ;;  %v238_v5 = vld [vmem:[%s344_s1 + $0x54] ss:$8 sps:$4 sm:$0xff]   ;;  %v240_v6 = vld [vmem:[%s344_s1 + $0x50] ss:$8 sps:$4 sm:$0xff]  }
   0x3   :  { %132 = vmatpush1.bf16.msra.mxu0 %v234_v2  ;;  %v241_v7 = vld [vmem:[%s344_s1 + $0x44] ss:$8 sps:$4 sm:$0xff]   ;;  %v243_v8 = vld [vmem:[%s344_s1 + $0x40] ss:$8 sps:$4 sm:$0xff]   ;;  %v244_v9 = vld [vmem:[%s344_s1 + $0x34] ss:$8 sps:$4 sm:$0xff]  }
   0x4   :  { %133 = vmatprep.subr.bf16.mxu0 %v235_v3  ;;  %v246_v10 = vld [vmem:[%s344_s1 + $0x30] ss:$8 sps:$4 sm:$0xff]   ;;  %v247_v11 = vld [vmem:[%s344_s1 + $0x24] ss:$8 sps:$4 sm:$0xff]   ;;  %v249_v12 = vld [vmem:[%s344_s1 + $0x20] ss:$8 sps:$4 sm:$0xff]  }
   0x5   :  { %v250_v13 = vld [vmem:[%s344_s1 + $0x14] ss:$8 sps:$4 sm:$0xff]   ;;  %v252_v14 = vld [vmem:[%s344_s1 + $0x10] ss:$8 sps:$4 sm:$0xff]   ;;  %v253_v15 = vld [vmem:[%s344_s1 + $0x4] ss:$8 sps:$4 sm:$0xff]  }
   0x6   :  { %v255_v16 = vld [vmem:[%s344_s1] ss:$8 sps:$4 sm:$0xff]   ;;  %v192_v19 = vshrl.u32 %v191_v18, 7 }
   0x7   :  { %134 = vmatpush1.bf16.msra.mxu0 %v237_v4  ;;  %v256_v17 = vld [vmem:[%s345_s0] sm:$0xff]  }
   0x8   :  { %135 = vmatprep.subr.bf16.mxu0 %v238_v5  ;;  %v193_v20 = vsub.s32 0, %v192_v19  ;;  %v189_v21 = vld [vmem:[%s346_s2] sm:$0x3]  ;;  %v197_v22 = vsub.s32 1, %v192_v19 }
   0xa   :  { %v194_v23 = vrot.slane %v189_v21, %v193_v20  ;;  %v198_v25 = vrot.slane %v189_v21, %v197_v22 }
   0xb   :  { %136 = vmatpush1.bf16.msra.mxu0 %v240_v6 }
   0xc   :  { %137 = vmatprep.subr.bf16.mxu0 %v241_v7 }
   0xf   :  { %138 = vmatpush1.bf16.msra.mxu0 %v243_v8 }
  0x10   :  { %139 = vmatprep.subr.bf16.mxu0 %v244_v9 }
  0x13   :  { %140 = vmatpush1.bf16.msra.mxu0 %v246_v10 }
  0x14   :  { %141 = vmatprep.subr.bf16.mxu0 %v247_v11 }
  0x17   :  { %142 = vmatpush1.bf16.msra.mxu0 %v249_v12 }
  0x18   :  { %143 = vmatprep.subr.bf16.mxu0 %v250_v13 }
  0x1b   :  { %144 = vmatpush1.bf16.msra.mxu0 %v252_v14 }
  0x1c   :  { %145 = vmatprep.subr.bf16.mxu0 %v253_v15 }
  0x1f   :  { %146 = vmatpush1.bf16.msra.mxu0 %v255_v16 }
  0x22   :  { %164 = vmatmul.mubr.bf16.vlgmr.msra.gmra.mxu0 %v256_v17 }
  0xe2   :  { %v165_v24 = vpop.f32.mrf.mxu0 }
  0xe3   :  { %v201_v27 = vadd.f32 %v194_v23, %v165_v24 }
  0xe4   :  { %v167_v26 = vpop.f32.mrf.mxu0 }
  0xe5   :  { %205 = vst [vmem:[%s347_s3] sm:$0xff] %v201_v27  ;;  %v202_v29 = vadd.f32 %v198_v25, %v167_v26 }
  0xe6   :  { %v169_v28 = vpop.f32.mrf.mxu0 }
  0xe7   :  { %206 = vst [vmem:[%s347_s3 + $0x8] sm:$0xff] %v202_v29  ;;  %v203_v31 = vadd.f32 %v194_v23, %v169_v28 }
  0xe8   :  { %v171_v30 = vpop.f32.mrf.mxu0 }
  0xe9   :  { %207 = vst [vmem:[%s347_s3 + $0x10] sm:$0xff] %v203_v31  ;;  %v204_v32 = vadd.f32 %v198_v25, %v171_v30 }
  0xeb   :  { %208 = vst [vmem:[%s347_s3 + $0x18] sm:$0xff] %v204_v32 }

// kernel: beyond_the_spectrum_forward.62
= control target key start
LH: loop header
LB: loop body
LE: loop exit
PB: predicated region body
PF: predicated region fallthrough
CT: control target
= control target key end

     0   :  { %s1134_s12 = smov 0   ;;  %s1136_s13 = smov 0   ;;  %s1319_s0 = inlined_call_operand.vmem [shape: bf16[16,2304], index: 0, kind: input, shape index: {}]   ;;  %s1320_s1 = inlined_call_operand.vmem [shape: bf16[2304,256], index: 1, kind: input, shape index: {}]   ;;  %s1321_s2 = inlined_call_operand.vmem [shape: f32[1,256], index: 2, kind: input, shape index: {}]   ;;  %s1322_s3 = inlined_call_operand.vmem [shape: f32[16,256], index: 3, kind: output, shape index: {}]  }
   0x1   :  { %s1138_s14 = smov 0   ;;  %s1140_s15 = smov 0  }
   0x2   :  { %s1142_s16 = smov 0  }
   0x3 LB: > { %s25_s17 = sadd.s32 1, %s1106_s15  ;;  %p48_p1 = scmp.ne.s32.totalorder %s1098_s13, %s1094_s12  ;;  %s1110_s16 = sphi %s1142_s16, %s13_s16   ;;  %s1106_s15 = sphi %s1140_s15, %s1326_s15   ;;  %s1102_s14 = sphi %s1138_s14, %s1325_s14   ;;  %s1098_s13 = sphi %s1136_s13, %s1324_s13   ;;  %s1094_s12 = sphi %s1134_s12, %s1323_s12  }
   0x4   : > { %p26_p0 = scmp.ge.s32.totalorder %s25_s17, 6  ;;  %p49_p2 = scmp.eq.s32.totalorder %s1110_s16, 0 }
   0x5   : > { %s41_s19 = sadd.s32 1, %s1098_s13  ;;  %p884_p5 = scmp.ge.s32.totalorder %s1110_s16, 6 }
   0x6   : > { %s1328_s17 = smov (%p26_p0, %s25_s17), 0  ;;  %p50_p3 = por %p49_p2, %p48_p1 }
   0x7   : > { %s37_s18 = ssub.s32 %s1106_s15, %s1328_s17  ;;  %164 = sbr.rel (%p884_p5) target bundleno = 19 (0x13), region = 20 }
   0x8   : > { %p39_p4 = scmp.eq.s32.totalorder %s37_s18, 0 }
   0xa   : > { %s1169_s20 = scalar_select %p39_p4, %s1098_s13, %s41_s19  }
   0xc   : > { %167 = sbr.rel (!%p50_p3) target bundleno = 19 (0x13), region = 24  ;;  %s169_s21 = sand.u32 (%p50_p3), 1, %s1098_s13  }
   0xd   : > { %s950_s22 = smul.u32 (%p50_p3), 12, %s1106_s15 }
   0xe   : > { %s952_s23 = smul.u32 (%p50_p3), 24, %s169_s21 }
   0xf   : > { %s177_s26 = scalar_lea.vmem (%p50_p3), %s1319_s0, %s950_s22 }
  0x10   : > { %v192_v0 = vld [vmem:[%s177_s26] sm:$0xff] (%p50_p3)  ;;  %v194_v1 = vld [vmem:[%s177_s26 + $0x48] sm:$0xff] (%p50_p3)  ;;  %s171_s27 = scalar_lea.vmem (%p50_p3), [#allocation2], %s952_s23  ;;  %v888_v3 = vld [vmem:[%s177_s26 + $0x50] sm:$0xf] (%p50_p3) }
  0x11   : > { %v886_v2 = vld [vmem:[%s177_s26 + $0x8] sm:$0xf]  ;;  %193 = vst [vmem:[%s171_s27] sm:$0xff] %v192_v0  ;;  %195 = vst [vmem:[%s171_s27 + $0xc] sm:$0xff] %v194_v1 }
  0x12   : > { %887 = vst [vmem:[%s171_s27 + $0x8] sm:$0xf] %v886_v2  ;;  %889 = vst [vmem:[%s171_s27 + $0x14] sm:$0xf] %v888_v3 }
  0x13 PF: > { %p890_p6 = scmp.ge.s32.totalorder %s1110_s16, 1  ;;  %p227_p7 = scmp.lt.s32.totalorder %s1110_s16, 7 }
  0x15   : > { %p228_p8 = pnand %p890_p6, %p227_p7 }
  0x16   : > { %s234_s28 = sand.u32 (!%p228_p8), 1, %s1094_s12   ;;  %s278_s29 = smul.u32 (!%p228_p8), 48, %s1102_s14 }
  0x17   : > { %231 = sbr.rel (%p228_p8) target bundleno = 319 (0x13f), region = 54  ;;  %p893_p10 = scmp.ne.s32.totalorder (!%p228_p8), %s1102_s14, 0 }
  0x18   : > { %s953_s30 = smul.u32 (!%p228_p8), 24, %s234_s28  ;;  %p280_p9 = scmp.lt.s32.totalorder (!%p228_p8), %s278_s29, 287 }
  0x1a   : > { %s1186_s8 = scalar_lea.vmem (!%p228_p8), [#allocation2], %s953_s30 }
  0x1c   : > { %s1330_s29 = smov (!%p280_p9, %s278_s29), 287  ;;  %311 = sbr.rel (%p893_p10) target bundleno = 36 (0x24), region = 62 }
  0x1d   : > { %s951_s4 = sshll.u32 %s1330_s29, 3 }
  0x1e   : > { %s1184_s7 = scalar_lea.vmem %s1320_s1, %s951_s4 }
  0x21   : > { %v1112_v4 = vmov 0.0  }
  0x22   : > { %312 = vst [vmem:[%s1322_s3] sm:$0xff] %v1112_v4  ;;  %313 = vst [vmem:[%s1322_s3 + $0x8] sm:$0xff] %v1112_v4 }
  0x23   : > { %314 = vst [vmem:[%s1322_s3 + $0x10] sm:$0xff] %v1112_v4  ;;  %315 = vst [vmem:[%s1322_s3 + $0x18] sm:$0xff] %v1112_v4 }
  0x24 PF: > { %v996_v5 = vld [vmem:[%s1184_s7 + $0x74] ss:$8 sps:$4 sm:$0xff]   ;;  %v998_v6 = vld [vmem:[%s1184_s7 + $0x70] ss:$8 sps:$4 sm:$0xff]   ;;  %v1113_v7 = vmov 0   ;;  %p945_p11 = scmp.ne.s32.totalorder %s1102_s14, 5 }
  0x25   : > { %703 = vmatprep.mubr.bf16.mxu1 %v1113_v7  ;;  %628 = vmatprep.subr.bf16.mxu0 %v996_v5  ;;  %v999_v8 = vld [vmem:[%s1184_s7 + $0x64] ss:$8 sps:$4 sm:$0xff]   ;;  %v1001_v9 = vld [vmem:[%s1184_s7 + $0x60] ss:$8 sps:$4 sm:$0xff]   ;;  %v1002_v10 = vld [vmem:[%s1184_s7 + $0x54] ss:$8 sps:$4 sm:$0xff]  }
  0x26   : > { %629 = vmatpush1.bf16.msra.mxu0 %v998_v6  ;;  %v1004_v11 = vld [vmem:[%s1184_s7 + $0x50] ss:$8 sps:$4 sm:$0xff]   ;;  %v1005_v12 = vld [vmem:[%s1184_s7 + $0x44] ss:$8 sps:$4 sm:$0xff]   ;;  %v1017_v13 = vld [vmem:[%s1184_s7 + $0x174] ss:$8 sps:$4 sm:$0xff]  }
  0x27   : > { %630 = vmatprep.subr.bf16.mxu0 %v999_v8  ;;  %v1019_v14 = vld [vmem:[%s1184_s7 + $0x170] ss:$8 sps:$4 sm:$0xff]   ;;  %v1007_v15 = vld [vmem:[%s1184_s7 + $0x40] ss:$8 sps:$4 sm:$0xff]   ;;  %v1008_v16 = vld [vmem:[%s1184_s7 + $0x34] ss:$8 sps:$4 sm:$0xff]   ;;  %671 = vmatprep.subr.bf16.mxu1 %v1017_v13 }
  0x28   : > { %v1023_v17 = vld [vmem:[%s1184_s7 + $0x164] ss:$8 sps:$4 sm:$0xff]   ;;  %672 = vmatpush1.bf16.msra.mxu1 %v1019_v14  ;;  %v1025_v18 = vld [vmem:[%s1184_s7 + $0x160] ss:$8 sps:$4 sm:$0xff]   ;;  %v1010_v19 = vld [vmem:[%s1184_s7 + $0x30] ss:$8 sps:$4 sm:$0xff]  }
  0x29   : > { %673 = vmatprep.subr.bf16.mxu1 %v1023_v17  ;;  %v1029_v20 = vld [vmem:[%s1184_s7 + $0x154] ss:$8 sps:$4 sm:$0xff]   ;;  %v1011_v21 = vld [vmem:[%s1184_s7 + $0x24] ss:$8 sps:$4 sm:$0xff]   ;;  %v1031_v22 = vld [vmem:[%s1184_s7 + $0x150] ss:$8 sps:$4 sm:$0xff]  }
  0x2a   : > { %631 = vmatpush1.bf16.msra.mxu0 %v1001_v9  ;;  %v1035_v23 = vld [vmem:[%s1184_s7 + $0x144] ss:$8 sps:$4 sm:$0xff]   ;;  %v1013_v24 = vld [vmem:[%s1184_s7 + $0x20] ss:$8 sps:$4 sm:$0xff]   ;;  %v1014_v25 = vld [vmem:[%s1184_s7 + $0x14] ss:$8 sps:$4 sm:$0xff]  }
  0x2b   : > { %632 = vmatprep.subr.bf16.mxu0 %v1002_v10  ;;  %v1037_v26 = vld [vmem:[%s1184_s7 + $0x140] ss:$8 sps:$4 sm:$0xff]   ;;  %v1041_v27 = vld [vmem:[%s1184_s7 + $0x134] ss:$8 sps:$4 sm:$0xff]   ;;  %v1016_v28 = vld [vmem:[%s1184_s7 + $0x10] ss:$8 sps:$4 sm:$0xff]  }
  0x2c   : > { %674 = vmatpush1.bf16.msra.mxu1 %v1025_v18  ;;  %v1020_v29 = vld [vmem:[%s1184_s7 + $0x4] ss:$8 sps:$4 sm:$0xff]   ;;  %v1043_v30 = vld [vmem:[%s1184_s7 + $0x130] ss:$8 sps:$4 sm:$0xff]   ;;  %v1022_v32 = vld [vmem:[%s1184_s7] ss:$8 sps:$4 sm:$0xff]  }
  0x2d   : > { %675 = vmatprep.subr.bf16.mxu1 %v1029_v20  ;;  %v1047_v31 = vld [vmem:[%s1184_s7 + $0x124] ss:$8 sps:$4 sm:$0xff]   ;;  %v1026_v33 = vld [vmem:[%s1184_s7 + $0xf4] ss:$8 sps:$4 sm:$0xff]   ;;  %v1049_v34 = vld [vmem:[%s1184_s7 + $0x120] ss:$8 sps:$4 sm:$0xff]  }
  0x2e   : > { %633 = vmatpush1.bf16.msra.mxu0 %v1004_v11  ;;  %v1053_v35 = vld [vmem:[%s1184_s7 + $0x114] ss:$8 sps:$4 sm:$0xff]   ;;  %v1028_v36 = vld [vmem:[%s1184_s7 + $0xf0] ss:$8 sps:$4 sm:$0xff]   ;;  %v1032_v37 = vld [vmem:[%s1184_s7 + $0xe4] ss:$8 sps:$4 sm:$0xff]  }
  0x2f   : > { %634 = vmatprep.subr.bf16.mxu0 %v1005_v12  ;;  %v1055_v38 = vld [vmem:[%s1184_s7 + $0x110] ss:$8 sps:$4 sm:$0xff]   ;;  %v1059_v39 = vld [vmem:[%s1184_s7 + $0x104] ss:$8 sps:$4 sm:$0xff]   ;;  %v1034_v41 = vld [vmem:[%s1184_s7 + $0xe0] ss:$8 sps:$4 sm:$0xff]  }
  0x30   : > { %676 = vmatpush1.bf16.msra.mxu1 %v1031_v22  ;;  %v1071_v40 = vld [vmem:[%s1186_s8 + $0x4] ss:$12 sps:$4 sm:$0xff]   ;;  %v1065_v46 = vld [vmem:[%s1186_s8 + $0x8] ss:$12 sps:$4 sm:$0xff]   ;;  %v1069_v56 = vld [vmem:[%s1186_s8] ss:$12 sps:$4 sm:$0xff]  }
  0x31   : > { %677 = vmatprep.subr.bf16.mxu1 %v1035_v23  ;;  %v1038_v42 = vld [vmem:[%s1184_s7 + $0xd4] ss:$8 sps:$4 sm:$0xff]   ;;  %660 = vmatprep.mubr.bf16.mxu0 %v1071_v40  ;;  %v1061_v43 = vld [vmem:[%s1184_s7 + $0x100] ss:$8 sps:$4 sm:$0xff]   ;;  %v1040_v44 = vld [vmem:[%s1184_s7 + $0xd0] ss:$8 sps:$4 sm:$0xff]  }
  0x32   : > { %635 = vmatpush1.bf16.msra.mxu0 %v1007_v15  ;;  %v1044_v45 = vld [vmem:[%s1184_s7 + $0xc4] ss:$8 sps:$4 sm:$0xff]   ;;  %v1046_v47 = vld [vmem:[%s1184_s7 + $0xc0] ss:$8 sps:$4 sm:$0xff]   ;;  %v1050_v48 = vld [vmem:[%s1184_s7 + $0xb4] ss:$8 sps:$4 sm:$0xff]  }
  0x33   : > { %636 = vmatprep.subr.bf16.mxu0 %v1008_v16  ;;  %v1052_v49 = vld [vmem:[%s1184_s7 + $0xb0] ss:$8 sps:$4 sm:$0xff]   ;;  %v1056_v50 = vld [vmem:[%s1184_s7 + $0xa4] ss:$8 sps:$4 sm:$0xff]   ;;  %v1058_v51 = vld [vmem:[%s1184_s7 + $0xa0] ss:$8 sps:$4 sm:$0xff]  }
  0x34   : > { %678 = vmatpush1.bf16.msra.mxu1 %v1037_v26  ;;  %v1062_v52 = vld [vmem:[%s1184_s7 + $0x94] ss:$8 sps:$4 sm:$0xff]   ;;  %v1064_v53 = vld [vmem:[%s1184_s7 + $0x90] ss:$8 sps:$4 sm:$0xff]   ;;  %v1066_v54 = vld [vmem:[%s1184_s7 + $0x84] ss:$8 sps:$4 sm:$0xff]  }
  0x35   : > { %679 = vmatprep.subr.bf16.mxu1 %v1041_v27  ;;  %v1068_v55 = vld [vmem:[%s1184_s7 + $0x80] ss:$8 sps:$4 sm:$0xff]   ;;  %v318_v3 = vld [vmem:[%s1322_s3 + $0x10] sm:$0xff]  ;;  %v319_v8 = vld [vmem:[%s1322_s3 + $0x18] sm:$0xff] }
  0x36   : > { %637 = vmatpush1.bf16.msra.mxu0 %v1010_v19  ;;  %v316_v59 = vld [vmem:[%s1322_s3] sm:$0xff]  ;;  %v317_v63 = vld [vmem:[%s1322_s3 + $0x8] sm:$0xff] }
  0x37   : > { %638 = vmatprep.subr.bf16.mxu0 %v1011_v21 }
  0x38   : > { %680 = vmatpush1.bf16.msra.mxu1 %v1043_v30 }
  0x39   : > { %681 = vmatprep.subr.bf16.mxu1 %v1047_v31 }
  0x3a   : > { %639 = vmatpush1.bf16.msra.mxu0 %v1013_v24 }
  0x3b   : > { %640 = vmatprep.subr.bf16.mxu0 %v1014_v25 }
  0x3c   : > { %682 = vmatpush1.bf16.msra.mxu1 %v1049_v34 }
  0x3d   : > { %683 = vmatprep.subr.bf16.mxu1 %v1053_v35 }
  0x3e   : > { %641 = vmatpush1.bf16.msra.mxu0 %v1016_v28 }
  0x3f   : > { %642 = vmatprep.subr.bf16.mxu0 %v1020_v29 }
  0x40   : > { %684 = vmatpush1.bf16.msra.mxu1 %v1055_v38 }
  0x41   : > { %685 = vmatprep.subr.bf16.mxu1 %v1059_v39 }
  0x42   : > { %643 = vmatpush1.bf16.msra.mxu0 %v1022_v32 }
  0x43   : > { %644 = vmatprep.subr.bf16.mxu0 %v1026_v33 }
  0x44   : > { %686 = vmatpush1.bf16.msra.mxu1 %v1061_v43 }
  0x46   : > { %645 = vmatpush2.bf16.msra.mxu0 %v1028_v36 }
  0x47   : > { %646 = vmatprep.subr.bf16.mxu0 %v1032_v37  ;;  %704 = vmatmul.mubr.bf16.vlgmr.msra.gmra.mxu1 %v1065_v46 }
  0x4a   : > { %647 = vmatpush2.bf16.msra.mxu0 %v1034_v41 }
  0x4b   : > { %648 = vmatprep.subr.bf16.mxu0 %v1038_v42 }
  0x4e   : > { %649 = vmatpush2.bf16.msra.mxu0 %v1040_v44 }
  0x4f   : > { %650 = vmatprep.subr.bf16.mxu0 %v1044_v45 }
  0x52   : > { %651 = vmatpush2.bf16.msra.mxu0 %v1046_v47 }
  0x53   : > { %652 = vmatprep.subr.bf16.mxu0 %v1050_v48 }
  0x56   : > { %653 = vmatpush2.bf16.msra.mxu0 %v1052_v49 }
  0x57   : > { %654 = vmatprep.subr.bf16.mxu0 %v1056_v50 }
  0x5a   : > { %655 = vmatpush2.bf16.msra.mxu0 %v1058_v51 }
  0x5b   : > { %656 = vmatprep.subr.bf16.mxu0 %v1062_v52 }
  0x5e   : > { %657 = vmatpush2.bf16.msra.mxu0 %v1064_v53 }
  0x5f   : > { %658 = vmatprep.subr.bf16.mxu0 %v1066_v54 }
  0x62   : > { %659 = vmatpush2.bf16.msra.mxu0 %v1068_v55 }
  0x65   : > { %661 = vmatmul.mubr.bf16.vlgmr.msra.gmra.mxu0 %v1069_v56 }
 0x107   : > { %v705_v57 = vpop.f32.mrf.mxu1 }
 0x109   : > { %v707_v58 = vpop.f32.mrf.mxu1 }
 0x10b   : > { %v709_v62 = vpop.f32.mrf.mxu1 }
 0x10d   : > { %v711_v7 = vpop.f32.mrf.mxu1 }
 0x125   : > { %v662_v60 = vpop.f32.mrf.mxu0 }
 0x126   : > { %v706_v61 = vadd.f32 %v705_v57, %v662_v60 }
 0x127   : > { %v664_v0 = vpop.f32.mrf.mxu0 }
 0x128   : > { %v714_v1 = vadd.f32 %v706_v61, %v316_v59  ;;  %v708_v2 = vadd.f32 %v707_v58, %v664_v0 }
 0x129   : > { %v666_v4 = vpop.f32.mrf.mxu0 }
 0x12a   : > { %718 = vst [vmem:[%s1322_s3] sm:$0xff] %v714_v1  ;;  %v715_v5 = vadd.f32 %v708_v2, %v317_v63  ;;  %v710_v6 = vadd.f32 %v709_v62, %v666_v4 }
 0x12b   : > { %v668_v9 = vpop.f32.mrf.mxu0 }
 0x12c   : > { %719 = vst [vmem:[%s1322_s3 + $0x8] sm:$0xff] %v715_v5  ;;  %v716_v10 = vadd.f32 %v710_v6, %v318_v3  ;;  %v712_v11 = vadd.f32 %v711_v7, %v668_v9  ;;  %725 = sbr.rel (%p945_p11) target bundleno = 319 (0x13f), region = 66 }
 0x12e   : > { %720 = vst [vmem:[%s1322_s3 + $0x10] sm:$0xff] %v716_v10  ;;  %v717_v12 = vadd.f32 %v712_v11, %v319_v8 }
 0x130   : > { %721 = vst [vmem:[%s1322_s3 + $0x18] sm:$0xff] %v717_v12 }
 0x131   : > { %v732_v13 = vlaneseq  ;;  %v730_v15 = vld [vmem:[%s1321_s2] sm:$0x3] }
 0x132   : > { %v726_v16 = vld [vmem:[%s1322_s3] sm:$0xff] }
 0x133   : > { %v733_v14 = vshrl.u32 %v732_v13, 7  ;;  %v727_v19 = vld [vmem:[%s1322_s3 + $0x8] sm:$0xff] }
 0x135   : > { %v734_v17 = vsub.s32 0, %v733_v14  ;;  %v738_v18 = vsub.s32 1, %v733_v14  ;;  %v728_v20 = vld [vmem:[%s1322_s3 + $0x10] sm:$0xff] }
 0x137   : > { %v729_v21 = vld [vmem:[%s1322_s3 + $0x18] sm:$0xff]  ;;  %v735_v22 = vrot.slane %v730_v15, %v734_v17  ;;  %v739_v23 = vrot.slane %v730_v15, %v738_v18 }
 0x139   : > { %v742_v24 = vadd.f32 %v735_v22, %v726_v16  ;;  %v743_v25 = vadd.f32 %v739_v23, %v727_v19  ;;  %v744_v26 = vadd.f32 %v735_v22, %v728_v20  ;;  %v745_v27 = vadd.f32 %v739_v23, %v729_v21 }
 0x13b   : > { %v746_v28 = vmax.f32 %v742_v24, 0.0  ;;  %v747_v29 = vmax.f32 %v743_v25, 0.0  ;;  %v748_v30 = vmax.f32 %v744_v26, 0.0  ;;  %v749_v31 = vmax.f32 %v745_v27, 0.0 }
 0x13d   : > { %750 = vst [vmem:[%s1322_s3] sm:$0xff] %v746_v28  ;;  %751 = vst [vmem:[%s1322_s3 + $0x8] sm:$0xff] %v747_v29 }
 0x13e   : > { %752 = vst [vmem:[%s1322_s3 + $0x10] sm:$0xff] %v748_v30  ;;  %753 = vst [vmem:[%s1322_s3 + $0x18] sm:$0xff] %v749_v31 }
 0x13f PF: > { %s13_s16 = sadd.s32 1, %s1110_s16   ;;  %s1323_s12 = smov %s1098_s13 }
 0x140   : > { %p10_p12 = scmp.ge.s32.totalorder %s13_s16, 8   ;;  %s1324_s13 = smov %s1169_s20 }
 0x141   : > { %s1325_s14 = smov %s1106_s15  ;;  %s1326_s15 = smov %s1328_s17 }
 0x142   :  { %12 = sbr.rel (!%p10_p12) target bundleno = 3 (0x3), region = 113 }

// kernel: beyond_the_spectrum_forward.61
= control target key start
LH: loop header
LB: loop body
LE: loop exit
PB: predicated region body
PF: predicated region fallthrough
CT: control target
= control target key end

     0   :  { %s1237_s15 = smov 0   ;;  %s1239_s16 = smov 0   ;;  %s1434_s0 = inlined_call_operand.vmem [shape: bf16[16,2304], index: 0, kind: input, shape index: {}]   ;;  %s1435_s1 = inlined_call_operand.vmem [shape: bf16[2304,256], index: 1, kind: input, shape index: {}]   ;;  %s1436_s2 = inlined_call_operand.vmem [shape: f32[1,256], index: 2, kind: input, shape index: {}]   ;;  %s1437_s3 = inlined_call_operand.vmem [shape: f32[16,256], index: 3, kind: input, shape index: {}]   ;;  %s1438_s4 = inlined_call_operand.vmem [shape: f32[16,256], index: 4, kind: output, shape index: {}]  }
   0x1   :  { %s1241_s17 = smov 0   ;;  %s1243_s18 = smov 0  }
   0x2   :  { %s1245_s19 = smov 0  }
   0x3 LB: > { %s26_s20 = sadd.s32 1, %s1204_s18  ;;  %p49_p1 = scmp.ne.s32.totalorder %s1196_s16, %s1192_s15  ;;  %s1208_s19 = sphi %s1245_s19, %s14_s19   ;;  %s1204_s18 = sphi %s1243_s18, %s1442_s18   ;;  %s1200_s17 = sphi %s1241_s17, %s1441_s17   ;;  %s1196_s16 = sphi %s1239_s16, %s1440_s16   ;;  %s1192_s15 = sphi %s1237_s15, %s1439_s15  }
   0x4   : > { %p27_p0 = scmp.ge.s32.totalorder %s26_s20, 6  ;;  %p50_p2 = scmp.eq.s32.totalorder %s1208_s19, 0 }
   0x5   : > { %s42_s22 = sadd.s32 1, %s1196_s16  ;;  %p982_p5 = scmp.ge.s32.totalorder %s1208_s19, 6 }
   0x6   : > { %s1444_s20 = smov (%p27_p0, %s26_s20), 0  ;;  %p51_p3 = por %p50_p2, %p49_p1 }
   0x7   : > { %s38_s21 = ssub.s32 %s1204_s18, %s1444_s20  ;;  %208 = sbr.rel (%p982_p5) target bundleno = 19 (0x13), region = 24 }
   0x8   : > { %p40_p4 = scmp.eq.s32.totalorder %s38_s21, 0 }
   0xa   : > { %s1272_s23 = scalar_select %p40_p4, %s1196_s16, %s42_s22  }
   0xc   : > { %211 = sbr.rel (!%p51_p3) target bundleno = 19 (0x13), region = 28  ;;  %s213_s24 = sand.u32 (%p51_p3), 1, %s1196_s16  }
   0xd   : > { %s1048_s25 = smul.u32 (%p51_p3), 12, %s1204_s18 }
   0xe   : > { %s1050_s26 = smul.u32 (%p51_p3), 24, %s213_s24 }
   0xf   : > { %s221_s29 = scalar_lea.vmem (%p51_p3), %s1434_s0, %s1048_s25 }
  0x10   : > { %v236_v0 = vld [vmem:[%s221_s29] sm:$0xff] (%p51_p3)  ;;  %v238_v1 = vld [vmem:[%s221_s29 + $0x48] sm:$0xff] (%p51_p3)  ;;  %s215_s30 = scalar_lea.vmem (%p51_p3), [#allocation2], %s1050_s26  ;;  %v986_v3 = vld [vmem:[%s221_s29 + $0x50] sm:$0xf] (%p51_p3) }
  0x11   : > { %v984_v2 = vld [vmem:[%s221_s29 + $0x8] sm:$0xf]  ;;  %237 = vst [vmem:[%s215_s30] sm:$0xff] %v236_v0  ;;  %239 = vst [vmem:[%s215_s30 + $0xc] sm:$0xff] %v238_v1 }
  0x12   : > { %985 = vst [vmem:[%s215_s30 + $0x8] sm:$0xf] %v984_v2  ;;  %987 = vst [vmem:[%s215_s30 + $0x14] sm:$0xf] %v986_v3 }
  0x13 PF: > { %p988_p6 = scmp.ge.s32.totalorder %s1208_s19, 1  ;;  %p271_p7 = scmp.lt.s32.totalorder %s1208_s19, 7 }
  0x15   : > { %p272_p8 = pnand %p988_p6, %p271_p7 }
  0x16   : > { %s278_s5 = sand.u32 (!%p272_p8), 1, %s1192_s15   ;;  %s334_s6 = smul.u32 (!%p272_p8), 48, %s1200_s17 }
  0x17   : > { %275 = sbr.rel (%p272_p8) target bundleno = 321 (0x141), region = 58  ;;  %p991_p10 = scmp.ne.s32.totalorder (!%p272_p8), %s1200_s17, 0 }
  0x18   : > { %s1051_s7 = smul.u32 (!%p272_p8), 24, %s278_s5  ;;  %p336_p9 = scmp.lt.s32.totalorder (!%p272_p8), %s334_s6, 287 }
  0x1a   : > { %s1289_s12 = scalar_lea.vmem (!%p272_p8), [#allocation2], %s1051_s7 }
  0x1c   : > { %s1446_s6 = smov (!%p336_p9, %s334_s6), 287  ;;  %379 = sbr.rel (%p991_p10) target bundleno = 36 (0x24), region = 66 }
  0x1d   : > { %s1049_s8 = sshll.u32 %s1446_s6, 3 }
  0x1e   : > { %s1287_s11 = scalar_lea.vmem %s1435_s1, %s1049_s8 }
  0x21   : > { %v1210_v4 = vmov 0.0  }
  0x22   : > { %380 = vst [vmem:[%s1438_s4] sm:$0xff] %v1210_v4  ;;  %381 = vst [vmem:[%s1438_s4 + $0x8] sm:$0xff] %v1210_v4 }
  0x23   : > { %382 = vst [vmem:[%s1438_s4 + $0x10] sm:$0xff] %v1210_v4  ;;  %383 = vst [vmem:[%s1438_s4 + $0x18] sm:$0xff] %v1210_v4 }
  0x24 PF: > { %v1094_v5 = vld [vmem:[%s1287_s11 + $0x74] ss:$8 sps:$4 sm:$0xff]   ;;  %v1096_v6 = vld [vmem:[%s1287_s11 + $0x70] ss:$8 sps:$4 sm:$0xff]   ;;  %v1211_v7 = vmov 0   ;;  %p1043_p11 = scmp.ne.s32.totalorder %s1200_s17, 5 }
  0x25   : > { %771 = vmatprep.mubr.bf16.mxu1 %v1211_v7  ;;  %696 = vmatprep.subr.bf16.mxu0 %v1094_v5  ;;  %v1097_v8 = vld [vmem:[%s1287_s11 + $0x64] ss:$8 sps:$4 sm:$0xff]   ;;  %v1099_v9 = vld [vmem:[%s1287_s11 + $0x60] ss:$8 sps:$4 sm:$0xff]   ;;  %v1100_v10 = vld [vmem:[%s1287_s11 + $0x54] ss:$8 sps:$4 sm:$0xff]  }
  0x26   : > { %697 = vmatpush1.bf16.msra.mxu0 %v1096_v6  ;;  %v1102_v11 = vld [vmem:[%s1287_s11 + $0x50] ss:$8 sps:$4 sm:$0xff]   ;;  %v1103_v12 = vld [vmem:[%s1287_s11 + $0x44] ss:$8 sps:$4 sm:$0xff]   ;;  %v1115_v13 = vld [vmem:[%s1287_s11 + $0x174] ss:$8 sps:$4 sm:$0xff]  }
  0x27   : > { %698 = vmatprep.subr.bf16.mxu0 %v1097_v8  ;;  %v1117_v14 = vld [vmem:[%s1287_s11 + $0x170] ss:$8 sps:$4 sm:$0xff]   ;;  %v1105_v15 = vld [vmem:[%s1287_s11 + $0x40] ss:$8 sps:$4 sm:$0xff]   ;;  %v1106_v16 = vld [vmem:[%s1287_s11 + $0x34] ss:$8 sps:$4 sm:$0xff]   ;;  %739 = vmatprep.subr.bf16.mxu1 %v1115_v13 }
  0x28   : > { %v1121_v17 = vld [vmem:[%s1287_s11 + $0x164] ss:$8 sps:$4 sm:$0xff]   ;;  %740 = vmatpush1.bf16.msra.mxu1 %v1117_v14  ;;  %v1123_v18 = vld [vmem:[%s1287_s11 + $0x160] ss:$8 sps:$4 sm:$0xff]   ;;  %v1108_v19 = vld [vmem:[%s1287_s11 + $0x30] ss:$8 sps:$4 sm:$0xff]  }
  0x29   : > { %741 = vmatprep.subr.bf16.mxu1 %v1121_v17  ;;  %v1127_v20 = vld [vmem:[%s1287_s11 + $0x154] ss:$8 sps:$4 sm:$0xff]   ;;  %v1109_v21 = vld [vmem:[%s1287_s11 + $0x24] ss:$8 sps:$4 sm:$0xff]   ;;  %v1129_v22 = vld [vmem:[%s1287_s11 + $0x150] ss:$8 sps:$4 sm:$0xff]  }
  0x2a   : > { %699 = vmatpush1.bf16.msra.mxu0 %v1099_v9  ;;  %v1133_v23 = vld [vmem:[%s1287_s11 + $0x144] ss:$8 sps:$4 sm:$0xff]   ;;  %v1111_v24 = vld [vmem:[%s1287_s11 + $0x20] ss:$8 sps:$4 sm:$0xff]   ;;  %v1112_v25 = vld [vmem:[%s1287_s11 + $0x14] ss:$8 sps:$4 sm:$0xff]  }
  0x2b   : > { %700 = vmatprep.subr.bf16.mxu0 %v1100_v10  ;;  %v1135_v26 = vld [vmem:[%s1287_s11 + $0x140] ss:$8 sps:$4 sm:$0xff]   ;;  %v1139_v27 = vld [vmem:[%s1287_s11 + $0x134] ss:$8 sps:$4 sm:$0xff]   ;;  %v1114_v28 = vld [vmem:[%s1287_s11 + $0x10] ss:$8 sps:$4 sm:$0xff]  }
  0x2c   : > { %742 = vmatpush1.bf16.msra.mxu1 %v1123_v18  ;;  %v1118_v29 = vld [vmem:[%s1287_s11 + $0x4] ss:$8 sps:$4 sm:$0xff]   ;;  %v1141_v30 = vld [vmem:[%s1287_s11 + $0x130] ss:$8 sps:$4 sm:$0xff]   ;;  %v1120_v32 = vld [vmem:[%s1287_s11] ss:$8 sps:$4 sm:$0xff]  }
  0x2d   : > { %743 = vmatprep.subr.bf16.mxu1 %v1127_v20  ;;  %v1145_v31 = vld [vmem:[%s1287_s11 + $0x124] ss:$8 sps:$4 sm:$0xff]   ;;  %v1124_v33 = vld [vmem:[%s1287_s11 + $0xf4] ss:$8 sps:$4 sm:$0xff]   ;;  %v1147_v34 = vld [vmem:[%s1287_s11 + $0x120] ss:$8 sps:$4 sm:$0xff]  }
  0x2e   : > { %701 = vmatpush1.bf16.msra.mxu0 %v1102_v11  ;;  %v1151_v35 = vld [vmem:[%s1287_s11 + $0x114] ss:$8 sps:$4 sm:$0xff]   ;;  %v1126_v36 = vld [vmem:[%s1287_s11 + $0xf0] ss:$8 sps:$4 sm:$0xff]   ;;  %v1130_v37 = vld [vmem:[%s1287_s11 + $0xe4] ss:$8 sps:$4 sm:$0xff]  }
  0x2f   : > { %702 = vmatprep.subr.bf16.mxu0 %v1103_v12  ;;  %v1153_v38 = vld [vmem:[%s1287_s11 + $0x110] ss:$8 sps:$4 sm:$0xff]   ;;  %v1157_v39 = vld [vmem:[%s1287_s11 + $0x104] ss:$8 sps:$4 sm:$0xff]   ;;  %v1132_v41 = vld [vmem:[%s1287_s11 + $0xe0] ss:$8 sps:$4 sm:$0xff]  }
  0x30   : > { %744 = vmatpush1.bf16.msra.mxu1 %v1129_v22  ;;  %v1169_v40 = vld [vmem:[%s1289_s12 + $0x4] ss:$12 sps:$4 sm:$0xff]   ;;  %v1163_v46 = vld [vmem:[%s1289_s12 + $0x8] ss:$12 sps:$4 sm:$0xff]   ;;  %v1167_v56 = vld [vmem:[%s1289_s12] ss:$12 sps:$4 sm:$0xff]  }
  0x31   : > { %745 = vmatprep.subr.bf16.mxu1 %v1133_v23  ;;  %v1136_v42 = vld [vmem:[%s1287_s11 + $0xd4] ss:$8 sps:$4 sm:$0xff]   ;;  %728 = vmatprep.mubr.bf16.mxu0 %v1169_v40  ;;  %v1159_v43 = vld [vmem:[%s1287_s11 + $0x100] ss:$8 sps:$4 sm:$0xff]   ;;  %v1138_v44 = vld [vmem:[%s1287_s11 + $0xd0] ss:$8 sps:$4 sm:$0xff]  }
  0x32   : > { %703 = vmatpush1.bf16.msra.mxu0 %v1105_v15  ;;  %v1142_v45 = vld [vmem:[%s1287_s11 + $0xc4] ss:$8 sps:$4 sm:$0xff]   ;;  %v1144_v47 = vld [vmem:[%s1287_s11 + $0xc0] ss:$8 sps:$4 sm:$0xff]   ;;  %v1148_v48 = vld [vmem:[%s1287_s11 + $0xb4] ss:$8 sps:$4 sm:$0xff]  }
  0x33   : > { %704 = vmatprep.subr.bf16.mxu0 %v1106_v16  ;;  %v1150_v49 = vld [vmem:[%s1287_s11 + $0xb0] ss:$8 sps:$4 sm:$0xff]   ;;  %v1154_v50 = vld [vmem:[%s1287_s11 + $0xa4] ss:$8 sps:$4 sm:$0xff]   ;;  %v1156_v51 = vld [vmem:[%s1287_s11 + $0xa0] ss:$8 sps:$4 sm:$0xff]  }
  0x34   : > { %746 = vmatpush1.bf16.msra.mxu1 %v1135_v26  ;;  %v1160_v52 = vld [vmem:[%s1287_s11 + $0x94] ss:$8 sps:$4 sm:$0xff]   ;;  %v1162_v53 = vld [vmem:[%s1287_s11 + $0x90] ss:$8 sps:$4 sm:$0xff]   ;;  %v1164_v54 = vld [vmem:[%s1287_s11 + $0x84] ss:$8 sps:$4 sm:$0xff]  }
  0x35   : > { %747 = vmatprep.subr.bf16.mxu1 %v1139_v27  ;;  %v1166_v55 = vld [vmem:[%s1287_s11 + $0x80] ss:$8 sps:$4 sm:$0xff]   ;;  %v386_v3 = vld [vmem:[%s1438_s4 + $0x10] sm:$0xff]  ;;  %v387_v8 = vld [vmem:[%s1438_s4 + $0x18] sm:$0xff] }
  0x36   : > { %705 = vmatpush1.bf16.msra.mxu0 %v1108_v19  ;;  %v384_v59 = vld [vmem:[%s1438_s4] sm:$0xff]  ;;  %v385_v63 = vld [vmem:[%s1438_s4 + $0x8] sm:$0xff] }
  0x37   : > { %706 = vmatprep.subr.bf16.mxu0 %v1109_v21 }
  0x38   : > { %748 = vmatpush1.bf16.msra.mxu1 %v1141_v30 }
  0x39   : > { %749 = vmatprep.subr.bf16.mxu1 %v1145_v31 }
  0x3a   : > { %707 = vmatpush1.bf16.msra.mxu0 %v1111_v24 }
  0x3b   : > { %708 = vmatprep.subr.bf16.mxu0 %v1112_v25 }
  0x3c   : > { %750 = vmatpush1.bf16.msra.mxu1 %v1147_v34 }
  0x3d   : > { %751 = vmatprep.subr.bf16.mxu1 %v1151_v35 }
  0x3e   : > { %709 = vmatpush1.bf16.msra.mxu0 %v1114_v28 }
  0x3f   : > { %710 = vmatprep.subr.bf16.mxu0 %v1118_v29 }
  0x40   : > { %752 = vmatpush1.bf16.msra.mxu1 %v1153_v38 }
  0x41   : > { %753 = vmatprep.subr.bf16.mxu1 %v1157_v39 }
  0x42   : > { %711 = vmatpush1.bf16.msra.mxu0 %v1120_v32 }
  0x43   : > { %712 = vmatprep.subr.bf16.mxu0 %v1124_v33 }
  0x44   : > { %754 = vmatpush1.bf16.msra.mxu1 %v1159_v43 }
  0x46   : > { %713 = vmatpush2.bf16.msra.mxu0 %v1126_v36 }
  0x47   : > { %714 = vmatprep.subr.bf16.mxu0 %v1130_v37  ;;  %772 = vmatmul.mubr.bf16.vlgmr.msra.gmra.mxu1 %v1163_v46 }
  0x4a   : > { %715 = vmatpush2.bf16.msra.mxu0 %v1132_v41 }
  0x4b   : > { %716 = vmatprep.subr.bf16.mxu0 %v1136_v42 }
  0x4e   : > { %717 = vmatpush2.bf16.msra.mxu0 %v1138_v44 }
  0x4f   : > { %718 = vmatprep.subr.bf16.mxu0 %v1142_v45 }
  0x52   : > { %719 = vmatpush2.bf16.msra.mxu0 %v1144_v47 }
  0x53   : > { %720 = vmatprep.subr.bf16.mxu0 %v1148_v48 }
  0x56   : > { %721 = vmatpush2.bf16.msra.mxu0 %v1150_v49 }
  0x57   : > { %722 = vmatprep.subr.bf16.mxu0 %v1154_v50 }
  0x5a   : > { %723 = vmatpush2.bf16.msra.mxu0 %v1156_v51 }
  0x5b   : > { %724 = vmatprep.subr.bf16.mxu0 %v1160_v52 }
  0x5e   : > { %725 = vmatpush2.bf16.msra.mxu0 %v1162_v53 }
  0x5f   : > { %726 = vmatprep.subr.bf16.mxu0 %v1164_v54 }
  0x62   : > { %727 = vmatpush2.bf16.msra.mxu0 %v1166_v55 }
  0x65   : > { %729 = vmatmul.mubr.bf16.vlgmr.msra.gmra.mxu0 %v1167_v56 }
 0x107   : > { %v773_v57 = vpop.f32.mrf.mxu1 }
 0x109   : > { %v775_v58 = vpop.f32.mrf.mxu1 }
 0x10b   : > { %v777_v62 = vpop.f32.mrf.mxu1 }
 0x10d   : > { %v779_v7 = vpop.f32.mrf.mxu1 }
 0x125   : > { %v730_v60 = vpop.f32.mrf.mxu0 }
 0x126   : > { %v774_v61 = vadd.f32 %v773_v57, %v730_v60 }
 0x127   : > { %v732_v0 = vpop.f32.mrf.mxu0 }
 0x128   : > { %v782_v1 = vadd.f32 %v774_v61, %v384_v59  ;;  %v776_v2 = vadd.f32 %v775_v58, %v732_v0 }
 0x129   : > { %v734_v4 = vpop.f32.mrf.mxu0 }
 0x12a   : > { %786 = vst [vmem:[%s1438_s4] sm:$0xff] %v782_v1  ;;  %v783_v5 = vadd.f32 %v776_v2, %v385_v63  ;;  %v778_v6 = vadd.f32 %v777_v62, %v734_v4 }
 0x12b   : > { %v736_v9 = vpop.f32.mrf.mxu0 }
 0x12c   : > { %787 = vst [vmem:[%s1438_s4 + $0x8] sm:$0xff] %v783_v5  ;;  %v784_v10 = vadd.f32 %v778_v6, %v386_v3  ;;  %v780_v11 = vadd.f32 %v779_v7, %v736_v9  ;;  %793 = sbr.rel (%p1043_p11) target bundleno = 321 (0x141), region = 70 }
 0x12e   : > { %788 = vst [vmem:[%s1438_s4 + $0x10] sm:$0xff] %v784_v10  ;;  %v785_v12 = vadd.f32 %v780_v11, %v387_v8 }
 0x130   : > { %789 = vst [vmem:[%s1438_s4 + $0x18] sm:$0xff] %v785_v12 }
 0x131   : > { %v800_v13 = vlaneseq  ;;  %v798_v15 = vld [vmem:[%s1436_s2] sm:$0x3]  ;;  %v815_v25 = vld [vmem:[%s1437_s3 + $0x8] sm:$0xff]  ;;  %v816_v26 = vld [vmem:[%s1437_s3 + $0x10] sm:$0xff] }
 0x132   : > { %v794_v16 = vld [vmem:[%s1438_s4] sm:$0xff]  ;;  %v817_v27 = vld [vmem:[%s1437_s3 + $0x18] sm:$0xff] }
 0x133   : > { %v801_v14 = vshrl.u32 %v800_v13, 7  ;;  %v795_v19 = vld [vmem:[%s1438_s4 + $0x8] sm:$0xff]  ;;  %v814_v23 = vld [vmem:[%s1437_s3] sm:$0xff] }
 0x135   : > { %v802_v17 = vsub.s32 0, %v801_v14  ;;  %v806_v18 = vsub.s32 1, %v801_v14  ;;  %v796_v20 = vld [vmem:[%s1438_s4 + $0x10] sm:$0xff] }
 0x137   : > { %v797_v21 = vld [vmem:[%s1438_s4 + $0x18] sm:$0xff]  ;;  %v803_v22 = vrot.slane %v798_v15, %v802_v17  ;;  %v807_v24 = vrot.slane %v798_v15, %v806_v18 }
 0x139   : > { %v810_v28 = vadd.f32 %v803_v22, %v794_v16  ;;  %v811_v29 = vadd.f32 %v807_v24, %v795_v19  ;;  %v812_v30 = vadd.f32 %v803_v22, %v796_v20  ;;  %v813_v31 = vadd.f32 %v807_v24, %v797_v21 }
 0x13b   : > { %v818_v32 = vadd.f32 %v814_v23, %v810_v28  ;;  %v819_v33 = vadd.f32 %v815_v25, %v811_v29  ;;  %v820_v34 = vadd.f32 %v816_v26, %v812_v30  ;;  %v821_v35 = vadd.f32 %v817_v27, %v813_v31 }
 0x13d   : > { %v822_v36 = vmax.f32 %v818_v32, 0.0  ;;  %v823_v37 = vmax.f32 %v819_v33, 0.0  ;;  %v824_v38 = vmax.f32 %v820_v34, 0.0  ;;  %v825_v39 = vmax.f32 %v821_v35, 0.0 }
 0x13f   : > { %826 = vst [vmem:[%s1438_s4] sm:$0xff] %v822_v36  ;;  %827 = vst [vmem:[%s1438_s4 + $0x8] sm:$0xff] %v823_v37 }
 0x140   : > { %828 = vst [vmem:[%s1438_s4 + $0x10] sm:$0xff] %v824_v38  ;;  %829 = vst [vmem:[%s1438_s4 + $0x18] sm:$0xff] %v825_v39 }
 0x141 PF: > { %s14_s19 = sadd.s32 1, %s1208_s19   ;;  %s1439_s15 = smov %s1196_s16 }
 0x142   : > { %p11_p12 = scmp.ge.s32.totalorder %s14_s19, 8   ;;  %s1440_s16 = smov %s1272_s23 }
 0x143   : > { %s1441_s17 = smov %s1204_s18  ;;  %s1442_s18 = smov %s1444_s20 }
 0x144   :  { %13 = sbr.rel (!%p11_p12) target bundleno = 3 (0x3), region = 120 }

// kernel: beyond_the_spectrum_forward.65
= control target key start
LH: loop header
LB: loop body
LE: loop exit
PB: predicated region body
PF: predicated region fallthrough
CT: control target
= control target key end

     0   :  { %s1054_s12 = smov 0   ;;  %s1056_s13 = smov 0   ;;  %s1242_s0 = inlined_call_operand.vmem [shape: bf16[16,256], index: 0, kind: input, shape index: {}]   ;;  %s1243_s1 = inlined_call_operand.vmem [shape: bf16[256,512], index: 1, kind: input, shape index: {}]   ;;  %s1244_s2 = inlined_call_operand.vmem [shape: f32[1,512], index: 2, kind: input, shape index: {}]   ;;  %s1245_s3 = inlined_call_operand.vmem [shape: f32[16,512], index: 3, kind: output, shape index: {}]  }
   0x1   :  { %s1058_s14 = smov 0   ;;  %s1060_s15 = smov 0  }
   0x2   :  { %s1062_s16 = smov 0  }
   0x3 LB: > { %s28_s17 = sadd.s32 1, %s1028_s15  ;;  %s849_s18 = sadd.s32 4294967295, %s1032_s16   ;;  %s1032_s16 = sphi %s1062_s16, %s13_s16   ;;  %s1028_s15 = sphi %s1060_s15, %s1250_s15   ;;  %s1024_s14 = sphi %s1058_s14, %s1249_s14   ;;  %s1020_s13 = sphi %s1056_s13, %s1248_s13   ;;  %s1016_s12 = sphi %s1054_s12, %s1247_s12  }
   0x4   : > { %p30_p0 = scmp.ge.s32.totalorder %s28_s17, 2  ;;  %p76_p1 = scmp.ne.s32.totalorder %s1020_s13, %s1016_s12 }
   0x5   : > { %p77_p2 = scmp.eq.s32.totalorder %s1032_s16, 0  ;;  %p134_p4 = scmp.eq.s32.totalorder %s849_s18, 1 }
   0x6   : > { %s1252_s17 = smov (%p30_p0, %s28_s17), 0  ;;  %s69_s20 = sadd.s32 1, %s1020_s13 }
   0x7   : > { %p78_p3 = por %p77_p2, %p76_p1  ;;  %s65_s19 = ssub.s32 %s1028_s15, %s1252_s17 }
   0x8   : > { %p67_p5 = scmp.eq.s32.totalorder %s65_s19, 0  ;;  %p1089_p6 = por %p134_p4, %p76_p1 }
   0x9   : > { %p853_p7 = scmp.ge.s32.totalorder %s1032_s16, 2 }
   0xa   : > { %s1094_s22 = scalar_select %p67_p5, %s1020_s13, %s69_s20  }
   0xb   : > { %171 = sbr.rel (%p853_p7) target bundleno = 36 (0x24), region = 20 }
  0x10   : > { %174 = sbr.rel (!%p78_p3) target bundleno = 36 (0x24), region = 24  ;;  %s176_s23 = sand.u32 (%p78_p3), 1, %s1020_s13  }
  0x11   : > { %s900_s24 = sshll.u32 (%p78_p3), %s1028_s15, 3  ;;  %s854_s25 = sshll.u32 (%p78_p3), %s176_s23, 8 }
  0x12   : > { %s1102_s28 = scalar_lea.vmem (%p78_p3), %s1243_s1, %s900_s24  ;;  %s1107_s29 = scalar_lea.vmem (%p78_p3), [#allocation2], %s854_s25 }
  0x13   : > { %v275_v0 = vld [vmem:[%s1102_s28] sm:$0xff] (%p78_p3)  ;;  %v277_v1 = vld [vmem:[%s1102_s28 + $0x10] sm:$0xff] (%p78_p3) }
  0x14   : > { %v279_v2 = vld [vmem:[%s1102_s28 + $0x20] sm:$0xff] (%p78_p3)  ;;  %276 = vst [vmem:[%s1107_s29] sm:$0xff] (%p78_p3), %v275_v0  ;;  %278 = vst [vmem:[%s1107_s29 + $0x8] sm:$0xff] (%p78_p3), %v277_v1  ;;  %v281_v3 = vld [vmem:[%s1102_s28 + $0x30] sm:$0xff] (%p78_p3) }
  0x15   : > { %280 = vst [vmem:[%s1107_s29 + $0x10] sm:$0xff] %v279_v2  ;;  %v283_v4 = vld [vmem:[%s1102_s28 + $0x40] sm:$0xff]  ;;  %v285_v5 = vld [vmem:[%s1102_s28 + $0x50] sm:$0xff]  ;;  %282 = vst [vmem:[%s1107_s29 + $0x18] sm:$0xff] %v281_v3 }
  0x16   : > { %284 = vst [vmem:[%s1107_s29 + $0x20] sm:$0xff] %v283_v4  ;;  %286 = vst [vmem:[%s1107_s29 + $0x28] sm:$0xff] %v285_v5  ;;  %v287_v6 = vld [vmem:[%s1102_s28 + $0x60] sm:$0xff]  ;;  %v289_v7 = vld [vmem:[%s1102_s28 + $0x70] sm:$0xff] }
  0x17   : > { %v291_v8 = vld [vmem:[%s1102_s28 + $0x80] sm:$0xff]  ;;  %288 = vst [vmem:[%s1107_s29 + $0x30] sm:$0xff] %v287_v6  ;;  %290 = vst [vmem:[%s1107_s29 + $0x38] sm:$0xff] %v289_v7  ;;  %v293_v9 = vld [vmem:[%s1102_s28 + $0x90] sm:$0xff] }
  0x18   : > { %292 = vst [vmem:[%s1107_s29 + $0x40] sm:$0xff] %v291_v8  ;;  %v295_v10 = vld [vmem:[%s1102_s28 + $0xa0] sm:$0xff]  ;;  %v297_v11 = vld [vmem:[%s1102_s28 + $0xb0] sm:$0xff]  ;;  %294 = vst [vmem:[%s1107_s29 + $0x48] sm:$0xff] %v293_v9 }
  0x19   : > { %296 = vst [vmem:[%s1107_s29 + $0x50] sm:$0xff] %v295_v10  ;;  %298 = vst [vmem:[%s1107_s29 + $0x58] sm:$0xff] %v297_v11  ;;  %v299_v12 = vld [vmem:[%s1102_s28 + $0xc0] sm:$0xff]  ;;  %v301_v13 = vld [vmem:[%s1102_s28 + $0xd0] sm:$0xff] }
  0x1a   : > { %v303_v14 = vld [vmem:[%s1102_s28 + $0xe0] sm:$0xff]  ;;  %300 = vst [vmem:[%s1107_s29 + $0x60] sm:$0xff] %v299_v12  ;;  %302 = vst [vmem:[%s1107_s29 + $0x68] sm:$0xff] %v301_v13  ;;  %v305_v15 = vld [vmem:[%s1102_s28 + $0xf0] sm:$0xff] }
  0x1b   : > { %304 = vst [vmem:[%s1107_s29 + $0x70] sm:$0xff] %v303_v14  ;;  %v307_v16 = vld [vmem:[%s1102_s28 + $0x100] sm:$0xff]  ;;  %v309_v17 = vld [vmem:[%s1102_s28 + $0x110] sm:$0xff]  ;;  %306 = vst [vmem:[%s1107_s29 + $0x78] sm:$0xff] %v305_v15 }
  0x1c   : > { %308 = vst [vmem:[%s1107_s29 + $0x80] sm:$0xff] %v307_v16  ;;  %310 = vst [vmem:[%s1107_s29 + $0x88] sm:$0xff] %v309_v17  ;;  %v311_v18 = vld [vmem:[%s1102_s28 + $0x120] sm:$0xff]  ;;  %v313_v19 = vld [vmem:[%s1102_s28 + $0x130] sm:$0xff] }
  0x1d   : > { %v315_v20 = vld [vmem:[%s1102_s28 + $0x140] sm:$0xff]  ;;  %312 = vst [vmem:[%s1107_s29 + $0x90] sm:$0xff] %v311_v18  ;;  %314 = vst [vmem:[%s1107_s29 + $0x98] sm:$0xff] %v313_v19  ;;  %v317_v21 = vld [vmem:[%s1102_s28 + $0x150] sm:$0xff] }
  0x1e   : > { %316 = vst [vmem:[%s1107_s29 + $0xa0] sm:$0xff] %v315_v20  ;;  %v319_v22 = vld [vmem:[%s1102_s28 + $0x160] sm:$0xff]  ;;  %v321_v23 = vld [vmem:[%s1102_s28 + $0x170] sm:$0xff]  ;;  %318 = vst [vmem:[%s1107_s29 + $0xa8] sm:$0xff] %v317_v21 }
  0x1f   : > { %320 = vst [vmem:[%s1107_s29 + $0xb0] sm:$0xff] %v319_v22  ;;  %322 = vst [vmem:[%s1107_s29 + $0xb8] sm:$0xff] %v321_v23  ;;  %v323_v24 = vld [vmem:[%s1102_s28 + $0x180] sm:$0xff]  ;;  %v325_v25 = vld [vmem:[%s1102_s28 + $0x190] sm:$0xff] }
  0x20   : > { %v327_v26 = vld [vmem:[%s1102_s28 + $0x1a0] sm:$0xff]  ;;  %324 = vst [vmem:[%s1107_s29 + $0xc0] sm:$0xff] %v323_v24  ;;  %326 = vst [vmem:[%s1107_s29 + $0xc8] sm:$0xff] %v325_v25  ;;  %v329_v27 = vld [vmem:[%s1102_s28 + $0x1b0] sm:$0xff] }
  0x21   : > { %328 = vst [vmem:[%s1107_s29 + $0xd0] sm:$0xff] %v327_v26  ;;  %v331_v28 = vld [vmem:[%s1102_s28 + $0x1c0] sm:$0xff]  ;;  %v333_v29 = vld [vmem:[%s1102_s28 + $0x1d0] sm:$0xff]  ;;  %330 = vst [vmem:[%s1107_s29 + $0xd8] sm:$0xff] %v329_v27 }
  0x22   : > { %332 = vst [vmem:[%s1107_s29 + $0xe0] sm:$0xff] %v331_v28  ;;  %334 = vst [vmem:[%s1107_s29 + $0xe8] sm:$0xff] %v333_v29  ;;  %v335_v30 = vld [vmem:[%s1102_s28 + $0x1e0] sm:$0xff]  ;;  %v337_v31 = vld [vmem:[%s1102_s28 + $0x1f0] sm:$0xff] }
  0x23   : > { %336 = vst [vmem:[%s1107_s29 + $0xf0] sm:$0xff] %v335_v30  ;;  %338 = vst [vmem:[%s1107_s29 + $0xf8] sm:$0xff] %v337_v31 }
  0x24 PF: > { %p857_p8 = scmp.ge.s32.totalorder %s1032_s16, 1  ;;  %p351_p9 = scmp.lt.s32.totalorder %s1032_s16, 3 }
  0x26   : > { %p352_p10 = pnand %p857_p8, %p351_p9 }
  0x27   : > { %s358_s30 = sand.u32 (!%p352_p10), 1, %s1016_s12   ;;  %s860_s10 = sshll.u32 (!%p352_p10), %s1024_s14, 1 }
  0x28   : > { %355 = sbr.rel (%p352_p10) target bundleno = 320 (0x140), region = 66  ;;  %s858_s4 = sshll.u32 (!%p352_p10), %s358_s30, 8 }
  0x29   : > { %s1178_s7 = scalar_lea.vmem (!%p352_p10), [#allocation2], %s858_s4  ;;  %p409_p11 = scmp.lt.s32.totalorder (!%p352_p10), %s860_s10, 3 }
  0x2a   : > { %s859_s20 = sshll.u32 (!%p352_p10), %s358_s30, 5 }
  0x2b   : > { %s393_s23 = scalar_lea.vmem (!%p352_p10), [#allocation3], %s859_s20 }
  0x2d   : > { %v993_v32 = vld [vmem:[%s1242_s0 + $0x4] ss:$8 sps:$4 sm:$0xff]   ;;  %v943_v33 = vld [vmem:[%s1178_s7 + $0x74] ss:$8 sps:$4 sm:$0xff]   ;;  %v945_v34 = vld [vmem:[%s1178_s7 + $0x70] ss:$8 sps:$4 sm:$0xff]   ;;  %v691_v2 = vlaneseq }
  0x2e   : > { %663 = vmatprep.mubr.bf16.mxu0 %v993_v32  ;;  %631 = vmatprep.subr.bf16.mxu0 %v943_v33  ;;  %v946_v35 = vld [vmem:[%s1178_s7 + $0x64] ss:$8 sps:$4 sm:$0xff]   ;;  %v948_v36 = vld [vmem:[%s1178_s7 + $0x60] ss:$8 sps:$4 sm:$0xff]   ;;  %v949_v37 = vld [vmem:[%s1178_s7 + $0x54] ss:$8 sps:$4 sm:$0xff]  }
  0x2f   : > { %632 = vmatpush1.bf16.msra.mxu0 %v945_v34  ;;  %v951_v38 = vld [vmem:[%s1178_s7 + $0x50] ss:$8 sps:$4 sm:$0xff]   ;;  %v952_v39 = vld [vmem:[%s1178_s7 + $0x44] ss:$8 sps:$4 sm:$0xff]   ;;  %v954_v40 = vld [vmem:[%s1178_s7 + $0x40] ss:$8 sps:$4 sm:$0xff]  }
  0x30   : > { %633 = vmatprep.subr.bf16.mxu0 %v946_v35  ;;  %v955_v41 = vld [vmem:[%s1178_s7 + $0x34] ss:$8 sps:$4 sm:$0xff]   ;;  %v957_v42 = vld [vmem:[%s1178_s7 + $0x30] ss:$8 sps:$4 sm:$0xff]   ;;  %v958_v43 = vld [vmem:[%s1178_s7 + $0x24] ss:$8 sps:$4 sm:$0xff]  }
  0x31   : > { %v960_v44 = vld [vmem:[%s1178_s7 + $0x20] ss:$8 sps:$4 sm:$0xff]   ;;  %v961_v45 = vld [vmem:[%s1178_s7 + $0x14] ss:$8 sps:$4 sm:$0xff]   ;;  %v963_v46 = vld [vmem:[%s1178_s7 + $0x10] ss:$8 sps:$4 sm:$0xff]  }
  0x32   : > { %v964_v47 = vld [vmem:[%s1178_s7 + $0x4] ss:$8 sps:$4 sm:$0xff]   ;;  %v966_v48 = vld [vmem:[%s1178_s7] ss:$8 sps:$4 sm:$0xff]   ;;  %v967_v49 = vld [vmem:[%s1178_s7 + $0xf4] ss:$8 sps:$4 sm:$0xff]  }
  0x33   : > { %634 = vmatpush1.bf16.msra.mxu0 %v948_v36  ;;  %v969_v50 = vld [vmem:[%s1178_s7 + $0xf0] ss:$8 sps:$4 sm:$0xff]   ;;  %v970_v51 = vld [vmem:[%s1178_s7 + $0xe4] ss:$8 sps:$4 sm:$0xff]   ;;  %v972_v52 = vld [vmem:[%s1178_s7 + $0xe0] ss:$8 sps:$4 sm:$0xff]  }
  0x34   : > { %635 = vmatprep.subr.bf16.mxu0 %v949_v37  ;;  %v973_v53 = vld [vmem:[%s1178_s7 + $0xd4] ss:$8 sps:$4 sm:$0xff]   ;;  %v975_v54 = vld [vmem:[%s1178_s7 + $0xd0] ss:$8 sps:$4 sm:$0xff]   ;;  %v976_v55 = vld [vmem:[%s1178_s7 + $0xc4] ss:$8 sps:$4 sm:$0xff]  }
  0x35   : > { %v978_v56 = vld [vmem:[%s1178_s7 + $0xc0] ss:$8 sps:$4 sm:$0xff]   ;;  %v979_v57 = vld [vmem:[%s1178_s7 + $0xb4] ss:$8 sps:$4 sm:$0xff]   ;;  %v981_v58 = vld [vmem:[%s1178_s7 + $0xb0] ss:$8 sps:$4 sm:$0xff]  }
  0x36   : > { %v982_v59 = vld [vmem:[%s1178_s7 + $0xa4] ss:$8 sps:$4 sm:$0xff]   ;;  %v984_v60 = vld [vmem:[%s1178_s7 + $0xa0] ss:$8 sps:$4 sm:$0xff]   ;;  %v985_v61 = vld [vmem:[%s1178_s7 + $0x94] ss:$8 sps:$4 sm:$0xff]  }
  0x37   : > { %636 = vmatpush1.bf16.msra.mxu0 %v951_v38  ;;  %v987_v62 = vld [vmem:[%s1178_s7 + $0x90] ss:$8 sps:$4 sm:$0xff]   ;;  %v988_v63 = vld [vmem:[%s1178_s7 + $0x84] ss:$8 sps:$4 sm:$0xff]   ;;  %v990_v0 = vld [vmem:[%s1178_s7 + $0x80] ss:$8 sps:$4 sm:$0xff]  }
  0x38   : > { %637 = vmatprep.subr.bf16.mxu0 %v952_v39  ;;  %v991_v1 = vld [vmem:[%s1242_s0] ss:$8 sps:$4 sm:$0xff]   ;;  %s1254_s10 = smov (!%p409_p11, %s860_s10), 3  ;;  %v692_v3 = vshrl.u32 %v691_v2, 7  ;;  %s901_s12 = sshll.u32 (%p1089_p6), %s1024_s14, 4 }
  0x39   : > { %s411_s19 = scalar_lea.vmem %s1244_s2, %s1254_s10  ;;  %s721_s26 = scalar_lea.vmem (%p1089_p6), %s1245_s3, %s901_s12 }
  0x3a   : > { %v693_v4 = vsub.s32 0, %v692_v3  ;;  %v689_v5 = vld [vmem:[%s411_s19] sm:$0x3]  ;;  %v697_v6 = vsub.s32 1, %v692_v3 }
  0x3b   : > { %638 = vmatpush1.bf16.msra.mxu0 %v954_v40 }
  0x3c   : > { %639 = vmatprep.subr.bf16.mxu0 %v955_v41  ;;  %v694_v7 = vrot.slane %v689_v5, %v693_v4  ;;  %v698_v9 = vrot.slane %v689_v5, %v697_v6 }
  0x3f   : > { %640 = vmatpush1.bf16.msra.mxu0 %v957_v42 }
  0x40   : > { %641 = vmatprep.subr.bf16.mxu0 %v958_v43 }
  0x43   : > { %642 = vmatpush1.bf16.msra.mxu0 %v960_v44 }
  0x44   : > { %643 = vmatprep.subr.bf16.mxu0 %v961_v45 }
  0x47   : > { %644 = vmatpush1.bf16.msra.mxu0 %v963_v46 }
  0x48   : > { %645 = vmatprep.subr.bf16.mxu0 %v964_v47 }
  0x4b   : > { %646 = vmatpush1.bf16.msra.mxu0 %v966_v48 }
  0x4c   : > { %647 = vmatprep.subr.bf16.mxu0 %v967_v49 }
  0x4f   : > { %648 = vmatpush2.bf16.msra.mxu0 %v969_v50 }
  0x50   : > { %649 = vmatprep.subr.bf16.mxu0 %v970_v51 }
  0x53   : > { %650 = vmatpush2.bf16.msra.mxu0 %v972_v52 }
  0x54   : > { %651 = vmatprep.subr.bf16.mxu0 %v973_v53 }
  0x57   : > { %652 = vmatpush2.bf16.msra.mxu0 %v975_v54 }
  0x58   : > { %653 = vmatprep.subr.bf16.mxu0 %v976_v55 }
  0x5b   : > { %654 = vmatpush2.bf16.msra.mxu0 %v978_v56 }
  0x5c   : > { %655 = vmatprep.subr.bf16.mxu0 %v979_v57 }
  0x5f   : > { %656 = vmatpush2.bf16.msra.mxu0 %v981_v58 }
  0x60   : > { %657 = vmatprep.subr.bf16.mxu0 %v982_v59 }
  0x63   : > { %658 = vmatpush2.bf16.msra.mxu0 %v984_v60 }
  0x64   : > { %659 = vmatprep.subr.bf16.mxu0 %v985_v61 }
  0x67   : > { %660 = vmatpush2.bf16.msra.mxu0 %v987_v62 }
  0x68   : > { %661 = vmatprep.subr.bf16.mxu0 %v988_v63 }
  0x6b   : > { %662 = vmatpush2.bf16.msra.mxu0 %v990_v0 }
  0x6e   : > { %664 = vmatmul.mubr.bf16.vlgmr.msra.gmra.mxu0 %v991_v1 }
 0x12e   : > { %v665_v8 = vpop.f32.mrf.mxu0 }
 0x12f   : > { %v701_v11 = vadd.f32 %v694_v7, %v665_v8 }
 0x130   : > { %v667_v10 = vpop.f32.mrf.mxu0 }
 0x131   : > { %705 = vst [vmem:[%s393_s23] sm:$0xff] %v701_v11  ;;  %v702_v13 = vadd.f32 %v698_v9, %v667_v10 }
 0x132   : > { %v669_v12 = vpop.f32.mrf.mxu0 }
 0x133   : > { %706 = vst [vmem:[%s393_s23 + $0x8] sm:$0xff] %v702_v13  ;;  %v703_v15 = vadd.f32 %v694_v7, %v669_v12  ;;  %715 = sbr.rel (!%p1089_p6) target bundleno = 320 (0x140), region = 82 }
 0x134   : > { %v671_v14 = vpop.f32.mrf.mxu0 }
 0x135   : > { %707 = vst [vmem:[%s393_s23 + $0x10] sm:$0xff] %v703_v15  ;;  %v704_v16 = vadd.f32 %v698_v9, %v671_v14 }
 0x137   : > { %708 = vst [vmem:[%s393_s23 + $0x18] sm:$0xff] %v704_v16 }
 0x138   : > { %v734_v17 = vld [vmem:[%s393_s23] sm:$0xff] }
 0x139   : > { %735 = vst [vmem:[%s721_s26] sm:$0xff] %v734_v17 }
 0x13a   : > { %v736_v18 = vld [vmem:[%s393_s23 + $0x8] sm:$0xff] }
 0x13b   : > { %737 = vst [vmem:[%s721_s26 + $0x8] sm:$0xff] %v736_v18 }
 0x13c   : > { %v738_v19 = vld [vmem:[%s393_s23 + $0x10] sm:$0xff] }
 0x13d   : > { %739 = vst [vmem:[%s721_s26 + $0x20] sm:$0xff] %v738_v19 }
 0x13e   : > { %v740_v20 = vld [vmem:[%s393_s23 + $0x18] sm:$0xff] }
 0x13f   : > { %741 = vst [vmem:[%s721_s26 + $0x28] sm:$0xff] %v740_v20 }
 0x140 PF: > { %s13_s16 = sadd.s32 1, %s1032_s16   ;;  %s1247_s12 = smov %s1020_s13 }
 0x141   : > { %p10_p12 = scmp.ge.s32.totalorder %s13_s16, 4   ;;  %s1248_s13 = smov %s1094_s22 }
 0x142   : > { %s1249_s14 = smov %s1028_s15  ;;  %s1250_s15 = smov %s1252_s17 }
 0x143   :  { %12 = sbr.rel (!%p10_p12) target bundleno = 3 (0x3), region = 142 }

// kernel: beyond_the_spectrum_forward.64
= control target key start
LH: loop header
LB: loop body
LE: loop exit
PB: predicated region body
PF: predicated region fallthrough
CT: control target
= control target key end

     0   :  { %s1804_s0 = inlined_call_operand.vmem [shape: bf16[16,2304], index: 0, kind: input, shape index: {}]   ;;  %s1805_s1 = inlined_call_operand.vmem [shape: bf16[2304,512], index: 1, kind: input, shape index: {}]   ;;  %s1806_s2 = inlined_call_operand.vmem [shape: f32[1,512], index: 2, kind: input, shape index: {}]   ;;  %s1807_s3 = inlined_call_operand.vmem [shape: f32[16,512], index: 3, kind: output, shape index: {}]  }
   0x1   :  { %1809 = sst [smem:[#allocation6_spill]] %s1804_s0 }
   0x2   :  { %1810 = sst [smem:[#allocation7_spill]] %s1805_s1 }
   0x3   :  { %s1451_s12 = smov 0   ;;  %s1453_s13 = smov 0  }
   0x4   :  { %s1455_s14 = smov 0   ;;  %s1457_s15 = smov 0  }
   0x5   :  { %s1459_s16 = smov 0   ;;  %s1461_s17 = smov 0  }
   0x6   :  { %s1463_s18 = smov 0   ;;  %s1465_s19 = smov 0  }
   0x7   :  { %s1467_s20 = smov 0   ;;  %s1469_s21 = smov 0  }
   0x8   :  { %s1471_s22 = smov 0  }
   0x9 LB: > { %s1095_s23 = sadd.s32 4294967295, %s1427_s22   ;;  %s25_s24 = sadd.s32 1, %s1419_s20  ;;  %s1427_s22 = sphi %s1471_s22, %s13_s22   ;;  %s1423_s21 = sphi %s1469_s21, %s1827_s21   ;;  %s1419_s20 = sphi %s1467_s20, %s1826_s20   ;;  %s1415_s19 = sphi %s1465_s19, %s1825_s19   ;;  %s1411_s18 = sphi %s1463_s18, %s1824_s18   ;;  %s1407_s17 = sphi %s1461_s17, %s1823_s17   ;;  %s1403_s16 = sphi %s1459_s16, %s1822_s16   ;;  %s1399_s15 = sphi %s1457_s15, %s1821_s15   ;;  %s1395_s14 = sphi %s1455_s14, %s1820_s14   ;;  %s1391_s13 = sphi %s1453_s13, %s1819_s13   ;;  %s1387_s12 = sphi %s1451_s12, %s1818_s12  }
   0xa   : > { %p26_p0 = scmp.ge.s32.totalorder %s25_s24, 6  ;;  %s28_s25 = sadd.s32 1, %s1423_s21 }
   0xb   : > { %s41_s26 = sadd.s32 1, %s1407_s17  ;;  %p48_p1 = scmp.ne.s32.totalorder %s1407_s17, %s1403_s16 }
   0xc   : > { %s1829_s24 = smov (%p26_p0, %s25_s24), 0  ;;  %s1831_s25 = smov (!%p26_p0, %s28_s25), %s1423_s21 }
   0xd   : > { %s37_s27 = ssub.s32 %s1419_s20, %s1829_s24  ;;  %p49_p2 = scmp.eq.s32.totalorder %s1427_s22, 0 }
   0xe   : > { %p30_p3 = scmp.ge.s32.totalorder %s1831_s25, 2  ;;  %p39_p4 = scmp.eq.s32.totalorder %s37_s27, 0 }
   0xf   : > { %p1518_p5 = por %p49_p2, %p48_p1  ;;  %s69_s29 = sadd.s32 1, %s1399_s15 }
  0x10   : > { %s1833_s25 = smov (%p30_p3, %s1831_s25), 0  ;;  %p76_p6 = scmp.ne.s32.totalorder %s1399_s15, %s1395_s14 }
  0x11   : > { %1812 = sst [smem:[#allocation5_spill]] %s1833_s25  ;;  %s65_s4 = ssub.s32 %s1423_s21, %s1833_s25 }
  0x12   : > { %s1526_s30 = scalar_select %p39_p4, %s1407_s17, %s41_s26  }
  0x13   : > { %s66_s5 = sor.u32 %s65_s4, %s37_s27  ;;  %p121_p7 = scmp.eq.s32.totalorder %s65_s4, 0 }
  0x14   : > { %p67_p8 = scmp.eq.s32.totalorder %s66_s5, 0  ;;  %p1532_p9 = por %p76_p6, %p49_p2 }
  0x15   : > { %s123_s7 = sadd.s32 1, %s1391_s13  ;;  %p133_p10 = scmp.ne.s32.totalorder %s1391_s13, %s1387_s12 }
  0x16   : > { %s1540_s8 = scalar_select %p67_p8, %s1399_s15, %s69_s29  }
  0x17   : > { %s1543_s9 = scalar_select %p121_p7, %s1391_s13, %s123_s7  }
  0x18   : > { %p134_p11 = scmp.eq.s32.totalorder %s1095_s23, 11  ;;  %p1098_p13 = scmp.ge.s32.totalorder %s1427_s22, 12 }
  0x1a   : > { %p1545_p12 = por %p134_p11, %p133_p10  ;;  %156 = sbr.rel (%p1098_p13) target bundleno = 76 (0x4c), region = 16 }
  0x1f   : > { %159 = sbr.rel (!%p1518_p5) target bundleno = 42 (0x2a), region = 20  ;;  %s161_s11 = sand.u32 (%p1518_p5), 1, %s1407_s17  }
  0x20   : > { %s1168_s26 = smul.u32 (%p1518_p5), 12, %s1419_s20  ;;  %s1815_s0 = sld [smem:[#allocation6_spill]] (%p1518_p5) }
  0x21   : > { %s1171_s27 = smul.u32 (%p1518_p5), 24, %s161_s11 }
  0x23   : > { %s163_s23 = scalar_lea.vmem (%p1518_p5), [#allocation2], %s1171_s27 }
  0x26   : > { %s169_s5 = scalar_lea.vmem %s1815_s0, %s1168_s26 }
  0x27   : > { %v184_v0 = vld [vmem:[%s169_s5] sm:$0xff]  ;;  %v186_v1 = vld [vmem:[%s169_s5 + $0x48] sm:$0xff]  ;;  %v1102_v3 = vld [vmem:[%s169_s5 + $0x50] sm:$0xf] }
  0x28   : > { %v1100_v2 = vld [vmem:[%s169_s5 + $0x8] sm:$0xf]  ;;  %185 = vst [vmem:[%s163_s23] sm:$0xff] %v184_v0  ;;  %187 = vst [vmem:[%s163_s23 + $0xc] sm:$0xff] %v186_v1 }
  0x29   : > { %1101 = vst [vmem:[%s163_s23 + $0x8] sm:$0xf] %v1100_v2  ;;  %1103 = vst [vmem:[%s163_s23 + $0x14] sm:$0xf] %v1102_v3 }
  0x2a PF: > { %205 = sbr.rel (!%p1532_p9) target bundleno = 76 (0x4c), region = 46  ;;  %s207_s28 = sand.u32 (%p1532_p9), 1, %s1399_s15  }
  0x2b   : > { %s1172_s7 = smul.u32 (%p1532_p9), 384, %s207_s28  ;;  %s1104_s11 = sshll.u32 (%p1532_p9), %s1423_s21, 1 }
  0x2c   : > { %s1169_s26 = smul.u32 (%p1532_p9), 192, %s1419_s20  ;;  %s1816_s1 = sld [smem:[#allocation7_spill]] (%p1532_p9) }
  0x2d   : > { %s1570_s6 = scalar_lea.vmem (%p1532_p9), [#allocation3], %s1172_s7 }
  0x2e   : > { %s213_s29 = sadd.s32 (%p1532_p9), %s1169_s26, %s1104_s11 }
  0x2f   : > { %s1106_s4 = sshll.u32 %s213_s29, 2 }
  0x32   : > { %s1565_s25 = scalar_lea.vmem %s1816_s1, %s1106_s4 }
  0x33   : > { %v338_v4 = vld [vmem:[%s1565_s25] sm:$0xff]  ;;  %v340_v5 = vld [vmem:[%s1565_s25 + $0x10] sm:$0xff] }
  0x34   : > { %v342_v6 = vld [vmem:[%s1565_s25 + $0x20] sm:$0xff]  ;;  %339 = vst [vmem:[%s1570_s6] sm:$0xff] %v338_v4  ;;  %341 = vst [vmem:[%s1570_s6 + $0x8] sm:$0xff] %v340_v5  ;;  %v344_v7 = vld [vmem:[%s1565_s25 + $0x30] sm:$0xff] }
  0x35   : > { %343 = vst [vmem:[%s1570_s6 + $0x10] sm:$0xff] %v342_v6  ;;  %v346_v8 = vld [vmem:[%s1565_s25 + $0x40] sm:$0xff]  ;;  %v348_v9 = vld [vmem:[%s1565_s25 + $0x50] sm:$0xff]  ;;  %345 = vst [vmem:[%s1570_s6 + $0x18] sm:$0xff] %v344_v7 }
  0x36   : > { %347 = vst [vmem:[%s1570_s6 + $0x20] sm:$0xff] %v346_v8  ;;  %349 = vst [vmem:[%s1570_s6 + $0x28] sm:$0xff] %v348_v9  ;;  %v350_v10 = vld [vmem:[%s1565_s25 + $0x60] sm:$0xff]  ;;  %v352_v11 = vld [vmem:[%s1565_s25 + $0x70] sm:$0xff] }
  0x37   : > { %v354_v12 = vld [vmem:[%s1565_s25 + $0x80] sm:$0xff]  ;;  %351 = vst [vmem:[%s1570_s6 + $0x30] sm:$0xff] %v350_v10  ;;  %353 = vst [vmem:[%s1570_s6 + $0x38] sm:$0xff] %v352_v11  ;;  %v356_v13 = vld [vmem:[%s1565_s25 + $0x90] sm:$0xff] }
  0x38   : > { %355 = vst [vmem:[%s1570_s6 + $0x40] sm:$0xff] %v354_v12  ;;  %v358_v14 = vld [vmem:[%s1565_s25 + $0xa0] sm:$0xff]  ;;  %v360_v15 = vld [vmem:[%s1565_s25 + $0xb0] sm:$0xff]  ;;  %357 = vst [vmem:[%s1570_s6 + $0x48] sm:$0xff] %v356_v13 }
  0x39   : > { %359 = vst [vmem:[%s1570_s6 + $0x50] sm:$0xff] %v358_v14  ;;  %361 = vst [vmem:[%s1570_s6 + $0x58] sm:$0xff] %v360_v15  ;;  %v362_v16 = vld [vmem:[%s1565_s25 + $0xc0] sm:$0xff]  ;;  %v364_v17 = vld [vmem:[%s1565_s25 + $0xd0] sm:$0xff] }
  0x3a   : > { %v366_v18 = vld [vmem:[%s1565_s25 + $0xe0] sm:$0xff]  ;;  %363 = vst [vmem:[%s1570_s6 + $0x60] sm:$0xff] %v362_v16  ;;  %365 = vst [vmem:[%s1570_s6 + $0x68] sm:$0xff] %v364_v17  ;;  %v368_v19 = vld [vmem:[%s1565_s25 + $0xf0] sm:$0xff] }
  0x3b   : > { %367 = vst [vmem:[%s1570_s6 + $0x70] sm:$0xff] %v366_v18  ;;  %v370_v20 = vld [vmem:[%s1565_s25 + $0x100] sm:$0xff]  ;;  %v372_v21 = vld [vmem:[%s1565_s25 + $0x110] sm:$0xff]  ;;  %369 = vst [vmem:[%s1570_s6 + $0x78] sm:$0xff] %v368_v19 }
  0x3c   : > { %371 = vst [vmem:[%s1570_s6 + $0x80] sm:$0xff] %v370_v20  ;;  %373 = vst [vmem:[%s1570_s6 + $0x88] sm:$0xff] %v372_v21  ;;  %v374_v22 = vld [vmem:[%s1565_s25 + $0x120] sm:$0xff]  ;;  %v376_v23 = vld [vmem:[%s1565_s25 + $0x130] sm:$0xff] }
  0x3d   : > { %v378_v24 = vld [vmem:[%s1565_s25 + $0x140] sm:$0xff]  ;;  %375 = vst [vmem:[%s1570_s6 + $0x90] sm:$0xff] %v374_v22  ;;  %377 = vst [vmem:[%s1570_s6 + $0x98] sm:$0xff] %v376_v23  ;;  %v380_v25 = vld [vmem:[%s1565_s25 + $0x150] sm:$0xff] }
  0x3e   : > { %379 = vst [vmem:[%s1570_s6 + $0xa0] sm:$0xff] %v378_v24  ;;  %v382_v26 = vld [vmem:[%s1565_s25 + $0x160] sm:$0xff]  ;;  %v384_v27 = vld [vmem:[%s1565_s25 + $0x170] sm:$0xff]  ;;  %381 = vst [vmem:[%s1570_s6 + $0xa8] sm:$0xff] %v380_v25 }
  0x3f   : > { %383 = vst [vmem:[%s1570_s6 + $0xb0] sm:$0xff] %v382_v26  ;;  %385 = vst [vmem:[%s1570_s6 + $0xb8] sm:$0xff] %v384_v27  ;;  %v386_v28 = vld [vmem:[%s1565_s25 + $0x180] sm:$0xff]  ;;  %v388_v29 = vld [vmem:[%s1565_s25 + $0x190] sm:$0xff] }
  0x40   : > { %v390_v30 = vld [vmem:[%s1565_s25 + $0x1a0] sm:$0xff]  ;;  %387 = vst [vmem:[%s1570_s6 + $0xc0] sm:$0xff] %v386_v28  ;;  %389 = vst [vmem:[%s1570_s6 + $0xc8] sm:$0xff] %v388_v29  ;;  %v392_v31 = vld [vmem:[%s1565_s25 + $0x1b0] sm:$0xff] }
  0x41   : > { %391 = vst [vmem:[%s1570_s6 + $0xd0] sm:$0xff] %v390_v30  ;;  %v394_v32 = vld [vmem:[%s1565_s25 + $0x1c0] sm:$0xff]  ;;  %v396_v33 = vld [vmem:[%s1565_s25 + $0x1d0] sm:$0xff]  ;;  %393 = vst [vmem:[%s1570_s6 + $0xd8] sm:$0xff] %v392_v31 }
  0x42   : > { %395 = vst [vmem:[%s1570_s6 + $0xe0] sm:$0xff] %v394_v32  ;;  %397 = vst [vmem:[%s1570_s6 + $0xe8] sm:$0xff] %v396_v33  ;;  %v398_v34 = vld [vmem:[%s1565_s25 + $0x1e0] sm:$0xff]  ;;  %v400_v35 = vld [vmem:[%s1565_s25 + $0x1f0] sm:$0xff] }
  0x43   : > { %v402_v36 = vld [vmem:[%s1565_s25 + $0x200] sm:$0xff]  ;;  %399 = vst [vmem:[%s1570_s6 + $0xf0] sm:$0xff] %v398_v34  ;;  %401 = vst [vmem:[%s1570_s6 + $0xf8] sm:$0xff] %v400_v35  ;;  %v404_v37 = vld [vmem:[%s1565_s25 + $0x210] sm:$0xff] }
  0x44   : > { %403 = vst [vmem:[%s1570_s6 + $0x100] sm:$0xff] %v402_v36  ;;  %v406_v38 = vld [vmem:[%s1565_s25 + $0x220] sm:$0xff]  ;;  %v408_v39 = vld [vmem:[%s1565_s25 + $0x230] sm:$0xff]  ;;  %405 = vst [vmem:[%s1570_s6 + $0x108] sm:$0xff] %v404_v37 }
  0x45   : > { %407 = vst [vmem:[%s1570_s6 + $0x110] sm:$0xff] %v406_v38  ;;  %409 = vst [vmem:[%s1570_s6 + $0x118] sm:$0xff] %v408_v39  ;;  %v410_v40 = vld [vmem:[%s1565_s25 + $0x240] sm:$0xff]  ;;  %v412_v41 = vld [vmem:[%s1565_s25 + $0x250] sm:$0xff] }
  0x46   : > { %v414_v42 = vld [vmem:[%s1565_s25 + $0x260] sm:$0xff]  ;;  %411 = vst [vmem:[%s1570_s6 + $0x120] sm:$0xff] %v410_v40  ;;  %413 = vst [vmem:[%s1570_s6 + $0x128] sm:$0xff] %v412_v41  ;;  %v416_v43 = vld [vmem:[%s1565_s25 + $0x270] sm:$0xff] }
  0x47   : > { %415 = vst [vmem:[%s1570_s6 + $0x130] sm:$0xff] %v414_v42  ;;  %v418_v44 = vld [vmem:[%s1565_s25 + $0x280] sm:$0xff]  ;;  %v420_v45 = vld [vmem:[%s1565_s25 + $0x290] sm:$0xff]  ;;  %417 = vst [vmem:[%s1570_s6 + $0x138] sm:$0xff] %v416_v43 }
  0x48   : > { %419 = vst [vmem:[%s1570_s6 + $0x140] sm:$0xff] %v418_v44  ;;  %421 = vst [vmem:[%s1570_s6 + $0x148] sm:$0xff] %v420_v45  ;;  %v422_v46 = vld [vmem:[%s1565_s25 + $0x2a0] sm:$0xff]  ;;  %v424_v47 = vld [vmem:[%s1565_s25 + $0x2b0] sm:$0xff] }
  0x49   : > { %v426_v48 = vld [vmem:[%s1565_s25 + $0x2c0] sm:$0xff]  ;;  %423 = vst [vmem:[%s1570_s6 + $0x150] sm:$0xff] %v422_v46  ;;  %425 = vst [vmem:[%s1570_s6 + $0x158] sm:$0xff] %v424_v47  ;;  %v428_v49 = vld [vmem:[%s1565_s25 + $0x2d0] sm:$0xff] }
  0x4a   : > { %427 = vst [vmem:[%s1570_s6 + $0x160] sm:$0xff] %v426_v48  ;;  %v430_v50 = vld [vmem:[%s1565_s25 + $0x2e0] sm:$0xff]  ;;  %v432_v51 = vld [vmem:[%s1565_s25 + $0x2f0] sm:$0xff]  ;;  %429 = vst [vmem:[%s1570_s6 + $0x168] sm:$0xff] %v428_v49 }
  0x4b   : > { %431 = vst [vmem:[%s1570_s6 + $0x170] sm:$0xff] %v430_v50  ;;  %433 = vst [vmem:[%s1570_s6 + $0x178] sm:$0xff] %v432_v51 }
  0x4c PF: > { %p1107_p0 = scmp.ge.s32.totalorder %s1427_s22, 1  ;;  %p446_p1 = scmp.lt.s32.totalorder %s1427_s22, 13 }
  0x4e   : > { %p447_p2 = pnand %p1107_p0, %p446_p1 }
  0x4f   : > { %s453_s0 = sand.u32 (!%p447_p2), 1, %s1403_s16   ;;  %s460_s5 = sand.u32 (!%p447_p2), 1, %s1395_s14  }
  0x50   : > { %450 = sbr.rel (%p447_p2) target bundleno = 386 (0x182), region = 88  ;;  %s487_s28 = sand.u32 (!%p447_p2), 1, %s1387_s12  }
  0x51   : > { %s1173_s23 = smul.u32 (!%p447_p2), 24, %s453_s0  ;;  %s1108_s7 = sshll.u32 (!%p447_p2), %s487_s28, 5 }
  0x52   : > { %s1174_s25 = smul.u32 (!%p447_p2), 384, %s460_s5  ;;  %s1109_s11 = sshll.u32 (!%p447_p2), %s1415_s19, 1 }
  0x53   : > { %p495_p3 = scmp.lt.s32.totalorder (!%p447_p2), %s1109_s11, 3  ;;  %s1677_s27 = scalar_lea.vmem (!%p447_p2), [#allocation2], %s1173_s23 }
  0x54   : > { %s1679_s6 = scalar_lea.vmem (!%p447_p2), [#allocation3], %s1174_s25  ;;  %s1681_s1 = scalar_lea.vmem (!%p447_p2), [#allocation4], %s1108_s7 }
  0x55   : > { %s1835_s11 = smov (!%p495_p3, %s1109_s11), 3  ;;  %p1110_p4 = scmp.ne.s32.totalorder %s1411_s18, 0 }
  0x56   : > { %s497_s4 = scalar_lea.vmem %s1806_s2, %s1835_s11 }
  0x57   : > { %505 = sbr.rel (%p1110_p4) target bundleno = 95 (0x5f), region = 100 }
  0x5c   : > { %v1429_v52 = vmov 0.0  }
  0x5d   : > { %506 = vst [vmem:[%s1681_s1] sm:$0xff] %v1429_v52  ;;  %507 = vst [vmem:[%s1681_s1 + $0x8] sm:$0xff] %v1429_v52 }
  0x5e   : > { %508 = vst [vmem:[%s1681_s1 + $0x10] sm:$0xff] %v1429_v52  ;;  %509 = vst [vmem:[%s1681_s1 + $0x18] sm:$0xff] %v1429_v52 }
  0x5f PF: > { %v1265_v53 = vld [vmem:[%s1679_s6 + $0x74] ss:$8 sps:$4 sm:$0xff]   ;;  %v1267_v54 = vld [vmem:[%s1679_s6 + $0x70] ss:$8 sps:$4 sm:$0xff]   ;;  %v1430_v55 = vmov 0   ;;  %p1162_p5 = scmp.ne.s32.totalorder %s1411_s18, 5 }
  0x60   : > { %897 = vmatprep.mubr.bf16.mxu1 %v1430_v55  ;;  %822 = vmatprep.subr.bf16.mxu0 %v1265_v53  ;;  %v1268_v56 = vld [vmem:[%s1679_s6 + $0x64] ss:$8 sps:$4 sm:$0xff]   ;;  %v1270_v57 = vld [vmem:[%s1679_s6 + $0x60] ss:$8 sps:$4 sm:$0xff]   ;;  %v1271_v58 = vld [vmem:[%s1679_s6 + $0x54] ss:$8 sps:$4 sm:$0xff]  }
  0x61   : > { %823 = vmatpush1.bf16.msra.mxu0 %v1267_v54  ;;  %v1273_v59 = vld [vmem:[%s1679_s6 + $0x50] ss:$8 sps:$4 sm:$0xff]   ;;  %v1274_v60 = vld [vmem:[%s1679_s6 + $0x44] ss:$8 sps:$4 sm:$0xff]   ;;  %v1286_v61 = vld [vmem:[%s1679_s6 + $0x174] ss:$8 sps:$4 sm:$0xff]  }
  0x62   : > { %824 = vmatprep.subr.bf16.mxu0 %v1268_v56  ;;  %v1288_v62 = vld [vmem:[%s1679_s6 + $0x170] ss:$8 sps:$4 sm:$0xff]   ;;  %v1276_v63 = vld [vmem:[%s1679_s6 + $0x40] ss:$8 sps:$4 sm:$0xff]   ;;  %v1277_v0 = vld [vmem:[%s1679_s6 + $0x34] ss:$8 sps:$4 sm:$0xff]   ;;  %865 = vmatprep.subr.bf16.mxu1 %v1286_v61 }
  0x63   : > { %v1292_v1 = vld [vmem:[%s1679_s6 + $0x164] ss:$8 sps:$4 sm:$0xff]   ;;  %866 = vmatpush1.bf16.msra.mxu1 %v1288_v62  ;;  %v1294_v2 = vld [vmem:[%s1679_s6 + $0x160] ss:$8 sps:$4 sm:$0xff]   ;;  %v1279_v3 = vld [vmem:[%s1679_s6 + $0x30] ss:$8 sps:$4 sm:$0xff]  }
  0x64   : > { %867 = vmatprep.subr.bf16.mxu1 %v1292_v1  ;;  %v1298_v4 = vld [vmem:[%s1679_s6 + $0x154] ss:$8 sps:$4 sm:$0xff]   ;;  %v1280_v5 = vld [vmem:[%s1679_s6 + $0x24] ss:$8 sps:$4 sm:$0xff]   ;;  %v1300_v6 = vld [vmem:[%s1679_s6 + $0x150] ss:$8 sps:$4 sm:$0xff]  }
  0x65   : > { %825 = vmatpush1.bf16.msra.mxu0 %v1270_v57  ;;  %v1304_v7 = vld [vmem:[%s1679_s6 + $0x144] ss:$8 sps:$4 sm:$0xff]   ;;  %v1282_v8 = vld [vmem:[%s1679_s6 + $0x20] ss:$8 sps:$4 sm:$0xff]   ;;  %v1283_v9 = vld [vmem:[%s1679_s6 + $0x14] ss:$8 sps:$4 sm:$0xff]  }
  0x66   : > { %826 = vmatprep.subr.bf16.mxu0 %v1271_v58  ;;  %v1306_v10 = vld [vmem:[%s1679_s6 + $0x140] ss:$8 sps:$4 sm:$0xff]   ;;  %v1310_v11 = vld [vmem:[%s1679_s6 + $0x134] ss:$8 sps:$4 sm:$0xff]   ;;  %v1285_v12 = vld [vmem:[%s1679_s6 + $0x10] ss:$8 sps:$4 sm:$0xff]  }
  0x67   : > { %868 = vmatpush1.bf16.msra.mxu1 %v1294_v2  ;;  %v1289_v13 = vld [vmem:[%s1679_s6 + $0x4] ss:$8 sps:$4 sm:$0xff]   ;;  %v1312_v14 = vld [vmem:[%s1679_s6 + $0x130] ss:$8 sps:$4 sm:$0xff]   ;;  %v1291_v16 = vld [vmem:[%s1679_s6] ss:$8 sps:$4 sm:$0xff]  }
  0x68   : > { %869 = vmatprep.subr.bf16.mxu1 %v1298_v4  ;;  %v1316_v15 = vld [vmem:[%s1679_s6 + $0x124] ss:$8 sps:$4 sm:$0xff]   ;;  %v1295_v17 = vld [vmem:[%s1679_s6 + $0xf4] ss:$8 sps:$4 sm:$0xff]   ;;  %v1318_v18 = vld [vmem:[%s1679_s6 + $0x120] ss:$8 sps:$4 sm:$0xff]  }
  0x69   : > { %827 = vmatpush1.bf16.msra.mxu0 %v1273_v59  ;;  %v1322_v19 = vld [vmem:[%s1679_s6 + $0x114] ss:$8 sps:$4 sm:$0xff]   ;;  %v1297_v20 = vld [vmem:[%s1679_s6 + $0xf0] ss:$8 sps:$4 sm:$0xff]   ;;  %v1301_v21 = vld [vmem:[%s1679_s6 + $0xe4] ss:$8 sps:$4 sm:$0xff]  }
  0x6a   : > { %828 = vmatprep.subr.bf16.mxu0 %v1274_v60  ;;  %v1324_v22 = vld [vmem:[%s1679_s6 + $0x110] ss:$8 sps:$4 sm:$0xff]   ;;  %v1328_v23 = vld [vmem:[%s1679_s6 + $0x104] ss:$8 sps:$4 sm:$0xff]   ;;  %v1303_v25 = vld [vmem:[%s1679_s6 + $0xe0] ss:$8 sps:$4 sm:$0xff]  }
  0x6b   : > { %870 = vmatpush1.bf16.msra.mxu1 %v1300_v6  ;;  %v1340_v24 = vld [vmem:[%s1677_s27 + $0x4] ss:$12 sps:$4 sm:$0xff]   ;;  %v1334_v30 = vld [vmem:[%s1677_s27 + $0x8] ss:$12 sps:$4 sm:$0xff]   ;;  %v1338_v40 = vld [vmem:[%s1677_s27] ss:$12 sps:$4 sm:$0xff]  }
  0x6c   : > { %871 = vmatprep.subr.bf16.mxu1 %v1304_v7  ;;  %v1307_v26 = vld [vmem:[%s1679_s6 + $0xd4] ss:$8 sps:$4 sm:$0xff]   ;;  %854 = vmatprep.mubr.bf16.mxu0 %v1340_v24  ;;  %v1330_v27 = vld [vmem:[%s1679_s6 + $0x100] ss:$8 sps:$4 sm:$0xff]   ;;  %v1309_v28 = vld [vmem:[%s1679_s6 + $0xd0] ss:$8 sps:$4 sm:$0xff]  }
  0x6d   : > { %829 = vmatpush1.bf16.msra.mxu0 %v1276_v63  ;;  %v1313_v29 = vld [vmem:[%s1679_s6 + $0xc4] ss:$8 sps:$4 sm:$0xff]   ;;  %v1315_v31 = vld [vmem:[%s1679_s6 + $0xc0] ss:$8 sps:$4 sm:$0xff]   ;;  %v1319_v32 = vld [vmem:[%s1679_s6 + $0xb4] ss:$8 sps:$4 sm:$0xff]  }
  0x6e   : > { %830 = vmatprep.subr.bf16.mxu0 %v1277_v0  ;;  %v1321_v33 = vld [vmem:[%s1679_s6 + $0xb0] ss:$8 sps:$4 sm:$0xff]   ;;  %v1325_v34 = vld [vmem:[%s1679_s6 + $0xa4] ss:$8 sps:$4 sm:$0xff]   ;;  %v1327_v35 = vld [vmem:[%s1679_s6 + $0xa0] ss:$8 sps:$4 sm:$0xff]  }
  0x6f   : > { %872 = vmatpush1.bf16.msra.mxu1 %v1306_v10  ;;  %v1331_v36 = vld [vmem:[%s1679_s6 + $0x94] ss:$8 sps:$4 sm:$0xff]   ;;  %v1333_v37 = vld [vmem:[%s1679_s6 + $0x90] ss:$8 sps:$4 sm:$0xff]   ;;  %v1335_v38 = vld [vmem:[%s1679_s6 + $0x84] ss:$8 sps:$4 sm:$0xff]  }
  0x70   : > { %873 = vmatprep.subr.bf16.mxu1 %v1310_v11  ;;  %v1337_v39 = vld [vmem:[%s1679_s6 + $0x80] ss:$8 sps:$4 sm:$0xff]   ;;  %v512_v51 = vld [vmem:[%s1681_s1 + $0x10] sm:$0xff]  ;;  %v513_v56 = vld [vmem:[%s1681_s1 + $0x18] sm:$0xff] }
  0x71   : > { %831 = vmatpush1.bf16.msra.mxu0 %v1279_v3  ;;  %v510_v43 = vld [vmem:[%s1681_s1] sm:$0xff]  ;;  %v511_v47 = vld [vmem:[%s1681_s1 + $0x8] sm:$0xff] }
  0x72   : > { %832 = vmatprep.subr.bf16.mxu0 %v1280_v5 }
  0x73   : > { %874 = vmatpush1.bf16.msra.mxu1 %v1312_v14 }
  0x74   : > { %875 = vmatprep.subr.bf16.mxu1 %v1316_v15 }
  0x75   : > { %833 = vmatpush1.bf16.msra.mxu0 %v1282_v8 }
  0x76   : > { %834 = vmatprep.subr.bf16.mxu0 %v1283_v9 }
  0x77   : > { %876 = vmatpush1.bf16.msra.mxu1 %v1318_v18 }
  0x78   : > { %877 = vmatprep.subr.bf16.mxu1 %v1322_v19 }
  0x79   : > { %835 = vmatpush1.bf16.msra.mxu0 %v1285_v12 }
  0x7a   : > { %836 = vmatprep.subr.bf16.mxu0 %v1289_v13 }
  0x7b   : > { %878 = vmatpush1.bf16.msra.mxu1 %v1324_v22 }
  0x7c   : > { %879 = vmatprep.subr.bf16.mxu1 %v1328_v23 }
  0x7d   : > { %837 = vmatpush1.bf16.msra.mxu0 %v1291_v16 }
  0x7e   : > { %838 = vmatprep.subr.bf16.mxu0 %v1295_v17 }
  0x7f   : > { %880 = vmatpush1.bf16.msra.mxu1 %v1330_v27 }
  0x81   : > { %839 = vmatpush2.bf16.msra.mxu0 %v1297_v20 }
  0x82   : > { %840 = vmatprep.subr.bf16.mxu0 %v1301_v21  ;;  %898 = vmatmul.mubr.bf16.vlgmr.msra.gmra.mxu1 %v1334_v30 }
  0x85   : > { %841 = vmatpush2.bf16.msra.mxu0 %v1303_v25 }
  0x86   : > { %842 = vmatprep.subr.bf16.mxu0 %v1307_v26 }
  0x89   : > { %843 = vmatpush2.bf16.msra.mxu0 %v1309_v28 }
  0x8a   : > { %844 = vmatprep.subr.bf16.mxu0 %v1313_v29 }
  0x8d   : > { %845 = vmatpush2.bf16.msra.mxu0 %v1315_v31 }
  0x8e   : > { %846 = vmatprep.subr.bf16.mxu0 %v1319_v32 }
  0x91   : > { %847 = vmatpush2.bf16.msra.mxu0 %v1321_v33 }
  0x92   : > { %848 = vmatprep.subr.bf16.mxu0 %v1325_v34 }
  0x95   : > { %849 = vmatpush2.bf16.msra.mxu0 %v1327_v35 }
  0x96   : > { %850 = vmatprep.subr.bf16.mxu0 %v1331_v36 }
  0x99   : > { %851 = vmatpush2.bf16.msra.mxu0 %v1333_v37 }
  0x9a   : > { %852 = vmatprep.subr.bf16.mxu0 %v1335_v38 }
  0x9d   : > { %853 = vmatpush2.bf16.msra.mxu0 %v1337_v39 }
  0xa0   : > { %855 = vmatmul.mubr.bf16.vlgmr.msra.gmra.mxu0 %v1338_v40 }
 0x142   : > { %v899_v41 = vpop.f32.mrf.mxu1 }
 0x144   : > { %v901_v42 = vpop.f32.mrf.mxu1 }
 0x146   : > { %v903_v46 = vpop.f32.mrf.mxu1 }
 0x148   : > { %v905_v55 = vpop.f32.mrf.mxu1 }
 0x160   : > { %v856_v44 = vpop.f32.mrf.mxu0 }
 0x161   : > { %v900_v45 = vadd.f32 %v899_v41, %v856_v44 }
 0x162   : > { %v858_v48 = vpop.f32.mrf.mxu0 }
 0x163   : > { %v908_v49 = vadd.f32 %v900_v45, %v510_v43  ;;  %v902_v50 = vadd.f32 %v901_v42, %v858_v48 }
 0x164   : > { %v860_v52 = vpop.f32.mrf.mxu0 }
 0x165   : > { %912 = vst [vmem:[%s1681_s1] sm:$0xff] %v908_v49  ;;  %v909_v53 = vadd.f32 %v902_v50, %v511_v47  ;;  %v904_v54 = vadd.f32 %v903_v46, %v860_v52 }
 0x166   : > { %v862_v57 = vpop.f32.mrf.mxu0 }
 0x167   : > { %913 = vst [vmem:[%s1681_s1 + $0x8] sm:$0xff] %v909_v53  ;;  %v910_v58 = vadd.f32 %v904_v54, %v512_v51  ;;  %v906_v59 = vadd.f32 %v905_v55, %v862_v57  ;;  %919 = sbr.rel (%p1162_p5) target bundleno = 378 (0x17a), region = 104 }
 0x169   : > { %914 = vst [vmem:[%s1681_s1 + $0x10] sm:$0xff] %v910_v58  ;;  %v911_v60 = vadd.f32 %v906_v59, %v513_v56 }
 0x16b   : > { %915 = vst [vmem:[%s1681_s1 + $0x18] sm:$0xff] %v911_v60 }
 0x16c   : > { %v926_v61 = vlaneseq  ;;  %v924_v63 = vld [vmem:[%s497_s4] sm:$0x3]  ;;  %v920_v0 = vld [vmem:[%s1681_s1] sm:$0xff] }
 0x16e   : > { %v927_v62 = vshrl.u32 %v926_v61, 7  ;;  %v921_v3 = vld [vmem:[%s1681_s1 + $0x8] sm:$0xff] }
 0x170   : > { %v928_v1 = vsub.s32 0, %v927_v62  ;;  %v932_v2 = vsub.s32 1, %v927_v62  ;;  %v922_v4 = vld [vmem:[%s1681_s1 + $0x10] sm:$0xff] }
 0x172   : > { %v923_v5 = vld [vmem:[%s1681_s1 + $0x18] sm:$0xff]  ;;  %v929_v6 = vrot.slane %v924_v63, %v928_v1  ;;  %v933_v7 = vrot.slane %v924_v63, %v932_v2 }
 0x174   : > { %v936_v8 = vadd.f32 %v929_v6, %v920_v0  ;;  %v937_v9 = vadd.f32 %v933_v7, %v921_v3  ;;  %v938_v10 = vadd.f32 %v929_v6, %v922_v4  ;;  %v939_v11 = vadd.f32 %v933_v7, %v923_v5 }
 0x176   : > { %v940_v12 = vmax.f32 %v936_v8, 0.0  ;;  %v941_v13 = vmax.f32 %v937_v9, 0.0  ;;  %v942_v14 = vmax.f32 %v938_v10, 0.0  ;;  %v943_v15 = vmax.f32 %v939_v11, 0.0 }
 0x178   : > { %944 = vst [vmem:[%s1681_s1] sm:$0xff] %v940_v12  ;;  %945 = vst [vmem:[%s1681_s1 + $0x8] sm:$0xff] %v941_v13 }
 0x179   : > { %946 = vst [vmem:[%s1681_s1 + $0x10] sm:$0xff] %v942_v14  ;;  %947 = vst [vmem:[%s1681_s1 + $0x18] sm:$0xff] %v943_v15 }
 0x17a PF: > { %954 = sbr.rel (!%p1545_p12) target bundleno = 386 (0x182), region = 108  ;;  %s1170_s16 = sshll.u32 (%p1545_p12), %s1415_s19, 4 }
 0x17b   : > { %s960_s5 = scalar_lea.vmem (%p1545_p12), %s1807_s3, %s1170_s16 }
 0x17f   : > { %v973_v16 = vld [vmem:[%s1681_s1] sm:$0xff]  ;;  %v975_v17 = vld [vmem:[%s1681_s1 + $0x8] sm:$0xff] }
 0x180   : > { %v977_v18 = vld [vmem:[%s1681_s1 + $0x10] sm:$0xff]  ;;  %v979_v19 = vld [vmem:[%s1681_s1 + $0x18] sm:$0xff]  ;;  %974 = vst [vmem:[%s960_s5] sm:$0xff] %v973_v16  ;;  %976 = vst [vmem:[%s960_s5 + $0x8] sm:$0xff] %v975_v17 }
 0x181   : > { %978 = vst [vmem:[%s960_s5 + $0x20] sm:$0xff] %v977_v18  ;;  %980 = vst [vmem:[%s960_s5 + $0x28] sm:$0xff] %v979_v19 }
 0x182 PF: > { %s13_s22 = sadd.s32 1, %s1427_s22   ;;  %s1817_s10 = sld [smem:[#allocation5_spill]] }
 0x183   : > { %p10_p6 = scmp.ge.s32.totalorder %s13_s22, 14   ;;  %s1818_s12 = smov %s1391_s13 }
 0x184   : > { %s1819_s13 = smov %s1543_s9  ;;  %s1820_s14 = smov %s1399_s15 }
 0x185   : > { %s1821_s15 = smov %s1540_s8  ;;  %s1822_s16 = smov %s1407_s17 }
 0x186   : > { %s1823_s17 = smov %s1526_s30  ;;  %s1824_s18 = smov %s1419_s20 }
 0x187   : > { %s1825_s19 = smov %s1423_s21  ;;  %s1826_s20 = smov %s1829_s24 }
 0x188   : > { %s1827_s21 = smov %s1817_s10  ;;  %12 = sbr.rel (!%p10_p6) target bundleno = 9 (0x9), region = 179 }

// kernel: beyond_the_spectrum_forward.67
= control target key start
LH: loop header
LB: loop body
LE: loop exit
PB: predicated region body
PF: predicated region fallthrough
CT: control target
= control target key end

     0   :  { %s2041_s0 = inlined_call_operand.vmem [shape: bf16[16,4608], index: 0, kind: input, shape index: {}]   ;;  %s2042_s1 = inlined_call_operand.vmem [shape: bf16[4608,512], index: 1, kind: input, shape index: {}]   ;;  %s2043_s2 = inlined_call_operand.vmem [shape: f32[1,512], index: 2, kind: input, shape index: {}]   ;;  %s2044_s3 = inlined_call_operand.vmem [shape: f32[16,512], index: 3, kind: output, shape index: {}]  }
   0x1   :  { %2046 = sst [smem:[#allocation6_spill]] %s2041_s0 }
   0x2   :  { %2047 = sst [smem:[#allocation7_spill]] %s2042_s1 }
   0x3   :  { %s1639_s12 = smov 0   ;;  %s1641_s13 = smov 0  }
   0x4   :  { %s1643_s14 = smov 0   ;;  %s1645_s15 = smov 0  }
   0x5   :  { %s1647_s16 = smov 0   ;;  %s1649_s17 = smov 0  }
   0x6   :  { %s1651_s18 = smov 0   ;;  %s1653_s19 = smov 0  }
   0x7   :  { %s1655_s20 = smov 0   ;;  %s1657_s21 = smov 0  }
   0x8   :  { %s1659_s22 = smov 0  }
   0x9 LB: > { %s1244_s23 = sadd.s32 4294967295, %s1616_s22   ;;  %s25_s24 = sadd.s32 1, %s1608_s20  ;;  %s1616_s22 = sphi %s1659_s22, %s13_s22   ;;  %s1612_s21 = sphi %s1657_s21, %s2064_s21   ;;  %s1608_s20 = sphi %s1655_s20, %s2063_s20   ;;  %s1604_s19 = sphi %s1653_s19, %s2062_s19   ;;  %s1600_s18 = sphi %s1651_s18, %s2061_s18   ;;  %s1596_s17 = sphi %s1649_s17, %s2060_s17   ;;  %s1592_s16 = sphi %s1647_s16, %s2059_s16   ;;  %s1588_s15 = sphi %s1645_s15, %s2058_s15   ;;  %s1584_s14 = sphi %s1643_s14, %s2057_s14   ;;  %s1580_s13 = sphi %s1641_s13, %s2056_s13   ;;  %s1576_s12 = sphi %s1639_s12, %s2055_s12  }
   0xa   : > { %p26_p0 = scmp.ge.s32.totalorder %s25_s24, 9  ;;  %s28_s25 = sadd.s32 1, %s1612_s21 }
   0xb   : > { %s41_s26 = sadd.s32 1, %s1596_s17  ;;  %p48_p1 = scmp.ne.s32.totalorder %s1596_s17, %s1592_s16 }
   0xc   : > { %s2066_s24 = smov (%p26_p0, %s25_s24), 0  ;;  %s2068_s25 = smov (!%p26_p0, %s28_s25), %s1612_s21 }
   0xd   : > { %s37_s27 = ssub.s32 %s1608_s20, %s2066_s24  ;;  %p49_p2 = scmp.eq.s32.totalorder %s1616_s22, 0 }
   0xe   : > { %p30_p3 = scmp.ge.s32.totalorder %s2068_s25, 2  ;;  %p39_p4 = scmp.eq.s32.totalorder %s37_s27, 0 }
   0xf   : > { %p1706_p5 = por %p49_p2, %p48_p1  ;;  %s69_s29 = sadd.s32 1, %s1588_s15 }
  0x10   : > { %s2070_s25 = smov (%p30_p3, %s2068_s25), 0  ;;  %p76_p6 = scmp.ne.s32.totalorder %s1588_s15, %s1584_s14 }
  0x11   : > { %2049 = sst [smem:[#allocation5_spill]] %s2070_s25  ;;  %s65_s4 = ssub.s32 %s1612_s21, %s2070_s25 }
  0x12   : > { %s1714_s30 = scalar_select %p39_p4, %s1596_s17, %s41_s26  }
  0x13   : > { %s66_s5 = sor.u32 %s65_s4, %s37_s27  ;;  %p121_p7 = scmp.eq.s32.totalorder %s65_s4, 0 }
  0x14   : > { %p67_p8 = scmp.eq.s32.totalorder %s66_s5, 0  ;;  %p1720_p9 = por %p76_p6, %p49_p2 }
  0x15   : > { %s123_s7 = sadd.s32 1, %s1580_s13  ;;  %p133_p10 = scmp.ne.s32.totalorder %s1580_s13, %s1576_s12 }
  0x16   : > { %s1728_s8 = scalar_select %p67_p8, %s1588_s15, %s69_s29  }
  0x17   : > { %s1731_s9 = scalar_select %p121_p7, %s1580_s13, %s123_s7  }
  0x18   : > { %p134_p11 = scmp.eq.s32.totalorder %s1244_s23, 17  ;;  %p1247_p13 = scmp.ge.s32.totalorder %s1616_s22, 18 }
  0x1a   : > { %p1733_p12 = por %p134_p11, %p133_p10  ;;  %156 = sbr.rel (%p1247_p13) target bundleno = 85 (0x55), region = 16 }
  0x1f   : > { %159 = sbr.rel (!%p1706_p5) target bundleno = 43 (0x2b), region = 20  ;;  %s161_s11 = sand.u32 (%p1706_p5), 1, %s1596_s17  }
  0x20   : > { %s1336_s26 = sshll.u32 (%p1706_p5), %s1608_s20, 4  ;;  %s1248_s27 = sshll.u32 (%p1706_p5), %s161_s11, 5 }
  0x21   : > { %s2052_s0 = sld [smem:[#allocation6_spill]] (%p1706_p5)  ;;  %s163_s23 = scalar_lea.vmem (%p1706_p5), [#allocation2], %s1248_s27 }
  0x27   : > { %s169_s5 = scalar_lea.vmem %s2052_s0, %s1336_s26 }
  0x28   : > { %v182_v0 = vld [vmem:[%s169_s5] sm:$0xff]  ;;  %v184_v1 = vld [vmem:[%s169_s5 + $0x8] sm:$0xff]  ;;  %v186_v2 = vld [vmem:[%s169_s5 + $0x90] sm:$0xff] }
  0x29   : > { %183 = vst [vmem:[%s163_s23] sm:$0xff] %v182_v0  ;;  %185 = vst [vmem:[%s163_s23 + $0x8] sm:$0xff] %v184_v1  ;;  %v188_v3 = vld [vmem:[%s169_s5 + $0x98] sm:$0xff] }
  0x2a   : > { %187 = vst [vmem:[%s163_s23 + $0x10] sm:$0xff] %v186_v2  ;;  %189 = vst [vmem:[%s163_s23 + $0x18] sm:$0xff] %v188_v3 }
  0x2b PF: > { %195 = sbr.rel (!%p1720_p9) target bundleno = 85 (0x55), region = 43  ;;  %s197_s28 = sand.u32 (%p1720_p9), 1, %s1588_s15  }
  0x2c   : > { %s1253_s7 = sshll.u32 (%p1720_p9), %s1612_s21, 1  ;;  %s1251_s11 = sshll.u32 (%p1720_p9), %s197_s28, 9 }
  0x2d   : > { %s1337_s26 = sshll.u32 (%p1720_p9), %s1608_s20, 8  ;;  %s2053_s1 = sld [smem:[#allocation7_spill]] (%p1720_p9) }
  0x2e   : > { %s203_s29 = sadd.s32 (%p1720_p9), %s1337_s26, %s1253_s7  ;;  %s1758_s6 = scalar_lea.vmem (%p1720_p9), [#allocation3], %s1251_s11 }
  0x2f   : > { %s1255_s4 = sshll.u32 (%p1720_p9), %s203_s29, 2 }
  0x33   : > { %s1753_s25 = scalar_lea.vmem %s2053_s1, %s1255_s4 }
  0x34   : > { %v360_v4 = vld [vmem:[%s1753_s25] sm:$0xff]  ;;  %v362_v5 = vld [vmem:[%s1753_s25 + $0x10] sm:$0xff] }
  0x35   : > { %v364_v6 = vld [vmem:[%s1753_s25 + $0x20] sm:$0xff]  ;;  %361 = vst [vmem:[%s1758_s6] sm:$0xff] %v360_v4  ;;  %363 = vst [vmem:[%s1758_s6 + $0x8] sm:$0xff] %v362_v5  ;;  %v366_v7 = vld [vmem:[%s1753_s25 + $0x30] sm:$0xff] }
  0x36   : > { %365 = vst [vmem:[%s1758_s6 + $0x10] sm:$0xff] %v364_v6  ;;  %v368_v8 = vld [vmem:[%s1753_s25 + $0x40] sm:$0xff]  ;;  %v370_v9 = vld [vmem:[%s1753_s25 + $0x50] sm:$0xff]  ;;  %367 = vst [vmem:[%s1758_s6 + $0x18] sm:$0xff] %v366_v7 }
  0x37   : > { %369 = vst [vmem:[%s1758_s6 + $0x20] sm:$0xff] %v368_v8  ;;  %371 = vst [vmem:[%s1758_s6 + $0x28] sm:$0xff] %v370_v9  ;;  %v372_v10 = vld [vmem:[%s1753_s25 + $0x60] sm:$0xff]  ;;  %v374_v11 = vld [vmem:[%s1753_s25 + $0x70] sm:$0xff] }
  0x38   : > { %v376_v12 = vld [vmem:[%s1753_s25 + $0x80] sm:$0xff]  ;;  %373 = vst [vmem:[%s1758_s6 + $0x30] sm:$0xff] %v372_v10  ;;  %375 = vst [vmem:[%s1758_s6 + $0x38] sm:$0xff] %v374_v11  ;;  %v378_v13 = vld [vmem:[%s1753_s25 + $0x90] sm:$0xff] }
  0x39   : > { %377 = vst [vmem:[%s1758_s6 + $0x40] sm:$0xff] %v376_v12  ;;  %v380_v14 = vld [vmem:[%s1753_s25 + $0xa0] sm:$0xff]  ;;  %v382_v15 = vld [vmem:[%s1753_s25 + $0xb0] sm:$0xff]  ;;  %379 = vst [vmem:[%s1758_s6 + $0x48] sm:$0xff] %v378_v13 }
  0x3a   : > { %381 = vst [vmem:[%s1758_s6 + $0x50] sm:$0xff] %v380_v14  ;;  %383 = vst [vmem:[%s1758_s6 + $0x58] sm:$0xff] %v382_v15  ;;  %v384_v16 = vld [vmem:[%s1753_s25 + $0xc0] sm:$0xff]  ;;  %v386_v17 = vld [vmem:[%s1753_s25 + $0xd0] sm:$0xff] }
  0x3b   : > { %v388_v18 = vld [vmem:[%s1753_s25 + $0xe0] sm:$0xff]  ;;  %385 = vst [vmem:[%s1758_s6 + $0x60] sm:$0xff] %v384_v16  ;;  %387 = vst [vmem:[%s1758_s6 + $0x68] sm:$0xff] %v386_v17  ;;  %v390_v19 = vld [vmem:[%s1753_s25 + $0xf0] sm:$0xff] }
  0x3c   : > { %389 = vst [vmem:[%s1758_s6 + $0x70] sm:$0xff] %v388_v18  ;;  %v392_v20 = vld [vmem:[%s1753_s25 + $0x100] sm:$0xff]  ;;  %v394_v21 = vld [vmem:[%s1753_s25 + $0x110] sm:$0xff]  ;;  %391 = vst [vmem:[%s1758_s6 + $0x78] sm:$0xff] %v390_v19 }
  0x3d   : > { %393 = vst [vmem:[%s1758_s6 + $0x80] sm:$0xff] %v392_v20  ;;  %395 = vst [vmem:[%s1758_s6 + $0x88] sm:$0xff] %v394_v21  ;;  %v396_v22 = vld [vmem:[%s1753_s25 + $0x120] sm:$0xff]  ;;  %v398_v23 = vld [vmem:[%s1753_s25 + $0x130] sm:$0xff] }
  0x3e   : > { %v400_v24 = vld [vmem:[%s1753_s25 + $0x140] sm:$0xff]  ;;  %397 = vst [vmem:[%s1758_s6 + $0x90] sm:$0xff] %v396_v22  ;;  %399 = vst [vmem:[%s1758_s6 + $0x98] sm:$0xff] %v398_v23  ;;  %v402_v25 = vld [vmem:[%s1753_s25 + $0x150] sm:$0xff] }
  0x3f   : > { %401 = vst [vmem:[%s1758_s6 + $0xa0] sm:$0xff] %v400_v24  ;;  %v404_v26 = vld [vmem:[%s1753_s25 + $0x160] sm:$0xff]  ;;  %v406_v27 = vld [vmem:[%s1753_s25 + $0x170] sm:$0xff]  ;;  %403 = vst [vmem:[%s1758_s6 + $0xa8] sm:$0xff] %v402_v25 }
  0x40   : > { %405 = vst [vmem:[%s1758_s6 + $0xb0] sm:$0xff] %v404_v26  ;;  %407 = vst [vmem:[%s1758_s6 + $0xb8] sm:$0xff] %v406_v27  ;;  %v408_v28 = vld [vmem:[%s1753_s25 + $0x180] sm:$0xff]  ;;  %v410_v29 = vld [vmem:[%s1753_s25 + $0x190] sm:$0xff] }
  0x41   : > { %v412_v30 = vld [vmem:[%s1753_s25 + $0x1a0] sm:$0xff]  ;;  %409 = vst [vmem:[%s1758_s6 + $0xc0] sm:$0xff] %v408_v28  ;;  %411 = vst [vmem:[%s1758_s6 + $0xc8] sm:$0xff] %v410_v29  ;;  %v414_v31 = vld [vmem:[%s1753_s25 + $0x1b0] sm:$0xff] }
  0x42   : > { %413 = vst [vmem:[%s1758_s6 + $0xd0] sm:$0xff] %v412_v30  ;;  %v416_v32 = vld [vmem:[%s1753_s25 + $0x1c0] sm:$0xff]  ;;  %v418_v33 = vld [vmem:[%s1753_s25 + $0x1d0] sm:$0xff]  ;;  %415 = vst [vmem:[%s1758_s6 + $0xd8] sm:$0xff] %v414_v31 }
  0x43   : > { %417 = vst [vmem:[%s1758_s6 + $0xe0] sm:$0xff] %v416_v32  ;;  %419 = vst [vmem:[%s1758_s6 + $0xe8] sm:$0xff] %v418_v33  ;;  %v420_v34 = vld [vmem:[%s1753_s25 + $0x1e0] sm:$0xff]  ;;  %v422_v35 = vld [vmem:[%s1753_s25 + $0x1f0] sm:$0xff] }
  0x44   : > { %v424_v36 = vld [vmem:[%s1753_s25 + $0x200] sm:$0xff]  ;;  %421 = vst [vmem:[%s1758_s6 + $0xf0] sm:$0xff] %v420_v34  ;;  %423 = vst [vmem:[%s1758_s6 + $0xf8] sm:$0xff] %v422_v35  ;;  %v426_v37 = vld [vmem:[%s1753_s25 + $0x210] sm:$0xff] }
  0x45   : > { %425 = vst [vmem:[%s1758_s6 + $0x100] sm:$0xff] %v424_v36  ;;  %v428_v38 = vld [vmem:[%s1753_s25 + $0x220] sm:$0xff]  ;;  %v430_v39 = vld [vmem:[%s1753_s25 + $0x230] sm:$0xff]  ;;  %427 = vst [vmem:[%s1758_s6 + $0x108] sm:$0xff] %v426_v37 }
  0x46   : > { %429 = vst [vmem:[%s1758_s6 + $0x110] sm:$0xff] %v428_v38  ;;  %431 = vst [vmem:[%s1758_s6 + $0x118] sm:$0xff] %v430_v39  ;;  %v432_v40 = vld [vmem:[%s1753_s25 + $0x240] sm:$0xff]  ;;  %v434_v41 = vld [vmem:[%s1753_s25 + $0x250] sm:$0xff] }
  0x47   : > { %v436_v42 = vld [vmem:[%s1753_s25 + $0x260] sm:$0xff]  ;;  %433 = vst [vmem:[%s1758_s6 + $0x120] sm:$0xff] %v432_v40  ;;  %435 = vst [vmem:[%s1758_s6 + $0x128] sm:$0xff] %v434_v41  ;;  %v438_v43 = vld [vmem:[%s1753_s25 + $0x270] sm:$0xff] }
  0x48   : > { %437 = vst [vmem:[%s1758_s6 + $0x130] sm:$0xff] %v436_v42  ;;  %v440_v44 = vld [vmem:[%s1753_s25 + $0x280] sm:$0xff]  ;;  %v442_v45 = vld [vmem:[%s1753_s25 + $0x290] sm:$0xff]  ;;  %439 = vst [vmem:[%s1758_s6 + $0x138] sm:$0xff] %v438_v43 }
  0x49   : > { %441 = vst [vmem:[%s1758_s6 + $0x140] sm:$0xff] %v440_v44  ;;  %443 = vst [vmem:[%s1758_s6 + $0x148] sm:$0xff] %v442_v45  ;;  %v444_v46 = vld [vmem:[%s1753_s25 + $0x2a0] sm:$0xff]  ;;  %v446_v47 = vld [vmem:[%s1753_s25 + $0x2b0] sm:$0xff] }
  0x4a   : > { %v448_v48 = vld [vmem:[%s1753_s25 + $0x2c0] sm:$0xff]  ;;  %445 = vst [vmem:[%s1758_s6 + $0x150] sm:$0xff] %v444_v46  ;;  %447 = vst [vmem:[%s1758_s6 + $0x158] sm:$0xff] %v446_v47  ;;  %v450_v49 = vld [vmem:[%s1753_s25 + $0x2d0] sm:$0xff] }
  0x4b   : > { %449 = vst [vmem:[%s1758_s6 + $0x160] sm:$0xff] %v448_v48  ;;  %v452_v50 = vld [vmem:[%s1753_s25 + $0x2e0] sm:$0xff]  ;;  %v454_v51 = vld [vmem:[%s1753_s25 + $0x2f0] sm:$0xff]  ;;  %451 = vst [vmem:[%s1758_s6 + $0x168] sm:$0xff] %v450_v49 }
  0x4c   : > { %453 = vst [vmem:[%s1758_s6 + $0x170] sm:$0xff] %v452_v50  ;;  %455 = vst [vmem:[%s1758_s6 + $0x178] sm:$0xff] %v454_v51  ;;  %v456_v52 = vld [vmem:[%s1753_s25 + $0x300] sm:$0xff]  ;;  %v458_v53 = vld [vmem:[%s1753_s25 + $0x310] sm:$0xff] }
  0x4d   : > { %v460_v54 = vld [vmem:[%s1753_s25 + $0x320] sm:$0xff]  ;;  %457 = vst [vmem:[%s1758_s6 + $0x180] sm:$0xff] %v456_v52  ;;  %459 = vst [vmem:[%s1758_s6 + $0x188] sm:$0xff] %v458_v53  ;;  %v462_v55 = vld [vmem:[%s1753_s25 + $0x330] sm:$0xff] }
  0x4e   : > { %461 = vst [vmem:[%s1758_s6 + $0x190] sm:$0xff] %v460_v54  ;;  %v464_v56 = vld [vmem:[%s1753_s25 + $0x340] sm:$0xff]  ;;  %v466_v57 = vld [vmem:[%s1753_s25 + $0x350] sm:$0xff]  ;;  %463 = vst [vmem:[%s1758_s6 + $0x198] sm:$0xff] %v462_v55 }
  0x4f   : > { %465 = vst [vmem:[%s1758_s6 + $0x1a0] sm:$0xff] %v464_v56  ;;  %467 = vst [vmem:[%s1758_s6 + $0x1a8] sm:$0xff] %v466_v57  ;;  %v468_v58 = vld [vmem:[%s1753_s25 + $0x360] sm:$0xff]  ;;  %v470_v59 = vld [vmem:[%s1753_s25 + $0x370] sm:$0xff] }
  0x50   : > { %v472_v60 = vld [vmem:[%s1753_s25 + $0x380] sm:$0xff]  ;;  %469 = vst [vmem:[%s1758_s6 + $0x1b0] sm:$0xff] %v468_v58  ;;  %471 = vst [vmem:[%s1758_s6 + $0x1b8] sm:$0xff] %v470_v59  ;;  %v474_v61 = vld [vmem:[%s1753_s25 + $0x390] sm:$0xff] }
  0x51   : > { %473 = vst [vmem:[%s1758_s6 + $0x1c0] sm:$0xff] %v472_v60  ;;  %v476_v62 = vld [vmem:[%s1753_s25 + $0x3a0] sm:$0xff]  ;;  %v478_v63 = vld [vmem:[%s1753_s25 + $0x3b0] sm:$0xff]  ;;  %475 = vst [vmem:[%s1758_s6 + $0x1c8] sm:$0xff] %v474_v61 }
  0x52   : > { %477 = vst [vmem:[%s1758_s6 + $0x1d0] sm:$0xff] %v476_v62  ;;  %479 = vst [vmem:[%s1758_s6 + $0x1d8] sm:$0xff] %v478_v63  ;;  %v480_v0 = vld [vmem:[%s1753_s25 + $0x3c0] sm:$0xff]  ;;  %v482_v1 = vld [vmem:[%s1753_s25 + $0x3d0] sm:$0xff] }
  0x53   : > { %v484_v2 = vld [vmem:[%s1753_s25 + $0x3e0] sm:$0xff]  ;;  %481 = vst [vmem:[%s1758_s6 + $0x1e0] sm:$0xff] %v480_v0  ;;  %483 = vst [vmem:[%s1758_s6 + $0x1e8] sm:$0xff] %v482_v1  ;;  %v486_v3 = vld [vmem:[%s1753_s25 + $0x3f0] sm:$0xff] }
  0x54   : > { %485 = vst [vmem:[%s1758_s6 + $0x1f0] sm:$0xff] %v484_v2  ;;  %487 = vst [vmem:[%s1758_s6 + $0x1f8] sm:$0xff] %v486_v3 }
  0x55 PF: > { %p1256_p0 = scmp.ge.s32.totalorder %s1616_s22, 1  ;;  %p500_p1 = scmp.lt.s32.totalorder %s1616_s22, 19 }
  0x57   : > { %p501_p2 = pnand %p1256_p0, %p500_p1 }
  0x58   : > { %s507_s0 = sand.u32 (!%p501_p2), 1, %s1592_s16   ;;  %s514_s5 = sand.u32 (!%p501_p2), 1, %s1584_s14  }
  0x59   : > { %504 = sbr.rel (%p501_p2) target bundleno = 396 (0x18c), region = 85  ;;  %s1257_s23 = sshll.u32 (!%p501_p2), %s507_s0, 5 }
  0x5a   : > { %s1258_s28 = sshll.u32 (!%p501_p2), %s514_s5, 9  ;;  %s541_s7 = sand.u32 (!%p501_p2), 1, %s1576_s12  }
  0x5b   : > { %s1260_s11 = sshll.u32 (!%p501_p2), %s1604_s19, 1  ;;  %s1259_s25 = sshll.u32 (!%p501_p2), %s541_s7, 5 }
  0x5c   : > { %p549_p3 = scmp.lt.s32.totalorder (!%p501_p2), %s1260_s11, 3  ;;  %s1897_s27 = scalar_lea.vmem (!%p501_p2), [#allocation2], %s1257_s23 }
  0x5d   : > { %s1899_s6 = scalar_lea.vmem (!%p501_p2), [#allocation3], %s1258_s28  ;;  %s1901_s1 = scalar_lea.vmem (!%p501_p2), [#allocation4], %s1259_s25 }
  0x5e   : > { %s2072_s11 = smov (!%p549_p3, %s1260_s11), 3  ;;  %p1261_p4 = scmp.ne.s32.totalorder %s1600_s18, 0 }
  0x5f   : > { %s551_s4 = scalar_lea.vmem %s2043_s2, %s2072_s11 }
  0x60   : > { %558 = sbr.rel (%p1261_p4) target bundleno = 104 (0x68), region = 97 }
  0x65   : > { %v1618_v4 = vmov 0.0  }
  0x66   : > { %559 = vst [vmem:[%s1901_s1] sm:$0xff] %v1618_v4  ;;  %560 = vst [vmem:[%s1901_s1 + $0x8] sm:$0xff] %v1618_v4 }
  0x67   : > { %561 = vst [vmem:[%s1901_s1 + $0x10] sm:$0xff] %v1618_v4  ;;  %562 = vst [vmem:[%s1901_s1 + $0x18] sm:$0xff] %v1618_v4 }
  0x68 PF: > { %v1428_v5 = vld [vmem:[%s1899_s6 + $0x74] ss:$8 sps:$4 sm:$0xff]   ;;  %v1432_v7 = vld [vmem:[%s1899_s6 + $0x70] ss:$8 sps:$4 sm:$0xff]   ;;  %v1434_v9 = vld [vmem:[%s1899_s6 + $0x64] ss:$8 sps:$4 sm:$0xff]  }
  0x69   : > { %v1430_v6 = vld [vmem:[%s1899_s6 + $0x174] ss:$8 sps:$4 sm:$0xff]   ;;  %975 = vmatprep.subr.bf16.mxu0 %v1428_v5  ;;  %v1433_v8 = vld [vmem:[%s1899_s6 + $0x170] ss:$8 sps:$4 sm:$0xff]   ;;  %v1436_v10 = vld [vmem:[%s1899_s6 + $0x164] ss:$8 sps:$4 sm:$0xff]  }
  0x6a   : > { %1018 = vmatprep.subr.bf16.mxu1 %v1430_v6  ;;  %976 = vmatpush1.bf16.msra.mxu0 %v1432_v7  ;;  %v1438_v11 = vld [vmem:[%s1899_s6 + $0x60] ss:$8 sps:$4 sm:$0xff]   ;;  %v1440_v13 = vld [vmem:[%s1899_s6 + $0x54] ss:$8 sps:$4 sm:$0xff]   ;;  %v1444_v15 = vld [vmem:[%s1899_s6 + $0x50] ss:$8 sps:$4 sm:$0xff]  }
  0x6b   : > { %1019 = vmatpush1.bf16.msra.mxu1 %v1433_v8  ;;  %977 = vmatprep.subr.bf16.mxu0 %v1434_v9  ;;  %v1439_v12 = vld [vmem:[%s1899_s6 + $0x160] ss:$8 sps:$4 sm:$0xff]   ;;  %v1442_v14 = vld [vmem:[%s1899_s6 + $0x154] ss:$8 sps:$4 sm:$0xff]   ;;  %v1445_v16 = vld [vmem:[%s1899_s6 + $0x150] ss:$8 sps:$4 sm:$0xff]  }
  0x6c   : > { %1020 = vmatprep.subr.bf16.mxu1 %v1436_v10  ;;  %v1446_v17 = vld [vmem:[%s1899_s6 + $0x44] ss:$8 sps:$4 sm:$0xff]   ;;  %v1450_v19 = vld [vmem:[%s1899_s6 + $0x40] ss:$8 sps:$4 sm:$0xff]   ;;  %v1452_v21 = vld [vmem:[%s1899_s6 + $0x34] ss:$8 sps:$4 sm:$0xff]  }
  0x6d   : > { %v1448_v18 = vld [vmem:[%s1899_s6 + $0x144] ss:$8 sps:$4 sm:$0xff]   ;;  %v1451_v20 = vld [vmem:[%s1899_s6 + $0x140] ss:$8 sps:$4 sm:$0xff]   ;;  %v1454_v22 = vld [vmem:[%s1899_s6 + $0x134] ss:$8 sps:$4 sm:$0xff]  }
  0x6e   : > { %978 = vmatpush1.bf16.msra.mxu0 %v1438_v11  ;;  %v1456_v23 = vld [vmem:[%s1899_s6 + $0x30] ss:$8 sps:$4 sm:$0xff]   ;;  %v1458_v25 = vld [vmem:[%s1899_s6 + $0x24] ss:$8 sps:$4 sm:$0xff]   ;;  %v1462_v27 = vld [vmem:[%s1899_s6 + $0x20] ss:$8 sps:$4 sm:$0xff]  }
  0x6f   : > { %1021 = vmatpush1.bf16.msra.mxu1 %v1439_v12  ;;  %979 = vmatprep.subr.bf16.mxu0 %v1440_v13  ;;  %v1457_v24 = vld [vmem:[%s1899_s6 + $0x130] ss:$8 sps:$4 sm:$0xff]   ;;  %v1460_v26 = vld [vmem:[%s1899_s6 + $0x124] ss:$8 sps:$4 sm:$0xff]   ;;  %v1463_v28 = vld [vmem:[%s1899_s6 + $0x120] ss:$8 sps:$4 sm:$0xff]  }
  0x70   : > { %1022 = vmatprep.subr.bf16.mxu1 %v1442_v14  ;;  %v1464_v29 = vld [vmem:[%s1899_s6 + $0x14] ss:$8 sps:$4 sm:$0xff]   ;;  %v1468_v31 = vld [vmem:[%s1899_s6 + $0x10] ss:$8 sps:$4 sm:$0xff]   ;;  %v1470_v33 = vld [vmem:[%s1899_s6 + $0x4] ss:$8 sps:$4 sm:$0xff]  }
  0x71   : > { %v1466_v30 = vld [vmem:[%s1899_s6 + $0x114] ss:$8 sps:$4 sm:$0xff]   ;;  %v1469_v32 = vld [vmem:[%s1899_s6 + $0x110] ss:$8 sps:$4 sm:$0xff]   ;;  %v1472_v34 = vld [vmem:[%s1899_s6 + $0x104] ss:$8 sps:$4 sm:$0xff]  }
  0x72   : > { %980 = vmatpush1.bf16.msra.mxu0 %v1444_v15  ;;  %v1474_v35 = vld [vmem:[%s1899_s6] ss:$8 sps:$4 sm:$0xff]   ;;  %v1476_v37 = vld [vmem:[%s1899_s6 + $0xf4] ss:$8 sps:$4 sm:$0xff]   ;;  %v1480_v39 = vld [vmem:[%s1899_s6 + $0xf0] ss:$8 sps:$4 sm:$0xff]  }
  0x73   : > { %1023 = vmatpush1.bf16.msra.mxu1 %v1445_v16  ;;  %981 = vmatprep.subr.bf16.mxu0 %v1446_v17  ;;  %v1475_v36 = vld [vmem:[%s1899_s6 + $0x100] ss:$8 sps:$4 sm:$0xff]   ;;  %v1478_v38 = vld [vmem:[%s1899_s6 + $0x1f4] ss:$8 sps:$4 sm:$0xff]   ;;  %v1481_v40 = vld [vmem:[%s1899_s6 + $0x1f0] ss:$8 sps:$4 sm:$0xff]  }
  0x74   : > { %1024 = vmatprep.subr.bf16.mxu1 %v1448_v18  ;;  %v1482_v41 = vld [vmem:[%s1899_s6 + $0xe4] ss:$8 sps:$4 sm:$0xff]   ;;  %v1486_v43 = vld [vmem:[%s1899_s6 + $0xe0] ss:$8 sps:$4 sm:$0xff]   ;;  %v1488_v45 = vld [vmem:[%s1899_s6 + $0xd4] ss:$8 sps:$4 sm:$0xff]  }
  0x75   : > { %v1484_v42 = vld [vmem:[%s1899_s6 + $0x1e4] ss:$8 sps:$4 sm:$0xff]   ;;  %v1487_v44 = vld [vmem:[%s1899_s6 + $0x1e0] ss:$8 sps:$4 sm:$0xff]   ;;  %v1490_v46 = vld [vmem:[%s1899_s6 + $0x1d4] ss:$8 sps:$4 sm:$0xff]  }
  0x76   : > { %982 = vmatpush1.bf16.msra.mxu0 %v1450_v19  ;;  %v1492_v47 = vld [vmem:[%s1899_s6 + $0xd0] ss:$8 sps:$4 sm:$0xff]   ;;  %v1494_v49 = vld [vmem:[%s1899_s6 + $0xc4] ss:$8 sps:$4 sm:$0xff]   ;;  %v1498_v51 = vld [vmem:[%s1899_s6 + $0xc0] ss:$8 sps:$4 sm:$0xff]  }
  0x77   : > { %1025 = vmatpush1.bf16.msra.mxu1 %v1451_v20  ;;  %983 = vmatprep.subr.bf16.mxu0 %v1452_v21  ;;  %v1493_v48 = vld [vmem:[%s1899_s6 + $0x1d0] ss:$8 sps:$4 sm:$0xff]   ;;  %v1496_v50 = vld [vmem:[%s1899_s6 + $0x1c4] ss:$8 sps:$4 sm:$0xff]   ;;  %v1499_v53 = vld [vmem:[%s1899_s6 + $0x1c0] ss:$8 sps:$4 sm:$0xff]  }
  0x78   : > { %1026 = vmatprep.subr.bf16.mxu1 %v1454_v22  ;;  %v1526_v52 = vld [vmem:[%s1897_s27 + $0x4] ss:$16 sps:$4 sm:$0xff]   ;;  %v1529_v56 = vld [vmem:[%s1897_s27 + $0xc] ss:$16 sps:$4 sm:$0xff]   ;;  %v1504_v57 = vld [vmem:[%s1899_s6 + $0xb0] ss:$8 sps:$4 sm:$0xff]  }
  0x79   : > { %v1500_v54 = vld [vmem:[%s1899_s6 + $0xb4] ss:$8 sps:$4 sm:$0xff]   ;;  %1007 = vmatprep.mubr.bf16.mxu0 %v1526_v52  ;;  %1050 = vmatprep.mubr.bf16.mxu1 %v1529_v56  ;;  %v1505_v58 = vld [vmem:[%s1899_s6 + $0x1b0] ss:$8 sps:$4 sm:$0xff]   ;;  %v1506_v59 = vld [vmem:[%s1899_s6 + $0xa4] ss:$8 sps:$4 sm:$0xff]  }
  0x7a   : > { %984 = vmatpush1.bf16.msra.mxu0 %v1456_v23  ;;  %v1502_v55 = vld [vmem:[%s1899_s6 + $0x1b4] ss:$8 sps:$4 sm:$0xff]   ;;  %v1508_v60 = vld [vmem:[%s1899_s6 + $0x1a4] ss:$8 sps:$4 sm:$0xff]   ;;  %v1510_v61 = vld [vmem:[%s1899_s6 + $0xa0] ss:$8 sps:$4 sm:$0xff]  }
  0x7b   : > { %1027 = vmatpush1.bf16.msra.mxu1 %v1457_v24  ;;  %985 = vmatprep.subr.bf16.mxu0 %v1458_v25  ;;  %v1511_v62 = vld [vmem:[%s1899_s6 + $0x1a0] ss:$8 sps:$4 sm:$0xff]   ;;  %v1512_v63 = vld [vmem:[%s1899_s6 + $0x94] ss:$8 sps:$4 sm:$0xff]   ;;  %v1516_v1 = vld [vmem:[%s1899_s6 + $0x90] ss:$8 sps:$4 sm:$0xff]  }
  0x7c   : > { %1028 = vmatprep.subr.bf16.mxu1 %v1460_v26  ;;  %v1514_v0 = vld [vmem:[%s1899_s6 + $0x194] ss:$8 sps:$4 sm:$0xff]   ;;  %v1517_v2 = vld [vmem:[%s1899_s6 + $0x190] ss:$8 sps:$4 sm:$0xff]   ;;  %v1518_v3 = vld [vmem:[%s1899_s6 + $0x84] ss:$8 sps:$4 sm:$0xff]  }
  0x7d   : > { %v1520_v4 = vld [vmem:[%s1899_s6 + $0x184] ss:$8 sps:$4 sm:$0xff]   ;;  %v1522_v5 = vld [vmem:[%s1899_s6 + $0x80] ss:$8 sps:$4 sm:$0xff]   ;;  %v565_v19 = vld [vmem:[%s1901_s1 + $0x10] sm:$0xff]  ;;  %p1330_p5 = scmp.ne.s32.totalorder %s1600_s18, 8 }
  0x7e   : > { %986 = vmatpush1.bf16.msra.mxu0 %v1462_v27  ;;  %v1523_v6 = vld [vmem:[%s1899_s6 + $0x180] ss:$8 sps:$4 sm:$0xff]   ;;  %v566_v24 = vld [vmem:[%s1901_s1 + $0x18] sm:$0xff] }
  0x7f   : > { %1029 = vmatpush1.bf16.msra.mxu1 %v1463_v28  ;;  %987 = vmatprep.subr.bf16.mxu0 %v1464_v29  ;;  %v1524_v7 = vld [vmem:[%s1897_s27] ss:$16 sps:$4 sm:$0xff]   ;;  %v1527_v8 = vld [vmem:[%s1897_s27 + $0x8] ss:$16 sps:$4 sm:$0xff]  }
  0x80   : > { %1030 = vmatprep.subr.bf16.mxu1 %v1466_v30  ;;  %v563_v10 = vld [vmem:[%s1901_s1] sm:$0xff]  ;;  %v564_v14 = vld [vmem:[%s1901_s1 + $0x8] sm:$0xff] }
  0x82   : > { %988 = vmatpush1.bf16.msra.mxu0 %v1468_v31 }
  0x83   : > { %1031 = vmatpush1.bf16.msra.mxu1 %v1469_v32  ;;  %989 = vmatprep.subr.bf16.mxu0 %v1470_v33 }
  0x84   : > { %1032 = vmatprep.subr.bf16.mxu1 %v1472_v34 }
  0x86   : > { %990 = vmatpush1.bf16.msra.mxu0 %v1474_v35 }
  0x87   : > { %1033 = vmatpush1.bf16.msra.mxu1 %v1475_v36  ;;  %991 = vmatprep.subr.bf16.mxu0 %v1476_v37 }
  0x88   : > { %1034 = vmatprep.subr.bf16.mxu1 %v1478_v38 }
  0x8a   : > { %992 = vmatpush2.bf16.msra.mxu0 %v1480_v39 }
  0x8b   : > { %1035 = vmatpush2.bf16.msra.mxu1 %v1481_v40  ;;  %993 = vmatprep.subr.bf16.mxu0 %v1482_v41 }
  0x8c   : > { %1036 = vmatprep.subr.bf16.mxu1 %v1484_v42 }
  0x8e   : > { %994 = vmatpush2.bf16.msra.mxu0 %v1486_v43 }
  0x8f   : > { %1037 = vmatpush2.bf16.msra.mxu1 %v1487_v44  ;;  %995 = vmatprep.subr.bf16.mxu0 %v1488_v45 }
  0x90   : > { %1038 = vmatprep.subr.bf16.mxu1 %v1490_v46 }
  0x92   : > { %996 = vmatpush2.bf16.msra.mxu0 %v1492_v47 }
  0x93   : > { %1039 = vmatpush2.bf16.msra.mxu1 %v1493_v48  ;;  %997 = vmatprep.subr.bf16.mxu0 %v1494_v49 }
  0x94   : > { %1040 = vmatprep.subr.bf16.mxu1 %v1496_v50 }
  0x96   : > { %998 = vmatpush2.bf16.msra.mxu0 %v1498_v51 }
  0x97   : > { %1041 = vmatpush2.bf16.msra.mxu1 %v1499_v53  ;;  %999 = vmatprep.subr.bf16.mxu0 %v1500_v54 }
  0x98   : > { %1042 = vmatprep.subr.bf16.mxu1 %v1502_v55 }
  0x9a   : > { %1000 = vmatpush2.bf16.msra.mxu0 %v1504_v57 }
  0x9b   : > { %1043 = vmatpush2.bf16.msra.mxu1 %v1505_v58  ;;  %1001 = vmatprep.subr.bf16.mxu0 %v1506_v59 }
  0x9c   : > { %1044 = vmatprep.subr.bf16.mxu1 %v1508_v60 }
  0x9e   : > { %1002 = vmatpush2.bf16.msra.mxu0 %v1510_v61 }
  0x9f   : > { %1045 = vmatpush2.bf16.msra.mxu1 %v1511_v62  ;;  %1003 = vmatprep.subr.bf16.mxu0 %v1512_v63 }
  0xa0   : > { %1046 = vmatprep.subr.bf16.mxu1 %v1514_v0 }
  0xa2   : > { %1004 = vmatpush2.bf16.msra.mxu0 %v1516_v1 }
  0xa3   : > { %1047 = vmatpush2.bf16.msra.mxu1 %v1517_v2  ;;  %1005 = vmatprep.subr.bf16.mxu0 %v1518_v3 }
  0xa4   : > { %1048 = vmatprep.subr.bf16.mxu1 %v1520_v4 }
  0xa6   : > { %1006 = vmatpush2.bf16.msra.mxu0 %v1522_v5 }
  0xa7   : > { %1049 = vmatpush2.bf16.msra.mxu1 %v1523_v6 }
  0xa9   : > { %1008 = vmatmul.mubr.bf16.vlgmr.msra.gmra.mxu0 %v1524_v7 }
  0xaa   : > { %1051 = vmatmul.mubr.bf16.vlgmr.msra.gmra.mxu1 %v1527_v8 }
 0x169   : > { %v1009_v9 = vpop.f32.mrf.mxu0 }
 0x16a   : > { %v1052_v11 = vpop.f32.mrf.mxu1 }
 0x16b   : > { %v1053_v12 = vadd.f32 %v1052_v11, %v1009_v9  ;;  %v1011_v13 = vpop.f32.mrf.mxu0 }
 0x16c   : > { %v1054_v15 = vpop.f32.mrf.mxu1 }
 0x16d   : > { %v1061_v16 = vadd.f32 %v1053_v12, %v563_v10  ;;  %v1055_v17 = vadd.f32 %v1054_v15, %v1011_v13  ;;  %v1013_v18 = vpop.f32.mrf.mxu0 }
 0x16e   : > { %v1056_v20 = vpop.f32.mrf.mxu1 }
 0x16f   : > { %1065 = vst [vmem:[%s1901_s1] sm:$0xff] %v1061_v16  ;;  %v1062_v21 = vadd.f32 %v1055_v17, %v564_v14  ;;  %v1057_v22 = vadd.f32 %v1056_v20, %v1013_v18  ;;  %v1015_v23 = vpop.f32.mrf.mxu0 }
 0x170   : > { %v1058_v25 = vpop.f32.mrf.mxu1 }
 0x171   : > { %1066 = vst [vmem:[%s1901_s1 + $0x8] sm:$0xff] %v1062_v21  ;;  %v1063_v26 = vadd.f32 %v1057_v22, %v565_v19  ;;  %v1059_v27 = vadd.f32 %v1058_v25, %v1015_v23  ;;  %1072 = sbr.rel (%p1330_p5) target bundleno = 388 (0x184), region = 101 }
 0x173   : > { %1067 = vst [vmem:[%s1901_s1 + $0x10] sm:$0xff] %v1063_v26  ;;  %v1064_v28 = vadd.f32 %v1059_v27, %v566_v24 }
 0x175   : > { %1068 = vst [vmem:[%s1901_s1 + $0x18] sm:$0xff] %v1064_v28 }
 0x176   : > { %v1079_v29 = vlaneseq  ;;  %v1077_v31 = vld [vmem:[%s551_s4] sm:$0x3] }
 0x177   : > { %v1073_v32 = vld [vmem:[%s1901_s1] sm:$0xff] }
 0x178   : > { %v1080_v30 = vshrl.u32 %v1079_v29, 7  ;;  %v1074_v35 = vld [vmem:[%s1901_s1 + $0x8] sm:$0xff] }
 0x17a   : > { %v1081_v33 = vsub.s32 0, %v1080_v30  ;;  %v1085_v34 = vsub.s32 1, %v1080_v30  ;;  %v1075_v36 = vld [vmem:[%s1901_s1 + $0x10] sm:$0xff] }
 0x17c   : > { %v1076_v37 = vld [vmem:[%s1901_s1 + $0x18] sm:$0xff]  ;;  %v1082_v38 = vrot.slane %v1077_v31, %v1081_v33  ;;  %v1086_v39 = vrot.slane %v1077_v31, %v1085_v34 }
 0x17e   : > { %v1089_v40 = vadd.f32 %v1082_v38, %v1073_v32  ;;  %v1090_v41 = vadd.f32 %v1086_v39, %v1074_v35  ;;  %v1091_v42 = vadd.f32 %v1082_v38, %v1075_v36  ;;  %v1092_v43 = vadd.f32 %v1086_v39, %v1076_v37 }
 0x180   : > { %v1093_v44 = vmax.f32 %v1089_v40, 0.0  ;;  %v1094_v45 = vmax.f32 %v1090_v41, 0.0  ;;  %v1095_v46 = vmax.f32 %v1091_v42, 0.0  ;;  %v1096_v47 = vmax.f32 %v1092_v43, 0.0 }
 0x182   : > { %1097 = vst [vmem:[%s1901_s1] sm:$0xff] %v1093_v44  ;;  %1098 = vst [vmem:[%s1901_s1 + $0x8] sm:$0xff] %v1094_v45 }
 0x183   : > { %1099 = vst [vmem:[%s1901_s1 + $0x10] sm:$0xff] %v1095_v46  ;;  %1100 = vst [vmem:[%s1901_s1 + $0x18] sm:$0xff] %v1096_v47 }
 0x184 PF: > { %1107 = sbr.rel (!%p1733_p12) target bundleno = 396 (0x18c), region = 105  ;;  %s1338_s16 = sshll.u32 (%p1733_p12), %s1604_s19, 4 }
 0x185   : > { %s1113_s5 = scalar_lea.vmem (%p1733_p12), %s2044_s3, %s1338_s16 }
 0x189   : > { %v1126_v48 = vld [vmem:[%s1901_s1] sm:$0xff]  ;;  %v1128_v49 = vld [vmem:[%s1901_s1 + $0x8] sm:$0xff] }
 0x18a   : > { %v1130_v50 = vld [vmem:[%s1901_s1 + $0x10] sm:$0xff]  ;;  %v1132_v51 = vld [vmem:[%s1901_s1 + $0x18] sm:$0xff]  ;;  %1127 = vst [vmem:[%s1113_s5] sm:$0xff] %v1126_v48  ;;  %1129 = vst [vmem:[%s1113_s5 + $0x8] sm:$0xff] %v1128_v49 }
 0x18b   : > { %1131 = vst [vmem:[%s1113_s5 + $0x20] sm:$0xff] %v1130_v50  ;;  %1133 = vst [vmem:[%s1113_s5 + $0x28] sm:$0xff] %v1132_v51 }
 0x18c PF: > { %s13_s22 = sadd.s32 1, %s1616_s22   ;;  %s2054_s10 = sld [smem:[#allocation5_spill]] }
 0x18d   : > { %p10_p6 = scmp.ge.s32.totalorder %s13_s22, 20   ;;  %s2055_s12 = smov %s1580_s13 }
 0x18e   : > { %s2056_s13 = smov %s1731_s9  ;;  %s2057_s14 = smov %s1588_s15 }
 0x18f   : > { %s2058_s15 = smov %s1728_s8  ;;  %s2059_s16 = smov %s1596_s17 }
 0x190   : > { %s2060_s17 = smov %s1714_s30  ;;  %s2061_s18 = smov %s1608_s20 }
 0x191   : > { %s2062_s19 = smov %s1612_s21  ;;  %s2063_s20 = smov %s2066_s24 }
 0x192   : > { %s2064_s21 = smov %s2054_s10  ;;  %12 = sbr.rel (!%p10_p6) target bundleno = 9 (0x9), region = 170 }

// kernel: beyond_the_spectrum_forward.66
= control target key start
LH: loop header
LB: loop body
LE: loop exit
PB: predicated region body
PF: predicated region fallthrough
CT: control target
= control target key end

     0   :  { %s2183_s0 = inlined_call_operand.vmem [shape: bf16[16,4608], index: 0, kind: input, shape index: {}]   ;;  %s2184_s1 = inlined_call_operand.vmem [shape: bf16[4608,512], index: 1, kind: input, shape index: {}]   ;;  %s2185_s2 = inlined_call_operand.vmem [shape: f32[1,512], index: 2, kind: input, shape index: {}]   ;;  %s2186_s3 = inlined_call_operand.vmem [shape: f32[16,512], index: 3, kind: input, shape index: {}]   ;;  %s2187_s4 = inlined_call_operand.vmem [shape: f32[16,512], index: 4, kind: output, shape index: {}]  }
   0x1   :  { %2190 = sst [smem:[#allocation9_spill]] %s2183_s0 }
   0x2   :  { %s1758_s15 = smov 0   ;;  %s1760_s16 = smov 0  }
   0x3   :  { %s1762_s17 = smov 0   ;;  %s1764_s18 = smov 0  }
   0x4   :  { %s1766_s19 = smov 0   ;;  %s1768_s20 = smov 0  }
   0x5   :  { %s1770_s21 = smov 0   ;;  %s1772_s22 = smov 0  }
   0x6   :  { %s1774_s23 = smov 0   ;;  %s1776_s24 = smov 0  }
   0x7   :  { %s1778_s25 = smov 0  }
   0x8 LB: > { %s1353_s26 = sadd.s32 4294967295, %s1730_s25   ;;  %s26_s27 = sadd.s32 1, %s1722_s23  ;;  %s1730_s25 = sphi %s1778_s25, %s14_s25   ;;  %s1726_s24 = sphi %s1776_s24, %s2211_s24   ;;  %s1722_s23 = sphi %s1774_s23, %s2210_s23   ;;  %s1718_s22 = sphi %s1772_s22, %s2209_s22   ;;  %s1714_s21 = sphi %s1770_s21, %s2208_s21   ;;  %s1710_s20 = sphi %s1768_s20, %s2207_s20   ;;  %s1706_s19 = sphi %s1766_s19, %s2206_s19   ;;  %s1702_s18 = sphi %s1764_s18, %s2205_s18   ;;  %s1698_s17 = sphi %s1762_s17, %s2204_s17   ;;  %s1694_s16 = sphi %s1760_s16, %s2203_s16   ;;  %s1690_s15 = sphi %s1758_s15, %s2202_s15  }
   0x9   : > { %p27_p0 = scmp.ge.s32.totalorder %s26_s27, 9  ;;  %s29_s28 = sadd.s32 1, %s1726_s24 }
   0xa   : > { %s42_s29 = sadd.s32 1, %s1710_s20  ;;  %p49_p1 = scmp.ne.s32.totalorder %s1710_s20, %s1706_s19 }
   0xb   : > { %s2213_s27 = smov (%p27_p0, %s26_s27), 0  ;;  %s2215_s28 = smov (!%p27_p0, %s29_s28), %s1726_s24 }
   0xc   : > { %2191 = sst [smem:[#allocation6_spill]] %s2213_s27  ;;  %s38_s30 = ssub.s32 %s1722_s23, %s2213_s27 }
   0xd   : > { %p50_p2 = scmp.eq.s32.totalorder %s1730_s25, 0  ;;  %p31_p3 = scmp.ge.s32.totalorder %s2215_s28, 2 }
   0xe   : > { %p40_p4 = scmp.eq.s32.totalorder %s38_s30, 0  ;;  %s70_s6 = sadd.s32 1, %s1702_s18 }
   0xf   : > { %p1827_p5 = por %p50_p2, %p49_p1  ;;  %s2217_s28 = smov (%p31_p3, %s2215_s28), 0 }
  0x10   : > { %2193 = sst [smem:[#allocation7_spill]] %s2217_s28  ;;  %s66_s8 = ssub.s32 %s1726_s24, %s2217_s28 }
  0x11   : > { %s1835_s7 = scalar_select %p40_p4, %s1710_s20, %s42_s29  }
  0x12   : > { %p77_p6 = scmp.ne.s32.totalorder %s1702_s18, %s1698_s17  ;;  %s67_s9 = sor.u32 %s66_s8, %s38_s30 }
  0x13   : > { %2194 = sst [smem:[#allocation8_spill]] %s1835_s7  ;;  %p122_p7 = scmp.eq.s32.totalorder %s66_s8, 0 }
  0x14   : > { %p68_p8 = scmp.eq.s32.totalorder %s67_s9, 0  ;;  %p1843_p9 = por %p77_p6, %p50_p2 }
  0x15   : > { %s124_s11 = sadd.s32 1, %s1694_s16  ;;  %p131_p10 = scmp.ne.s32.totalorder %s1694_s16, %s1690_s15 }
  0x16   : > { %s1851_s12 = scalar_select %p68_p8, %s1702_s18, %s70_s6  }
  0x17   : > { %s1854_s13 = scalar_select %p122_p7, %s1694_s16, %s124_s11  }
  0x18   : > { %p1858_p11 = por %p131_p10, %p50_p2  ;;  %p163_p12 = scmp.eq.s32.totalorder %s1353_s26, 17 }
  0x19   : > { %p1356_p0 = scmp.ge.s32.totalorder %s1730_s25, 18 }
  0x1a   : > { %p1862_p13 = por %p163_p12, %p131_p10 }
  0x1b   : > { %185 = sbr.rel (%p1356_p0) target bundleno = 89 (0x59), region = 16 }
  0x20   : > { %188 = sbr.rel (!%p1827_p5) target bundleno = 44 (0x2c), region = 20  ;;  %s190_s30 = sand.u32 (%p1827_p5), 1, %s1710_s20  }
  0x21   : > { %s1449_s6 = sshll.u32 (%p1827_p5), %s1722_s23, 4  ;;  %s1357_s8 = sshll.u32 (%p1827_p5), %s190_s30, 5 }
  0x22   : > { %s2198_s0 = sld [smem:[#allocation9_spill]] (%p1827_p5)  ;;  %s192_s26 = scalar_lea.vmem (%p1827_p5), [#allocation2], %s1357_s8 }
  0x28   : > { %s198_s28 = scalar_lea.vmem %s2198_s0, %s1449_s6 }
  0x29   : > { %v211_v0 = vld [vmem:[%s198_s28] sm:$0xff]  ;;  %v213_v1 = vld [vmem:[%s198_s28 + $0x8] sm:$0xff]  ;;  %v215_v2 = vld [vmem:[%s198_s28 + $0x90] sm:$0xff] }
  0x2a   : > { %212 = vst [vmem:[%s192_s26] sm:$0xff] %v211_v0  ;;  %214 = vst [vmem:[%s192_s26 + $0x8] sm:$0xff] %v213_v1  ;;  %v217_v3 = vld [vmem:[%s198_s28 + $0x98] sm:$0xff] }
  0x2b   : > { %216 = vst [vmem:[%s192_s26 + $0x10] sm:$0xff] %v215_v2  ;;  %218 = vst [vmem:[%s192_s26 + $0x18] sm:$0xff] %v217_v3 }
  0x2c PF: > { %224 = sbr.rel (!%p1843_p9) target bundleno = 83 (0x53), region = 43  ;;  %s226_s5 = sand.u32 (%p1843_p9), 1, %s1702_s18  }
  0x2d   : > { %s1362_s30 = sshll.u32 (%p1843_p9), %s1726_s24, 1  ;;  %s1360_s9 = sshll.u32 (%p1843_p9), %s226_s5, 9 }
  0x2e   : > { %s1450_s6 = sshll.u32 (%p1843_p9), %s1722_s23, 8  ;;  %s1887_s28 = scalar_lea.vmem (%p1843_p9), [#allocation3], %s1360_s9 }
  0x2f   : > { %s232_s11 = sadd.s32 (%p1843_p9), %s1450_s6, %s1362_s30 }
  0x30   : > { %s1364_s0 = sshll.u32 (%p1843_p9), %s232_s11, 2 }
  0x31   : > { %s1882_s7 = scalar_lea.vmem %s2184_s1, %s1364_s0 }
  0x32   : > { %v389_v4 = vld [vmem:[%s1882_s7] sm:$0xff]  ;;  %v391_v5 = vld [vmem:[%s1882_s7 + $0x10] sm:$0xff] }
  0x33   : > { %v393_v6 = vld [vmem:[%s1882_s7 + $0x20] sm:$0xff]  ;;  %390 = vst [vmem:[%s1887_s28] sm:$0xff] %v389_v4  ;;  %392 = vst [vmem:[%s1887_s28 + $0x8] sm:$0xff] %v391_v5  ;;  %v395_v7 = vld [vmem:[%s1882_s7 + $0x30] sm:$0xff] }
  0x34   : > { %394 = vst [vmem:[%s1887_s28 + $0x10] sm:$0xff] %v393_v6  ;;  %v397_v8 = vld [vmem:[%s1882_s7 + $0x40] sm:$0xff]  ;;  %v399_v9 = vld [vmem:[%s1882_s7 + $0x50] sm:$0xff]  ;;  %396 = vst [vmem:[%s1887_s28 + $0x18] sm:$0xff] %v395_v7 }
  0x35   : > { %398 = vst [vmem:[%s1887_s28 + $0x20] sm:$0xff] %v397_v8  ;;  %400 = vst [vmem:[%s1887_s28 + $0x28] sm:$0xff] %v399_v9  ;;  %v401_v10 = vld [vmem:[%s1882_s7 + $0x60] sm:$0xff]  ;;  %v403_v11 = vld [vmem:[%s1882_s7 + $0x70] sm:$0xff] }
  0x36   : > { %v405_v12 = vld [vmem:[%s1882_s7 + $0x80] sm:$0xff]  ;;  %402 = vst [vmem:[%s1887_s28 + $0x30] sm:$0xff] %v401_v10  ;;  %404 = vst [vmem:[%s1887_s28 + $0x38] sm:$0xff] %v403_v11  ;;  %v407_v13 = vld [vmem:[%s1882_s7 + $0x90] sm:$0xff] }
  0x37   : > { %406 = vst [vmem:[%s1887_s28 + $0x40] sm:$0xff] %v405_v12  ;;  %v409_v14 = vld [vmem:[%s1882_s7 + $0xa0] sm:$0xff]  ;;  %v411_v15 = vld [vmem:[%s1882_s7 + $0xb0] sm:$0xff]  ;;  %408 = vst [vmem:[%s1887_s28 + $0x48] sm:$0xff] %v407_v13 }
  0x38   : > { %410 = vst [vmem:[%s1887_s28 + $0x50] sm:$0xff] %v409_v14  ;;  %412 = vst [vmem:[%s1887_s28 + $0x58] sm:$0xff] %v411_v15  ;;  %v413_v16 = vld [vmem:[%s1882_s7 + $0xc0] sm:$0xff]  ;;  %v415_v17 = vld [vmem:[%s1882_s7 + $0xd0] sm:$0xff] }
  0x39   : > { %v417_v18 = vld [vmem:[%s1882_s7 + $0xe0] sm:$0xff]  ;;  %414 = vst [vmem:[%s1887_s28 + $0x60] sm:$0xff] %v413_v16  ;;  %416 = vst [vmem:[%s1887_s28 + $0x68] sm:$0xff] %v415_v17  ;;  %v419_v19 = vld [vmem:[%s1882_s7 + $0xf0] sm:$0xff] }
  0x3a   : > { %418 = vst [vmem:[%s1887_s28 + $0x70] sm:$0xff] %v417_v18  ;;  %v421_v20 = vld [vmem:[%s1882_s7 + $0x100] sm:$0xff]  ;;  %v423_v21 = vld [vmem:[%s1882_s7 + $0x110] sm:$0xff]  ;;  %420 = vst [vmem:[%s1887_s28 + $0x78] sm:$0xff] %v419_v19 }
  0x3b   : > { %422 = vst [vmem:[%s1887_s28 + $0x80] sm:$0xff] %v421_v20  ;;  %424 = vst [vmem:[%s1887_s28 + $0x88] sm:$0xff] %v423_v21  ;;  %v425_v22 = vld [vmem:[%s1882_s7 + $0x120] sm:$0xff]  ;;  %v427_v23 = vld [vmem:[%s1882_s7 + $0x130] sm:$0xff] }
  0x3c   : > { %v429_v24 = vld [vmem:[%s1882_s7 + $0x140] sm:$0xff]  ;;  %426 = vst [vmem:[%s1887_s28 + $0x90] sm:$0xff] %v425_v22  ;;  %428 = vst [vmem:[%s1887_s28 + $0x98] sm:$0xff] %v427_v23  ;;  %v431_v25 = vld [vmem:[%s1882_s7 + $0x150] sm:$0xff] }
  0x3d   : > { %430 = vst [vmem:[%s1887_s28 + $0xa0] sm:$0xff] %v429_v24  ;;  %v433_v26 = vld [vmem:[%s1882_s7 + $0x160] sm:$0xff]  ;;  %v435_v27 = vld [vmem:[%s1882_s7 + $0x170] sm:$0xff]  ;;  %432 = vst [vmem:[%s1887_s28 + $0xa8] sm:$0xff] %v431_v25 }
  0x3e   : > { %434 = vst [vmem:[%s1887_s28 + $0xb0] sm:$0xff] %v433_v26  ;;  %436 = vst [vmem:[%s1887_s28 + $0xb8] sm:$0xff] %v435_v27  ;;  %v437_v28 = vld [vmem:[%s1882_s7 + $0x180] sm:$0xff]  ;;  %v439_v29 = vld [vmem:[%s1882_s7 + $0x190] sm:$0xff] }
  0x3f   : > { %v441_v30 = vld [vmem:[%s1882_s7 + $0x1a0] sm:$0xff]  ;;  %438 = vst [vmem:[%s1887_s28 + $0xc0] sm:$0xff] %v437_v28  ;;  %440 = vst [vmem:[%s1887_s28 + $0xc8] sm:$0xff] %v439_v29  ;;  %v443_v31 = vld [vmem:[%s1882_s7 + $0x1b0] sm:$0xff] }
  0x40   : > { %442 = vst [vmem:[%s1887_s28 + $0xd0] sm:$0xff] %v441_v30  ;;  %v445_v32 = vld [vmem:[%s1882_s7 + $0x1c0] sm:$0xff]  ;;  %v447_v33 = vld [vmem:[%s1882_s7 + $0x1d0] sm:$0xff]  ;;  %444 = vst [vmem:[%s1887_s28 + $0xd8] sm:$0xff] %v443_v31 }
  0x41   : > { %446 = vst [vmem:[%s1887_s28 + $0xe0] sm:$0xff] %v445_v32  ;;  %448 = vst [vmem:[%s1887_s28 + $0xe8] sm:$0xff] %v447_v33  ;;  %v449_v34 = vld [vmem:[%s1882_s7 + $0x1e0] sm:$0xff]  ;;  %v451_v35 = vld [vmem:[%s1882_s7 + $0x1f0] sm:$0xff] }
  0x42   : > { %v453_v36 = vld [vmem:[%s1882_s7 + $0x200] sm:$0xff]  ;;  %450 = vst [vmem:[%s1887_s28 + $0xf0] sm:$0xff] %v449_v34  ;;  %452 = vst [vmem:[%s1887_s28 + $0xf8] sm:$0xff] %v451_v35  ;;  %v455_v37 = vld [vmem:[%s1882_s7 + $0x210] sm:$0xff] }
  0x43   : > { %454 = vst [vmem:[%s1887_s28 + $0x100] sm:$0xff] %v453_v36  ;;  %v457_v38 = vld [vmem:[%s1882_s7 + $0x220] sm:$0xff]  ;;  %v459_v39 = vld [vmem:[%s1882_s7 + $0x230] sm:$0xff]  ;;  %456 = vst [vmem:[%s1887_s28 + $0x108] sm:$0xff] %v455_v37 }
  0x44   : > { %458 = vst [vmem:[%s1887_s28 + $0x110] sm:$0xff] %v457_v38  ;;  %460 = vst [vmem:[%s1887_s28 + $0x118] sm:$0xff] %v459_v39  ;;  %v461_v40 = vld [vmem:[%s1882_s7 + $0x240] sm:$0xff]  ;;  %v463_v41 = vld [vmem:[%s1882_s7 + $0x250] sm:$0xff] }
  0x45   : > { %v465_v42 = vld [vmem:[%s1882_s7 + $0x260] sm:$0xff]  ;;  %462 = vst [vmem:[%s1887_s28 + $0x120] sm:$0xff] %v461_v40  ;;  %464 = vst [vmem:[%s1887_s28 + $0x128] sm:$0xff] %v463_v41  ;;  %v467_v43 = vld [vmem:[%s1882_s7 + $0x270] sm:$0xff] }
  0x46   : > { %466 = vst [vmem:[%s1887_s28 + $0x130] sm:$0xff] %v465_v42  ;;  %v469_v44 = vld [vmem:[%s1882_s7 + $0x280] sm:$0xff]  ;;  %v471_v45 = vld [vmem:[%s1882_s7 + $0x290] sm:$0xff]  ;;  %468 = vst [vmem:[%s1887_s28 + $0x138] sm:$0xff] %v467_v43 }
  0x47   : > { %470 = vst [vmem:[%s1887_s28 + $0x140] sm:$0xff] %v469_v44  ;;  %472 = vst [vmem:[%s1887_s28 + $0x148] sm:$0xff] %v471_v45  ;;  %v473_v46 = vld [vmem:[%s1882_s7 + $0x2a0] sm:$0xff]  ;;  %v475_v47 = vld [vmem:[%s1882_s7 + $0x2b0] sm:$0xff] }
  0x48   : > { %v477_v48 = vld [vmem:[%s1882_s7 + $0x2c0] sm:$0xff]  ;;  %474 = vst [vmem:[%s1887_s28 + $0x150] sm:$0xff] %v473_v46  ;;  %476 = vst [vmem:[%s1887_s28 + $0x158] sm:$0xff] %v475_v47  ;;  %v479_v49 = vld [vmem:[%s1882_s7 + $0x2d0] sm:$0xff] }
  0x49   : > { %478 = vst [vmem:[%s1887_s28 + $0x160] sm:$0xff] %v477_v48  ;;  %v481_v50 = vld [vmem:[%s1882_s7 + $0x2e0] sm:$0xff]  ;;  %v483_v51 = vld [vmem:[%s1882_s7 + $0x2f0] sm:$0xff]  ;;  %480 = vst [vmem:[%s1887_s28 + $0x168] sm:$0xff] %v479_v49 }
  0x4a   : > { %482 = vst [vmem:[%s1887_s28 + $0x170] sm:$0xff] %v481_v50  ;;  %484 = vst [vmem:[%s1887_s28 + $0x178] sm:$0xff] %v483_v51  ;;  %v485_v52 = vld [vmem:[%s1882_s7 + $0x300] sm:$0xff]  ;;  %v487_v53 = vld [vmem:[%s1882_s7 + $0x310] sm:$0xff] }
  0x4b   : > { %v489_v54 = vld [vmem:[%s1882_s7 + $0x320] sm:$0xff]  ;;  %486 = vst [vmem:[%s1887_s28 + $0x180] sm:$0xff] %v485_v52  ;;  %488 = vst [vmem:[%s1887_s28 + $0x188] sm:$0xff] %v487_v53  ;;  %v491_v55 = vld [vmem:[%s1882_s7 + $0x330] sm:$0xff] }
  0x4c   : > { %490 = vst [vmem:[%s1887_s28 + $0x190] sm:$0xff] %v489_v54  ;;  %v493_v56 = vld [vmem:[%s1882_s7 + $0x340] sm:$0xff]  ;;  %v495_v57 = vld [vmem:[%s1882_s7 + $0x350] sm:$0xff]  ;;  %492 = vst [vmem:[%s1887_s28 + $0x198] sm:$0xff] %v491_v55 }
  0x4d   : > { %494 = vst [vmem:[%s1887_s28 + $0x1a0] sm:$0xff] %v493_v56  ;;  %496 = vst [vmem:[%s1887_s28 + $0x1a8] sm:$0xff] %v495_v57  ;;  %v497_v58 = vld [vmem:[%s1882_s7 + $0x360] sm:$0xff]  ;;  %v499_v59 = vld [vmem:[%s1882_s7 + $0x370] sm:$0xff] }
  0x4e   : > { %v501_v60 = vld [vmem:[%s1882_s7 + $0x380] sm:$0xff]  ;;  %498 = vst [vmem:[%s1887_s28 + $0x1b0] sm:$0xff] %v497_v58  ;;  %500 = vst [vmem:[%s1887_s28 + $0x1b8] sm:$0xff] %v499_v59  ;;  %v503_v61 = vld [vmem:[%s1882_s7 + $0x390] sm:$0xff] }
  0x4f   : > { %502 = vst [vmem:[%s1887_s28 + $0x1c0] sm:$0xff] %v501_v60  ;;  %v505_v62 = vld [vmem:[%s1882_s7 + $0x3a0] sm:$0xff]  ;;  %v507_v63 = vld [vmem:[%s1882_s7 + $0x3b0] sm:$0xff]  ;;  %504 = vst [vmem:[%s1887_s28 + $0x1c8] sm:$0xff] %v503_v61 }
  0x50   : > { %506 = vst [vmem:[%s1887_s28 + $0x1d0] sm:$0xff] %v505_v62  ;;  %508 = vst [vmem:[%s1887_s28 + $0x1d8] sm:$0xff] %v507_v63  ;;  %v509_v0 = vld [vmem:[%s1882_s7 + $0x3c0] sm:$0xff]  ;;  %v511_v1 = vld [vmem:[%s1882_s7 + $0x3d0] sm:$0xff] }
  0x51   : > { %v513_v2 = vld [vmem:[%s1882_s7 + $0x3e0] sm:$0xff]  ;;  %510 = vst [vmem:[%s1887_s28 + $0x1e0] sm:$0xff] %v509_v0  ;;  %512 = vst [vmem:[%s1887_s28 + $0x1e8] sm:$0xff] %v511_v1  ;;  %v515_v3 = vld [vmem:[%s1882_s7 + $0x3f0] sm:$0xff] }
  0x52   : > { %514 = vst [vmem:[%s1887_s28 + $0x1f0] sm:$0xff] %v513_v2  ;;  %516 = vst [vmem:[%s1887_s28 + $0x1f8] sm:$0xff] %v515_v3 }
  0x53 PF: > { %530 = sbr.rel (!%p1858_p11) target bundleno = 89 (0x59), region = 85  ;;  %s532_s0 = sand.u32 (%p1858_p11), 1, %s1694_s16  }
  0x54   : > { %s1451_s27 = sshll.u32 (%p1858_p11), %s1726_s24, 4  ;;  %s1365_s10 = sshll.u32 (%p1858_p11), %s532_s0, 5 }
  0x55   : > { %s540_s30 = scalar_lea.vmem (%p1858_p11), %s2186_s3, %s1451_s27  ;;  %s534_s9 = scalar_lea.vmem (%p1858_p11), [#allocation4], %s1365_s10 }
  0x56   : > { %v553_v4 = vld [vmem:[%s540_s30] sm:$0xff] (%p1858_p11)  ;;  %v555_v5 = vld [vmem:[%s540_s30 + $0x8] sm:$0xff] (%p1858_p11) }
  0x57   : > { %v557_v6 = vld [vmem:[%s540_s30 + $0x20] sm:$0xff] (%p1858_p11)  ;;  %554 = vst [vmem:[%s534_s9] sm:$0xff] (%p1858_p11), %v553_v4  ;;  %556 = vst [vmem:[%s534_s9 + $0x8] sm:$0xff] (%p1858_p11), %v555_v5  ;;  %v559_v7 = vld [vmem:[%s540_s30 + $0x28] sm:$0xff] (%p1858_p11) }
  0x58   : > { %558 = vst [vmem:[%s534_s9 + $0x10] sm:$0xff] %v557_v6  ;;  %560 = vst [vmem:[%s534_s9 + $0x18] sm:$0xff] %v559_v7 }
  0x59 PF: > { %p1368_p1 = scmp.ge.s32.totalorder %s1730_s25, 1  ;;  %p565_p2 = scmp.lt.s32.totalorder %s1730_s25, 19 }
  0x5b   : > { %p566_p3 = pnand %p1368_p1, %p565_p2 }
  0x5c   : > { %s572_s7 = sand.u32 (!%p566_p3), 1, %s1706_s19   ;;  %s579_s14 = sand.u32 (!%p566_p3), 1, %s1698_s17  }
  0x5d   : > { %569 = sbr.rel (%p566_p3) target bundleno = 403 (0x193), region = 108  ;;  %s1369_s6 = sshll.u32 (!%p566_p3), %s572_s7, 5 }
  0x5e   : > { %s1370_s11 = sshll.u32 (!%p566_p3), %s579_s14, 9  ;;  %s586_s8 = sand.u32 (!%p566_p3), 1, %s1690_s15  }
  0x5f   : > { %s1373_s28 = sshll.u32 (!%p566_p3), %s1718_s22, 1  ;;  %s1371_s0 = sshll.u32 (!%p566_p3), %s586_s8, 5 }
  0x60   : > { %p627_p4 = scmp.lt.s32.totalorder (!%p566_p3), %s1373_s28, 3  ;;  %s2033_s5 = scalar_lea.vmem (!%p566_p3), [#allocation2], %s1369_s6 }
  0x61   : > { %s2035_s30 = scalar_lea.vmem (!%p566_p3), [#allocation3], %s1370_s11  ;;  %s2037_s9 = scalar_lea.vmem (!%p566_p3), [#allocation4], %s1371_s0 }
  0x62   : > { %s2219_s28 = smov (!%p627_p4, %s1373_s28), 3  ;;  %s2039_s17 = scalar_lea.vmem [#allocation5], %s1371_s0 }
  0x63   : > { %s629_s26 = scalar_lea.vmem %s2185_s2, %s2219_s28  ;;  %p1374_p5 = scmp.ne.s32.totalorder %s1714_s21, 0 }
  0x65   : > { %638 = sbr.rel (%p1374_p5) target bundleno = 109 (0x6d), region = 124 }
  0x6a   : > { %v1732_v8 = vmov 0.0  }
  0x6b   : > { %639 = vst [vmem:[%s2039_s17] sm:$0xff] %v1732_v8  ;;  %640 = vst [vmem:[%s2039_s17 + $0x8] sm:$0xff] %v1732_v8 }
  0x6c   : > { %641 = vst [vmem:[%s2039_s17 + $0x10] sm:$0xff] %v1732_v8  ;;  %642 = vst [vmem:[%s2039_s17 + $0x18] sm:$0xff] %v1732_v8 }
  0x6d PF: > { %v1542_v9 = vld [vmem:[%s2035_s30 + $0x74] ss:$8 sps:$4 sm:$0xff]   ;;  %v1546_v11 = vld [vmem:[%s2035_s30 + $0x70] ss:$8 sps:$4 sm:$0xff]   ;;  %v1548_v13 = vld [vmem:[%s2035_s30 + $0x64] ss:$8 sps:$4 sm:$0xff]  }
  0x6e   : > { %v1544_v10 = vld [vmem:[%s2035_s30 + $0x174] ss:$8 sps:$4 sm:$0xff]   ;;  %1055 = vmatprep.subr.bf16.mxu0 %v1542_v9  ;;  %v1547_v12 = vld [vmem:[%s2035_s30 + $0x170] ss:$8 sps:$4 sm:$0xff]   ;;  %v1550_v14 = vld [vmem:[%s2035_s30 + $0x164] ss:$8 sps:$4 sm:$0xff]  }
  0x6f   : > { %1098 = vmatprep.subr.bf16.mxu1 %v1544_v10  ;;  %1056 = vmatpush1.bf16.msra.mxu0 %v1546_v11  ;;  %v1552_v15 = vld [vmem:[%s2035_s30 + $0x60] ss:$8 sps:$4 sm:$0xff]   ;;  %v1554_v17 = vld [vmem:[%s2035_s30 + $0x54] ss:$8 sps:$4 sm:$0xff]   ;;  %v1558_v19 = vld [vmem:[%s2035_s30 + $0x50] ss:$8 sps:$4 sm:$0xff]  }
  0x70   : > { %1099 = vmatpush1.bf16.msra.mxu1 %v1547_v12  ;;  %1057 = vmatprep.subr.bf16.mxu0 %v1548_v13  ;;  %v1553_v16 = vld [vmem:[%s2035_s30 + $0x160] ss:$8 sps:$4 sm:$0xff]   ;;  %v1556_v18 = vld [vmem:[%s2035_s30 + $0x154] ss:$8 sps:$4 sm:$0xff]   ;;  %v1559_v20 = vld [vmem:[%s2035_s30 + $0x150] ss:$8 sps:$4 sm:$0xff]  }
  0x71   : > { %1100 = vmatprep.subr.bf16.mxu1 %v1550_v14  ;;  %v1560_v21 = vld [vmem:[%s2035_s30 + $0x44] ss:$8 sps:$4 sm:$0xff]   ;;  %v1564_v23 = vld [vmem:[%s2035_s30 + $0x40] ss:$8 sps:$4 sm:$0xff]   ;;  %v1566_v25 = vld [vmem:[%s2035_s30 + $0x34] ss:$8 sps:$4 sm:$0xff]  }
  0x72   : > { %v1562_v22 = vld [vmem:[%s2035_s30 + $0x144] ss:$8 sps:$4 sm:$0xff]   ;;  %v1565_v24 = vld [vmem:[%s2035_s30 + $0x140] ss:$8 sps:$4 sm:$0xff]   ;;  %v1568_v26 = vld [vmem:[%s2035_s30 + $0x134] ss:$8 sps:$4 sm:$0xff]  }
  0x73   : > { %1058 = vmatpush1.bf16.msra.mxu0 %v1552_v15  ;;  %v1570_v27 = vld [vmem:[%s2035_s30 + $0x30] ss:$8 sps:$4 sm:$0xff]   ;;  %v1572_v29 = vld [vmem:[%s2035_s30 + $0x24] ss:$8 sps:$4 sm:$0xff]   ;;  %v1576_v31 = vld [vmem:[%s2035_s30 + $0x20] ss:$8 sps:$4 sm:$0xff]  }
  0x74   : > { %1101 = vmatpush1.bf16.msra.mxu1 %v1553_v16  ;;  %1059 = vmatprep.subr.bf16.mxu0 %v1554_v17  ;;  %v1571_v28 = vld [vmem:[%s2035_s30 + $0x130] ss:$8 sps:$4 sm:$0xff]   ;;  %v1574_v30 = vld [vmem:[%s2035_s30 + $0x124] ss:$8 sps:$4 sm:$0xff]   ;;  %v1577_v32 = vld [vmem:[%s2035_s30 + $0x120] ss:$8 sps:$4 sm:$0xff]  }
  0x75   : > { %1102 = vmatprep.subr.bf16.mxu1 %v1556_v18  ;;  %v1578_v33 = vld [vmem:[%s2035_s30 + $0x14] ss:$8 sps:$4 sm:$0xff]   ;;  %v1582_v35 = vld [vmem:[%s2035_s30 + $0x10] ss:$8 sps:$4 sm:$0xff]   ;;  %v1584_v37 = vld [vmem:[%s2035_s30 + $0x4] ss:$8 sps:$4 sm:$0xff]  }
  0x76   : > { %v1580_v34 = vld [vmem:[%s2035_s30 + $0x114] ss:$8 sps:$4 sm:$0xff]   ;;  %v1583_v36 = vld [vmem:[%s2035_s30 + $0x110] ss:$8 sps:$4 sm:$0xff]   ;;  %v1586_v38 = vld [vmem:[%s2035_s30 + $0x104] ss:$8 sps:$4 sm:$0xff]  }
  0x77   : > { %1060 = vmatpush1.bf16.msra.mxu0 %v1558_v19  ;;  %v1588_v39 = vld [vmem:[%s2035_s30] ss:$8 sps:$4 sm:$0xff]   ;;  %v1590_v41 = vld [vmem:[%s2035_s30 + $0xf4] ss:$8 sps:$4 sm:$0xff]   ;;  %v1594_v43 = vld [vmem:[%s2035_s30 + $0xf0] ss:$8 sps:$4 sm:$0xff]  }
  0x78   : > { %1103 = vmatpush1.bf16.msra.mxu1 %v1559_v20  ;;  %1061 = vmatprep.subr.bf16.mxu0 %v1560_v21  ;;  %v1589_v40 = vld [vmem:[%s2035_s30 + $0x100] ss:$8 sps:$4 sm:$0xff]   ;;  %v1592_v42 = vld [vmem:[%s2035_s30 + $0x1f4] ss:$8 sps:$4 sm:$0xff]   ;;  %v1595_v44 = vld [vmem:[%s2035_s30 + $0x1f0] ss:$8 sps:$4 sm:$0xff]  }
  0x79   : > { %1104 = vmatprep.subr.bf16.mxu1 %v1562_v22  ;;  %v1596_v45 = vld [vmem:[%s2035_s30 + $0xe4] ss:$8 sps:$4 sm:$0xff]   ;;  %v1600_v47 = vld [vmem:[%s2035_s30 + $0xe0] ss:$8 sps:$4 sm:$0xff]   ;;  %v1602_v49 = vld [vmem:[%s2035_s30 + $0xd4] ss:$8 sps:$4 sm:$0xff]  }
  0x7a   : > { %v1598_v46 = vld [vmem:[%s2035_s30 + $0x1e4] ss:$8 sps:$4 sm:$0xff]   ;;  %v1601_v48 = vld [vmem:[%s2035_s30 + $0x1e0] ss:$8 sps:$4 sm:$0xff]   ;;  %v1604_v50 = vld [vmem:[%s2035_s30 + $0x1d4] ss:$8 sps:$4 sm:$0xff]  }
  0x7b   : > { %1062 = vmatpush1.bf16.msra.mxu0 %v1564_v23  ;;  %v1606_v51 = vld [vmem:[%s2035_s30 + $0xd0] ss:$8 sps:$4 sm:$0xff]   ;;  %v1608_v53 = vld [vmem:[%s2035_s30 + $0xc4] ss:$8 sps:$4 sm:$0xff]   ;;  %v1612_v55 = vld [vmem:[%s2035_s30 + $0xc0] ss:$8 sps:$4 sm:$0xff]  }
  0x7c   : > { %1105 = vmatpush1.bf16.msra.mxu1 %v1565_v24  ;;  %1063 = vmatprep.subr.bf16.mxu0 %v1566_v25  ;;  %v1607_v52 = vld [vmem:[%s2035_s30 + $0x1d0] ss:$8 sps:$4 sm:$0xff]   ;;  %v1610_v54 = vld [vmem:[%s2035_s30 + $0x1c4] ss:$8 sps:$4 sm:$0xff]   ;;  %v1613_v57 = vld [vmem:[%s2035_s30 + $0x1c0] ss:$8 sps:$4 sm:$0xff]  }
  0x7d   : > { %1106 = vmatprep.subr.bf16.mxu1 %v1568_v26  ;;  %v1640_v56 = vld [vmem:[%s2033_s5 + $0x4] ss:$16 sps:$4 sm:$0xff]   ;;  %v1643_v60 = vld [vmem:[%s2033_s5 + $0xc] ss:$16 sps:$4 sm:$0xff]   ;;  %v1618_v61 = vld [vmem:[%s2035_s30 + $0xb0] ss:$8 sps:$4 sm:$0xff]  }
  0x7e   : > { %v1614_v58 = vld [vmem:[%s2035_s30 + $0xb4] ss:$8 sps:$4 sm:$0xff]   ;;  %1087 = vmatprep.mubr.bf16.mxu0 %v1640_v56  ;;  %1130 = vmatprep.mubr.bf16.mxu1 %v1643_v60  ;;  %v1619_v62 = vld [vmem:[%s2035_s30 + $0x1b0] ss:$8 sps:$4 sm:$0xff]   ;;  %v1620_v63 = vld [vmem:[%s2035_s30 + $0xa4] ss:$8 sps:$4 sm:$0xff]  }
  0x7f   : > { %1064 = vmatpush1.bf16.msra.mxu0 %v1570_v27  ;;  %v1616_v59 = vld [vmem:[%s2035_s30 + $0x1b4] ss:$8 sps:$4 sm:$0xff]   ;;  %v1622_v0 = vld [vmem:[%s2035_s30 + $0x1a4] ss:$8 sps:$4 sm:$0xff]   ;;  %v1624_v1 = vld [vmem:[%s2035_s30 + $0xa0] ss:$8 sps:$4 sm:$0xff]  }
  0x80   : > { %1107 = vmatpush1.bf16.msra.mxu1 %v1571_v28  ;;  %1065 = vmatprep.subr.bf16.mxu0 %v1572_v29  ;;  %v1625_v2 = vld [vmem:[%s2035_s30 + $0x1a0] ss:$8 sps:$4 sm:$0xff]   ;;  %v1626_v3 = vld [vmem:[%s2035_s30 + $0x94] ss:$8 sps:$4 sm:$0xff]   ;;  %v1630_v5 = vld [vmem:[%s2035_s30 + $0x90] ss:$8 sps:$4 sm:$0xff]  }
  0x81   : > { %1108 = vmatprep.subr.bf16.mxu1 %v1574_v30  ;;  %v1628_v4 = vld [vmem:[%s2035_s30 + $0x194] ss:$8 sps:$4 sm:$0xff]   ;;  %v1631_v6 = vld [vmem:[%s2035_s30 + $0x190] ss:$8 sps:$4 sm:$0xff]   ;;  %v1632_v7 = vld [vmem:[%s2035_s30 + $0x84] ss:$8 sps:$4 sm:$0xff]  }
  0x82   : > { %v1634_v8 = vld [vmem:[%s2035_s30 + $0x184] ss:$8 sps:$4 sm:$0xff]   ;;  %v1636_v9 = vld [vmem:[%s2035_s30 + $0x80] ss:$8 sps:$4 sm:$0xff]   ;;  %v645_v23 = vld [vmem:[%s2039_s17 + $0x10] sm:$0xff]  ;;  %p1443_p6 = scmp.ne.s32.totalorder %s1714_s21, 8 }
  0x83   : > { %1066 = vmatpush1.bf16.msra.mxu0 %v1576_v31  ;;  %v1637_v10 = vld [vmem:[%s2035_s30 + $0x180] ss:$8 sps:$4 sm:$0xff]   ;;  %v646_v28 = vld [vmem:[%s2039_s17 + $0x18] sm:$0xff] }
  0x84   : > { %1109 = vmatpush1.bf16.msra.mxu1 %v1577_v32  ;;  %1067 = vmatprep.subr.bf16.mxu0 %v1578_v33  ;;  %v1638_v11 = vld [vmem:[%s2033_s5] ss:$16 sps:$4 sm:$0xff]   ;;  %v1641_v12 = vld [vmem:[%s2033_s5 + $0x8] ss:$16 sps:$4 sm:$0xff]  }
  0x85   : > { %1110 = vmatprep.subr.bf16.mxu1 %v1580_v34  ;;  %v643_v14 = vld [vmem:[%s2039_s17] sm:$0xff]  ;;  %v644_v18 = vld [vmem:[%s2039_s17 + $0x8] sm:$0xff] }
  0x87   : > { %1068 = vmatpush1.bf16.msra.mxu0 %v1582_v35 }
  0x88   : > { %1111 = vmatpush1.bf16.msra.mxu1 %v1583_v36  ;;  %1069 = vmatprep.subr.bf16.mxu0 %v1584_v37 }
  0x89   : > { %1112 = vmatprep.subr.bf16.mxu1 %v1586_v38 }
  0x8b   : > { %1070 = vmatpush1.bf16.msra.mxu0 %v1588_v39 }
  0x8c   : > { %1113 = vmatpush1.bf16.msra.mxu1 %v1589_v40  ;;  %1071 = vmatprep.subr.bf16.mxu0 %v1590_v41 }
  0x8d   : > { %1114 = vmatprep.subr.bf16.mxu1 %v1592_v42 }
  0x8f   : > { %1072 = vmatpush2.bf16.msra.mxu0 %v1594_v43 }
  0x90   : > { %1115 = vmatpush2.bf16.msra.mxu1 %v1595_v44  ;;  %1073 = vmatprep.subr.bf16.mxu0 %v1596_v45 }
  0x91   : > { %1116 = vmatprep.subr.bf16.mxu1 %v1598_v46 }
  0x93   : > { %1074 = vmatpush2.bf16.msra.mxu0 %v1600_v47 }
  0x94   : > { %1117 = vmatpush2.bf16.msra.mxu1 %v1601_v48  ;;  %1075 = vmatprep.subr.bf16.mxu0 %v1602_v49 }
  0x95   : > { %1118 = vmatprep.subr.bf16.mxu1 %v1604_v50 }
  0x97   : > { %1076 = vmatpush2.bf16.msra.mxu0 %v1606_v51 }
  0x98   : > { %1119 = vmatpush2.bf16.msra.mxu1 %v1607_v52  ;;  %1077 = vmatprep.subr.bf16.mxu0 %v1608_v53 }
  0x99   : > { %1120 = vmatprep.subr.bf16.mxu1 %v1610_v54 }
  0x9b   : > { %1078 = vmatpush2.bf16.msra.mxu0 %v1612_v55 }
  0x9c   : > { %1121 = vmatpush2.bf16.msra.mxu1 %v1613_v57  ;;  %1079 = vmatprep.subr.bf16.mxu0 %v1614_v58 }
  0x9d   : > { %1122 = vmatprep.subr.bf16.mxu1 %v1616_v59 }
  0x9f   : > { %1080 = vmatpush2.bf16.msra.mxu0 %v1618_v61 }
  0xa0   : > { %1123 = vmatpush2.bf16.msra.mxu1 %v1619_v62  ;;  %1081 = vmatprep.subr.bf16.mxu0 %v1620_v63 }
  0xa1   : > { %1124 = vmatprep.subr.bf16.mxu1 %v1622_v0 }
  0xa3   : > { %1082 = vmatpush2.bf16.msra.mxu0 %v1624_v1 }
  0xa4   : > { %1125 = vmatpush2.bf16.msra.mxu1 %v1625_v2  ;;  %1083 = vmatprep.subr.bf16.mxu0 %v1626_v3 }
  0xa5   : > { %1126 = vmatprep.subr.bf16.mxu1 %v1628_v4 }
  0xa7   : > { %1084 = vmatpush2.bf16.msra.mxu0 %v1630_v5 }
  0xa8   : > { %1127 = vmatpush2.bf16.msra.mxu1 %v1631_v6  ;;  %1085 = vmatprep.subr.bf16.mxu0 %v1632_v7 }
  0xa9   : > { %1128 = vmatprep.subr.bf16.mxu1 %v1634_v8 }
  0xab   : > { %1086 = vmatpush2.bf16.msra.mxu0 %v1636_v9 }
  0xac   : > { %1129 = vmatpush2.bf16.msra.mxu1 %v1637_v10 }
  0xae   : > { %1088 = vmatmul.mubr.bf16.vlgmr.msra.gmra.mxu0 %v1638_v11 }
  0xaf   : > { %1131 = vmatmul.mubr.bf16.vlgmr.msra.gmra.mxu1 %v1641_v12 }
 0x16e   : > { %v1089_v13 = vpop.f32.mrf.mxu0 }
 0x16f   : > { %v1132_v15 = vpop.f32.mrf.mxu1 }
 0x170   : > { %v1133_v16 = vadd.f32 %v1132_v15, %v1089_v13  ;;  %v1091_v17 = vpop.f32.mrf.mxu0 }
 0x171   : > { %v1134_v19 = vpop.f32.mrf.mxu1 }
 0x172   : > { %v1141_v20 = vadd.f32 %v1133_v16, %v643_v14  ;;  %v1135_v21 = vadd.f32 %v1134_v19, %v1091_v17  ;;  %v1093_v22 = vpop.f32.mrf.mxu0 }
 0x173   : > { %v1136_v24 = vpop.f32.mrf.mxu1 }
 0x174   : > { %1145 = vst [vmem:[%s2039_s17] sm:$0xff] %v1141_v20  ;;  %v1142_v25 = vadd.f32 %v1135_v21, %v644_v18  ;;  %v1137_v26 = vadd.f32 %v1136_v24, %v1093_v22  ;;  %v1095_v27 = vpop.f32.mrf.mxu0 }
 0x175   : > { %v1138_v29 = vpop.f32.mrf.mxu1 }
 0x176   : > { %1146 = vst [vmem:[%s2039_s17 + $0x8] sm:$0xff] %v1142_v25  ;;  %v1143_v30 = vadd.f32 %v1137_v26, %v645_v23  ;;  %v1139_v31 = vadd.f32 %v1138_v29, %v1095_v27  ;;  %1152 = sbr.rel (%p1443_p6) target bundleno = 395 (0x18b), region = 128 }
 0x178   : > { %1147 = vst [vmem:[%s2039_s17 + $0x10] sm:$0xff] %v1143_v30  ;;  %v1144_v32 = vadd.f32 %v1139_v31, %v646_v28 }
 0x17a   : > { %1148 = vst [vmem:[%s2039_s17 + $0x18] sm:$0xff] %v1144_v32 }
 0x17b   : > { %v1159_v33 = vlaneseq  ;;  %v1157_v35 = vld [vmem:[%s629_s26] sm:$0x3]  ;;  %v1174_v45 = vld [vmem:[%s2037_s9 + $0x8] sm:$0xff]  ;;  %v1175_v46 = vld [vmem:[%s2037_s9 + $0x10] sm:$0xff] }
 0x17c   : > { %v1153_v36 = vld [vmem:[%s2039_s17] sm:$0xff]  ;;  %v1176_v47 = vld [vmem:[%s2037_s9 + $0x18] sm:$0xff] }
 0x17d   : > { %v1160_v34 = vshrl.u32 %v1159_v33, 7  ;;  %v1154_v39 = vld [vmem:[%s2039_s17 + $0x8] sm:$0xff]  ;;  %v1173_v43 = vld [vmem:[%s2037_s9] sm:$0xff] }
 0x17f   : > { %v1161_v37 = vsub.s32 0, %v1160_v34  ;;  %v1165_v38 = vsub.s32 1, %v1160_v34  ;;  %v1155_v40 = vld [vmem:[%s2039_s17 + $0x10] sm:$0xff] }
 0x181   : > { %v1156_v41 = vld [vmem:[%s2039_s17 + $0x18] sm:$0xff]  ;;  %v1162_v42 = vrot.slane %v1157_v35, %v1161_v37  ;;  %v1166_v44 = vrot.slane %v1157_v35, %v1165_v38 }
 0x183   : > { %v1169_v48 = vadd.f32 %v1162_v42, %v1153_v36  ;;  %v1170_v49 = vadd.f32 %v1166_v44, %v1154_v39  ;;  %v1171_v50 = vadd.f32 %v1162_v42, %v1155_v40  ;;  %v1172_v51 = vadd.f32 %v1166_v44, %v1156_v41 }
 0x185   : > { %v1177_v52 = vadd.f32 %v1173_v43, %v1169_v48  ;;  %v1178_v53 = vadd.f32 %v1174_v45, %v1170_v49  ;;  %v1179_v54 = vadd.f32 %v1175_v46, %v1171_v50  ;;  %v1180_v55 = vadd.f32 %v1176_v47, %v1172_v51 }
 0x187   : > { %v1181_v56 = vmax.f32 %v1177_v52, 0.0  ;;  %v1182_v57 = vmax.f32 %v1178_v53, 0.0  ;;  %v1183_v58 = vmax.f32 %v1179_v54, 0.0  ;;  %v1184_v59 = vmax.f32 %v1180_v55, 0.0 }
 0x189   : > { %1185 = vst [vmem:[%s2039_s17] sm:$0xff] %v1181_v56  ;;  %1186 = vst [vmem:[%s2039_s17 + $0x8] sm:$0xff] %v1182_v57 }
 0x18a   : > { %1187 = vst [vmem:[%s2039_s17 + $0x10] sm:$0xff] %v1183_v58  ;;  %1188 = vst [vmem:[%s2039_s17 + $0x18] sm:$0xff] %v1184_v59 }
 0x18b PF: > { %1195 = sbr.rel (!%p1862_p13) target bundleno = 403 (0x193), region = 132  ;;  %s1452_s21 = sshll.u32 (%p1862_p13), %s1718_s22, 4 }
 0x18c   : > { %s1201_s6 = scalar_lea.vmem (%p1862_p13), %s2187_s4, %s1452_s21 }
 0x190   : > { %v1214_v60 = vld [vmem:[%s2039_s17] sm:$0xff]  ;;  %v1216_v61 = vld [vmem:[%s2039_s17 + $0x8] sm:$0xff] }
 0x191   : > { %v1218_v62 = vld [vmem:[%s2039_s17 + $0x10] sm:$0xff]  ;;  %v1220_v63 = vld [vmem:[%s2039_s17 + $0x18] sm:$0xff]  ;;  %1215 = vst [vmem:[%s1201_s6] sm:$0xff] %v1214_v60  ;;  %1217 = vst [vmem:[%s1201_s6 + $0x8] sm:$0xff] %v1216_v61 }
 0x192   : > { %1219 = vst [vmem:[%s1201_s6 + $0x20] sm:$0xff] %v1218_v62  ;;  %1221 = vst [vmem:[%s1201_s6 + $0x28] sm:$0xff] %v1220_v63 }
 0x193 PF: > { %s14_s25 = sadd.s32 1, %s1730_s25   ;;  %s2199_s22 = sld [smem:[#allocation8_spill]] }
 0x194   : > { %p11_p7 = scmp.ge.s32.totalorder %s14_s25, 20   ;;  %s2200_s29 = sld [smem:[#allocation6_spill]] }
 0x195   : > { %s2201_s11 = sld [smem:[#allocation7_spill]]  ;;  %s2202_s15 = smov %s1694_s16 }
 0x196   : > { %s2203_s16 = smov %s1854_s13  ;;  %s2204_s17 = smov %s1702_s18 }
 0x197   : > { %s2205_s18 = smov %s1851_s12  ;;  %s2206_s19 = smov %s1710_s20 }
 0x198   : > { %s2208_s21 = smov %s1722_s23  ;;  %13 = sbr.rel (!%p11_p7) target bundleno = 8 (0x8), region = 205 }
 0x199   : > { %s2207_s20 = smov %s2199_s22  ;;  %s2209_s22 = smov %s1726_s24 }
 0x19a   : > { %s2210_s23 = smov %s2200_s29 }
 0x19b   : > { %s2211_s24 = smov %s2201_s11 }

// kernel: beyond_the_spectrum_forward.69
= control target key start
LH: loop header
LB: loop body
LE: loop exit
PB: predicated region body
PF: predicated region fallthrough
CT: control target
= control target key end

     0   :  { %s666_s1 = inlined_call_operand.vmem [shape: bf16[512,128], index: 1, kind: input, shape index: {}]   ;;  %s667_s0 = inlined_call_operand.vmem [shape: bf16[16,512], index: 0, kind: input, shape index: {}]   ;;  %s668_s2 = inlined_call_operand.vmem [shape: f32[1,128], index: 2, kind: input, shape index: {}]   ;;  %s669_s3 = inlined_call_operand.vmem [shape: f32[16,128], index: 3, kind: output, shape index: {}]  }
   0x1   :  { %v491_v0 = vld [vmem:[%s666_s1 + $0x78] sm:$0xff]   ;;  %v495_v4 = vld [vmem:[%s666_s1 + $0x70] sm:$0xff]   ;;  %v499_v8 = vld [vmem:[%s666_s1 + $0x68] sm:$0xff]  }
   0x2   :  { %v492_v1 = vld [vmem:[%s666_s1 + $0xf8] sm:$0xff]   ;;  %446 = vmatprep.subr.bf16.mxu0 %v491_v0  ;;  %v496_v5 = vld [vmem:[%s666_s1 + $0xf0] sm:$0xff]   ;;  %v500_v9 = vld [vmem:[%s666_s1 + $0xe8] sm:$0xff]  }
   0x3   :  { %v493_v2 = vld [vmem:[%s666_s1 + $0x38] sm:$0xff]   ;;  %468 = vmatprep.subr.bf16.mxu1 %v492_v1  ;;  %v497_v6 = vld [vmem:[%s666_s1 + $0x30] sm:$0xff]   ;;  %v501_v10 = vld [vmem:[%s666_s1 + $0x28] sm:$0xff]  }
   0x4   :  { %v494_v3 = vld [vmem:[%s666_s1 + $0xb8] sm:$0xff]   ;;  %447 = vmatpush3.bf16.msra.mxu0 %v493_v2  ;;  %v498_v7 = vld [vmem:[%s666_s1 + $0xb0] sm:$0xff]   ;;  %v502_v11 = vld [vmem:[%s666_s1 + $0xa8] sm:$0xff]  }
   0x5   :  { %469 = vmatpush3.bf16.msra.mxu1 %v494_v3  ;;  %448 = vmatprep.subr.bf16.mxu0 %v495_v4  ;;  %v503_v12 = vld [vmem:[%s666_s1 + $0x60] sm:$0xff]   ;;  %v507_v16 = vld [vmem:[%s666_s1 + $0x58] sm:$0xff]   ;;  %v511_v20 = vld [vmem:[%s666_s1 + $0x50] sm:$0xff]  }
   0x6   :  { %470 = vmatprep.subr.bf16.mxu1 %v496_v5  ;;  %v504_v13 = vld [vmem:[%s666_s1 + $0xe0] sm:$0xff]   ;;  %v508_v17 = vld [vmem:[%s666_s1 + $0xd8] sm:$0xff]   ;;  %v512_v21 = vld [vmem:[%s666_s1 + $0xd0] sm:$0xff]  }
   0x7   :  { %v505_v14 = vld [vmem:[%s666_s1 + $0x20] sm:$0xff]   ;;  %v509_v18 = vld [vmem:[%s666_s1 + $0x18] sm:$0xff]   ;;  %v513_v22 = vld [vmem:[%s666_s1 + $0x10] sm:$0xff]  }
   0x8   :  { %449 = vmatpush3.bf16.msra.mxu0 %v497_v6  ;;  %v506_v15 = vld [vmem:[%s666_s1 + $0xa0] sm:$0xff]   ;;  %v510_v19 = vld [vmem:[%s666_s1 + $0x98] sm:$0xff]   ;;  %v514_v23 = vld [vmem:[%s666_s1 + $0x90] sm:$0xff]  }
   0x9   :  { %471 = vmatpush3.bf16.msra.mxu1 %v498_v7  ;;  %450 = vmatprep.subr.bf16.mxu0 %v499_v8  ;;  %v515_v24 = vld [vmem:[%s666_s1 + $0x48] sm:$0xff]   ;;  %v519_v28 = vld [vmem:[%s666_s1 + $0x40] sm:$0xff]  }
   0xa   :  { %472 = vmatprep.subr.bf16.mxu1 %v500_v9  ;;  %v516_v25 = vld [vmem:[%s666_s1 + $0xc8] sm:$0xff]   ;;  %v520_v29 = vld [vmem:[%s666_s1 + $0xc0] sm:$0xff]  }
   0xb   :  { %v517_v26 = vld [vmem:[%s666_s1 + $0x8] sm:$0xff]   ;;  %v521_v30 = vld [vmem:[%s666_s1] sm:$0xff]  }
   0xc   :  { %451 = vmatpush3.bf16.msra.mxu0 %v501_v10  ;;  %v518_v27 = vld [vmem:[%s666_s1 + $0x88] sm:$0xff]   ;;  %v522_v31 = vld [vmem:[%s666_s1 + $0x80] sm:$0xff]  }
   0xd   :  { %473 = vmatpush3.bf16.msra.mxu1 %v502_v11  ;;  %452 = vmatprep.subr.bf16.mxu0 %v503_v12  ;;  %v523_v32 = vld [vmem:[%s667_s0] ss:$16 sps:$4 sm:$0xff]   ;;  %v525_v33 = vld [vmem:[%s667_s0 + $0x4] ss:$16 sps:$4 sm:$0xff]   ;;  %v526_v34 = vld [vmem:[%s667_s0 + $0x8] ss:$16 sps:$4 sm:$0xff]  }
   0xe   :  { %474 = vmatprep.subr.bf16.mxu1 %v504_v13  ;;  %v528_v35 = vld [vmem:[%s667_s0 + $0xc] ss:$16 sps:$4 sm:$0xff]   ;;  %335 = vmatprep.mubr.bf16.mxu0 %v525_v33  ;;  %v445_v46 = vld [vmem:[%s668_s2] ss:$0 sm:$0xff] }
   0xf   :  { %376 = vmatprep.mubr.bf16.mxu1 %v528_v35 }
  0x10   :  { %453 = vmatpush3.bf16.msra.mxu0 %v505_v14 }
  0x11   :  { %475 = vmatpush3.bf16.msra.mxu1 %v506_v15  ;;  %454 = vmatprep.subr.bf16.mxu0 %v507_v16 }
  0x12   :  { %476 = vmatprep.subr.bf16.mxu1 %v508_v17 }
  0x14   :  { %455 = vmatpush3.bf16.msra.mxu0 %v509_v18 }
  0x15   :  { %477 = vmatpush3.bf16.msra.mxu1 %v510_v19  ;;  %456 = vmatprep.subr.bf16.mxu0 %v511_v20 }
  0x16   :  { %478 = vmatprep.subr.bf16.mxu1 %v512_v21 }
  0x18   :  { %457 = vmatpush3.bf16.msra.mxu0 %v513_v22 }
  0x19   :  { %479 = vmatpush3.bf16.msra.mxu1 %v514_v23  ;;  %458 = vmatprep.subr.bf16.mxu0 %v515_v24 }
  0x1a   :  { %480 = vmatprep.subr.bf16.mxu1 %v516_v25 }
  0x1c   :  { %459 = vmatpush3.bf16.msra.mxu0 %v517_v26 }
  0x1d   :  { %481 = vmatpush3.bf16.msra.mxu1 %v518_v27  ;;  %460 = vmatprep.subr.bf16.mxu0 %v519_v28 }
  0x1e   :  { %482 = vmatprep.subr.bf16.mxu1 %v520_v29 }
  0x20   :  { %461 = vmatpush3.bf16.msra.mxu0 %v521_v30 }
  0x21   :  { %483 = vmatpush3.bf16.msra.mxu1 %v522_v31 }
  0x23   :  { %336 = vmatmul.mubr.bf16.vlgmr.msra.gmra.mxu0 %v523_v32 }
  0x24   :  { %377 = vmatmul.mubr.bf16.vlgmr.msra.gmra.mxu1 %v526_v34 }
  0xe3   :  { %v462_v36 = vpop.f32.mrf.mxu0 }
  0xe4   :  { %v484_v37 = vpop.f32.mrf.mxu1 }
  0xe5   :  { %v463_v38 = vpop.f32.mrf.mxu0 }
  0xe6   :  { %v464_v39 = vadd.f32 %v463_v38, %v462_v36  ;;  %v485_v40 = vpop.f32.mrf.mxu1 }
  0xe7   :  { %v486_v41 = vadd.f32 %v485_v40, %v484_v37  ;;  %v465_v42 = vpop.f32.mrf.mxu0 }
  0xe8   :  { %v487_v43 = vpop.f32.mrf.mxu1 }
  0xe9   :  { %v379_v44 = vadd.f32 %v486_v41, %v464_v39  ;;  %v466_v45 = vpop.f32.mrf.mxu0 }
  0xea   :  { %v467_v47 = vadd.f32 %v466_v45, %v465_v42  ;;  %v488_v48 = vpop.f32.mrf.mxu1 }
  0xeb   :  { %v489_v49 = vadd.f32 %v488_v48, %v487_v43  ;;  %v401_v50 = vadd.f32 %v445_v46, %v379_v44 }
  0xed   :  { %v382_v51 = vadd.f32 %v489_v49, %v467_v47  ;;  %403 = vst [vmem:[%s669_s3] sm:$0xff] %v401_v50 }
  0xef   :  { %v402_v52 = vadd.f32 %v445_v46, %v382_v51 }
  0xf1   :  { %404 = vst [vmem:[%s669_s3 + $0x8] sm:$0xff] %v402_v52 }

</bundles_post_ra>
